<compile_context>
chip_gen: v5e
topology: v5e:2x2
jax: 0.10.0
libtpu: 0.0.40
codegen_flags: <defaults>
</compile_context>

<pallas_src>
import functools

import jax
import jax.numpy as jnp
from jax.experimental import pallas as pl
from jax.experimental.pallas import tpu as pltpu


def _conv_stats_kernel(x0_ref, xh_ref, w_ref, mask_ref, y_ref, st_ref, xw_ref,
                       *, taps, halo):
    """One row tile: shift-matmul conv into a local f32 accumulator (single bf16
    store) + fused masked BatchNorm partial sums."""
    tm = y_ref.shape[0]

    # Stage this tile plus its halo rows once, in bf16 (no casts).
    xw_ref[:tm, :] = x0_ref[...]
    xw_ref[tm:tm + halo, :] = xh_ref[...]

    # Hoist all tap slab loads, then chain the matmuls back-to-back into one f32
    # accumulator (no read-modify-write of y_ref; MRB accumulation friendly on v7x).
    slabs = [xw_ref[pl.ds(d, tm), :] for d in taps]
    acc = jnp.dot(slabs[0], w_ref[0], preferred_element_type=jnp.float32)
    for t in range(1, len(taps)):
        acc = acc + jnp.dot(slabs[t], w_ref[t], preferred_element_type=jnp.float32)

    # Single store of the conv tile (bf16 intermediate in HBM).
    y_ref[...] = acc.astype(y_ref.dtype)

    # Fused BatchNorm partial statistics from the f32 accumulator (masked rows).
    mk = mask_ref[...]                                   # (tm, 1): 1.0 on real rows
    ym = acc * mk
    st_ref[0, 0:1, :] = jnp.sum(ym, axis=0, keepdims=True)         # per-channel sum
    st_ref[0, 1:2, :] = jnp.sum(ym * acc, axis=0, keepdims=True)   # sum of squares


def _bn_lrelu_kernel(y_ref, scale_ref, shift_ref, o_ref, *, slope):
    z = y_ref[...].astype(jnp.float32) * scale_ref[...] + shift_ref[...]
    o_ref[...] = jnp.where(z >= 0, z, slope * z)


@functools.partial(jax.jit,
                   static_argnames=("stride", "padding", "eps", "slope", "tile_m"))
def conv_batch_leaky_relu(x, weight, gamma, beta, *, stride=1, padding=0,
                          eps=1e-5, slope=0.1, tile_m=512):
    """x: (N, C_in, H, W) f32; weight: (C_out, C_in, KH, KW); gamma/beta: (C_out,)."""
    N, C_in, H, W = x.shape
    C_out, _, KH, KW = weight.shape
    OH = (H + 2 * padding - KH) // stride + 1
    OW = (W + 2 * padding - KW) // stride + 1
    HP, WP = H + 2 * padding, W + 2 * padding

    # ---- tap offsets & tiling geometry --------------------------------------
    taps = tuple(i * WP + j for i in range(KH) for j in range(KW))
    max_off = taps[-1]
    halo = max(16, ((max_off + 15) // 16) * 16)      # halo rows, bf16-sublane aligned
    # tile_m must be a multiple of halo so the halo block lands at (m+1)*tile_m.
    tile_m = max(halo, ((tile_m + halo - 1) // halo) * halo)

    # VMEM byte budget (conservative for v7x's 64 MiB VMEM): shrink tile_m if needed.
    def _est_vmem(tm):
        w = 2 * KH * KW * C_in * C_out * 2            # double-buffered bf16 weights
        xin = 2 * (tm + halo) * C_in * 2              # main + halo input streams
        msk = 2 * tm * 4
        yout = 2 * tm * C_out * 2
        stat = 2 * 2 * C_out * 4
        scratch = (tm + halo) * C_in * 2
        accum = 2 * tm * C_out * 4                    # live f32 accumulator + temps
        return w + xin + msk + yout + stat + scratch + accum

    budget = 36 * 1024 * 1024
    while _est_vmem(tile_m) > budget and tile_m > 2 * halo:
        tile_m = max(halo, (tile_m // 2 // halo) * halo)
    # TODO(synk): if the resident KH*KW*C_in*C_out weights alone blow the budget,
    # add a grid axis over C_out blocks instead of shrinking tile_m further.
    vmem_limit = int(min(max(2 * _est_vmem(tile_m), 32 * 1024 * 1024),
                         48 * 1024 * 1024))

    rows_true = N * HP * WP
    grid_m = -(-rows_true // tile_m)
    rows_pad = grid_m * tile_m
    ratio = tile_m // halo

    # ---- layout prep (cheap glue) --------------------------------------------
    # TODO(synk): keep the op NHWC end-to-end if the surrounding model allows,
    # dropping these NCHW<->NHWC transposes.
    x_nhwc = jnp.transpose(x, (0, 2, 3, 1))
    xp = jnp.pad(x_nhwc, ((0, 0), (padding, padding), (padding, padding), (0, 0)))
    x2d = xp.reshape(rows_true, C_in)
    # Pad one extra tile of rows so the last tile's halo block stays in bounds.
    x2d = jnp.pad(x2d, ((0, (grid_m + 1) * tile_m - rows_true), (0, 0)))
    x2d = x2d.astype(jnp.bfloat16)

    # Weights: (C_out, C_in, KH, KW) -> (KH*KW, C_in, C_out), bf16, no lane padding.
    w_t = jnp.transpose(weight, (2, 3, 1, 0)).reshape(KH * KW, C_in, C_out)
    w_t = w_t.astype(jnp.bfloat16)

    # Row-validity mask: which dense rows are real (strided) conv output positions.
    # TODO(synk): for stride>1, emit only valid rows (scalar-prefetched row map)
    # instead of computing all dense positions and masking.
    ridx = jnp.arange(rows_pad, dtype=jnp.int32)
    q = ridx % (HP * WP)
    r, c = q // WP, q % WP
    valid = ((ridx < rows_true) & (r % stride == 0) & (c % stride == 0)
             & (r // stride < OH) & (c // stride < OW))
    mask = valid.astype(jnp.float32).reshape(rows_pad, 1)

    # ---- Pallas kernel 1: fused conv (shift-matmul) + BN partial stats -------
    conv_y, stats = pl.pallas_call(
        functools.partial(_conv_stats_kernel, taps=taps, halo=halo),
        out_shape=(jax.ShapeDtypeStruct((rows_pad, C_out), jnp.bfloat16),
                   jax.ShapeDtypeStruct((grid_m, 2, C_out), jnp.float32)),
        grid=(grid_m,),
        in_specs=[
            pl.BlockSpec((tile_m, C_in), lambda m: (m, 0)),             # tile rows
            pl.BlockSpec((halo, C_in), lambda m: ((m + 1) * ratio, 0)), # halo rows only
            pl.BlockSpec((KH * KW, C_in, C_out), lambda m: (0, 0, 0)),  # resident weights
            pl.BlockSpec((tile_m, 1), lambda m: (m, 0)),                # validity mask
        ],
        out_specs=(
            pl.BlockSpec((tile_m, C_out), lambda m: (m, 0)),            # conv out (bf16)
            pl.BlockSpec((1, 2, C_out), lambda m: (m, 0, 0)),           # partial stats
        ),
        scratch_shapes=[pltpu.VMEM((tile_m + halo, C_in), jnp.bfloat16)],
        compiler_params=pltpu.CompilerParams(
            dimension_semantics=("parallel",), vmem_limit_bytes=vmem_limit),
    )(x2d, x2d, w_t, mask)

    # ---- finalize BN statistics (tiny reduction in plain JAX) ----------------
    count = float(N * OH * OW)
    tot = jnp.sum(stats, axis=0)                  # (2, C_out)
    mean = tot[0] / count
    # E[x^2]-mean^2 in f32 (per-tile partials); clamp against tiny negative variance.
    var = jnp.maximum(tot[1] / count - mean * mean, 0.0)
    inv = jax.lax.rsqrt(var + eps)
    g = gamma.astype(jnp.float32)
    b = beta.astype(jnp.float32)
    scale = (g * inv).reshape(1, C_out)
    shift = (b - mean * g * inv).reshape(1, C_out)

    # ---- Pallas kernel 2: tiled normalize + LeakyReLU (decoupled, big tile) ---
    tile2 = tile_m
    for d in range(min(grid_m, 16), 0, -1):
        if grid_m % d == 0 and 12 * d * tile_m * C_out <= 24 * 1024 * 1024:
            tile2 = d * tile_m
            break
    grid2 = rows_pad // tile2

    out_flat = pl.pallas_call(
        functools.partial(_bn_lrelu_kernel, slope=slope),
        out_shape=jax.ShapeDtypeStruct((rows_pad, C_out), jnp.float32),
        grid=(grid2,),
        in_specs=[pl.BlockSpec((tile2, C_out), lambda m: (m, 0)),
                  pl.BlockSpec((1, C_out), lambda m: (0, 0)),
                  pl.BlockSpec((1, C_out), lambda m: (0, 0))],
        out_specs=pl.BlockSpec((tile2, C_out), lambda m: (m, 0)),
        compiler_params=pltpu.CompilerParams(
            dimension_semantics=("parallel",), vmem_limit_bytes=vmem_limit),
    )(conv_y, scale, shift)

    # Strip dense-row padding only at the very end; back to NCHW.
    out = out_flat[:rows_true].reshape(N, HP, WP, C_out)
    out = out[:, 0:OH * stride:stride, 0:OW * stride:stride, :]
    return jnp.transpose(out, (0, 3, 1, 2))


def _reference(x, weight, gamma, beta, *, stride, padding, eps=1e-5, slope=0.1):
    conv = jax.lax.conv_general_dilated(
        x, weight, window_strides=(stride, stride),
        padding=[(padding, padding), (padding, padding)],
        dimension_numbers=("NCHW", "OIHW", "NCHW"))
    mean = conv.mean(axis=(0, 2, 3), keepdims=True)
    var = ((conv - mean) ** 2).mean(axis=(0, 2, 3), keepdims=True)
    yhat = (conv - mean) * jax.lax.rsqrt(var + eps) \
        * gamma.reshape(1, -1, 1, 1) + beta.reshape(1, -1, 1, 1)
    return jnp.where(yhat >= 0, yhat, slope * yhat)


if __name__ == "__main__":
    key = jax.random.PRNGKey(0)
    k1, k2, k3, k4 = jax.random.split(key, 4)

    N, C_in, H, W = 2, 4, 16, 16
    C_out, KH, KW = 8, 3, 3
    stride, padding = 1, 1

    x = jax.random.normal(k1, (N, C_in, H, W), jnp.float32)
    weight = jax.random.normal(k2, (C_out, C_in, KH, KW), jnp.float32) * 0.1
    # BatchNorm affine params (perturbed so both scale and shift are exercised).
    gamma = 1.0 + 0.1 * jax.random.normal(k3, (C_out,), jnp.float32)
    beta = 0.1 * jax.random.normal(k4, (C_out,), jnp.float32)

    out = conv_batch_leaky_relu(x, weight, gamma, beta,
                                stride=stride, padding=padding)
    out = jax.block_until_ready(out)

    ref = _reference(x, weight, gamma, beta, stride=stride, padding=padding)
    assert out.shape == (N, C_out, H, W), out.shape
    max_err = float(jnp.max(jnp.abs(out - ref)))
    # bf16 matmul operands / bf16 conv_y intermediate vs f32 reference -> relaxed tol.
    assert jnp.allclose(out, ref, atol=5e-2, rtol=5e-2), max_err
    print("KERNEL_OK")
</pallas_src>

<mosaic_0001>
module attributes {stable_mosaic.version = 11 : i64} {
  func.func @_conv_stats_kernel(%arg0: i32, %arg1: memref<528x4xbf16, #tpu.memory_space<vmem>>, %arg2: memref<48x4xbf16, #tpu.memory_space<vmem>>, %arg3: memref<9x4x8xbf16, #tpu.memory_space<vmem>>, %arg4: memref<528x1xf32, #tpu.memory_space<vmem>>, %arg5: memref<528x8xbf16, #tpu.memory_space<vmem>>, %arg6: memref<1x2x8xf32, #tpu.memory_space<vmem>>, %arg7: memref<576x4xbf16, #tpu.memory_space<vmem>>) attributes {dimension_semantics = [#tpu.dimension_semantics<parallel>], iteration_bounds = array<i64: 2>, scalar_prefetch = 0 : i64, scratch_operands = 1 : i64, tpu.core_type = #tpu.core_type<tc>, window_params = [{transform_indices = @transform_0, window_bounds = array<i64: 528, 4>}, {transform_indices = @transform_1, window_bounds = array<i64: 48, 4>}, {pipeline_mode = #tpu.pipeline_mode<synchronous>, transform_indices = @transform_2, window_bounds = array<i64: 9, 4, 8>}, {transform_indices = @transform_3, window_bounds = array<i64: 528, 1>}, {transform_indices = @transform_4, window_bounds = array<i64: 528, 8>}, {transform_indices = @transform_5, window_bounds = array<i64: 1, 2, 8>}]} {
    %c0 = arith.constant 0 : index
    %c0_0 = arith.constant 0 : index
    %0 = vector.load %arg1[%c0, %c0_0] : memref<528x4xbf16, #tpu.memory_space<vmem>>, vector<528x4xbf16>
    %c0_1 = arith.constant 0 : index
    %c0_2 = arith.constant 0 : index
    %1 = vector.load %arg7[%c0_1, %c0_2] : memref<576x4xbf16, #tpu.memory_space<vmem>>, vector<528x4xbf16>
    tpu.vector_store %arg7[%c0_1, %c0_2], %0 {strides = array<i32>} : memref<576x4xbf16, #tpu.memory_space<vmem>>, vector<528x4xbf16>,
    %c0_3 = arith.constant 0 : index
    %c0_4 = arith.constant 0 : index
    %2 = vector.load %arg2[%c0_3, %c0_4] : memref<48x4xbf16, #tpu.memory_space<vmem>>, vector<48x4xbf16>
    %c528 = arith.constant 528 : index
    %c0_5 = arith.constant 0 : index
    %3 = vector.load %arg7[%c528, %c0_5] : memref<576x4xbf16, #tpu.memory_space<vmem>>, vector<48x4xbf16>
    tpu.vector_store %arg7[%c528, %c0_5], %2 {strides = array<i32>} : memref<576x4xbf16, #tpu.memory_space<vmem>>, vector<48x4xbf16>,
    %c0_6 = arith.constant 0 : index
    %c0_7 = arith.constant 0 : index
    %4 = vector.load %arg7[%c0_6, %c0_7] : memref<576x4xbf16, #tpu.memory_space<vmem>>, vector<528x4xbf16>
    %c1 = arith.constant 1 : index
    %c0_8 = arith.constant 0 : index
    %5 = vector.load %arg7[%c1, %c0_8] : memref<576x4xbf16, #tpu.memory_space<vmem>>, vector<528x4xbf16>
    %c2 = arith.constant 2 : index
    %c0_9 = arith.constant 0 : index
    %6 = vector.load %arg7[%c2, %c0_9] : memref<576x4xbf16, #tpu.memory_space<vmem>>, vector<528x4xbf16>
    %c18 = arith.constant 18 : index
    %c0_10 = arith.constant 0 : index
    %7 = vector.load %arg7[%c18, %c0_10] : memref<576x4xbf16, #tpu.memory_space<vmem>>, vector<528x4xbf16>
    %c19 = arith.constant 19 : index
    %c0_11 = arith.constant 0 : index
    %8 = vector.load %arg7[%c19, %c0_11] : memref<576x4xbf16, #tpu.memory_space<vmem>>, vector<528x4xbf16>
    %c20 = arith.constant 20 : index
    %c0_12 = arith.constant 0 : index
    %9 = vector.load %arg7[%c20, %c0_12] : memref<576x4xbf16, #tpu.memory_space<vmem>>, vector<528x4xbf16>
    %c36 = arith.constant 36 : index
    %c0_13 = arith.constant 0 : index
    %10 = vector.load %arg7[%c36, %c0_13] : memref<576x4xbf16, #tpu.memory_space<vmem>>, vector<528x4xbf16>
    %c37 = arith.constant 37 : index
    %c0_14 = arith.constant 0 : index
    %11 = vector.load %arg7[%c37, %c0_14] : memref<576x4xbf16, #tpu.memory_space<vmem>>, vector<528x4xbf16>
    %c38 = arith.constant 38 : index
    %c0_15 = arith.constant 0 : index
    %12 = vector.load %arg7[%c38, %c0_15] : memref<576x4xbf16, #tpu.memory_space<vmem>>, vector<528x4xbf16>
    %c0_16 = arith.constant 0 : index
    %c0_17 = arith.constant 0 : index
    %c0_18 = arith.constant 0 : index
    %13 = vector.load %arg3[%c0_16, %c0_17, %c0_18] : memref<9x4x8xbf16, #tpu.memory_space<vmem>>, vector<1x4x8xbf16>
    %14 = vector.shape_cast %13 : vector<1x4x8xbf16> to vector<4x8xbf16>
    %cst = arith.constant dense<0.000000e+00> : vector<528x8xf32>
    %15 = tpu.matmul %4, %14, %cst {dimension_numbers = #tpu.dot_dimension_numbers<[1], [0], [0], [1], [0, 0, 1, 1], [], []>} : vector<528x4xbf16>, vector<4x8xbf16>, vector<528x8xf32> -> vector<528x8xf32>
    %c1_19 = arith.constant 1 : index
    %c0_20 = arith.constant 0 : index
    %c0_21 = arith.constant 0 : index
    %16 = vector.load %arg3[%c1_19, %c0_20, %c0_21] : memref<9x4x8xbf16, #tpu.memory_space<vmem>>, vector<1x4x8xbf16>
    %17 = vector.shape_cast %16 : vector<1x4x8xbf16> to vector<4x8xbf16>
    %cst_22 = arith.constant dense<0.000000e+00> : vector<528x8xf32>
    %18 = tpu.matmul %5, %17, %cst_22 {dimension_numbers = #tpu.dot_dimension_numbers<[1], [0], [0], [1], [0, 0, 1, 1], [], []>} : vector<528x4xbf16>, vector<4x8xbf16>, vector<528x8xf32> -> vector<528x8xf32>
    %19 = arith.addf %15, %18 : vector<528x8xf32>
    %c2_23 = arith.constant 2 : index
    %c0_24 = arith.constant 0 : index
    %c0_25 = arith.constant 0 : index
    %20 = vector.load %arg3[%c2_23, %c0_24, %c0_25] : memref<9x4x8xbf16, #tpu.memory_space<vmem>>, vector<1x4x8xbf16>
    %21 = vector.shape_cast %20 : vector<1x4x8xbf16> to vector<4x8xbf16>
    %cst_26 = arith.constant dense<0.000000e+00> : vector<528x8xf32>
    %22 = tpu.matmul %6, %21, %cst_26 {dimension_numbers = #tpu.dot_dimension_numbers<[1], [0], [0], [1], [0, 0, 1, 1], [], []>} : vector<528x4xbf16>, vector<4x8xbf16>, vector<528x8xf32> -> vector<528x8xf32>
    %23 = arith.addf %19, %22 : vector<528x8xf32>
    %c3 = arith.constant 3 : index
    %c0_27 = arith.constant 0 : index
    %c0_28 = arith.constant 0 : index
    %24 = vector.load %arg3[%c3, %c0_27, %c0_28] : memref<9x4x8xbf16, #tpu.memory_space<vmem>>, vector<1x4x8xbf16>
    %25 = vector.shape_cast %24 : vector<1x4x8xbf16> to vector<4x8xbf16>
    %cst_29 = arith.constant dense<0.000000e+00> : vector<528x8xf32>
    %26 = tpu.matmul %7, %25, %cst_29 {dimension_numbers = #tpu.dot_dimension_numbers<[1], [0], [0], [1], [0, 0, 1, 1], [], []>} : vector<528x4xbf16>, vector<4x8xbf16>, vector<528x8xf32> -> vector<528x8xf32>
    %27 = arith.addf %23, %26 : vector<528x8xf32>
    %c4 = arith.constant 4 : index
    %c0_30 = arith.constant 0 : index
    %c0_31 = arith.constant 0 : index
    %28 = vector.load %arg3[%c4, %c0_30, %c0_31] : memref<9x4x8xbf16, #tpu.memory_space<vmem>>, vector<1x4x8xbf16>
    %29 = vector.shape_cast %28 : vector<1x4x8xbf16> to vector<4x8xbf16>
    %cst_32 = arith.constant dense<0.000000e+00> : vector<528x8xf32>
    %30 = tpu.matmul %8, %29, %cst_32 {dimension_numbers = #tpu.dot_dimension_numbers<[1], [0], [0], [1], [0, 0, 1, 1], [], []>} : vector<528x4xbf16>, vector<4x8xbf16>, vector<528x8xf32> -> vector<528x8xf32>
    %31 = arith.addf %27, %30 : vector<528x8xf32>
    %c5 = arith.constant 5 : index
    %c0_33 = arith.constant 0 : index
    %c0_34 = arith.constant 0 : index
    %32 = vector.load %arg3[%c5, %c0_33, %c0_34] : memref<9x4x8xbf16, #tpu.memory_space<vmem>>, vector<1x4x8xbf16>
    %33 = vector.shape_cast %32 : vector<1x4x8xbf16> to vector<4x8xbf16>
    %cst_35 = arith.constant dense<0.000000e+00> : vector<528x8xf32>
    %34 = tpu.matmul %9, %33, %cst_35 {dimension_numbers = #tpu.dot_dimension_numbers<[1], [0], [0], [1], [0, 0, 1, 1], [], []>} : vector<528x4xbf16>, vector<4x8xbf16>, vector<528x8xf32> -> vector<528x8xf32>
    %35 = arith.addf %31, %34 : vector<528x8xf32>
    %c6 = arith.constant 6 : index
    %c0_36 = arith.constant 0 : index
    %c0_37 = arith.constant 0 : index
    %36 = vector.load %arg3[%c6, %c0_36, %c0_37] : memref<9x4x8xbf16, #tpu.memory_space<vmem>>, vector<1x4x8xbf16>
    %37 = vector.shape_cast %36 : vector<1x4x8xbf16> to vector<4x8xbf16>
    %cst_38 = arith.constant dense<0.000000e+00> : vector<528x8xf32>
    %38 = tpu.matmul %10, %37, %cst_38 {dimension_numbers = #tpu.dot_dimension_numbers<[1], [0], [0], [1], [0, 0, 1, 1], [], []>} : vector<528x4xbf16>, vector<4x8xbf16>, vector<528x8xf32> -> vector<528x8xf32>
    %39 = arith.addf %35, %38 : vector<528x8xf32>
    %c7 = arith.constant 7 : index
    %c0_39 = arith.constant 0 : index
    %c0_40 = arith.constant 0 : index
    %40 = vector.load %arg3[%c7, %c0_39, %c0_40] : memref<9x4x8xbf16, #tpu.memory_space<vmem>>, vector<1x4x8xbf16>
    %41 = vector.shape_cast %40 : vector<1x4x8xbf16> to vector<4x8xbf16>
    %cst_41 = arith.constant dense<0.000000e+00> : vector<528x8xf32>
    %42 = tpu.matmul %11, %41, %cst_41 {dimension_numbers = #tpu.dot_dimension_numbers<[1], [0], [0], [1], [0, 0, 1, 1], [], []>} : vector<528x4xbf16>, vector<4x8xbf16>, vector<528x8xf32> -> vector<528x8xf32>
    %43 = arith.addf %39, %42 : vector<528x8xf32>
    %c8 = arith.constant 8 : index
    %c0_42 = arith.constant 0 : index
    %c0_43 = arith.constant 0 : index
    %44 = vector.load %arg3[%c8, %c0_42, %c0_43] : memref<9x4x8xbf16, #tpu.memory_space<vmem>>, vector<1x4x8xbf16>
    %45 = vector.shape_cast %44 : vector<1x4x8xbf16> to vector<4x8xbf16>
    %cst_44 = arith.constant dense<0.000000e+00> : vector<528x8xf32>
    %46 = tpu.matmul %12, %45, %cst_44 {dimension_numbers = #tpu.dot_dimension_numbers<[1], [0], [0], [1], [0, 0, 1, 1], [], []>} : vector<528x4xbf16>, vector<4x8xbf16>, vector<528x8xf32> -> vector<528x8xf32>
    %47 = arith.addf %43, %46 : vector<528x8xf32>
    %48 = arith.truncf %47 : vector<528x8xf32> to vector<528x8xbf16>
    %c0_45 = arith.constant 0 : index
    %c0_46 = arith.constant 0 : index
    %49 = vector.load %arg5[%c0_45, %c0_46] : memref<528x8xbf16, #tpu.memory_space<vmem>>, vector<528x8xbf16>
    tpu.vector_store %arg5[%c0_45, %c0_46], %48 {strides = array<i32>} : memref<528x8xbf16, #tpu.memory_space<vmem>>, vector<528x8xbf16>,
    %c0_47 = arith.constant 0 : index
    %c0_48 = arith.constant 0 : index
    %50 = vector.load %arg4[%c0_47, %c0_48] : memref<528x1xf32, #tpu.memory_space<vmem>>, vector<528x1xf32>
    %51 = vector.broadcast %50 : vector<528x1xf32> to vector<528x8xf32>
    %52 = arith.mulf %47, %51 : vector<528x8xf32>
    %cst_49 = arith.constant dense<0.000000e+00> : vector<8xf32>
    %53 = vector.multi_reduction <add>, %52, %cst_49 [0] : vector<528x8xf32> to vector<8xf32>
    %54 = vector.shape_cast %53 : vector<8xf32> to vector<1x8xf32>
    %c0_50 = arith.constant 0 : index
    %c0_51 = arith.constant 0 : index
    %c0_52 = arith.constant 0 : index
    %55 = vector.load %arg6[%c0_50, %c0_51, %c0_52] : memref<1x2x8xf32, #tpu.memory_space<vmem>>, vector<1x1x8xf32>
    %56 = vector.shape_cast %55 : vector<1x1x8xf32> to vector<1x8xf32>
    %57 = vector.shape_cast %54 : vector<1x8xf32> to vector<1x1x8xf32>
    tpu.vector_store %arg6[%c0_50, %c0_51, %c0_52], %57 {strides = array<i32>} : memref<1x2x8xf32, #tpu.memory_space<vmem>>, vector<1x1x8xf32>,
    %58 = arith.mulf %52, %47 : vector<528x8xf32>
    %cst_53 = arith.constant dense<0.000000e+00> : vector<8xf32>
    %59 = vector.multi_reduction <add>, %58, %cst_53 [0] : vector<528x8xf32> to vector<8xf32>
    %60 = vector.shape_cast %59 : vector<8xf32> to vector<1x8xf32>
    %c0_54 = arith.constant 0 : index
    %c1_55 = arith.constant 1 : index
    %c0_56 = arith.constant 0 : index
    %61 = vector.load %arg6[%c0_54, %c1_55, %c0_56] : memref<1x2x8xf32, #tpu.memory_space<vmem>>, vector<1x1x8xf32>
    %62 = vector.shape_cast %61 : vector<1x1x8xf32> to vector<1x8xf32>
    %63 = vector.shape_cast %60 : vector<1x8xf32> to vector<1x1x8xf32>
    tpu.vector_store %arg6[%c0_54, %c1_55, %c0_56], %63 {strides = array<i32>} : memref<1x2x8xf32, #tpu.memory_space<vmem>>, vector<1x1x8xf32>,
    return
  }
  func.func @transform_0(%arg0: i32) -> (i32, i32) {
    %c0_i32 = arith.constant 0 : i32
    %c0_i32_0 = arith.constant 0 : i32
    return %arg0, %c0_i32 : i32, i32
  }
  func.func @transform_1(%arg0: i32) -> (i32, i32) {
    %c1_i32 = arith.constant 1 : i32
    %0 = arith.addi %arg0, %c1_i32 : i32
    %c11_i32 = arith.constant 11 : i32
    %1 = arith.muli %0, %c11_i32 : i32
    %c0_i32 = arith.constant 0 : i32
    %c0_i32_0 = arith.constant 0 : i32
    return %1, %c0_i32 : i32, i32
  }
  func.func @transform_2(%arg0: i32) -> (i32, i32, i32) {
    %c0_i32 = arith.constant 0 : i32
    %c0_i32_0 = arith.constant 0 : i32
    %c0_i32_1 = arith.constant 0 : i32
    %c0_i32_2 = arith.constant 0 : i32
    return %c0_i32, %c0_i32_0, %c0_i32_1 : i32, i32, i32
  }
  func.func @transform_3(%arg0: i32) -> (i32, i32) {
    %c0_i32 = arith.constant 0 : i32
    %c0_i32_0 = arith.constant 0 : i32
    return %arg0, %c0_i32 : i32, i32
  }
  func.func @transform_4(%arg0: i32) -> (i32, i32) {
    %c0_i32 = arith.constant 0 : i32
    %c0_i32_0 = arith.constant 0 : i32
    return %arg0, %c0_i32 : i32, i32
  }
  func.func @transform_5(%arg0: i32) -> (i32, i32, i32) {
    %c0_i32 = arith.constant 0 : i32
    %c0_i32_0 = arith.constant 0 : i32
    %c0_i32_1 = arith.constant 0 : i32
    return %arg0, %c0_i32, %c0_i32_0 : i32, i32, i32
  }
}

module attributes {stable_mosaic.version = 11 : i64} {
  func.func @_bn_lrelu_kernel(%arg0: i32, %arg1: memref<1056x8xbf16, #tpu.memory_space<vmem>>, %arg2: memref<1x8xf32, #tpu.memory_space<vmem>>, %arg3: memref<1x8xf32, #tpu.memory_space<vmem>>, %arg4: memref<1056x8xf32, #tpu.memory_space<vmem>>) attributes {dimension_semantics = [#tpu.dimension_semantics<parallel>], iteration_bounds = array<i64: 1>, scalar_prefetch = 0 : i64, scratch_operands = 0 : i64, tpu.core_type = #tpu.core_type<tc>, window_params = [{transform_indices = @transform_0, window_bounds = array<i64: 1056, 8>}, {pipeline_mode = #tpu.pipeline_mode<synchronous>, transform_indices = @transform_1, window_bounds = array<i64: 1, 8>}, {pipeline_mode = #tpu.pipeline_mode<synchronous>, transform_indices = @transform_2, window_bounds = array<i64: 1, 8>}, {transform_indices = @transform_3, window_bounds = array<i64: 1056, 8>}]} {
    %c0 = arith.constant 0 : index
    %c0_0 = arith.constant 0 : index
    %0 = vector.load %arg1[%c0, %c0_0] : memref<1056x8xbf16, #tpu.memory_space<vmem>>, vector<1056x8xbf16>
    %1 = arith.extf %0 : vector<1056x8xbf16> to vector<1056x8xf32>
    %c0_1 = arith.constant 0 : index
    %c0_2 = arith.constant 0 : index
    %2 = vector.load %arg2[%c0_1, %c0_2] : memref<1x8xf32, #tpu.memory_space<vmem>>, vector<1x8xf32>
    %3 = vector.broadcast %2 : vector<1x8xf32> to vector<1056x8xf32>
    %4 = arith.mulf %1, %3 : vector<1056x8xf32>
    %c0_3 = arith.constant 0 : index
    %c0_4 = arith.constant 0 : index
    %5 = vector.load %arg3[%c0_3, %c0_4] : memref<1x8xf32, #tpu.memory_space<vmem>>, vector<1x8xf32>
    %6 = vector.broadcast %5 : vector<1x8xf32> to vector<1056x8xf32>
    %7 = arith.addf %4, %6 : vector<1056x8xf32>
    %cst = arith.constant 0.000000e+00 : f32
    %8 = vector.broadcast %cst : f32 to vector<1056x8xf32>
    %9 = arith.cmpf oge, %7, %8 : vector<1056x8xf32>
    %cst_5 = arith.constant 1.000000e-01 : f32
    %10 = vector.broadcast %cst_5 : f32 to vector<1056x8xf32>
    %11 = arith.mulf %10, %7 : vector<1056x8xf32>
    %12 = arith.select %9, %7, %11 : vector<1056x8xi1>, vector<1056x8xf32>
    %c0_6 = arith.constant 0 : index
    %c0_7 = arith.constant 0 : index
    %13 = vector.load %arg4[%c0_6, %c0_7] : memref<1056x8xf32, #tpu.memory_space<vmem>>, vector<1056x8xf32>
    tpu.vector_store %arg4[%c0_6, %c0_7], %12 {strides = array<i32>} : memref<1056x8xf32, #tpu.memory_space<vmem>>, vector<1056x8xf32>,
    return
  }
  func.func @transform_0(%arg0: i32) -> (i32, i32) {
    %c0_i32 = arith.constant 0 : i32
    %c0_i32_0 = arith.constant 0 : i32
    return %arg0, %c0_i32 : i32, i32
  }
  func.func @transform_1(%arg0: i32) -> (i32, i32) {
    %c0_i32 = arith.constant 0 : i32
    %c0_i32_0 = arith.constant 0 : i32
    %c0_i32_1 = arith.constant 0 : i32
    return %c0_i32, %c0_i32_0 : i32, i32
  }
  func.func @transform_2(%arg0: i32) -> (i32, i32) {
    %c0_i32 = arith.constant 0 : i32
    %c0_i32_0 = arith.constant 0 : i32
    %c0_i32_1 = arith.constant 0 : i32
    return %c0_i32, %c0_i32_0 : i32, i32
  }
  func.func @transform_3(%arg0: i32) -> (i32, i32) {
    %c0_i32 = arith.constant 0 : i32
    %c0_i32_0 = arith.constant 0 : i32
    return %arg0, %c0_i32 : i32, i32
  }
}

</mosaic_0001>

<bundles_post_ra>
// kernel: conv_batch_leaky_relu.3
= control target key start
LH: loop header
LB: loop body
LE: loop exit
PB: predicated region body
PF: predicated region fallthrough
CT: control target
= control target key end

     0   :  { %vm946_vm0 = vcmask 64512   ;;  %s2446_s0 = inlined_call_operand.vmem [shape: bf16[1056,8], index: 0, kind: input, shape index: {}]   ;;  %s2447_s1 = inlined_call_operand.vmem [shape: f32[1,8], index: 1, kind: input, shape index: {}]   ;;  %s2448_s2 = inlined_call_operand.vmem [shape: f32[1,8], index: 2, kind: input, shape index: {}]   ;;  %s2449_s3 = inlined_call_operand.vmem [shape: f32[1056,8], index: 3, kind: output, shape index: {}]  }
   0x1   :  { %v1084_v0 = vld [vmem:[%s2446_s0] sm:$0xff]   ;;  %v1347_v5 = vld [vmem:[%s2446_s0 + $0x8] sm:$0xff]   ;;  %v1348_v8 = vld [vmem:[%s2446_s0 + $0x10] sm:$0xff]  }
   0x2   :  { %v1442_v1 = vld [vmem:[%s2447_s1] ss:$0 sm:$0xff]  ;;  %v1085_v2 = vunpack.c.l.bf16 %v1084_v0  ;;  %v1086_v4 = vunpack.c.h.bf16 %v1084_v0  ;;  %v1089_v6 = vunpack.c.l.bf16 %v1347_v5  ;;  %v1090_v7 = vunpack.c.h.bf16 %v1347_v5  ;;  %v1349_v9 = vld [vmem:[%s2446_s0 + $0x18] sm:$0xff]   ;;  %v1351_v39 = vld [vmem:[%s2446_s0 + $0x28] sm:$0xff]  }
   0x3   :  { %v1447_v3 = vld [vmem:[%s2448_s2] ss:$0 sm:$0xff]  ;;  %v1093_v12 = vunpack.c.l.bf16 %v1348_v8  ;;  %v1094_v13 = vunpack.c.h.bf16 %v1348_v8  ;;  %v1097_v16 = vunpack.c.l.bf16 %v1349_v9  ;;  %v1098_v17 = vunpack.c.h.bf16 %v1349_v9  ;;  %v1352_v42 = vld [vmem:[%s2446_s0 + $0x30] sm:$0xff]   ;;  %v1353_v49 = vld [vmem:[%s2446_s0 + $0x38] sm:$0xff]  }
   0x4   :  { %v282_v10 = vmul.f32 %v1442_v1, %v1085_v2  ;;  %v283_v11 = vmul.f32 %v1442_v1, %v1086_v4  ;;  %v284_v14 = vmul.f32 %v1442_v1, %v1089_v6  ;;  %v285_v15 = vmul.f32 %v1442_v1, %v1090_v7  ;;  %v1350_v26 = vld [vmem:[%s2446_s0 + $0x20] sm:$0xff]  }
   0x5   :  { %v286_v20 = vmul.f32 %v1442_v1, %v1093_v12  ;;  %v287_v21 = vmul.f32 %v1442_v1, %v1094_v13  ;;  %v288_v24 = vmul.f32 %v1442_v1, %v1097_v16  ;;  %v289_v25 = vmul.f32 %v1442_v1, %v1098_v17 }
   0x6   :  { %v418_v18 = vadd.f32 %v1447_v3, %v282_v10  ;;  %v419_v19 = vadd.f32 %v1447_v3, %v283_v11  ;;  %v420_v22 = vadd.f32 %v1447_v3, %v284_v14  ;;  %v421_v23 = vadd.f32 %v1447_v3, %v285_v15  ;;  %v1354_v15 = vld [vmem:[%s2446_s0 + $0x40] sm:$0xff]  }
   0x7   :  { %v422_v33 = vadd.f32 %v1447_v3, %v286_v20  ;;  %v423_v34 = vadd.f32 %v1447_v3, %v287_v21  ;;  %v424_v37 = vadd.f32 %v1447_v3, %v288_v24  ;;  %v425_v38 = vadd.f32 %v1447_v3, %v289_v25 }
   0x8   :  { %vm550_vm1 = vcmp.ge.f32.partialorder %v418_v18, 0.0  ;;  %v682_v27 = vmul.f32 0.1, %v418_v18  ;;  %vm551_vm2 = vcmp.ge.f32.partialorder %v419_v19, 0.0  ;;  %v683_v28 = vmul.f32 0.1, %v419_v19 }
   0x9   :  { %vm552_vm3 = vcmp.ge.f32.partialorder %v420_v22, 0.0  ;;  %v684_v29 = vmul.f32 0.1, %v420_v22  ;;  %vm553_vm4 = vcmp.ge.f32.partialorder %v421_v23, 0.0  ;;  %v685_v30 = vmul.f32 0.1, %v421_v23 }
   0xa   :  { %v814_v31 = vsel %vm550_vm1, %v418_v18, %v682_v27  ;;  %v815_v32 = vsel %vm551_vm2, %v419_v19, %v683_v28  ;;  %vm554_vm5 = vcmp.ge.f32.partialorder %v422_v33, 0.0  ;;  %v686_v40 = vmul.f32 0.1, %v422_v33  ;;  %v1355_v19 = vld [vmem:[%s2446_s0 + $0x48] sm:$0xff]   ;;  %v1357_v28 = vld [vmem:[%s2446_s0 + $0x58] sm:$0xff]  }
   0xb   :  { %947 = vst.msk [vmem:[%s2449_s3] sm:$0xff] %vm946_vm0, %v814_v31  ;;  %v816_v35 = vsel %vm552_vm3, %v420_v22, %v684_v29  ;;  %v817_v36 = vsel %vm553_vm4, %v421_v23, %v685_v30  ;;  %vm555_vm6 = vcmp.ge.f32.partialorder %v423_v34, 0.0  ;;  %v1101_v41 = vunpack.c.l.bf16 %v1350_v26  ;;  %v1356_v23 = vld [vmem:[%s2446_s0 + $0x50] sm:$0xff]  }
   0xc   :  { %948 = vst.msk [vmem:[%s2449_s3 + $0x8] sm:$0xff] %vm946_vm0, %v815_v32  ;;  %v687_v43 = vmul.f32 0.1, %v423_v34  ;;  %vm556_vm7 = vcmp.ge.f32.partialorder %v424_v37, 0.0  ;;  %v688_v44 = vmul.f32 0.1, %v424_v37  ;;  %v1102_v45 = vunpack.c.h.bf16 %v1350_v26 }
   0xd   :  { %949 = vst.msk [vmem:[%s2449_s3 + $0x10] sm:$0xff] %vm946_vm0, %v816_v35  ;;  %v818_v46 = vsel %vm554_vm5, %v422_v33, %v686_v40  ;;  %vm557_vm8 = vcmp.ge.f32.partialorder %v425_v38, 0.0  ;;  %v689_v47 = vmul.f32 0.1, %v425_v38  ;;  %v290_v48 = vmul.f32 %v1442_v1, %v1101_v41 }
   0xe   :  { %950 = vst.msk [vmem:[%s2449_s3 + $0x18] sm:$0xff] %vm946_vm0, %v817_v36  ;;  %v819_v50 = vsel %vm555_vm6, %v423_v34, %v687_v43  ;;  %v820_v51 = vsel %vm556_vm7, %v424_v37, %v688_v44  ;;  %v291_v52 = vmul.f32 %v1442_v1, %v1102_v45  ;;  %v1105_v53 = vunpack.c.l.bf16 %v1351_v39 }
   0xf   :  { %951 = vst.msk [vmem:[%s2449_s3 + $0x20] sm:$0xff] %vm946_vm0, %v818_v46  ;;  %v821_v54 = vsel %vm557_vm8, %v425_v38, %v689_v47  ;;  %v426_v55 = vadd.f32 %v1447_v3, %v290_v48  ;;  %v1106_v56 = vunpack.c.h.bf16 %v1351_v39  ;;  %v1109_v57 = vunpack.c.l.bf16 %v1352_v42 }
  0x10   :  { %952 = vst.msk [vmem:[%s2449_s3 + $0x28] sm:$0xff] %vm946_vm0, %v819_v50  ;;  %v427_v58 = vadd.f32 %v1447_v3, %v291_v52  ;;  %v292_v59 = vmul.f32 %v1442_v1, %v1105_v53  ;;  %v1110_v60 = vunpack.c.h.bf16 %v1352_v42  ;;  %v1113_v61 = vunpack.c.l.bf16 %v1353_v49  ;;  %v1358_v52 = vld [vmem:[%s2446_s0 + $0x60] sm:$0xff]  }
  0x11   :  { %953 = vst.msk [vmem:[%s2449_s3 + $0x30] sm:$0xff] %vm946_vm0, %v820_v51  ;;  %vm558_vm9 = vcmp.ge.f32.partialorder %v426_v55, 0.0  ;;  %v690_v62 = vmul.f32 0.1, %v426_v55  ;;  %v293_v63 = vmul.f32 %v1442_v1, %v1106_v56  ;;  %v294_v0 = vmul.f32 %v1442_v1, %v1109_v57 }
  0x12   :  { %954 = vst.msk [vmem:[%s2449_s3 + $0x38] sm:$0xff] %vm946_vm0, %v821_v54  ;;  %vm559_vm10 = vcmp.ge.f32.partialorder %v427_v58, 0.0  ;;  %v691_v2 = vmul.f32 0.1, %v427_v58  ;;  %v428_v4 = vadd.f32 %v1447_v3, %v292_v59  ;;  %v295_v5 = vmul.f32 %v1442_v1, %v1110_v60 }
  0x13   :  { %v822_v6 = vsel %vm558_vm9, %v426_v55, %v690_v62  ;;  %v429_v7 = vadd.f32 %v1447_v3, %v293_v63  ;;  %v430_v8 = vadd.f32 %v1447_v3, %v294_v0  ;;  %v296_v9 = vmul.f32 %v1442_v1, %v1113_v61  ;;  %v1359_v61 = vld [vmem:[%s2446_s0 + $0x68] sm:$0xff]  }
  0x14   :  { %955 = vst.msk [vmem:[%s2449_s3 + $0x40] sm:$0xff] %vm946_vm0, %v822_v6  ;;  %v823_v10 = vsel %vm559_vm10, %v427_v58, %v691_v2  ;;  %vm560_vm11 = vcmp.ge.f32.partialorder %v428_v4, 0.0  ;;  %v692_v11 = vmul.f32 0.1, %v428_v4  ;;  %v431_v12 = vadd.f32 %v1447_v3, %v295_v5 }
  0x15   :  { %956 = vst.msk [vmem:[%s2449_s3 + $0x48] sm:$0xff] %vm946_vm0, %v823_v10  ;;  %vm561_vm12 = vcmp.ge.f32.partialorder %v429_v7, 0.0  ;;  %v693_v13 = vmul.f32 0.1, %v429_v7  ;;  %vm562_vm13 = vcmp.ge.f32.partialorder %v430_v8, 0.0  ;;  %v432_v14 = vadd.f32 %v1447_v3, %v296_v9  ;;  %v1360_v10 = vld [vmem:[%s2446_s0 + $0x70] sm:$0xff]  }
  0x16   :  { %v824_v16 = vsel %vm560_vm11, %v428_v4, %v692_v11  ;;  %v694_v17 = vmul.f32 0.1, %v430_v8  ;;  %vm563_vm14 = vcmp.ge.f32.partialorder %v431_v12, 0.0  ;;  %v695_v18 = vmul.f32 0.1, %v431_v12 }
  0x17   :  { %957 = vst.msk [vmem:[%s2449_s3 + $0x50] sm:$0xff] %vm946_vm0, %v824_v16  ;;  %v825_v20 = vsel %vm561_vm12, %v429_v7, %v693_v13  ;;  %vm564_vm15 = vcmp.ge.f32.partialorder %v432_v14, 0.0  ;;  %v696_v21 = vmul.f32 0.1, %v432_v14  ;;  %v1114_v22 = vunpack.c.h.bf16 %v1353_v49 }
  0x18   :  { %958 = vst.msk [vmem:[%s2449_s3 + $0x58] sm:$0xff] %vm946_vm0, %v825_v20  ;;  %v826_v24 = vsel %vm562_vm13, %v430_v8, %v694_v17  ;;  %v827_v25 = vsel %vm563_vm14, %v431_v12, %v695_v18  ;;  %v1117_v26 = vunpack.c.l.bf16 %v1354_v15  ;;  %v1118_v27 = vunpack.c.h.bf16 %v1354_v15 }
  0x19   :  { %959 = vst.msk [vmem:[%s2449_s3 + $0x60] sm:$0xff] %vm946_vm0, %v826_v24  ;;  %v828_v29 = vsel %vm564_vm15, %v432_v14, %v696_v21  ;;  %v297_v30 = vmul.f32 %v1442_v1, %v1114_v22  ;;  %v1121_v31 = vunpack.c.l.bf16 %v1355_v19  ;;  %v1122_v32 = vunpack.c.h.bf16 %v1355_v19 }
  0x1a   :  { %960 = vst.msk [vmem:[%s2449_s3 + $0x68] sm:$0xff] %vm946_vm0, %v827_v25  ;;  %v298_v33 = vmul.f32 %v1442_v1, %v1117_v26  ;;  %v299_v34 = vmul.f32 %v1442_v1, %v1118_v27  ;;  %v1125_v35 = vunpack.c.l.bf16 %v1356_v23  ;;  %v1126_v36 = vunpack.c.h.bf16 %v1356_v23 }
  0x1b   :  { %961 = vst.msk [vmem:[%s2449_s3 + $0x70] sm:$0xff] %vm946_vm0, %v828_v29  ;;  %v433_v37 = vadd.f32 %v1447_v3, %v297_v30  ;;  %v300_v38 = vmul.f32 %v1442_v1, %v1121_v31  ;;  %v301_v39 = vmul.f32 %v1442_v1, %v1122_v32  ;;  %v1129_v40 = vunpack.c.l.bf16 %v1357_v28  ;;  %v1362_v29 = vld [vmem:[%s2446_s0 + $0x80] sm:$0xff]  }
  0x1c   :  { %v434_v41 = vadd.f32 %v1447_v3, %v298_v33  ;;  %v435_v42 = vadd.f32 %v1447_v3, %v299_v34  ;;  %v302_v43 = vmul.f32 %v1442_v1, %v1125_v35  ;;  %v303_v44 = vmul.f32 %v1442_v1, %v1126_v36 }
  0x1d   :  { %vm565_vm1 = vcmp.ge.f32.partialorder %v433_v37, 0.0  ;;  %v697_v45 = vmul.f32 0.1, %v433_v37  ;;  %v436_v46 = vadd.f32 %v1447_v3, %v300_v38  ;;  %v437_v47 = vadd.f32 %v1447_v3, %v301_v39 }
  0x1e   :  { %vm566_vm2 = vcmp.ge.f32.partialorder %v434_v41, 0.0  ;;  %v698_v48 = vmul.f32 0.1, %v434_v41  ;;  %vm567_vm3 = vcmp.ge.f32.partialorder %v435_v42, 0.0  ;;  %v699_v49 = vmul.f32 0.1, %v435_v42 }
  0x1f   :  { %v829_v50 = vsel %vm565_vm1, %v433_v37, %v697_v45  ;;  %vm568_vm4 = vcmp.ge.f32.partialorder %v436_v46, 0.0  ;;  %v700_v51 = vmul.f32 0.1, %v436_v46  ;;  %vm569_vm5 = vcmp.ge.f32.partialorder %v437_v47, 0.0 }
  0x20   :  { %962 = vst.msk [vmem:[%s2449_s3 + $0x78] sm:$0xff] %vm946_vm0, %v829_v50  ;;  %v830_v53 = vsel %vm566_vm2, %v434_v41, %v698_v48  ;;  %v831_v54 = vsel %vm567_vm3, %v435_v42, %v699_v49  ;;  %v701_v55 = vmul.f32 0.1, %v437_v47  ;;  %v438_v56 = vadd.f32 %v1447_v3, %v302_v43 }
  0x21   :  { %963 = vst.msk [vmem:[%s2449_s3 + $0x80] sm:$0xff] %vm946_vm0, %v830_v53  ;;  %v832_v57 = vsel %vm568_vm4, %v436_v46, %v700_v51  ;;  %v439_v58 = vadd.f32 %v1447_v3, %v303_v44  ;;  %v304_v59 = vmul.f32 %v1442_v1, %v1129_v40  ;;  %v1130_v60 = vunpack.c.h.bf16 %v1357_v28  ;;  %v1361_v28 = vld [vmem:[%s2446_s0 + $0x78] sm:$0xff]   ;;  %v1363_v40 = vld [vmem:[%s2446_s0 + $0x88] sm:$0xff]  }
  0x22   :  { %964 = vst.msk [vmem:[%s2449_s3 + $0x88] sm:$0xff] %vm946_vm0, %v831_v54  ;;  %v833_v62 = vsel %vm569_vm5, %v437_v47, %v701_v55  ;;  %vm570_vm6 = vcmp.ge.f32.partialorder %v438_v56, 0.0  ;;  %v702_v63 = vmul.f32 0.1, %v438_v56  ;;  %v1133_v0 = vunpack.c.l.bf16 %v1358_v52 }
  0x23   :  { %965 = vst.msk [vmem:[%s2449_s3 + $0x90] sm:$0xff] %vm946_vm0, %v832_v57  ;;  %vm571_vm7 = vcmp.ge.f32.partialorder %v439_v58, 0.0  ;;  %v703_v2 = vmul.f32 0.1, %v439_v58  ;;  %v440_v4 = vadd.f32 %v1447_v3, %v304_v59  ;;  %v305_v5 = vmul.f32 %v1442_v1, %v1130_v60 }
  0x24   :  { %966 = vst.msk [vmem:[%s2449_s3 + $0x98] sm:$0xff] %vm946_vm0, %v833_v62  ;;  %v834_v6 = vsel %vm570_vm6, %v438_v56, %v702_v63  ;;  %v306_v7 = vmul.f32 %v1442_v1, %v1133_v0  ;;  %v1134_v8 = vunpack.c.h.bf16 %v1358_v52  ;;  %v1137_v9 = vunpack.c.l.bf16 %v1359_v61 }
  0x25   :  { %967 = vst.msk [vmem:[%s2449_s3 + $0xa0] sm:$0xff] %vm946_vm0, %v834_v6  ;;  %v835_v11 = vsel %vm571_vm7, %v439_v58, %v703_v2  ;;  %vm572_vm8 = vcmp.ge.f32.partialorder %v440_v4, 0.0  ;;  %v704_v12 = vmul.f32 0.1, %v440_v4  ;;  %v441_v13 = vadd.f32 %v1447_v3, %v305_v5  ;;  %v1365_v6 = vld [vmem:[%s2446_s0 + $0x98] sm:$0xff]  }
  0x26   :  { %968 = vst.msk [vmem:[%s2449_s3 + $0xa8] sm:$0xff] %vm946_vm0, %v835_v11  ;;  %v442_v14 = vadd.f32 %v1447_v3, %v306_v7  ;;  %v307_v15 = vmul.f32 %v1442_v1, %v1134_v8  ;;  %v308_v16 = vmul.f32 %v1442_v1, %v1137_v9  ;;  %v1138_v17 = vunpack.c.h.bf16 %v1359_v61  ;;  %v1364_v61 = vld [vmem:[%s2446_s0 + $0x90] sm:$0xff]  }
  0x27   :  { %v836_v18 = vsel %vm572_vm8, %v440_v4, %v704_v12  ;;  %vm573_vm9 = vcmp.ge.f32.partialorder %v441_v13, 0.0  ;;  %v705_v19 = vmul.f32 0.1, %v441_v13  ;;  %v1141_v20 = vunpack.c.l.bf16 %v1360_v10 }
  0x28   :  { %969 = vst.msk [vmem:[%s2449_s3 + $0xb0] sm:$0xff] %vm946_vm0, %v836_v18  ;;  %vm574_vm10 = vcmp.ge.f32.partialorder %v442_v14, 0.0  ;;  %v706_v21 = vmul.f32 0.1, %v442_v14  ;;  %v443_v22 = vadd.f32 %v1447_v3, %v307_v15  ;;  %v444_v23 = vadd.f32 %v1447_v3, %v308_v16  ;;  %v1367_v18 = vld [vmem:[%s2446_s0 + $0xa8] sm:$0xff]  }
  0x29   :  { %v837_v24 = vsel %vm573_vm9, %v441_v13, %v705_v19  ;;  %v309_v25 = vmul.f32 %v1442_v1, %v1138_v17  ;;  %v310_v26 = vmul.f32 %v1442_v1, %v1141_v20  ;;  %v1142_v27 = vunpack.c.h.bf16 %v1360_v10  ;;  %v1366_v13 = vld [vmem:[%s2446_s0 + $0xa0] sm:$0xff]  }
  0x2a   :  { %970 = vst.msk [vmem:[%s2449_s3 + $0xb8] sm:$0xff] %vm946_vm0, %v837_v24  ;;  %v838_v30 = vsel %vm574_vm10, %v442_v14, %v706_v21  ;;  %vm575_vm11 = vcmp.ge.f32.partialorder %v443_v22, 0.0  ;;  %v707_v31 = vmul.f32 0.1, %v443_v22  ;;  %vm576_vm12 = vcmp.ge.f32.partialorder %v444_v23, 0.0 }
  0x2b   :  { %971 = vst.msk [vmem:[%s2449_s3 + $0xc0] sm:$0xff] %vm946_vm0, %v838_v30  ;;  %v708_v32 = vmul.f32 0.1, %v444_v23  ;;  %v445_v33 = vadd.f32 %v1447_v3, %v309_v25  ;;  %v446_v34 = vadd.f32 %v1447_v3, %v310_v26  ;;  %v311_v35 = vmul.f32 %v1442_v1, %v1142_v27 }
  0x2c   :  { %v839_v36 = vsel %vm575_vm11, %v443_v22, %v707_v31  ;;  %v1145_v37 = vunpack.c.l.bf16 %v1361_v28  ;;  %v1146_v38 = vunpack.c.h.bf16 %v1361_v28  ;;  %v1149_v39 = vunpack.c.l.bf16 %v1362_v29 }
  0x2d   :  { %972 = vst.msk [vmem:[%s2449_s3 + $0xc8] sm:$0xff] %vm946_vm0, %v839_v36  ;;  %v840_v41 = vsel %vm576_vm12, %v444_v23, %v708_v32  ;;  %vm577_vm13 = vcmp.ge.f32.partialorder %v445_v33, 0.0  ;;  %v709_v42 = vmul.f32 0.1, %v445_v33  ;;  %vm578_vm14 = vcmp.ge.f32.partialorder %v446_v34, 0.0 }
  0x2e   :  { %973 = vst.msk [vmem:[%s2449_s3 + $0xd0] sm:$0xff] %vm946_vm0, %v840_v41  ;;  %v710_v43 = vmul.f32 0.1, %v446_v34  ;;  %v447_v44 = vadd.f32 %v1447_v3, %v311_v35  ;;  %v312_v45 = vmul.f32 %v1442_v1, %v1145_v37  ;;  %v313_v46 = vmul.f32 %v1442_v1, %v1146_v38 }
  0x2f   :  { %v841_v47 = vsel %vm577_vm13, %v445_v33, %v709_v42  ;;  %v314_v48 = vmul.f32 %v1442_v1, %v1149_v39  ;;  %v1150_v49 = vunpack.c.h.bf16 %v1362_v29  ;;  %v1153_v50 = vunpack.c.l.bf16 %v1363_v40 }
  0x30   :  { %974 = vst.msk [vmem:[%s2449_s3 + $0xd8] sm:$0xff] %vm946_vm0, %v841_v47  ;;  %v842_v51 = vsel %vm578_vm14, %v446_v34, %v710_v43  ;;  %vm579_vm15 = vcmp.ge.f32.partialorder %v447_v44, 0.0  ;;  %v711_v52 = vmul.f32 0.1, %v447_v44  ;;  %v448_v53 = vadd.f32 %v1447_v3, %v312_v45 }
  0x31   :  { %975 = vst.msk [vmem:[%s2449_s3 + $0xe0] sm:$0xff] %vm946_vm0, %v842_v51  ;;  %v449_v54 = vadd.f32 %v1447_v3, %v313_v46  ;;  %v450_v55 = vadd.f32 %v1447_v3, %v314_v48  ;;  %v315_v56 = vmul.f32 %v1442_v1, %v1150_v49  ;;  %v316_v57 = vmul.f32 %v1442_v1, %v1153_v50  ;;  %v1368_v46 = vld [vmem:[%s2446_s0 + $0xb0] sm:$0xff]   ;;  %v1369_v50 = vld [vmem:[%s2446_s0 + $0xb8] sm:$0xff]  }
  0x32   :  { %v843_v58 = vsel %vm579_vm15, %v447_v44, %v711_v52  ;;  %vm580_vm1 = vcmp.ge.f32.partialorder %v448_v53, 0.0  ;;  %v712_v59 = vmul.f32 0.1, %v448_v53  ;;  %v1154_v60 = vunpack.c.h.bf16 %v1363_v40 }
  0x33   :  { %976 = vst.msk [vmem:[%s2449_s3 + $0xe8] sm:$0xff] %vm946_vm0, %v843_v58  ;;  %vm581_vm2 = vcmp.ge.f32.partialorder %v449_v54, 0.0  ;;  %v713_v62 = vmul.f32 0.1, %v449_v54  ;;  %vm582_vm3 = vcmp.ge.f32.partialorder %v450_v55, 0.0  ;;  %v451_v63 = vadd.f32 %v1447_v3, %v315_v56 }
  0x34   :  { %v844_v0 = vsel %vm580_vm1, %v448_v53, %v712_v59  ;;  %v714_v2 = vmul.f32 0.1, %v450_v55  ;;  %v452_v4 = vadd.f32 %v1447_v3, %v316_v57  ;;  %v317_v5 = vmul.f32 %v1442_v1, %v1154_v60  ;;  %v1370_v53 = vld [vmem:[%s2446_s0 + $0xc0] sm:$0xff]  }
  0x35   :  { %977 = vst.msk [vmem:[%s2449_s3 + $0xf0] sm:$0xff] %vm946_vm0, %v844_v0  ;;  %v845_v7 = vsel %vm581_vm2, %v449_v54, %v713_v62  ;;  %vm583_vm4 = vcmp.ge.f32.partialorder %v451_v63, 0.0  ;;  %v715_v8 = vmul.f32 0.1, %v451_v63  ;;  %v1157_v9 = vunpack.c.l.bf16 %v1364_v61 }
  0x36   :  { %978 = vst.msk [vmem:[%s2449_s3 + $0xf8] sm:$0xff] %vm946_vm0, %v845_v7  ;;  %v846_v10 = vsel %vm582_vm3, %v450_v55, %v714_v2  ;;  %vm584_vm5 = vcmp.ge.f32.partialorder %v452_v4, 0.0  ;;  %v716_v11 = vmul.f32 0.1, %v452_v4  ;;  %v453_v12 = vadd.f32 %v1447_v3, %v317_v5 }
  0x37   :  { %979 = vst.msk [vmem:[%s2449_s3 + $0x100] sm:$0xff] %vm946_vm0, %v846_v10  ;;  %v847_v14 = vsel %vm583_vm4, %v451_v63, %v715_v8  ;;  %v318_v15 = vmul.f32 %v1442_v1, %v1157_v9  ;;  %v1158_v16 = vunpack.c.h.bf16 %v1364_v61  ;;  %v1161_v17 = vunpack.c.l.bf16 %v1365_v6 }
  0x38   :  { %980 = vst.msk [vmem:[%s2449_s3 + $0x108] sm:$0xff] %vm946_vm0, %v847_v14  ;;  %v848_v19 = vsel %vm584_vm5, %v452_v4, %v716_v11  ;;  %vm585_vm6 = vcmp.ge.f32.partialorder %v453_v12, 0.0  ;;  %v717_v20 = vmul.f32 0.1, %v453_v12  ;;  %v1162_v21 = vunpack.c.h.bf16 %v1365_v6  ;;  %v1371_v4 = vld [vmem:[%s2446_s0 + $0xc8] sm:$0xff]  }
  0x39   :  { %981 = vst.msk [vmem:[%s2449_s3 + $0x110] sm:$0xff] %vm946_vm0, %v848_v19  ;;  %v454_v22 = vadd.f32 %v1447_v3, %v318_v15  ;;  %v319_v23 = vmul.f32 %v1442_v1, %v1158_v16  ;;  %v320_v24 = vmul.f32 %v1442_v1, %v1161_v17  ;;  %v1165_v25 = vunpack.c.l.bf16 %v1366_v13 }
  0x3a   :  { %v849_v26 = vsel %vm585_vm6, %v453_v12, %v717_v20  ;;  %v321_v27 = vmul.f32 %v1442_v1, %v1162_v21  ;;  %v1166_v28 = vunpack.c.h.bf16 %v1366_v13  ;;  %v1169_v29 = vunpack.c.l.bf16 %v1367_v18 }
  0x3b   :  { %982 = vst.msk [vmem:[%s2449_s3 + $0x118] sm:$0xff] %vm946_vm0, %v849_v26  ;;  %vm586_vm7 = vcmp.ge.f32.partialorder %v454_v22, 0.0  ;;  %v718_v30 = vmul.f32 0.1, %v454_v22  ;;  %v455_v31 = vadd.f32 %v1447_v3, %v319_v23  ;;  %v456_v32 = vadd.f32 %v1447_v3, %v320_v24  ;;  %v1373_v24 = vld [vmem:[%s2446_s0 + $0xd8] sm:$0xff]  }
  0x3c   :  { %v457_v33 = vadd.f32 %v1447_v3, %v321_v27  ;;  %v322_v34 = vmul.f32 %v1442_v1, %v1165_v25  ;;  %v323_v35 = vmul.f32 %v1442_v1, %v1166_v28  ;;  %v324_v36 = vmul.f32 %v1442_v1, %v1169_v29  ;;  %v1374_v29 = vld [vmem:[%s2446_s0 + $0xe0] sm:$0xff]  }
  0x3d   :  { %v850_v37 = vsel %vm586_vm7, %v454_v22, %v718_v30  ;;  %vm587_vm8 = vcmp.ge.f32.partialorder %v455_v31, 0.0  ;;  %v719_v38 = vmul.f32 0.1, %v455_v31  ;;  %vm588_vm9 = vcmp.ge.f32.partialorder %v456_v32, 0.0 }
  0x3e   :  { %983 = vst.msk [vmem:[%s2449_s3 + $0x120] sm:$0xff] %vm946_vm0, %v850_v37  ;;  %v720_v39 = vmul.f32 0.1, %v456_v32  ;;  %vm589_vm10 = vcmp.ge.f32.partialorder %v457_v33, 0.0  ;;  %v721_v40 = vmul.f32 0.1, %v457_v33  ;;  %v458_v41 = vadd.f32 %v1447_v3, %v322_v34 }
  0x3f   :  { %v851_v42 = vsel %vm587_vm8, %v455_v31, %v719_v38  ;;  %v459_v43 = vadd.f32 %v1447_v3, %v323_v35  ;;  %v460_v44 = vadd.f32 %v1447_v3, %v324_v36  ;;  %v1170_v45 = vunpack.c.h.bf16 %v1367_v18  ;;  %v1372_v18 = vld [vmem:[%s2446_s0 + $0xd0] sm:$0xff]  }
  0x40   :  { %984 = vst.msk [vmem:[%s2449_s3 + $0x128] sm:$0xff] %vm946_vm0, %v851_v42  ;;  %v852_v47 = vsel %vm588_vm9, %v456_v32, %v720_v39  ;;  %v853_v48 = vsel %vm589_vm10, %v457_v33, %v721_v40  ;;  %vm590_vm11 = vcmp.ge.f32.partialorder %v458_v41, 0.0  ;;  %v722_v49 = vmul.f32 0.1, %v458_v41 }
  0x41   :  { %985 = vst.msk [vmem:[%s2449_s3 + $0x130] sm:$0xff] %vm946_vm0, %v852_v47  ;;  %vm591_vm12 = vcmp.ge.f32.partialorder %v459_v43, 0.0  ;;  %v723_v51 = vmul.f32 0.1, %v459_v43  ;;  %vm592_vm13 = vcmp.ge.f32.partialorder %v460_v44, 0.0  ;;  %v325_v52 = vmul.f32 %v1442_v1, %v1170_v45 }
  0x42   :  { %986 = vst.msk [vmem:[%s2449_s3 + $0x138] sm:$0xff] %vm946_vm0, %v853_v48  ;;  %v854_v54 = vsel %vm590_vm11, %v458_v41, %v722_v49  ;;  %v724_v55 = vmul.f32 0.1, %v460_v44  ;;  %v1173_v56 = vunpack.c.l.bf16 %v1368_v46  ;;  %v1174_v57 = vunpack.c.h.bf16 %v1368_v46 }
  0x43   :  { %987 = vst.msk [vmem:[%s2449_s3 + $0x140] sm:$0xff] %vm946_vm0, %v854_v54  ;;  %v855_v58 = vsel %vm591_vm12, %v459_v43, %v723_v51  ;;  %v461_v59 = vadd.f32 %v1447_v3, %v325_v52  ;;  %v1177_v60 = vunpack.c.l.bf16 %v1369_v50  ;;  %v1178_v61 = vunpack.c.h.bf16 %v1369_v50 }
  0x44   :  { %988 = vst.msk [vmem:[%s2449_s3 + $0x148] sm:$0xff] %vm946_vm0, %v855_v58  ;;  %v856_v62 = vsel %vm592_vm13, %v460_v44, %v724_v55  ;;  %v326_v63 = vmul.f32 %v1442_v1, %v1173_v56  ;;  %v327_v0 = vmul.f32 %v1442_v1, %v1174_v57  ;;  %v1181_v2 = vunpack.c.l.bf16 %v1370_v53 }
  0x45   :  { %989 = vst.msk [vmem:[%s2449_s3 + $0x150] sm:$0xff] %vm946_vm0, %v856_v62  ;;  %vm593_vm14 = vcmp.ge.f32.partialorder %v461_v59, 0.0  ;;  %v725_v5 = vmul.f32 0.1, %v461_v59  ;;  %v328_v6 = vmul.f32 %v1442_v1, %v1177_v60  ;;  %v329_v7 = vmul.f32 %v1442_v1, %v1178_v61  ;;  %v1375_v61 = vld [vmem:[%s2446_s0 + $0xe8] sm:$0xff]  }
  0x46   :  { %v462_v8 = vadd.f32 %v1447_v3, %v326_v63  ;;  %v463_v9 = vadd.f32 %v1447_v3, %v327_v0  ;;  %v330_v10 = vmul.f32 %v1442_v1, %v1181_v2  ;;  %v1182_v11 = vunpack.c.h.bf16 %v1370_v53  ;;  %v1376_v2 = vld [vmem:[%s2446_s0 + $0xf0] sm:$0xff]  }
  0x47   :  { %v857_v12 = vsel %vm593_vm14, %v461_v59, %v725_v5  ;;  %v464_v13 = vadd.f32 %v1447_v3, %v328_v6  ;;  %v465_v14 = vadd.f32 %v1447_v3, %v329_v7  ;;  %v1185_v15 = vunpack.c.l.bf16 %v1371_v4  ;;  %v1377_v6 = vld [vmem:[%s2446_s0 + $0xf8] sm:$0xff]  }
  0x48   :  { %990 = vst.msk [vmem:[%s2449_s3 + $0x158] sm:$0xff] %vm946_vm0, %v857_v12  ;;  %vm594_vm15 = vcmp.ge.f32.partialorder %v462_v8, 0.0  ;;  %v726_v16 = vmul.f32 0.1, %v462_v8  ;;  %vm595_vm1 = vcmp.ge.f32.partialorder %v463_v9, 0.0  ;;  %v466_v17 = vadd.f32 %v1447_v3, %v330_v10 }
  0x49   :  { %v727_v19 = vmul.f32 0.1, %v463_v9  ;;  %vm596_vm2 = vcmp.ge.f32.partialorder %v464_v13, 0.0  ;;  %v728_v20 = vmul.f32 0.1, %v464_v13  ;;  %vm597_vm3 = vcmp.ge.f32.partialorder %v465_v14, 0.0 }
  0x4a   :  { %v858_v21 = vsel %vm594_vm15, %v462_v8, %v726_v16  ;;  %v729_v22 = vmul.f32 0.1, %v465_v14  ;;  %vm598_vm4 = vcmp.ge.f32.partialorder %v466_v17, 0.0  ;;  %v730_v23 = vmul.f32 0.1, %v466_v17 }
  0x4b   :  { %991 = vst.msk [vmem:[%s2449_s3 + $0x160] sm:$0xff] %vm946_vm0, %v858_v21  ;;  %v859_v25 = vsel %vm595_vm1, %v463_v9, %v727_v19  ;;  %v860_v26 = vsel %vm596_vm2, %v464_v13, %v728_v20  ;;  %v331_v27 = vmul.f32 %v1442_v1, %v1182_v11  ;;  %v332_v28 = vmul.f32 %v1442_v1, %v1185_v15  ;;  %v1378_v19 = vld [vmem:[%s2446_s0 + $0x100] sm:$0xff]  }
  0x4c   :  { %992 = vst.msk [vmem:[%s2449_s3 + $0x168] sm:$0xff] %vm946_vm0, %v859_v25  ;;  %v861_v30 = vsel %vm597_vm3, %v465_v14, %v729_v22  ;;  %v862_v31 = vsel %vm598_vm4, %v466_v17, %v730_v23  ;;  %v1186_v32 = vunpack.c.h.bf16 %v1371_v4  ;;  %v1189_v33 = vunpack.c.l.bf16 %v1372_v18 }
  0x4d   :  { %993 = vst.msk [vmem:[%s2449_s3 + $0x170] sm:$0xff] %vm946_vm0, %v860_v26  ;;  %v467_v34 = vadd.f32 %v1447_v3, %v331_v27  ;;  %v468_v35 = vadd.f32 %v1447_v3, %v332_v28  ;;  %v1190_v36 = vunpack.c.h.bf16 %v1372_v18  ;;  %v1193_v37 = vunpack.c.l.bf16 %v1373_v24 }
  0x4e   :  { %994 = vst.msk [vmem:[%s2449_s3 + $0x178] sm:$0xff] %vm946_vm0, %v861_v30  ;;  %v333_v38 = vmul.f32 %v1442_v1, %v1186_v32  ;;  %v334_v39 = vmul.f32 %v1442_v1, %v1189_v33  ;;  %v1194_v40 = vunpack.c.h.bf16 %v1373_v24  ;;  %v1197_v41 = vunpack.c.l.bf16 %v1374_v29  ;;  %v1379_v33 = vld [vmem:[%s2446_s0 + $0x108] sm:$0xff]  }
  0x4f   :  { %995 = vst.msk [vmem:[%s2449_s3 + $0x180] sm:$0xff] %vm946_vm0, %v862_v31  ;;  %vm599_vm5 = vcmp.ge.f32.partialorder %v467_v34, 0.0  ;;  %v731_v42 = vmul.f32 0.1, %v467_v34  ;;  %vm600_vm6 = vcmp.ge.f32.partialorder %v468_v35, 0.0  ;;  %v335_v43 = vmul.f32 %v1442_v1, %v1190_v36 }
  0x50   :  { %v732_v44 = vmul.f32 0.1, %v468_v35  ;;  %v469_v45 = vadd.f32 %v1447_v3, %v333_v38  ;;  %v470_v46 = vadd.f32 %v1447_v3, %v334_v39  ;;  %v336_v47 = vmul.f32 %v1442_v1, %v1193_v37  ;;  %v1380_v39 = vld [vmem:[%s2446_s0 + $0x110] sm:$0xff]  }
  0x51   :  { %v863_v48 = vsel %vm599_vm5, %v467_v34, %v731_v42  ;;  %v471_v49 = vadd.f32 %v1447_v3, %v335_v43  ;;  %v337_v50 = vmul.f32 %v1442_v1, %v1194_v40  ;;  %v338_v51 = vmul.f32 %v1442_v1, %v1197_v41 }
  0x52   :  { %996 = vst.msk [vmem:[%s2449_s3 + $0x188] sm:$0xff] %vm946_vm0, %v863_v48  ;;  %v864_v52 = vsel %vm600_vm6, %v468_v35, %v732_v44  ;;  %vm601_vm7 = vcmp.ge.f32.partialorder %v469_v45, 0.0  ;;  %v733_v53 = vmul.f32 0.1, %v469_v45  ;;  %vm602_vm8 = vcmp.ge.f32.partialorder %v470_v46, 0.0  ;;  %v1381_v44 = vld [vmem:[%s2446_s0 + $0x118] sm:$0xff]  }
  0x53   :  { %997 = vst.msk [vmem:[%s2449_s3 + $0x190] sm:$0xff] %vm946_vm0, %v864_v52  ;;  %v734_v54 = vmul.f32 0.1, %v470_v46  ;;  %vm603_vm9 = vcmp.ge.f32.partialorder %v471_v49, 0.0  ;;  %v735_v55 = vmul.f32 0.1, %v471_v49  ;;  %v472_v56 = vadd.f32 %v1447_v3, %v336_v47 }
  0x54   :  { %v865_v57 = vsel %vm601_vm7, %v469_v45, %v733_v53  ;;  %v473_v58 = vadd.f32 %v1447_v3, %v337_v50  ;;  %v474_v59 = vadd.f32 %v1447_v3, %v338_v51  ;;  %v1198_v60 = vunpack.c.h.bf16 %v1374_v29 }
  0x55   :  { %998 = vst.msk [vmem:[%s2449_s3 + $0x198] sm:$0xff] %vm946_vm0, %v865_v57  ;;  %v866_v62 = vsel %vm602_vm8, %v470_v46, %v734_v54  ;;  %v867_v63 = vsel %vm603_vm9, %v471_v49, %v735_v55  ;;  %vm604_vm10 = vcmp.ge.f32.partialorder %v472_v56, 0.0  ;;  %v736_v0 = vmul.f32 0.1, %v472_v56 }
  0x56   :  { %999 = vst.msk [vmem:[%s2449_s3 + $0x1a0] sm:$0xff] %vm946_vm0, %v866_v62  ;;  %vm605_vm11 = vcmp.ge.f32.partialorder %v473_v58, 0.0  ;;  %v737_v4 = vmul.f32 0.1, %v473_v58  ;;  %vm606_vm12 = vcmp.ge.f32.partialorder %v474_v59, 0.0  ;;  %v339_v5 = vmul.f32 %v1442_v1, %v1198_v60 }
  0x57   :  { %1000 = vst.msk [vmem:[%s2449_s3 + $0x1a8] sm:$0xff] %vm946_vm0, %v867_v63  ;;  %v868_v7 = vsel %vm604_vm10, %v472_v56, %v736_v0  ;;  %v738_v8 = vmul.f32 0.1, %v474_v59  ;;  %v1201_v9 = vunpack.c.l.bf16 %v1375_v61  ;;  %v1202_v10 = vunpack.c.h.bf16 %v1375_v61 }
  0x58   :  { %1001 = vst.msk [vmem:[%s2449_s3 + $0x1b0] sm:$0xff] %vm946_vm0, %v868_v7  ;;  %v869_v11 = vsel %vm605_vm11, %v473_v58, %v737_v4  ;;  %v475_v12 = vadd.f32 %v1447_v3, %v339_v5  ;;  %v1205_v13 = vunpack.c.l.bf16 %v1376_v2  ;;  %v1206_v14 = vunpack.c.h.bf16 %v1376_v2 }
  0x59   :  { %1002 = vst.msk [vmem:[%s2449_s3 + $0x1b8] sm:$0xff] %vm946_vm0, %v869_v11  ;;  %v870_v15 = vsel %vm606_vm12, %v474_v59, %v738_v8  ;;  %v340_v16 = vmul.f32 %v1442_v1, %v1201_v9  ;;  %v341_v17 = vmul.f32 %v1442_v1, %v1202_v10  ;;  %v1209_v18 = vunpack.c.l.bf16 %v1377_v6 }
  0x5a   :  { %1003 = vst.msk [vmem:[%s2449_s3 + $0x1c0] sm:$0xff] %vm946_vm0, %v870_v15  ;;  %vm607_vm13 = vcmp.ge.f32.partialorder %v475_v12, 0.0  ;;  %v739_v20 = vmul.f32 0.1, %v475_v12  ;;  %v342_v21 = vmul.f32 %v1442_v1, %v1205_v13  ;;  %v343_v22 = vmul.f32 %v1442_v1, %v1206_v14  ;;  %v1382_v13 = vld [vmem:[%s2446_s0 + $0x120] sm:$0xff]  }
  0x5b   :  { %v476_v23 = vadd.f32 %v1447_v3, %v340_v16  ;;  %v477_v24 = vadd.f32 %v1447_v3, %v341_v17  ;;  %v344_v25 = vmul.f32 %v1442_v1, %v1209_v18  ;;  %v1210_v26 = vunpack.c.h.bf16 %v1377_v6  ;;  %v1383_v17 = vld [vmem:[%s2446_s0 + $0x128] sm:$0xff]  }
  0x5c   :  { %v871_v27 = vsel %vm607_vm13, %v475_v12, %v739_v20  ;;  %v478_v28 = vadd.f32 %v1447_v3, %v342_v21  ;;  %v479_v29 = vadd.f32 %v1447_v3, %v343_v22  ;;  %v1213_v30 = vunpack.c.l.bf16 %v1378_v19  ;;  %v1384_v21 = vld [vmem:[%s2446_s0 + $0x130] sm:$0xff]  }
  0x5d   :  { %1004 = vst.msk [vmem:[%s2449_s3 + $0x1c8] sm:$0xff] %vm946_vm0, %v871_v27  ;;  %vm608_vm14 = vcmp.ge.f32.partialorder %v476_v23, 0.0  ;;  %v740_v31 = vmul.f32 0.1, %v476_v23  ;;  %vm609_vm15 = vcmp.ge.f32.partialorder %v477_v24, 0.0  ;;  %v480_v32 = vadd.f32 %v1447_v3, %v344_v25 }
  0x5e   :  { %v741_v34 = vmul.f32 0.1, %v477_v24  ;;  %vm610_vm1 = vcmp.ge.f32.partialorder %v478_v28, 0.0  ;;  %v742_v35 = vmul.f32 0.1, %v478_v28  ;;  %vm611_vm2 = vcmp.ge.f32.partialorder %v479_v29, 0.0 }
  0x5f   :  { %v872_v36 = vsel %vm608_vm14, %v476_v23, %v740_v31  ;;  %v743_v37 = vmul.f32 0.1, %v479_v29  ;;  %vm612_vm3 = vcmp.ge.f32.partialorder %v480_v32, 0.0  ;;  %v744_v38 = vmul.f32 0.1, %v480_v32 }
  0x60   :  { %1005 = vst.msk [vmem:[%s2449_s3 + $0x1d0] sm:$0xff] %vm946_vm0, %v872_v36  ;;  %v873_v40 = vsel %vm609_vm15, %v477_v24, %v741_v34  ;;  %v874_v41 = vsel %vm610_vm1, %v478_v28, %v742_v35  ;;  %v345_v42 = vmul.f32 %v1442_v1, %v1210_v26  ;;  %v346_v43 = vmul.f32 %v1442_v1, %v1213_v30  ;;  %v1385_v34 = vld [vmem:[%s2446_s0 + $0x138] sm:$0xff]  }
  0x61   :  { %1006 = vst.msk [vmem:[%s2449_s3 + $0x1d8] sm:$0xff] %vm946_vm0, %v873_v40  ;;  %v875_v45 = vsel %vm611_vm2, %v479_v29, %v743_v37  ;;  %v876_v46 = vsel %vm612_vm3, %v480_v32, %v744_v38  ;;  %v1214_v47 = vunpack.c.h.bf16 %v1378_v19  ;;  %v1217_v48 = vunpack.c.l.bf16 %v1379_v33  ;;  %v1978_v19 = vld [vmem:[%s2447_s1] ss:$0 sm:$0xff] }
  0x62   :  { %1007 = vst.msk [vmem:[%s2449_s3 + $0x1e0] sm:$0xff] %vm946_vm0, %v874_v41  ;;  %v481_v49 = vadd.f32 %v1447_v3, %v345_v42  ;;  %v482_v50 = vadd.f32 %v1447_v3, %v346_v43  ;;  %v1218_v51 = vunpack.c.h.bf16 %v1379_v33  ;;  %v1221_v52 = vunpack.c.l.bf16 %v1380_v39 }
  0x63   :  { %1008 = vst.msk [vmem:[%s2449_s3 + $0x1e8] sm:$0xff] %vm946_vm0, %v875_v45  ;;  %v347_v53 = vmul.f32 %v1442_v1, %v1214_v47  ;;  %v348_v54 = vmul.f32 %v1442_v1, %v1217_v48  ;;  %v1222_v55 = vunpack.c.h.bf16 %v1380_v39  ;;  %v1225_v56 = vunpack.c.l.bf16 %v1381_v44  ;;  %v1386_v48 = vld [vmem:[%s2446_s0 + $0x140] sm:$0xff]  }
  0x64   :  { %1009 = vst.msk [vmem:[%s2449_s3 + $0x1f0] sm:$0xff] %vm946_vm0, %v876_v46  ;;  %vm613_vm4 = vcmp.ge.f32.partialorder %v481_v49, 0.0  ;;  %v745_v57 = vmul.f32 0.1, %v481_v49  ;;  %vm614_vm5 = vcmp.ge.f32.partialorder %v482_v50, 0.0  ;;  %v349_v58 = vmul.f32 %v1442_v1, %v1218_v51 }
  0x65   :  { %v746_v59 = vmul.f32 0.1, %v482_v50  ;;  %v483_v60 = vadd.f32 %v1447_v3, %v347_v53  ;;  %v484_v61 = vadd.f32 %v1447_v3, %v348_v54  ;;  %v350_v62 = vmul.f32 %v1442_v1, %v1221_v52  ;;  %v1387_v54 = vld [vmem:[%s2446_s0 + $0x148] sm:$0xff]  }
  0x66   :  { %v877_v63 = vsel %vm613_vm4, %v481_v49, %v745_v57  ;;  %v485_v0 = vadd.f32 %v1447_v3, %v349_v58  ;;  %v351_v2 = vmul.f32 %v1442_v1, %v1222_v55  ;;  %v352_v4 = vmul.f32 %v1442_v1, %v1225_v56  ;;  %v1956_v1 = vld [vmem:[%s2448_s2] ss:$0 sm:$0xff] }
  0x67   :  { %1010 = vst.msk [vmem:[%s2449_s3 + $0x1f8] sm:$0xff] %vm946_vm0, %v877_v63  ;;  %v878_v5 = vsel %vm614_vm5, %v482_v50, %v746_v59  ;;  %vm615_vm6 = vcmp.ge.f32.partialorder %v483_v60, 0.0  ;;  %v747_v6 = vmul.f32 0.1, %v483_v60  ;;  %vm616_vm7 = vcmp.ge.f32.partialorder %v484_v61, 0.0  ;;  %v1388_v59 = vld [vmem:[%s2446_s0 + $0x150] sm:$0xff]  }
  0x68   :  { %1011 = vst.msk [vmem:[%s2449_s3 + $0x200] sm:$0xff] %vm946_vm0, %v878_v5  ;;  %v748_v7 = vmul.f32 0.1, %v484_v61  ;;  %vm617_vm8 = vcmp.ge.f32.partialorder %v485_v0, 0.0  ;;  %v749_v3 = vmul.f32 0.1, %v485_v0  ;;  %v486_v8 = vadd.f32 %v1956_v1, %v350_v62 }
  0x69   :  { %v879_v9 = vsel %vm615_vm6, %v483_v60, %v747_v6  ;;  %v487_v10 = vadd.f32 %v1956_v1, %v351_v2  ;;  %v488_v11 = vadd.f32 %v1956_v1, %v352_v4  ;;  %v1226_v12 = vunpack.c.h.bf16 %v1381_v44 }
  0x6a   :  { %1012 = vst.msk [vmem:[%s2449_s3 + $0x208] sm:$0xff] %vm946_vm0, %v879_v9  ;;  %v880_v14 = vsel %vm616_vm7, %v484_v61, %v748_v7  ;;  %v881_v15 = vsel %vm617_vm8, %v485_v0, %v749_v3  ;;  %vm618_vm9 = vcmp.ge.f32.partialorder %v486_v8, 0.0  ;;  %v750_v16 = vmul.f32 0.1, %v486_v8 }
  0x6b   :  { %1013 = vst.msk [vmem:[%s2449_s3 + $0x210] sm:$0xff] %vm946_vm0, %v880_v14  ;;  %vm619_vm10 = vcmp.ge.f32.partialorder %v487_v10, 0.0  ;;  %v751_v18 = vmul.f32 0.1, %v487_v10  ;;  %vm620_vm11 = vcmp.ge.f32.partialorder %v488_v11, 0.0  ;;  %v353_v20 = vmul.f32 %v1978_v19, %v1226_v12 }
  0x6c   :  { %1014 = vst.msk [vmem:[%s2449_s3 + $0x218] sm:$0xff] %vm946_vm0, %v881_v15  ;;  %v882_v22 = vsel %vm618_vm9, %v486_v8, %v750_v16  ;;  %v752_v23 = vmul.f32 0.1, %v488_v11  ;;  %v1229_v24 = vunpack.c.l.bf16 %v1382_v13  ;;  %v1230_v25 = vunpack.c.h.bf16 %v1382_v13 }
  0x6d   :  { %1015 = vst.msk [vmem:[%s2449_s3 + $0x220] sm:$0xff] %vm946_vm0, %v882_v22  ;;  %v883_v26 = vsel %vm619_vm10, %v487_v10, %v751_v18  ;;  %v489_v27 = vadd.f32 %v1956_v1, %v353_v20  ;;  %v1233_v28 = vunpack.c.l.bf16 %v1383_v17  ;;  %v1234_v29 = vunpack.c.h.bf16 %v1383_v17 }
  0x6e   :  { %1016 = vst.msk [vmem:[%s2449_s3 + $0x228] sm:$0xff] %vm946_vm0, %v883_v26  ;;  %v884_v30 = vsel %vm620_vm11, %v488_v11, %v752_v23  ;;  %v354_v31 = vmul.f32 %v1978_v19, %v1229_v24  ;;  %v355_v32 = vmul.f32 %v1978_v19, %v1230_v25  ;;  %v1237_v33 = vunpack.c.l.bf16 %v1384_v21 }
  0x6f   :  { %1017 = vst.msk [vmem:[%s2449_s3 + $0x230] sm:$0xff] %vm946_vm0, %v884_v30  ;;  %vm621_vm12 = vcmp.ge.f32.partialorder %v489_v27, 0.0  ;;  %v753_v35 = vmul.f32 0.1, %v489_v27  ;;  %v356_v36 = vmul.f32 %v1978_v19, %v1233_v28  ;;  %v357_v37 = vmul.f32 %v1978_v19, %v1234_v29  ;;  %v1389_v29 = vld [vmem:[%s2446_s0 + $0x158] sm:$0xff]  }
  0x70   :  { %v490_v38 = vadd.f32 %v1956_v1, %v354_v31  ;;  %v491_v39 = vadd.f32 %v1956_v1, %v355_v32  ;;  %v358_v40 = vmul.f32 %v1978_v19, %v1237_v33  ;;  %v1238_v41 = vunpack.c.h.bf16 %v1384_v21  ;;  %v1390_v33 = vld [vmem:[%s2446_s0 + $0x160] sm:$0xff]  }
  0x71   :  { %v885_v42 = vsel %vm621_vm12, %v489_v27, %v753_v35  ;;  %v492_v43 = vadd.f32 %v1956_v1, %v356_v36  ;;  %v493_v44 = vadd.f32 %v1956_v1, %v357_v37  ;;  %v1241_v45 = vunpack.c.l.bf16 %v1385_v34  ;;  %v1391_v36 = vld [vmem:[%s2446_s0 + $0x168] sm:$0xff]  }
  0x72   :  { %1018 = vst.msk [vmem:[%s2449_s3 + $0x238] sm:$0xff] %vm946_vm0, %v885_v42  ;;  %vm622_vm13 = vcmp.ge.f32.partialorder %v490_v38, 0.0  ;;  %v754_v46 = vmul.f32 0.1, %v490_v38  ;;  %vm623_vm14 = vcmp.ge.f32.partialorder %v491_v39, 0.0  ;;  %v494_v47 = vadd.f32 %v1956_v1, %v358_v40 }
  0x73   :  { %v755_v49 = vmul.f32 0.1, %v491_v39  ;;  %vm624_vm15 = vcmp.ge.f32.partialorder %v492_v43, 0.0  ;;  %v756_v50 = vmul.f32 0.1, %v492_v43  ;;  %vm625_vm1 = vcmp.ge.f32.partialorder %v493_v44, 0.0 }
  0x74   :  { %v886_v51 = vsel %vm622_vm13, %v490_v38, %v754_v46  ;;  %v757_v52 = vmul.f32 0.1, %v493_v44  ;;  %vm626_vm2 = vcmp.ge.f32.partialorder %v494_v47, 0.0  ;;  %v758_v53 = vmul.f32 0.1, %v494_v47 }
  0x75   :  { %1019 = vst.msk [vmem:[%s2449_s3 + $0x240] sm:$0xff] %vm946_vm0, %v886_v51  ;;  %v887_v55 = vsel %vm623_vm14, %v491_v39, %v755_v49  ;;  %v888_v56 = vsel %vm624_vm15, %v492_v43, %v756_v50  ;;  %v359_v57 = vmul.f32 %v1978_v19, %v1238_v41  ;;  %v360_v58 = vmul.f32 %v1978_v19, %v1241_v45  ;;  %v1392_v49 = vld [vmem:[%s2446_s0 + $0x170] sm:$0xff]  }
  0x76   :  { %1020 = vst.msk [vmem:[%s2449_s3 + $0x248] sm:$0xff] %vm946_vm0, %v887_v55  ;;  %v889_v60 = vsel %vm625_vm1, %v493_v44, %v757_v52  ;;  %v890_v61 = vsel %vm626_vm2, %v494_v47, %v758_v53  ;;  %v1242_v62 = vunpack.c.h.bf16 %v1385_v34  ;;  %v1245_v63 = vunpack.c.l.bf16 %v1386_v48 }
  0x77   :  { %1021 = vst.msk [vmem:[%s2449_s3 + $0x250] sm:$0xff] %vm946_vm0, %v888_v56  ;;  %v495_v0 = vadd.f32 %v1956_v1, %v359_v57  ;;  %v496_v2 = vadd.f32 %v1956_v1, %v360_v58  ;;  %v1246_v4 = vunpack.c.h.bf16 %v1386_v48  ;;  %v1249_v5 = vunpack.c.l.bf16 %v1387_v54 }
  0x78   :  { %1022 = vst.msk [vmem:[%s2449_s3 + $0x258] sm:$0xff] %vm946_vm0, %v889_v60  ;;  %v361_v6 = vmul.f32 %v1978_v19, %v1242_v62  ;;  %v362_v7 = vmul.f32 %v1978_v19, %v1245_v63  ;;  %v1250_v3 = vunpack.c.h.bf16 %v1387_v54  ;;  %v1253_v8 = vunpack.c.l.bf16 %v1388_v59  ;;  %v1393_v63 = vld [vmem:[%s2446_s0 + $0x178] sm:$0xff]  }
  0x79   :  { %1023 = vst.msk [vmem:[%s2449_s3 + $0x260] sm:$0xff] %vm946_vm0, %v890_v61  ;;  %vm627_vm3 = vcmp.ge.f32.partialorder %v495_v0, 0.0  ;;  %v759_v9 = vmul.f32 0.1, %v495_v0  ;;  %vm628_vm4 = vcmp.ge.f32.partialorder %v496_v2, 0.0  ;;  %v363_v10 = vmul.f32 %v1978_v19, %v1246_v4 }
  0x7a   :  { %v760_v11 = vmul.f32 0.1, %v496_v2  ;;  %v497_v12 = vadd.f32 %v1956_v1, %v361_v6  ;;  %v498_v13 = vadd.f32 %v1956_v1, %v362_v7  ;;  %v364_v14 = vmul.f32 %v1978_v19, %v1249_v5  ;;  %v1394_v7 = vld [vmem:[%s2446_s0 + $0x180] sm:$0xff]  }
  0x7b   :  { %v891_v15 = vsel %vm627_vm3, %v495_v0, %v759_v9  ;;  %v499_v16 = vadd.f32 %v1956_v1, %v363_v10  ;;  %v365_v17 = vmul.f32 %v1978_v19, %v1250_v3  ;;  %v366_v18 = vmul.f32 %v1978_v19, %v1253_v8 }
  0x7c   :  { %1024 = vst.msk [vmem:[%s2449_s3 + $0x268] sm:$0xff] %vm946_vm0, %v891_v15  ;;  %v892_v20 = vsel %vm628_vm4, %v496_v2, %v760_v11  ;;  %vm629_vm5 = vcmp.ge.f32.partialorder %v497_v12, 0.0  ;;  %v761_v21 = vmul.f32 0.1, %v497_v12  ;;  %vm630_vm6 = vcmp.ge.f32.partialorder %v498_v13, 0.0  ;;  %v1395_v11 = vld [vmem:[%s2446_s0 + $0x188] sm:$0xff]  }
  0x7d   :  { %1025 = vst.msk [vmem:[%s2449_s3 + $0x270] sm:$0xff] %vm946_vm0, %v892_v20  ;;  %v762_v22 = vmul.f32 0.1, %v498_v13  ;;  %vm631_vm7 = vcmp.ge.f32.partialorder %v499_v16, 0.0  ;;  %v763_v23 = vmul.f32 0.1, %v499_v16  ;;  %v500_v24 = vadd.f32 %v1956_v1, %v364_v14 }
  0x7e   :  { %v893_v25 = vsel %vm629_vm5, %v497_v12, %v761_v21  ;;  %v501_v26 = vadd.f32 %v1956_v1, %v365_v17  ;;  %v502_v27 = vadd.f32 %v1956_v1, %v366_v18  ;;  %v1254_v28 = vunpack.c.h.bf16 %v1388_v59 }
  0x7f   :  { %1026 = vst.msk [vmem:[%s2449_s3 + $0x278] sm:$0xff] %vm946_vm0, %v893_v25  ;;  %v894_v30 = vsel %vm630_vm6, %v498_v13, %v762_v22  ;;  %v895_v31 = vsel %vm631_vm7, %v499_v16, %v763_v23  ;;  %vm632_vm8 = vcmp.ge.f32.partialorder %v500_v24, 0.0  ;;  %v764_v32 = vmul.f32 0.1, %v500_v24 }
  0x80   :  { %1027 = vst.msk [vmem:[%s2449_s3 + $0x280] sm:$0xff] %vm946_vm0, %v894_v30  ;;  %vm633_vm9 = vcmp.ge.f32.partialorder %v501_v26, 0.0  ;;  %v765_v34 = vmul.f32 0.1, %v501_v26  ;;  %vm634_vm10 = vcmp.ge.f32.partialorder %v502_v27, 0.0  ;;  %v367_v35 = vmul.f32 %v1978_v19, %v1254_v28 }
  0x81   :  { %1028 = vst.msk [vmem:[%s2449_s3 + $0x288] sm:$0xff] %vm946_vm0, %v895_v31  ;;  %v896_v37 = vsel %vm632_vm8, %v500_v24, %v764_v32  ;;  %v766_v38 = vmul.f32 0.1, %v502_v27  ;;  %v1257_v39 = vunpack.c.l.bf16 %v1389_v29  ;;  %v1258_v40 = vunpack.c.h.bf16 %v1389_v29 }
  0x82   :  { %1029 = vst.msk [vmem:[%s2449_s3 + $0x290] sm:$0xff] %vm946_vm0, %v896_v37  ;;  %v897_v41 = vsel %vm633_vm9, %v501_v26, %v765_v34  ;;  %v503_v42 = vadd.f32 %v1956_v1, %v367_v35  ;;  %v1261_v43 = vunpack.c.l.bf16 %v1390_v33  ;;  %v1262_v44 = vunpack.c.h.bf16 %v1390_v33 }
  0x83   :  { %1030 = vst.msk [vmem:[%s2449_s3 + $0x298] sm:$0xff] %vm946_vm0, %v897_v41  ;;  %v898_v45 = vsel %vm634_vm10, %v502_v27, %v766_v38  ;;  %v368_v46 = vmul.f32 %v1978_v19, %v1257_v39  ;;  %v369_v47 = vmul.f32 %v1978_v19, %v1258_v40  ;;  %v1265_v48 = vunpack.c.l.bf16 %v1391_v36 }
  0x84   :  { %1031 = vst.msk [vmem:[%s2449_s3 + $0x2a0] sm:$0xff] %vm946_vm0, %v898_v45  ;;  %vm635_vm11 = vcmp.ge.f32.partialorder %v503_v42, 0.0  ;;  %v767_v50 = vmul.f32 0.1, %v503_v42  ;;  %v370_v51 = vmul.f32 %v1978_v19, %v1261_v43  ;;  %v371_v52 = vmul.f32 %v1978_v19, %v1262_v44  ;;  %v1396_v44 = vld [vmem:[%s2446_s0 + $0x190] sm:$0xff]  }
  0x85   :  { %v504_v53 = vadd.f32 %v1956_v1, %v368_v46  ;;  %v505_v54 = vadd.f32 %v1956_v1, %v369_v47  ;;  %v372_v55 = vmul.f32 %v1978_v19, %v1265_v48  ;;  %v1266_v56 = vunpack.c.h.bf16 %v1391_v36  ;;  %v1397_v48 = vld [vmem:[%s2446_s0 + $0x198] sm:$0xff]  }
  0x86   :  { %v899_v57 = vsel %vm635_vm11, %v503_v42, %v767_v50  ;;  %v506_v58 = vadd.f32 %v1956_v1, %v370_v51  ;;  %v507_v59 = vadd.f32 %v1956_v1, %v371_v52  ;;  %v1269_v60 = vunpack.c.l.bf16 %v1392_v49  ;;  %v1398_v51 = vld [vmem:[%s2446_s0 + $0x1a0] sm:$0xff]  }
  0x87   :  { %1032 = vst.msk [vmem:[%s2449_s3 + $0x2a8] sm:$0xff] %vm946_vm0, %v899_v57  ;;  %vm636_vm12 = vcmp.ge.f32.partialorder %v504_v53, 0.0  ;;  %v768_v61 = vmul.f32 0.1, %v504_v53  ;;  %vm637_vm13 = vcmp.ge.f32.partialorder %v505_v54, 0.0  ;;  %v508_v62 = vadd.f32 %v1956_v1, %v372_v55 }
  0x88   :  { %v769_v0 = vmul.f32 0.1, %v505_v54  ;;  %vm638_vm14 = vcmp.ge.f32.partialorder %v506_v58, 0.0  ;;  %v770_v2 = vmul.f32 0.1, %v506_v58  ;;  %vm639_vm15 = vcmp.ge.f32.partialorder %v507_v59, 0.0 }
  0x89   :  { %v900_v4 = vsel %vm636_vm12, %v504_v53, %v768_v61  ;;  %v771_v5 = vmul.f32 0.1, %v507_v59  ;;  %vm640_vm1 = vcmp.ge.f32.partialorder %v508_v62, 0.0  ;;  %v772_v6 = vmul.f32 0.1, %v508_v62 }
  0x8a   :  { %1033 = vst.msk [vmem:[%s2449_s3 + $0x2b0] sm:$0xff] %vm946_vm0, %v900_v4  ;;  %v901_v3 = vsel %vm637_vm13, %v505_v54, %v769_v0  ;;  %v902_v8 = vsel %vm638_vm14, %v506_v58, %v770_v2  ;;  %v373_v9 = vmul.f32 %v1978_v19, %v1266_v56  ;;  %v374_v10 = vmul.f32 %v1978_v19, %v1269_v60  ;;  %v1399_v0 = vld [vmem:[%s2446_s0 + $0x1a8] sm:$0xff]  }
  0x8b   :  { %1034 = vst.msk [vmem:[%s2449_s3 + $0x2b8] sm:$0xff] %vm946_vm0, %v901_v3  ;;  %v903_v12 = vsel %vm639_vm15, %v507_v59, %v771_v5  ;;  %v904_v13 = vsel %vm640_vm1, %v508_v62, %v772_v6  ;;  %v1270_v14 = vunpack.c.h.bf16 %v1392_v49  ;;  %v1273_v15 = vunpack.c.l.bf16 %v1393_v63 }
  0x8c   :  { %1035 = vst.msk [vmem:[%s2449_s3 + $0x2c0] sm:$0xff] %vm946_vm0, %v902_v8  ;;  %v509_v16 = vadd.f32 %v1956_v1, %v373_v9  ;;  %v510_v17 = vadd.f32 %v1956_v1, %v374_v10  ;;  %v1274_v18 = vunpack.c.h.bf16 %v1393_v63  ;;  %v1277_v20 = vunpack.c.l.bf16 %v1394_v7 }
  0x8d   :  { %1036 = vst.msk [vmem:[%s2449_s3 + $0x2c8] sm:$0xff] %vm946_vm0, %v903_v12  ;;  %v375_v21 = vmul.f32 %v1978_v19, %v1270_v14  ;;  %v376_v22 = vmul.f32 %v1978_v19, %v1273_v15  ;;  %v1278_v23 = vunpack.c.h.bf16 %v1394_v7  ;;  %v1281_v24 = vunpack.c.l.bf16 %v1395_v11  ;;  %v1400_v15 = vld [vmem:[%s2446_s0 + $0x1b0] sm:$0xff]  }
  0x8e   :  { %1037 = vst.msk [vmem:[%s2449_s3 + $0x2d0] sm:$0xff] %vm946_vm0, %v904_v13  ;;  %vm641_vm2 = vcmp.ge.f32.partialorder %v509_v16, 0.0  ;;  %v773_v25 = vmul.f32 0.1, %v509_v16  ;;  %vm642_vm3 = vcmp.ge.f32.partialorder %v510_v17, 0.0  ;;  %v377_v26 = vmul.f32 %v1978_v19, %v1274_v18 }
  0x8f   :  { %v774_v27 = vmul.f32 0.1, %v510_v17  ;;  %v511_v28 = vadd.f32 %v1956_v1, %v375_v21  ;;  %v512_v29 = vadd.f32 %v1956_v1, %v376_v22  ;;  %v378_v30 = vmul.f32 %v1978_v19, %v1277_v20  ;;  %v1401_v22 = vld [vmem:[%s2446_s0 + $0x1b8] sm:$0xff]  }
  0x90   :  { %v905_v31 = vsel %vm641_vm2, %v509_v16, %v773_v25  ;;  %v513_v32 = vadd.f32 %v1956_v1, %v377_v26  ;;  %v379_v33 = vmul.f32 %v1978_v19, %v1278_v23  ;;  %v380_v34 = vmul.f32 %v1978_v19, %v1281_v24 }
  0x91   :  { %1038 = vst.msk [vmem:[%s2449_s3 + $0x2d8] sm:$0xff] %vm946_vm0, %v905_v31  ;;  %v906_v35 = vsel %vm642_vm3, %v510_v17, %v774_v27  ;;  %vm643_vm4 = vcmp.ge.f32.partialorder %v511_v28, 0.0  ;;  %v775_v36 = vmul.f32 0.1, %v511_v28  ;;  %vm644_vm5 = vcmp.ge.f32.partialorder %v512_v29, 0.0  ;;  %v1402_v27 = vld [vmem:[%s2446_s0 + $0x1c0] sm:$0xff]  }
  0x92   :  { %1039 = vst.msk [vmem:[%s2449_s3 + $0x2e0] sm:$0xff] %vm946_vm0, %v906_v35  ;;  %v776_v37 = vmul.f32 0.1, %v512_v29  ;;  %vm645_vm6 = vcmp.ge.f32.partialorder %v513_v32, 0.0  ;;  %v777_v38 = vmul.f32 0.1, %v513_v32  ;;  %v514_v39 = vadd.f32 %v1956_v1, %v378_v30 }
  0x93   :  { %v907_v40 = vsel %vm643_vm4, %v511_v28, %v775_v36  ;;  %v515_v41 = vadd.f32 %v1956_v1, %v379_v33  ;;  %v516_v42 = vadd.f32 %v1956_v1, %v380_v34  ;;  %v1282_v43 = vunpack.c.h.bf16 %v1395_v11 }
  0x94   :  { %1040 = vst.msk [vmem:[%s2449_s3 + $0x2e8] sm:$0xff] %vm946_vm0, %v907_v40  ;;  %v908_v45 = vsel %vm644_vm5, %v512_v29, %v776_v37  ;;  %v909_v46 = vsel %vm645_vm6, %v513_v32, %v777_v38  ;;  %vm646_vm7 = vcmp.ge.f32.partialorder %v514_v39, 0.0  ;;  %v778_v47 = vmul.f32 0.1, %v514_v39 }
  0x95   :  { %1041 = vst.msk [vmem:[%s2449_s3 + $0x2f0] sm:$0xff] %vm946_vm0, %v908_v45  ;;  %vm647_vm8 = vcmp.ge.f32.partialorder %v515_v41, 0.0  ;;  %v779_v49 = vmul.f32 0.1, %v515_v41  ;;  %vm648_vm9 = vcmp.ge.f32.partialorder %v516_v42, 0.0  ;;  %v381_v50 = vmul.f32 %v1978_v19, %v1282_v43 }
  0x96   :  { %1042 = vst.msk [vmem:[%s2449_s3 + $0x2f8] sm:$0xff] %vm946_vm0, %v909_v46  ;;  %v910_v52 = vsel %vm646_vm7, %v514_v39, %v778_v47  ;;  %v780_v53 = vmul.f32 0.1, %v516_v42  ;;  %v1285_v54 = vunpack.c.l.bf16 %v1396_v44  ;;  %v1286_v55 = vunpack.c.h.bf16 %v1396_v44 }
  0x97   :  { %1043 = vst.msk [vmem:[%s2449_s3 + $0x300] sm:$0xff] %vm946_vm0, %v910_v52  ;;  %v911_v56 = vsel %vm647_vm8, %v515_v41, %v779_v49  ;;  %v517_v57 = vadd.f32 %v1956_v1, %v381_v50  ;;  %v1289_v58 = vunpack.c.l.bf16 %v1397_v48  ;;  %v1290_v59 = vunpack.c.h.bf16 %v1397_v48 }
  0x98   :  { %1044 = vst.msk [vmem:[%s2449_s3 + $0x308] sm:$0xff] %vm946_vm0, %v911_v56  ;;  %v912_v60 = vsel %vm648_vm9, %v516_v42, %v780_v53  ;;  %v382_v61 = vmul.f32 %v1978_v19, %v1285_v54  ;;  %v383_v62 = vmul.f32 %v1978_v19, %v1286_v55  ;;  %v1293_v63 = vunpack.c.l.bf16 %v1398_v51 }
  0x99   :  { %1045 = vst.msk [vmem:[%s2449_s3 + $0x310] sm:$0xff] %vm946_vm0, %v912_v60  ;;  %vm649_vm10 = vcmp.ge.f32.partialorder %v517_v57, 0.0  ;;  %v781_v2 = vmul.f32 0.1, %v517_v57  ;;  %v384_v4 = vmul.f32 %v1978_v19, %v1289_v58  ;;  %v385_v5 = vmul.f32 %v1978_v19, %v1290_v59  ;;  %v1403_v59 = vld [vmem:[%s2446_s0 + $0x1c8] sm:$0xff]  }
  0x9a   :  { %v518_v6 = vadd.f32 %v1956_v1, %v382_v61  ;;  %v519_v7 = vadd.f32 %v1956_v1, %v383_v62  ;;  %v386_v3 = vmul.f32 %v1978_v19, %v1293_v63  ;;  %v1294_v8 = vunpack.c.h.bf16 %v1398_v51  ;;  %v1404_v63 = vld [vmem:[%s2446_s0 + $0x1d0] sm:$0xff]  }
  0x9b   :  { %v913_v9 = vsel %vm649_vm10, %v517_v57, %v781_v2  ;;  %v520_v10 = vadd.f32 %v1956_v1, %v384_v4  ;;  %v521_v11 = vadd.f32 %v1956_v1, %v385_v5  ;;  %v1297_v12 = vunpack.c.l.bf16 %v1399_v0  ;;  %v1405_v4 = vld [vmem:[%s2446_s0 + $0x1d8] sm:$0xff]  }
  0x9c   :  { %1046 = vst.msk [vmem:[%s2449_s3 + $0x318] sm:$0xff] %vm946_vm0, %v913_v9  ;;  %vm650_vm11 = vcmp.ge.f32.partialorder %v518_v6, 0.0  ;;  %v782_v13 = vmul.f32 0.1, %v518_v6  ;;  %vm651_vm12 = vcmp.ge.f32.partialorder %v519_v7, 0.0  ;;  %v522_v14 = vadd.f32 %v1956_v1, %v386_v3 }
  0x9d   :  { %v783_v16 = vmul.f32 0.1, %v519_v7  ;;  %vm652_vm13 = vcmp.ge.f32.partialorder %v520_v10, 0.0  ;;  %v784_v17 = vmul.f32 0.1, %v520_v10  ;;  %vm653_vm14 = vcmp.ge.f32.partialorder %v521_v11, 0.0 }
  0x9e   :  { %v914_v18 = vsel %vm650_vm11, %v518_v6, %v782_v13  ;;  %v785_v20 = vmul.f32 0.1, %v521_v11  ;;  %vm654_vm15 = vcmp.ge.f32.partialorder %v522_v14, 0.0  ;;  %v786_v21 = vmul.f32 0.1, %v522_v14 }
  0x9f   :  { %1047 = vst.msk [vmem:[%s2449_s3 + $0x320] sm:$0xff] %vm946_vm0, %v914_v18  ;;  %v915_v23 = vsel %vm651_vm12, %v519_v7, %v783_v16  ;;  %v916_v24 = vsel %vm652_vm13, %v520_v10, %v784_v17  ;;  %v387_v25 = vmul.f32 %v1978_v19, %v1294_v8  ;;  %v388_v26 = vmul.f32 %v1978_v19, %v1297_v12  ;;  %v1406_v16 = vld [vmem:[%s2446_s0 + $0x1e0] sm:$0xff]  }
  0xa0   :  { %1048 = vst.msk [vmem:[%s2449_s3 + $0x328] sm:$0xff] %vm946_vm0, %v915_v23  ;;  %v917_v28 = vsel %vm653_vm14, %v521_v11, %v785_v20  ;;  %v918_v29 = vsel %vm654_vm15, %v522_v14, %v786_v21  ;;  %v1298_v30 = vunpack.c.h.bf16 %v1399_v0  ;;  %v1301_v31 = vunpack.c.l.bf16 %v1400_v15 }
  0xa1   :  { %1049 = vst.msk [vmem:[%s2449_s3 + $0x330] sm:$0xff] %vm946_vm0, %v916_v24  ;;  %v523_v32 = vadd.f32 %v1956_v1, %v387_v25  ;;  %v524_v33 = vadd.f32 %v1956_v1, %v388_v26  ;;  %v1302_v34 = vunpack.c.h.bf16 %v1400_v15  ;;  %v1305_v35 = vunpack.c.l.bf16 %v1401_v22 }
  0xa2   :  { %1050 = vst.msk [vmem:[%s2449_s3 + $0x338] sm:$0xff] %vm946_vm0, %v917_v28  ;;  %v389_v36 = vmul.f32 %v1978_v19, %v1298_v30  ;;  %v390_v37 = vmul.f32 %v1978_v19, %v1301_v31  ;;  %v1306_v38 = vunpack.c.h.bf16 %v1401_v22  ;;  %v1309_v39 = vunpack.c.l.bf16 %v1402_v27  ;;  %v1407_v31 = vld [vmem:[%s2446_s0 + $0x1e8] sm:$0xff]  }
  0xa3   :  { %1051 = vst.msk [vmem:[%s2449_s3 + $0x340] sm:$0xff] %vm946_vm0, %v918_v29  ;;  %vm655_vm1 = vcmp.ge.f32.partialorder %v523_v32, 0.0  ;;  %v787_v40 = vmul.f32 0.1, %v523_v32  ;;  %vm656_vm2 = vcmp.ge.f32.partialorder %v524_v33, 0.0  ;;  %v391_v41 = vmul.f32 %v1978_v19, %v1302_v34 }
  0xa4   :  { %v788_v42 = vmul.f32 0.1, %v524_v33  ;;  %v525_v43 = vadd.f32 %v1956_v1, %v389_v36  ;;  %v526_v44 = vadd.f32 %v1956_v1, %v390_v37  ;;  %v392_v45 = vmul.f32 %v1978_v19, %v1305_v35  ;;  %v1408_v37 = vld [vmem:[%s2446_s0 + $0x1f0] sm:$0xff]  }
  0xa5   :  { %v919_v46 = vsel %vm655_vm1, %v523_v32, %v787_v40  ;;  %v527_v47 = vadd.f32 %v1956_v1, %v391_v41  ;;  %v393_v48 = vmul.f32 %v1978_v19, %v1306_v38  ;;  %v394_v49 = vmul.f32 %v1978_v19, %v1309_v39 }
  0xa6   :  { %1052 = vst.msk [vmem:[%s2449_s3 + $0x348] sm:$0xff] %vm946_vm0, %v919_v46  ;;  %v920_v50 = vsel %vm656_vm2, %v524_v33, %v788_v42  ;;  %vm657_vm3 = vcmp.ge.f32.partialorder %v525_v43, 0.0  ;;  %v789_v51 = vmul.f32 0.1, %v525_v43  ;;  %vm658_vm4 = vcmp.ge.f32.partialorder %v526_v44, 0.0  ;;  %v1409_v42 = vld [vmem:[%s2446_s0 + $0x1f8] sm:$0xff]  }
  0xa7   :  { %1053 = vst.msk [vmem:[%s2449_s3 + $0x350] sm:$0xff] %vm946_vm0, %v920_v50  ;;  %v790_v52 = vmul.f32 0.1, %v526_v44  ;;  %vm659_vm5 = vcmp.ge.f32.partialorder %v527_v47, 0.0  ;;  %v791_v53 = vmul.f32 0.1, %v527_v47  ;;  %v528_v54 = vadd.f32 %v1956_v1, %v392_v45 }
  0xa8   :  { %v921_v55 = vsel %vm657_vm3, %v525_v43, %v789_v51  ;;  %v529_v56 = vadd.f32 %v1956_v1, %v393_v48  ;;  %v530_v57 = vadd.f32 %v1956_v1, %v394_v49  ;;  %v1310_v58 = vunpack.c.h.bf16 %v1402_v27 }
  0xa9   :  { %1054 = vst.msk [vmem:[%s2449_s3 + $0x358] sm:$0xff] %vm946_vm0, %v921_v55  ;;  %v922_v60 = vsel %vm658_vm4, %v526_v44, %v790_v52  ;;  %v923_v61 = vsel %vm659_vm5, %v527_v47, %v791_v53  ;;  %vm660_vm6 = vcmp.ge.f32.partialorder %v528_v54, 0.0  ;;  %v792_v62 = vmul.f32 0.1, %v528_v54 }
  0xaa   :  { %1055 = vst.msk [vmem:[%s2449_s3 + $0x360] sm:$0xff] %vm946_vm0, %v922_v60  ;;  %vm661_vm7 = vcmp.ge.f32.partialorder %v529_v56, 0.0  ;;  %v793_v0 = vmul.f32 0.1, %v529_v56  ;;  %vm662_vm8 = vcmp.ge.f32.partialorder %v530_v57, 0.0  ;;  %v395_v2 = vmul.f32 %v1978_v19, %v1310_v58 }
  0xab   :  { %1056 = vst.msk [vmem:[%s2449_s3 + $0x368] sm:$0xff] %vm946_vm0, %v923_v61  ;;  %v924_v5 = vsel %vm660_vm6, %v528_v54, %v792_v62  ;;  %v794_v6 = vmul.f32 0.1, %v530_v57  ;;  %v1313_v7 = vunpack.c.l.bf16 %v1403_v59  ;;  %v1314_v3 = vunpack.c.h.bf16 %v1403_v59 }
  0xac   :  { %1057 = vst.msk [vmem:[%s2449_s3 + $0x370] sm:$0xff] %vm946_vm0, %v924_v5  ;;  %v925_v8 = vsel %vm661_vm7, %v529_v56, %v793_v0  ;;  %v531_v9 = vadd.f32 %v1956_v1, %v395_v2  ;;  %v1317_v10 = vunpack.c.l.bf16 %v1404_v63  ;;  %v1318_v11 = vunpack.c.h.bf16 %v1404_v63 }
  0xad   :  { %1058 = vst.msk [vmem:[%s2449_s3 + $0x378] sm:$0xff] %vm946_vm0, %v925_v8  ;;  %v926_v12 = vsel %vm662_vm8, %v530_v57, %v794_v6  ;;  %v396_v13 = vmul.f32 %v1978_v19, %v1313_v7  ;;  %v397_v14 = vmul.f32 %v1978_v19, %v1314_v3  ;;  %v1321_v15 = vunpack.c.l.bf16 %v1405_v4 }
  0xae   :  { %1059 = vst.msk [vmem:[%s2449_s3 + $0x380] sm:$0xff] %vm946_vm0, %v926_v12  ;;  %vm663_vm9 = vcmp.ge.f32.partialorder %v531_v9, 0.0  ;;  %v795_v17 = vmul.f32 0.1, %v531_v9  ;;  %v398_v18 = vmul.f32 %v1978_v19, %v1317_v10  ;;  %v399_v20 = vmul.f32 %v1978_v19, %v1318_v11  ;;  %v1410_v11 = vld [vmem:[%s2446_s0 + $0x200] sm:$0xff]  }
  0xaf   :  { %v532_v21 = vadd.f32 %v1956_v1, %v396_v13  ;;  %v533_v22 = vadd.f32 %v1956_v1, %v397_v14  ;;  %v400_v23 = vmul.f32 %v1978_v19, %v1321_v15  ;;  %v1322_v24 = vunpack.c.h.bf16 %v1405_v4  ;;  %v1411_v15 = vld [vmem:[%s2446_s0 + $0x208] sm:$0xff]  }
  0xb0   :  { %v927_v25 = vsel %vm663_vm9, %v531_v9, %v795_v17  ;;  %v534_v26 = vadd.f32 %v1956_v1, %v398_v18  ;;  %v535_v27 = vadd.f32 %v1956_v1, %v399_v20  ;;  %v1325_v28 = vunpack.c.l.bf16 %v1406_v16 }
  0xb1   :  { %1060 = vst.msk [vmem:[%s2449_s3 + $0x388] sm:$0xff] %vm946_vm0, %v927_v25  ;;  %vm664_vm10 = vcmp.ge.f32.partialorder %v532_v21, 0.0  ;;  %v796_v29 = vmul.f32 0.1, %v532_v21  ;;  %vm665_vm11 = vcmp.ge.f32.partialorder %v533_v22, 0.0  ;;  %v536_v30 = vadd.f32 %v1956_v1, %v400_v23 }
  0xb2   :  { %v797_v32 = vmul.f32 0.1, %v533_v22  ;;  %vm666_vm12 = vcmp.ge.f32.partialorder %v534_v26, 0.0  ;;  %v798_v33 = vmul.f32 0.1, %v534_v26  ;;  %vm667_vm13 = vcmp.ge.f32.partialorder %v535_v27, 0.0 }
  0xb3   :  { %v928_v34 = vsel %vm664_vm10, %v532_v21, %v796_v29  ;;  %v799_v35 = vmul.f32 0.1, %v535_v27  ;;  %vm668_vm14 = vcmp.ge.f32.partialorder %v536_v30, 0.0  ;;  %v800_v36 = vmul.f32 0.1, %v536_v30 }
  0xb4   :  { %1061 = vst.msk [vmem:[%s2449_s3 + $0x390] sm:$0xff] %vm946_vm0, %v928_v34  ;;  %v929_v38 = vsel %vm665_vm11, %v533_v22, %v797_v32  ;;  %v930_v39 = vsel %vm666_vm12, %v534_v26, %v798_v33  ;;  %v401_v40 = vmul.f32 %v1978_v19, %v1322_v24  ;;  %v402_v41 = vmul.f32 %v1978_v19, %v1325_v28 }
  0xb5   :  { %1062 = vst.msk [vmem:[%s2449_s3 + $0x398] sm:$0xff] %vm946_vm0, %v929_v38  ;;  %v931_v43 = vsel %vm667_vm13, %v535_v27, %v799_v35  ;;  %v932_v44 = vsel %vm668_vm14, %v536_v30, %v800_v36  ;;  %v1326_v45 = vunpack.c.h.bf16 %v1406_v16  ;;  %v1329_v46 = vunpack.c.l.bf16 %v1407_v31 }
  0xb6   :  { %1063 = vst.msk [vmem:[%s2449_s3 + $0x3a0] sm:$0xff] %vm946_vm0, %v930_v39  ;;  %v537_v47 = vadd.f32 %v1956_v1, %v401_v40  ;;  %v538_v48 = vadd.f32 %v1956_v1, %v402_v41  ;;  %v1330_v49 = vunpack.c.h.bf16 %v1407_v31  ;;  %v1333_v50 = vunpack.c.l.bf16 %v1408_v37 }
  0xb7   :  { %1064 = vst.msk [vmem:[%s2449_s3 + $0x3a8] sm:$0xff] %vm946_vm0, %v931_v43  ;;  %v403_v51 = vmul.f32 %v1978_v19, %v1326_v45  ;;  %v404_v52 = vmul.f32 %v1978_v19, %v1329_v46  ;;  %v1334_v53 = vunpack.c.h.bf16 %v1408_v37  ;;  %v1337_v54 = vunpack.c.l.bf16 %v1409_v42 }
  0xb8   :  { %1065 = vst.msk [vmem:[%s2449_s3 + $0x3b0] sm:$0xff] %vm946_vm0, %v932_v44  ;;  %vm669_vm15 = vcmp.ge.f32.partialorder %v537_v47, 0.0  ;;  %v801_v55 = vmul.f32 0.1, %v537_v47  ;;  %vm670_vm1 = vcmp.ge.f32.partialorder %v538_v48, 0.0  ;;  %v405_v56 = vmul.f32 %v1978_v19, %v1330_v49 }
  0xb9   :  { %v802_v57 = vmul.f32 0.1, %v538_v48  ;;  %v539_v58 = vadd.f32 %v1956_v1, %v403_v51  ;;  %v540_v59 = vadd.f32 %v1956_v1, %v404_v52  ;;  %v406_v60 = vmul.f32 %v1978_v19, %v1333_v50 }
  0xba   :  { %v933_v61 = vsel %vm669_vm15, %v537_v47, %v801_v55  ;;  %v541_v62 = vadd.f32 %v1956_v1, %v405_v56  ;;  %v407_v63 = vmul.f32 %v1978_v19, %v1334_v53  ;;  %v408_v0 = vmul.f32 %v1978_v19, %v1337_v54 }
  0xbb   :  { %1066 = vst.msk [vmem:[%s2449_s3 + $0x3b8] sm:$0xff] %vm946_vm0, %v933_v61  ;;  %v934_v2 = vsel %vm670_vm1, %v538_v48, %v802_v57  ;;  %vm671_vm2 = vcmp.ge.f32.partialorder %v539_v58, 0.0  ;;  %v803_v4 = vmul.f32 0.1, %v539_v58  ;;  %vm672_vm3 = vcmp.ge.f32.partialorder %v540_v59, 0.0 }
  0xbc   :  { %1067 = vst.msk [vmem:[%s2449_s3 + $0x3c0] sm:$0xff] %vm946_vm0, %v934_v2  ;;  %v804_v5 = vmul.f32 0.1, %v540_v59  ;;  %vm673_vm4 = vcmp.ge.f32.partialorder %v541_v62, 0.0  ;;  %v805_v6 = vmul.f32 0.1, %v541_v62  ;;  %v542_v7 = vadd.f32 %v1956_v1, %v406_v60 }
  0xbd   :  { %v935_v3 = vsel %vm671_vm2, %v539_v58, %v803_v4  ;;  %v543_v8 = vadd.f32 %v1956_v1, %v407_v63  ;;  %v544_v9 = vadd.f32 %v1956_v1, %v408_v0  ;;  %v1338_v10 = vunpack.c.h.bf16 %v1409_v42 }
  0xbe   :  { %1068 = vst.msk [vmem:[%s2449_s3 + $0x3c8] sm:$0xff] %vm946_vm0, %v935_v3  ;;  %v936_v12 = vsel %vm672_vm3, %v540_v59, %v804_v5  ;;  %v937_v13 = vsel %vm673_vm4, %v541_v62, %v805_v6  ;;  %vm674_vm5 = vcmp.ge.f32.partialorder %v542_v7, 0.0  ;;  %v806_v14 = vmul.f32 0.1, %v542_v7 }
  0xbf   :  { %1069 = vst.msk [vmem:[%s2449_s3 + $0x3d0] sm:$0xff] %vm946_vm0, %v936_v12  ;;  %vm675_vm6 = vcmp.ge.f32.partialorder %v543_v8, 0.0  ;;  %v807_v16 = vmul.f32 0.1, %v543_v8  ;;  %vm676_vm7 = vcmp.ge.f32.partialorder %v544_v9, 0.0  ;;  %v409_v17 = vmul.f32 %v1978_v19, %v1338_v10 }
  0xc0   :  { %1070 = vst.msk [vmem:[%s2449_s3 + $0x3d8] sm:$0xff] %vm946_vm0, %v937_v13  ;;  %v938_v18 = vsel %vm674_vm5, %v542_v7, %v806_v14  ;;  %v808_v20 = vmul.f32 0.1, %v544_v9  ;;  %v1341_v21 = vunpack.c.l.bf16 %v1410_v11  ;;  %v1342_v22 = vunpack.c.h.bf16 %v1410_v11 }
  0xc1   :  { %1071 = vst.msk [vmem:[%s2449_s3 + $0x3e0] sm:$0xff] %vm946_vm0, %v938_v18  ;;  %v939_v23 = vsel %vm675_vm6, %v543_v8, %v807_v16  ;;  %v545_v24 = vadd.f32 %v1956_v1, %v409_v17  ;;  %v1345_v25 = vunpack.c.l.bf16 %v1411_v15  ;;  %v1346_v26 = vunpack.c.h.bf16 %v1411_v15 }
  0xc2   :  { %1072 = vst.msk [vmem:[%s2449_s3 + $0x3e8] sm:$0xff] %vm946_vm0, %v939_v23  ;;  %v940_v27 = vsel %vm676_vm7, %v544_v9, %v808_v20  ;;  %v410_v28 = vmul.f32 %v1978_v19, %v1341_v21  ;;  %v411_v29 = vmul.f32 %v1978_v19, %v1342_v22 }
  0xc3   :  { %1073 = vst.msk [vmem:[%s2449_s3 + $0x3f0] sm:$0xff] %vm946_vm0, %v940_v27  ;;  %vm677_vm8 = vcmp.ge.f32.partialorder %v545_v24, 0.0  ;;  %v809_v30 = vmul.f32 0.1, %v545_v24  ;;  %v412_v31 = vmul.f32 %v1978_v19, %v1345_v25  ;;  %v413_v32 = vmul.f32 %v1978_v19, %v1346_v26 }
  0xc4   :  { %v546_v33 = vadd.f32 %v1956_v1, %v410_v28  ;;  %v547_v34 = vadd.f32 %v1956_v1, %v411_v29 }
  0xc5   :  { %v941_v35 = vsel %vm677_vm8, %v545_v24, %v809_v30  ;;  %v548_v36 = vadd.f32 %v1956_v1, %v412_v31  ;;  %v549_v37 = vadd.f32 %v1956_v1, %v413_v32 }
  0xc6   :  { %1074 = vst.msk [vmem:[%s2449_s3 + $0x3f8] sm:$0xff] %vm946_vm0, %v941_v35  ;;  %vm678_vm9 = vcmp.ge.f32.partialorder %v546_v33, 0.0  ;;  %v810_v38 = vmul.f32 0.1, %v546_v33  ;;  %vm679_vm10 = vcmp.ge.f32.partialorder %v547_v34, 0.0 }
  0xc7   :  { %v811_v39 = vmul.f32 0.1, %v547_v34  ;;  %vm680_vm11 = vcmp.ge.f32.partialorder %v548_v36, 0.0  ;;  %v812_v19 = vmul.f32 0.1, %v548_v36  ;;  %vm681_vm12 = vcmp.ge.f32.partialorder %v549_v37, 0.0 }
  0xc8   :  { %v942_v40 = vsel %vm678_vm9, %v546_v33, %v810_v38  ;;  %v813_v41 = vmul.f32 0.1, %v549_v37 }
  0xc9   :  { %1075 = vst.msk [vmem:[%s2449_s3 + $0x400] sm:$0xff] %vm946_vm0, %v942_v40  ;;  %v943_v1 = vsel %vm679_vm10, %v547_v34, %v811_v39  ;;  %v944_v42 = vsel %vm680_vm11, %v548_v36, %v812_v19 }
  0xca   :  { %1076 = vst.msk [vmem:[%s2449_s3 + $0x408] sm:$0xff] %vm946_vm0, %v943_v1  ;;  %v945_v43 = vsel %vm681_vm12, %v549_v37, %v813_v41 }
  0xcb   :  { %1077 = vst.msk [vmem:[%s2449_s3 + $0x410] sm:$0xff] %vm946_vm0, %v944_v42 }
  0xcc   :  { %1078 = vst.msk [vmem:[%s2449_s3 + $0x418] sm:$0xff] %vm946_vm0, %v945_v43 }

// kernel: conv_batch_leaky_relu.2
= control target key start
LH: loop header
LB: loop body
LE: loop exit
PB: predicated region body
PF: predicated region fallthrough
CT: control target
= control target key end

     0   :  { %s5919_s18 = smov 0   ;;  %s8509_s0 = inlined_call_operand.vmem [shape: bf16[1584,4], index: 0, kind: input, shape index: {}, may-alias: {0,1}]   ;;  %s8510_s1 = inlined_call_operand.vmem [shape: bf16[1584,4], index: 1, kind: input, shape index: {}, may-alias: {0,1}]   ;;  %s8511_s2 = inlined_call_operand.vmem [shape: bf16[9,4,8], index: 2, kind: input, shape index: {}]   ;;  %s8512_s3 = inlined_call_operand.vmem [shape: f32[1056,1], index: 3, kind: input, shape index: {}]   ;;  %s8513_s4 = inlined_call_operand.vmem [shape: bf16[1056,8], index: 4, kind: output, shape index: {0}]   ;;  %s8514_s5 = inlined_call_operand.vmem [shape: f32[2,2,8], index: 5, kind: output, shape index: {1}]  }
   0x1 LB: > { %s5925_s19 = sadd.s32 4294967295, %s5886_s18   ;;  %p5321_p0 = scmp.ge.s32.totalorder %s5886_s18, 1  ;;  %s5886_s18 = sphi %s5919_s18, %s16_s18  }
   0x2   : > { %p221_p1 = scmp.lt.s32.totalorder %s5886_s18, 3 }
   0x4   : > { %p222_p2 = pnand %p5321_p0, %p221_p1 }
   0x6   : > { %225 = sbr.rel (%p222_p2) target bundleno = 1394 (0x572), region = 36 }
   0xb   : > { %v5328_v0 = vld [vmem:[%s8511_s2 + $0x2] sm:$0x3]  ;;  %vm1063_vm0 = vcmask 1041408   ;;  %s5933_s22 = smul.u32 66, %s5925_s19  ;;  %v5515_v2 = vld [vmem:[%s8511_s2 + $0x4] sm:$0x3] }
   0xc   : > { %v1065_v1 = vsel %vm1063_vm0, %v5328_v0, 0  ;;  %v1657_v3 = vsel %vm1063_vm0, %v5515_v2, 0  ;;  %v523_v4 = vld [vmem:[%s8511_s2] sm:$0x3]  ;;  %v5587_v5 = vld [vmem:[%s8511_s2 + $0x8] sm:$0x3] }
   0xd   : > { %5812 = vmatpush.bf16.msra.mxu1 %v1065_v1  ;;  %5813 = vmatpush.bf16.msra.mxu2 %v1065_v1  ;;  %p266_p3 = scmp.lt.s32.totalorder %s5933_s22, 197  ;;  %v1308_v6 = vsel %vm1063_vm0, %v523_v4, 0  ;;  %v2426_v7 = vsel %vm1063_vm0, %v5587_v5, 0  ;;  %vm364_vm1 = vcmask 27648   ;;  %vm694_vm2 = vsmask.f32 7424 }
   0xe   : > { %1074 = vmatpush.bf16.msra.mxu0 %v1065_v1  ;;  %5814 = vmatpush.bf16.msra.mxu3 %v1065_v1  ;;  %vm963_vm3 = vcmask 31744   ;;  %s271_s11 = sadd.s32 1, %s5925_s19  ;;  %vm1489_vm4 = vcmask 1046528   ;;  %vm2175_vm5 = vsmask.f32 6400  ;;  %p282_p5 = scmp.lt.s32.totalorder %s5933_s22, 131 }
   0xf   : > { %s267_s29 = scalar_select %p266_p3, %s5933_s22, 197  ;;  %vm3359_vm6 = vsmask.f32 5376  ;;  %vm2673_vm7 = vcmask 1045504   ;;  %vm3857_vm8 = vcmask 1044480   ;;  %vm4333_vm9 = vcmask 60416  }
  0x10   : > { %s5323_s12 = smul.u32 66, %s271_s11  ;;  %s8931_s22 = smov (!%p282_p5, %s5933_s22), 131  ;;  %vm4862_vm10 = vcmask 64512   ;;  %vm5000_vm11 = vcmask 57344  }
  0x11   : > { %1666 = vmatpush.bf16.msrb.mxu2 %v1657_v3  ;;  %1317 = vmatpush.bf16.msrb.mxu1 %v1308_v6  ;;  %s5322_s30 = sshll.u32 %s267_s29, 2  ;;  %s5325_s28 = sshll.u32 %s8931_s22, 3 }
  0x12   : > { %2435 = vmatpush.bf16.msrb.mxu0 %v2426_v7  ;;  %s5953_s8 = scalar_lea.vmem %s8509_s0, %s5322_s30  ;;  %p274_p4 = scmp.lt.s32.totalorder %s5323_s12, 197 }
  0x13   : > { %v316_v8 = vld [vmem:[%s5953_s8 + $0x48] sm:$0xf]  ;;  %v317_v9 = vld [vmem:[%s5953_s8 + $0x4c] sm:$0xf]  ;;  %v318_v10 = vld [vmem:[%s5953_s8 + $0x50] sm:$0xf]  ;;  %s7247_s6 = scalar_lea.vmem %s8512_s3, %s5325_s28 }
  0x14   : > { %v319_v11 = vld [vmem:[%s5953_s8 + $0x54] sm:$0xf]  ;;  %383 = vst.msk [vmem:[#allocation2 + $0x48] sm:$0xf] %vm364_vm1, %v316_v8  ;;  %v334_v12 = vld [vmem:[%s5953_s8 + $0x90] sm:$0xf] }
  0x15   : > { %384 = vst.msk [vmem:[#allocation2 + $0x4c] sm:$0xf] %vm364_vm1, %v317_v9  ;;  %v335_v13 = vld [vmem:[%s5953_s8 + $0x94] sm:$0xf]  ;;  %v336_v14 = vld [vmem:[%s5953_s8 + $0x98] sm:$0xf] }
  0x16   : > { %385 = vst.msk [vmem:[#allocation2 + $0x50] sm:$0xf] %vm364_vm1, %v318_v10  ;;  %v337_v15 = vld [vmem:[%s5953_s8 + $0x9c] sm:$0xf]  ;;  %v298_v16 = vld [vmem:[%s5953_s8] sm:$0xf] }
  0x17   : > { %386 = vst.msk [vmem:[#allocation2 + $0x54] sm:$0xf] %vm364_vm1, %v319_v11  ;;  %v299_v17 = vld [vmem:[%s5953_s8 + $0x4] sm:$0xf]  ;;  %v300_v18 = vld [vmem:[%s5953_s8 + $0x8] sm:$0xf] }
  0x18   : > { %401 = vst.msk [vmem:[#allocation2 + $0x90] sm:$0xf] %vm364_vm1, %v334_v12  ;;  %v301_v20 = vld [vmem:[%s5953_s8 + $0xc] sm:$0xf]  ;;  %v320_v21 = vld [vmem:[%s5953_s8 + $0x58] sm:$0xf] }
  0x19   : > { %402 = vst.msk [vmem:[#allocation2 + $0x94] sm:$0xf] %vm364_vm1, %v335_v13  ;;  %v321_v22 = vld [vmem:[%s5953_s8 + $0x5c] sm:$0xf]  ;;  %v338_v26 = vld [vmem:[%s5953_s8 + $0xa0] sm:$0xf] }
  0x1a   : > { %403 = vst.msk [vmem:[#allocation2 + $0x98] sm:$0xf] %vm364_vm1, %v336_v14  ;;  %v339_v27 = vld [vmem:[%s5953_s8 + $0xa4] sm:$0xf]  ;;  %v302_v31 = vld [vmem:[%s5953_s8 + $0x10] sm:$0xf] }
  0x1b   : > { %404 = vst.msk [vmem:[#allocation2 + $0x9c] sm:$0xf] %vm364_vm1, %v337_v15  ;;  %v303_v32 = vld [vmem:[%s5953_s8 + $0x14] sm:$0xf]  ;;  %v322_v38 = vld [vmem:[%s5953_s8 + $0x60] sm:$0xf] }
  0x1c   : > { %v5974_v19 = vld [vmem:[#allocation2 + $0x48] sm:$0xff]  ;;  %365 = vst.msk [vmem:[#allocation2] sm:$0xf] %vm364_vm1, %v298_v16  ;;  %v323_v39 = vld [vmem:[%s5953_s8 + $0x64] sm:$0xf]  ;;  %s8929_s12 = smov (!%p274_p4, %s5323_s12), 197 }
  0x1d   : > { %366 = vst.msk [vmem:[#allocation2 + $0x4] sm:$0xf] %vm364_vm1, %v299_v17  ;;  %v5982_v24 = vshll.u32 %v5974_v19, 16  ;;  %v5985_v25 = vshrl.u32 %v5974_v19, 16  ;;  %v340_v46 = vld [vmem:[%s5953_s8 + $0xa8] sm:$0xf] }
  0x1e   : > { %v5770_v23 = vld [vmem:[#allocation2 + $0x50] sm:$0xff]  ;;  %367 = vst.msk [vmem:[#allocation2 + $0x8] sm:$0xf] %vm364_vm1, %v300_v18  ;;  %v341_v50 = vld [vmem:[%s5953_s8 + $0xac] sm:$0xf]  ;;  %s5324_s13 = sshll.u32 %s8929_s12, 2 }
  0x1f   : > { %8614 = vst [vmem:[#allocation3_spill] sm:$0xff] %v5982_v24  ;;  %v8517_v28 = vrot.slane %v5982_v24, 1  ;;  %v5992_v29 = vshll.u32 %v5770_v23, 16  ;;  %v304_v53 = vld [vmem:[%s5953_s8 + $0x18] sm:$0xf]  ;;  %v6039_v59 = vshrl.u32 %v5770_v23, 16  ;;  %s6307_s16 = scalar_lea.vmem %s8510_s1, %s5324_s13 }
  0x20   : > { %8615 = vst [vmem:[#allocation4_spill] sm:$0xff] %v5985_v25  ;;  %v5778_v30 = vld [vmem:[#allocation2 + $0x90] sm:$0xff]  ;;  %v305_v56 = vld [vmem:[%s5953_s8 + $0x1c] sm:$0xf]  ;;  %v352_v60 = vld [vmem:[%s5953_s8 + $0xd8] sm:$0xf] }
  0x21   : > { %368 = vst.msk [vmem:[#allocation2 + $0xc] sm:$0xf] %vm364_vm1, %v301_v20  ;;  %v773_v33 = vor.u32 %v5985_v25, %v8517_v28  ;;  %v777_v34 = vrot.slane %v5992_v29, 1  ;;  %v6002_v36 = vshll.u32 %v5778_v30, 16  ;;  %v6004_v37 = vshrl.u32 %v5778_v30, 16  ;;  %s5326_s7 = sshll.u32 %s8931_s22, 2 }
  0x22   : > { %8616 = vst [vmem:[#allocation5_spill] sm:$0xff] %v5992_v29  ;;  %v5779_v35 = vld [vmem:[#allocation2 + $0x98] sm:$0xff]  ;;  %v354_v1 = vld [vmem:[%s5953_s8 + $0xe0] sm:$0xf]  ;;  %v355_v2 = vld [vmem:[%s5953_s8 + $0xe4] sm:$0xf]  ;;  %s7464_s10 = scalar_lea.vmem %s8513_s4, %s5326_s7 }
  0x23   : > { %387 = vst.msk [vmem:[#allocation2 + $0x58] sm:$0xf] %vm364_vm1, %v320_v21  ;;  %v778_v40 = vsel %vm694_vm2, %v773_v33, %v777_v34  ;;  %v8519_v41 = vrot.slane %v6002_v36, 1  ;;  %v6012_v42 = vshll.u32 %v5779_v35, 16  ;;  %v353_v63 = vld [vmem:[%s5953_s8 + $0xdc] sm:$0xf]  ;;  %v781_v5 = vor.u32 %v6039_v59, %v777_v34 }
  0x24   : > { %388 = vst.msk [vmem:[#allocation2 + $0x5c] sm:$0xf] %vm364_vm1, %v321_v22  ;;  %v6014_v43 = vld [vmem:[#allocation2] sm:$0xff]   ;;  %5458 = vmatmul.msk.bf16.vlgmr.msra.gmra.mxu1 %vm963_vm3, %v778_v40  ;;  %v324_v3 = vld [vmem:[%s5953_s8 + $0x68] sm:$0xf]  ;;  %v6059_v7 = vshrl.u32 %v5779_v35, 16 }
  0x25   : > { %8617 = vst [vmem:[#allocation6_spill] sm:$0xff] %v6002_v36  ;;  %v696_v44 = vshrl.u32 %v6014_v43, 16  ;;  %v698_v45 = vshll.u32 %v6014_v43, 16  ;;  %v845_v47 = vor.u32 %v6004_v37, %v8519_v41  ;;  %v849_v48 = vrot.slane %v6012_v42, 1  ;;  %v325_v4 = vld [vmem:[%s5953_s8 + $0x6c] sm:$0xf] }
  0x26   : > { %8618 = vst [vmem:[#allocation7_spill] sm:$0xff] %v6004_v37  ;;  %v342_v10 = vld [vmem:[%s5953_s8 + $0xb0] sm:$0xf]  ;;  %v343_v11 = vld [vmem:[%s5953_s8 + $0xb4] sm:$0xf]  ;;  %p293_p6 = scmp.lt.s32.totalorder %s5925_s19, 1 }
  0x27   : > { %405 = vst.msk [vmem:[#allocation2 + $0xa0] sm:$0xf] %vm364_vm1, %v338_v26  ;;  %v700_v51 = vrot.slane %v698_v45, 1  ;;  %v850_v54 = vsel %vm694_vm2, %v845_v47, %v849_v48  ;;  %v306_v14 = vld [vmem:[%s5953_s8 + $0x20] sm:$0xf]  ;;  %v853_v16 = vor.u32 %v6059_v7, %v849_v48 }
  0x28   : > { %406 = vst.msk [vmem:[#allocation2 + $0xa4] sm:$0xf] %vm364_vm1, %v339_v27  ;;  %v6026_v49 = vld [vmem:[#allocation2 + $0x8] sm:$0xff]   ;;  %5467 = vmatmul.msk.bf16.vlgmr.msra.gmra.mxu2 %vm963_vm3, %v850_v54  ;;  %v307_v18 = vld [vmem:[%s5953_s8 + $0x24] sm:$0xf]  ;;  %s8933_s19 = smov (!%p293_p6, %s5925_s19), 1 }
  0x29   : > { %8619 = vst [vmem:[#allocation8_spill] sm:$0xff] %v6012_v42  ;;  %v703_v52 = vshll.u32 %v6026_v49, 16  ;;  %v701_v57 = vor.u32 %v700_v51, %v696_v44  ;;  %v707_v12 = vshrl.u32 %v6026_v49, 16  ;;  %v356_v23 = vld [vmem:[%s5953_s8 + $0xe8] sm:$0xf]  ;;  %s5327_s22 = sshll.u32 %s8933_s19, 1 }
  0x2a   : > { %369 = vst.msk [vmem:[#allocation2 + $0x10] sm:$0xf] %vm364_vm1, %v302_v31  ;;  %v357_v33 = vld [vmem:[%s5953_s8 + $0xec] sm:$0xf]  ;;  %v326_v47 = vld [vmem:[%s5953_s8 + $0x70] sm:$0xf]  ;;  %s296_s13 = scalar_lea.vmem %s8514_s5, %s5327_s22 }
  0x2b   : > { %370 = vst.msk [vmem:[#allocation2 + $0x14] sm:$0xf] %vm364_vm1, %v303_v32  ;;  %v6034_v55 = vld [vmem:[#allocation2 + $0x58] sm:$0xff]  ;;  %v705_v58 = vrot.slane %v703_v52, 1  ;;  %v327_v48 = vld [vmem:[%s5953_s8 + $0x74] sm:$0xf] }
  0x2c   : > { %8620 = vst [vmem:[#allocation9_spill] sm:$0xff] %v6026_v49  ;;  %v6044_v61 = vshll.u32 %v6034_v55, 16  ;;  %v5549_v52 = vld [vmem:[%s8511_s2 + $0x6] sm:$0x3] }
  0x2d   : > { %389 = vst.msk [vmem:[#allocation2 + $0x60] sm:$0xf] %vm364_vm1, %v322_v38  ;;  %v706_v0 = vsel %vm694_vm2, %v701_v57, %v705_v58  ;;  %v709_v21 = vor.u32 %v707_v12, %v705_v58  ;;  %v345_v57 = vld [vmem:[%s5953_s8 + $0xbc] sm:$0xf] }
  0x2e   : > { %390 = vst.msk [vmem:[#allocation2 + $0x64] sm:$0xf] %vm364_vm1, %v323_v39  ;;  %5449 = vmatmul.msk.bf16.vlgmr.msra.gmra.mxu0 %vm963_vm3, %v706_v0  ;;  %v785_v6 = vrot.slane %v6044_v61, 1  ;;  %v6102_v39 = vshrl.u32 %v6034_v55, 16 }
  0x2f   : > { %407 = vst.msk [vmem:[#allocation2 + $0xa8] sm:$0xf] %vm364_vm1, %v340_v46  ;;  %v5780_v62 = vld [vmem:[#allocation2 + $0xa0] sm:$0xff] }
  0x30   : > { %8621 = vst [vmem:[#allocation10_spill] sm:$0xff] %v6039_v59  ;;  %v6061_v8 = vshll.u32 %v5780_v62, 16  ;;  %v786_v15 = vsel %vm694_vm2, %v781_v5, %v785_v6  ;;  %v789_v58 = vor.u32 %v6102_v39, %v785_v6 }
  0x31   : > { %408 = vst.msk [vmem:[#allocation2 + $0xac] sm:$0xf] %vm364_vm1, %v341_v50  ;;  %v6114_v50 = vshrl.u32 %v5780_v62, 16 }
  0x32   : > { %8622 = vst [vmem:[#allocation11_spill] sm:$0xff] %v6044_v61  ;;  %v6063_v9 = vld [vmem:[#allocation2 + $0x10] sm:$0xff]   ;;  %v857_v17 = vrot.slane %v6061_v8, 1 }
  0x33   : > { %371 = vst.msk [vmem:[#allocation2 + $0x18] sm:$0xf] %vm364_vm1, %v304_v53  ;;  %v8515_v13 = vshll.u32 %v6063_v9, 16  ;;  %v344_v53 = vld [vmem:[%s5953_s8 + $0xb8] sm:$0xf]  ;;  %v6410_v37 = vrot.slane %v6063_v9, 1 }
  0x34   : > { %372 = vst.msk [vmem:[#allocation2 + $0x1c] sm:$0xf] %vm364_vm1, %v305_v56  ;;  %5459 = vmatmul.msk.bf16.gmra.mxu1 %vm963_vm3, %v786_v15  ;;  %v858_v26 = vsel %vm694_vm2, %v853_v16, %v857_v17  ;;  %v1928_v56 = vsel %vm1063_vm0, %v5549_v52, 0  ;;  %v358_v16 = vld [vmem:[%s5953_s8 + $0xf0] sm:$0xf] }
  0x35   : > { %419 = vst.msk [vmem:[#allocation2 + $0xd8] sm:$0xf] %vm364_vm1, %v352_v60  ;;  %v713_v22 = vrot.slane %v8515_v13, 1  ;;  %v6087_v27 = vld [vmem:[#allocation2 + $0x60] sm:$0xff]  ;;  %1937 = vmatpush.bf16.msrb.mxu3 %v1928_v56 }
  0x36   : > { %420 = vst.msk [vmem:[#allocation2 + $0xdc] sm:$0xf] %vm364_vm1, %v353_v63  ;;  %v6105_v40 = vshll.u32 %v6087_v27, 16  ;;  %v308_v63 = vld [vmem:[%s5953_s8 + $0x28] sm:$0xf] }
  0x37   : > { %8623 = vst [vmem:[#allocation12_spill] sm:$0xff] %v6059_v7  ;;  %v714_v38 = vsel %vm694_vm2, %v709_v21, %v713_v22  ;;  %v347_v52 = vld [vmem:[%s5953_s8 + $0xc4] sm:$0xf] }
  0x38   : > { %8624 = vst [vmem:[#allocation13_spill] sm:$0xff] %v6061_v8  ;;  %5468 = vmatmul.msk.bf16.gmra.mxu2 %vm963_vm3, %v858_v26  ;;  %v5781_v44 = vld [vmem:[#allocation2 + $0xa8] sm:$0xff]  ;;  %v793_v60 = vrot.slane %v6105_v40, 1  ;;  %v6168_v26 = vshrl.u32 %v6087_v27, 16 }
  0x39   : > { %421 = vst.msk [vmem:[#allocation2 + $0xe0] sm:$0xf] %vm364_vm1, %v354_v1  ;;  %v6129_v62 = vshll.u32 %v5781_v44, 16  ;;  %v309_v1 = vld [vmem:[%s5953_s8 + $0x2c] sm:$0xf] }
  0x3a   : > { %422 = vst.msk [vmem:[#allocation2 + $0xe4] sm:$0xf] %vm364_vm1, %v355_v2  ;;  %v861_v2 = vor.u32 %v6114_v50, %v857_v17  ;;  %v794_v5 = vsel %vm694_vm2, %v789_v58, %v793_v60  ;;  %v359_v17 = vld [vmem:[%s5953_s8 + $0xf4] sm:$0xf] }
  0x3b   : > { %391 = vst.msk [vmem:[#allocation2 + $0x68] sm:$0xf] %vm364_vm1, %v324_v3  ;;  %v6121_v54 = vld [vmem:[#allocation2 + $0x18] sm:$0xff]  ;;  %v8516_v3 = vshrl.u32 %v6063_v9, 16  ;;  %v865_v6 = vrot.slane %v6129_v62, 1 }
  0x3c   : > { %392 = vst.msk [vmem:[#allocation2 + $0x6c] sm:$0xf] %vm364_vm1, %v325_v4  ;;  %v6139_v4 = vshll.u32 %v6121_v54, 16  ;;  %v311_v58 = vld [vmem:[%s5953_s8 + $0x34] sm:$0xf] }
  0x3d   : > { %409 = vst.msk [vmem:[#allocation2 + $0xb0] sm:$0xf] %vm364_vm1, %v342_v10  ;;  %v5787_v20 = vld [vmem:[#allocation2 + $0xd8] sm:$0xff]  ;;  %v717_v12 = vor.u32 %v8516_v3, %v713_v22 }
  0x3e   : > { %410 = vst.msk [vmem:[#allocation2 + $0xb4] sm:$0xf] %vm364_vm1, %v343_v11  ;;  %v6089_v31 = vshll.u32 %v5787_v20, 16  ;;  %v6091_v32 = vshrl.u32 %v5787_v20, 16  ;;  %5450 = vmatmul.msk.bf16.gmra.mxu0 %vm963_vm3, %v714_v38  ;;  %v328_v38 = vld [vmem:[%s5953_s8 + $0x78] sm:$0xf] }
  0x3f   : > { %373 = vst.msk [vmem:[#allocation2 + $0x20] sm:$0xf] %vm364_vm1, %v306_v14  ;;  %v721_v14 = vrot.slane %v6139_v4, 1 }
  0x40   : > { %374 = vst.msk [vmem:[#allocation2 + $0x24] sm:$0xf] %vm364_vm1, %v307_v18  ;;  %v8518_v34 = vrot.slane %v6089_v31, 1  ;;  %v866_v18 = vsel %vm694_vm2, %v861_v2, %v865_v6 }
  0x41   : > { %v5788_v30 = vld [vmem:[#allocation2 + $0xe0] sm:$0xff]  ;;  %8625 = vst [vmem:[#allocation14_spill] sm:$0xff] %v6089_v31  ;;  %v722_v22 = vsel %vm694_vm2, %v717_v12, %v721_v14 }
  0x42   : > { %8626 = vst [vmem:[#allocation15_spill] sm:$0xff] %v6091_v32  ;;  %v6096_v35 = vshll.u32 %v5788_v30, 16  ;;  %v917_v45 = vor.u32 %v6091_v32, %v8518_v34  ;;  %v6144_v10 = vshrl.u32 %v5788_v30, 16 }
  0x43   : > { %423 = vst.msk [vmem:[#allocation2 + $0xe8] sm:$0xf] %vm364_vm1, %v356_v23  ;;  %v6153_v15 = vld [vmem:[#allocation2 + $0x68] sm:$0xff] }
  0x44   : > { %8627 = vst [vmem:[#allocation16_spill] sm:$0xff] %v6096_v35  ;;  %v921_v46 = vrot.slane %v6096_v35, 1  ;;  %5460 = vmatmul.msk.bf16.gmra.mxu1 %vm963_vm3, %v794_v5  ;;  %v6165_v23 = vshll.u32 %v6153_v15, 16 }
  0x45   : > { %424 = vst.msk [vmem:[#allocation2 + $0xec] sm:$0xf] %vm364_vm1, %v357_v33  ;;  %v5782_v30 = vld [vmem:[#allocation2 + $0xb0] sm:$0xff] }
  0x46   : > { %8628 = vst [vmem:[#allocation17_spill] sm:$0xff] %v6114_v50  ;;  %v922_v51 = vsel %vm694_vm2, %v917_v45, %v921_v46  ;;  %v925_v20 = vor.u32 %v6144_v10, %v921_v46  ;;  %v329_v45 = vld [vmem:[%s5953_s8 + $0x7c] sm:$0xf]  ;;  %v6174_v46 = vshrl.u32 %v5781_v44, 16  ;;  %v6185_v56 = vshll.u32 %v5782_v30, 16 }
  0x47   : > { %5476 = vmatmul.msk.bf16.vlgmr.msra.gmra.mxu3 %vm963_vm3, %v922_v51  ;;  %393 = vst.msk [vmem:[#allocation2 + $0x70] sm:$0xf] %vm364_vm1, %v326_v47  ;;  %v346_v47 = vld [vmem:[%s5953_s8 + $0xc0] sm:$0xf]  ;;  %v310_v44 = vld [vmem:[%s5953_s8 + $0x30] sm:$0xf] }
  0x48   : > { %8629 = vst [vmem:[#allocation18_spill] sm:$0xff] %v6129_v62  ;;  %5469 = vmatmul.msk.bf16.gmra.mxu2 %vm963_vm3, %v866_v18  ;;  %v6179_v51 = vld [vmem:[#allocation2 + $0x20] sm:$0xff]  ;;  %v873_v5 = vrot.slane %v6185_v56, 1 }
  0x49   : > { %394 = vst.msk [vmem:[#allocation2 + $0x74] sm:$0xf] %vm364_vm1, %v327_v48  ;;  %v801_v48 = vrot.slane %v6165_v23, 1 }
  0x4a   : > { %411 = vst.msk [vmem:[#allocation2 + $0xb8] sm:$0xf] %vm364_vm1, %v344_v53  ;;  %v797_v53 = vor.u32 %v6168_v26, %v793_v60  ;;  %v6197_v60 = vshll.u32 %v6179_v51, 16 }
  0x4b   : > { %412 = vst.msk [vmem:[#allocation2 + $0xbc] sm:$0xf] %vm364_vm1, %v345_v57 }
  0x4c   : > { %v5789_v0 = vld [vmem:[#allocation2 + $0xe8] sm:$0xff]  ;;  %8630 = vst [vmem:[#allocation19_spill] sm:$0xff] %v6139_v4  ;;  %v802_v2 = vsel %vm694_vm2, %v797_v53, %v801_v48  ;;  %v729_v18 = vrot.slane %v6197_v60, 1  ;;  %v330_v53 = vld [vmem:[%s5953_s8 + $0x80] sm:$0xf] }
  0x4d   : > { %375 = vst.msk [vmem:[#allocation2 + $0x28] sm:$0xf] %vm364_vm1, %v308_v63  ;;  %v6146_v11 = vshll.u32 %v5789_v0, 16  ;;  %v869_v63 = vor.u32 %v6174_v46, %v865_v6  ;;  %v6202_v12 = vshrl.u32 %v5789_v0, 16 }
  0x4e   : > { %8631 = vst [vmem:[#allocation20_spill] sm:$0xff] %v6144_v10  ;;  %5451 = vmatmul.msk.bf16.gmra.mxu0 %vm963_vm3, %v722_v22  ;;  %v361_v22 = vld [vmem:[%s5953_s8 + $0xfc] sm:$0xf]  ;;  %v431_v10 = vld [vmem:[%s6307_s16] sm:$0xf] }
  0x4f   : > { %8632 = vst [vmem:[#allocation21_spill] sm:$0xff] %v6146_v11  ;;  %v929_v21 = vrot.slane %v6146_v11, 1 }
  0x50   : > { %376 = vst.msk [vmem:[#allocation2 + $0x2c] sm:$0xf] %vm364_vm1, %v309_v1  ;;  %v6194_v1 = vshrl.u32 %v6121_v54, 16 }
  0x51   : > { %425 = vst.msk [vmem:[#allocation2 + $0xf0] sm:$0xf] %vm364_vm1, %v358_v16  ;;  %v930_v33 = vsel %vm694_vm2, %v925_v20, %v929_v21  ;;  %v360_v20 = vld [vmem:[%s5953_s8 + $0xf8] sm:$0xf]  ;;  %v933_v0 = vor.u32 %v6202_v12, %v929_v21 }
  0x52   : > { %426 = vst.msk [vmem:[#allocation2 + $0xf4] sm:$0xf] %vm364_vm1, %v359_v17  ;;  %v6206_v17 = vld [vmem:[#allocation2 + $0x70] sm:$0xff]  ;;  %v725_v6 = vor.u32 %v6194_v1, %v721_v14  ;;  %v5783_v21 = vld [vmem:[#allocation2 + $0xb8] sm:$0xff] }
  0x53   : > { %8633 = vst [vmem:[#allocation22_spill] sm:$0xff] %v6174_v46 }
  0x54   : > { %395 = vst.msk [vmem:[#allocation2 + $0x78] sm:$0xf] %vm364_vm1, %v328_v38  ;;  %5461 = vmatmul.msk.bf16.gmra.mxu1 %vm963_vm3, %v802_v2  ;;  %v730_v14 = vsel %vm694_vm2, %v725_v6, %v729_v18  ;;  %v6232_v2 = vshrl.u32 %v5782_v30, 16  ;;  %v349_v6 = vld [vmem:[%s5953_s8 + $0xcc] sm:$0xf] }
  0x55   : > { %396 = vst.msk [vmem:[#allocation2 + $0x7c] sm:$0xf] %vm364_vm1, %v329_v45  ;;  %v6219_v45 = vshll.u32 %v6206_v17, 16  ;;  %v313_v30 = vld [vmem:[%s5953_s8 + $0x3c] sm:$0xf] }
  0x56   : > { %8634 = vst [vmem:[#allocation23_spill] sm:$0xff] %v6185_v56 }
  0x57   : > { %5477 = vmatmul.msk.bf16.gmra.mxu3 %vm963_vm3, %v930_v33  ;;  %413 = vst.msk [vmem:[#allocation2 + $0xc0] sm:$0xf] %vm364_vm1, %v346_v47  ;;  %v874_v33 = vsel %vm694_vm2, %v869_v63, %v873_v5  ;;  %v6224_v47 = vshrl.u32 %v6153_v15, 16  ;;  %v809_v63 = vrot.slane %v6219_v45, 1 }
  0x58   : > { %414 = vst.msk [vmem:[#allocation2 + $0xc4] sm:$0xf] %vm364_vm1, %v347_v52  ;;  %5470 = vmatmul.msk.bf16.gmra.mxu2 %vm963_vm3, %v874_v33 }
  0x59   : > { %v5790_v57 = vld [vmem:[#allocation2 + $0xf0] sm:$0xff]  ;;  %377 = vst.msk [vmem:[#allocation2 + $0x30] sm:$0xf] %vm364_vm1, %v310_v44  ;;  %v331_v44 = vld [vmem:[%s5953_s8 + $0x84] sm:$0xf]  ;;  %v805_v33 = vor.u32 %v6224_v47, %v801_v48 }
  0x5a   : > { %8635 = vst [vmem:[#allocation24_spill] sm:$0xff] %v6194_v1  ;;  %v6204_v16 = vshll.u32 %v5790_v57, 16 }
  0x5b   : > { %8636 = vst [vmem:[#allocation25_spill] sm:$0xff] %v6197_v60 }
  0x5c   : > { %378 = vst.msk [vmem:[#allocation2 + $0x34] sm:$0xf] %vm364_vm1, %v311_v58  ;;  %v937_v38 = vrot.slane %v6204_v16, 1  ;;  %v348_v58 = vld [vmem:[%s5953_s8 + $0xc8] sm:$0xf] }
  0x5d   : > { %8637 = vst [vmem:[#allocation26_spill] sm:$0xff] %v6202_v12 }
  0x5e   : > { %8638 = vst [vmem:[#allocation27_spill] sm:$0xff] %v6204_v16  ;;  %v938_v52 = vsel %vm694_vm2, %v933_v0, %v937_v38  ;;  %5452 = vmatmul.msk.bf16.gmra.mxu0 %vm963_vm3, %v730_v14  ;;  %v6243_v0 = vshll.u32 %v5783_v21, 16 }
  0x5f   : > { %427 = vst.msk [vmem:[#allocation2 + $0xf8] sm:$0xf] %vm364_vm1, %v360_v20  ;;  %v6234_v20 = vld [vmem:[#allocation2 + $0x28] sm:$0xff] }
  0x60   : > { %428 = vst.msk [vmem:[#allocation2 + $0xfc] sm:$0xf] %vm364_vm1, %v361_v22  ;;  %v312_v22 = vld [vmem:[%s5953_s8 + $0x38] sm:$0xf]  ;;  %v6254_v48 = vshll.u32 %v6234_v20, 16 }
  0x61   : > { %8639 = vst [vmem:[#allocation28_spill] sm:$0xff] %v6232_v2 }
  0x62   : > { %397 = vst.msk [vmem:[#allocation2 + $0x80] sm:$0xf] %vm364_vm1, %v330_v53  ;;  %v6251_v53 = vshrl.u32 %v6179_v51, 16  ;;  %v737_v3 = vrot.slane %v6254_v48, 1 }
  0x63   : > { %398 = vst.msk [vmem:[#allocation2 + $0x84] sm:$0xf] %vm364_vm1, %v331_v44  ;;  %v810_v44 = vsel %vm694_vm2, %v805_v33, %v809_v63  ;;  %v363_v33 = vld [vmem:[%s5953_s8 + $0x104] sm:$0xf] }
  0x64   : > { %8640 = vst [vmem:[#allocation29_spill] sm:$0xff] %v6243_v0  ;;  %5462 = vmatmul.msk.bf16.gmra.mxu1 %vm963_vm3, %v810_v44 }
  0x65   : > { %415 = vst.msk [vmem:[#allocation2 + $0xc8] sm:$0xf] %vm364_vm1, %v348_v58  ;;  %v881_v58 = vrot.slane %v6243_v0, 1 }
  0x66   : > { %416 = vst.msk [vmem:[#allocation2 + $0xcc] sm:$0xf] %vm364_vm1, %v349_v6  ;;  %v6259_v6 = vshrl.u32 %v5790_v57, 16 }
  0x67   : > { %5478 = vmatmul.msk.bf16.gmra.mxu3 %vm963_vm3, %v938_v52  ;;  %v5791_v14 = vld [vmem:[#allocation2 + $0xf8] sm:$0xff]  ;;  %379 = vst.msk [vmem:[#allocation2 + $0x38] sm:$0xf] %vm364_vm1, %v312_v22  ;;  %v877_v52 = vor.u32 %v6232_v2, %v873_v5  ;;  %v733_v5 = vor.u32 %v6251_v53, %v729_v18 }
  0x68   : > { %8641 = vst [vmem:[#allocation30_spill] sm:$0xff] %v6251_v53  ;;  %v6261_v13 = vshll.u32 %v5791_v14, 16  ;;  %v6263_v22 = vld [vmem:[#allocation2 + $0x78] sm:$0xff]  ;;  %v941_v57 = vor.u32 %v6259_v6, %v937_v38  ;;  %v5784_v38 = vld [vmem:[#allocation2 + $0xc0] sm:$0xff] }
  0x69   : > { %8642 = vst [vmem:[#allocation31_spill] sm:$0xff] %v6254_v48  ;;  %v882_v28 = vsel %vm694_vm2, %v877_v52, %v881_v58  ;;  %v6276_v44 = vshll.u32 %v6263_v22, 16  ;;  %v738_v18 = vsel %vm694_vm2, %v733_v5, %v737_v3  ;;  %v6281_v52 = vshrl.u32 %v6206_v17, 16  ;;  %v351_v5 = vld [vmem:[%s5953_s8 + $0xd4] sm:$0xf] }
  0x6a   : > { %380 = vst.msk [vmem:[#allocation2 + $0x3c] sm:$0xf] %vm364_vm1, %v313_v30  ;;  %v362_v30 = vld [vmem:[%s5953_s8 + $0x100] sm:$0xf]  ;;  %v945_v34 = vrot.slane %v6261_v13, 1  ;;  %5471 = vmatmul.msk.bf16.gmra.mxu2 %vm963_vm3, %v882_v28  ;;  %v6291_v28 = vld [vmem:[#allocation2 + $0x30] sm:$0xff] }
  0x6b   : > { %8643 = vst [vmem:[#allocation32_spill] sm:$0xff] %v6259_v6  ;;  %v817_v16 = vrot.slane %v6276_v44, 1  ;;  %v6289_v6 = vshrl.u32 %v5783_v21, 16  ;;  %v813_v11 = vor.u32 %v6281_v52, %v809_v63  ;;  %v6299_v12 = vshll.u32 %v5784_v38, 16  ;;  %v315_v21 = vld [vmem:[%s5953_s8 + $0x44] sm:$0xf] }
  0x6c   : > { %8644 = vst [vmem:[#allocation33_spill] sm:$0xff] %v6261_v13  ;;  %v946_v41 = vsel %vm694_vm2, %v941_v57, %v945_v34  ;;  %v332_v13 = vld [vmem:[%s5953_s8 + $0x88] sm:$0xf]  ;;  %v314_v57 = vld [vmem:[%s5953_s8 + $0x40] sm:$0xf]  ;;  %v6315_v63 = vshll.u32 %v6291_v28, 16 }
  0x6d   : > { %429 = vst.msk [vmem:[#allocation2 + $0x100] sm:$0xf] %vm364_vm1, %v362_v30  ;;  %v333_v30 = vld [vmem:[%s5953_s8 + $0x8c] sm:$0xf] }
  0x6e   : > { %430 = vst.msk [vmem:[#allocation2 + $0x104] sm:$0xf] %vm364_vm1, %v363_v33  ;;  %v350_v33 = vld [vmem:[%s5953_s8 + $0xd0] sm:$0xf]  ;;  %5453 = vmatmul.msk.bf16.gmra.mxu0 %vm963_vm3, %v738_v18 }
  0x6f   : > { %8645 = vst [vmem:[#allocation34_spill] sm:$0xff] %v6289_v6 }
  0x70   : > { %399 = vst.msk [vmem:[#allocation2 + $0x88] sm:$0xf] %vm364_vm1, %v332_v13  ;;  %v6312_v13 = vshrl.u32 %v6234_v20, 16 }
  0x71   : > { %400 = vst.msk [vmem:[#allocation2 + $0x8c] sm:$0xf] %vm364_vm1, %v333_v30  ;;  %v818_v30 = vsel %vm694_vm2, %v813_v11, %v817_v16 }
  0x72   : > { %8646 = vst [vmem:[#allocation35_spill] sm:$0xff] %v6299_v12 }
  0x73   : > { %417 = vst.msk [vmem:[#allocation2 + $0xd0] sm:$0xf] %vm364_vm1, %v350_v33  ;;  %v889_v33 = vrot.slane %v6299_v12, 1 }
  0x74   : > { %418 = vst.msk [vmem:[#allocation2 + $0xd4] sm:$0xf] %vm364_vm1, %v351_v5  ;;  %v6320_v5 = vshrl.u32 %v5791_v14, 16  ;;  %5463 = vmatmul.msk.bf16.gmra.mxu1 %vm963_vm3, %v818_v30 }
  0x75   : > { %v5792_v18 = vld [vmem:[#allocation2 + $0x100] sm:$0xff]  ;;  %381 = vst.msk [vmem:[#allocation2 + $0x40] sm:$0xf] %vm364_vm1, %v314_v57  ;;  %v745_v57 = vrot.slane %v6315_v63, 1 }
  0x76   : > { %8647 = vst [vmem:[#allocation36_spill] sm:$0xff] %v6312_v13  ;;  %v6322_v35 = vshll.u32 %v5792_v18, 16  ;;  %v949_v11 = vor.u32 %v6320_v5, %v945_v34  ;;  %v6344_v34 = vshrl.u32 %v5784_v38, 16  ;;  %v6364_v2 = vshrl.u32 %v5792_v18, 16 }
  0x77   : > { %5479 = vmatmul.msk.bf16.gmra.mxu3 %vm963_vm3, %v946_v41  ;;  %v885_v41 = vor.u32 %v6289_v6, %v881_v58  ;;  %8648 = vst [vmem:[#allocation37_spill] sm:$0xff] %v6315_v63  ;;  %v741_v58 = vor.u32 %v6312_v13, %v737_v3  ;;  %v5785_v3 = vld [vmem:[#allocation2 + $0xc8] sm:$0xff] }
  0x78   : > { %382 = vst.msk [vmem:[#allocation2 + $0x44] sm:$0xf] %vm364_vm1, %v315_v21  ;;  %v6330_v21 = vld [vmem:[#allocation2 + $0x80] sm:$0xff]  ;;  %v953_v14 = vrot.slane %v6322_v35, 1  ;;  %v6371_v62 = vld [vmem:[#allocation2 + $0x88] sm:$0xff] }
  0x79   : > { %8649 = vst [vmem:[#allocation38_spill] sm:$0xff] %v6320_v5  ;;  %v890_v32 = vsel %vm694_vm2, %v885_v41, %v889_v33  ;;  %v746_v12 = vsel %vm694_vm2, %v741_v58, %v745_v57  ;;  %v6340_v30 = vshll.u32 %v6330_v21, 16  ;;  %v6351_v5 = vshll.u32 %v5785_v3, 16 }
  0x7a   : > { %8650 = vst [vmem:[#allocation39_spill] sm:$0xff] %v6322_v35  ;;  %5472 = vmatmul.msk.bf16.gmra.mxu2 %vm963_vm3, %v890_v32  ;;  %v954_v0 = vsel %vm694_vm2, %v949_v11, %v953_v14  ;;  %v6346_v35 = vld [vmem:[#allocation2 + $0x38] sm:$0xff]  ;;  %v893_v11 = vor.u32 %v6344_v34, %v889_v33  ;;  %v957_v46 = vor.u32 %v6364_v2, %v953_v14  ;;  %v6385_v14 = vshrl.u32 %v5785_v3, 16 }
  0x7b   : > { %437 = vst.msk [vmem:[#allocation2 + $0x108] sm:$0xf] %vm364_vm1, %v431_v10  ;;  %v6337_v10 = vshrl.u32 %v6263_v22, 16  ;;  %v825_v58 = vrot.slane %v6340_v30, 1 }
  0x7c   : > { %8651 = vst [vmem:[#allocation40_spill] sm:$0xff] %v6340_v30 }
  0x7d   : > { %8652 = vst [vmem:[#allocation41_spill] sm:$0xff] %v6344_v34  ;;  %v821_v32 = vor.u32 %v6337_v10, %v817_v16 }
  0x7e   : > { %5454 = vmatmul.msk.bf16.gmra.mxu0 %vm963_vm3, %v746_v12  ;;  %8653 = vst [vmem:[#allocation42_spill] sm:$0xff] %v6351_v5  ;;  %v6360_v12 = vshll.u32 %v6346_v35, 16 }
  0x7f   : > { %v826_v38 = vsel %vm694_vm2, %v821_v32, %v825_v58  ;;  %8657 = vst [vmem:[#allocation46_spill] sm:$0xff] %v6364_v2  ;;  %v6377_v32 = vshrl.u32 %v6330_v21, 16  ;;  %v8573_v2 = vunpack.c.h.b16 %v6026_v49 }
  0x80   : > { %8656 = vst [vmem:[#allocation45_spill] sm:$0xff] %v6360_v12  ;;  %v753_v33 = vrot.slane %v6360_v12, 1 }
  0x81   : > { %8658 = vst [vmem:[#allocation47_spill] sm:$0xff] %v6377_v32 }
  0x82   : > { %v509_v41 = vld [vmem:[#allocation2 + $0x108] sm:$0x1]  ;;  %8660 = vst [vmem:[#allocation49_spill] sm:$0xff] %v6385_v14 }
  0x83   : > { %v659_v6 = vunpack.c.l.b16 %v509_v41  ;;  %v6357_v41 = vshrl.u32 %v6291_v28, 16 }
  0x84   : > { %5464 = vmatmul.msk.bf16.gmra.mxu1 %vm963_vm3, %v826_v38  ;;  %v6380_v38 = vshll.u32 %v6371_v62, 16 }
  0x85   : > { %v6353_v56 = vpack.c.b16 %v659_v6, %v659_v6  ;;  %8655 = vst [vmem:[#allocation44_spill] sm:$0xff] %v6357_v41  ;;  %v749_v6 = vor.u32 %v6357_v41, %v745_v57  ;;  %v5786_v57 = vld [vmem:[#allocation2 + $0xd0] sm:$0xff] }
  0x86   : > { %8659 = vst [vmem:[#allocation48_spill] sm:$0xff] %v6380_v38 }
  0x87   : > { %5480 = vmatmul.msk.bf16.gmra.mxu3 %vm963_vm3, %v954_v0  ;;  %8654 = vst [vmem:[#allocation43_spill] sm:$0xff] %v6353_v56  ;;  %v897_v0 = vrot.slane %v6351_v5, 1  ;;  %v959_v16 = vshll.u32 %v6353_v56, 16  ;;  %v754_v18 = vsel %vm694_vm2, %v749_v6, %v753_v33  ;;  %v829_v5 = vor.u32 %v6377_v32, %v825_v58 }
  0x88   : > { %v6391_v6 = vshll.u32 %v5786_v57, 16 }
  0x89   : > { %v898_v34 = vsel %vm694_vm2, %v893_v11, %v897_v0  ;;  %v961_v8 = vrot.slane %v959_v16, 1  ;;  %v511_v11 = vld [vmem:[#allocation2 + $0x8] sm:$0xe]  ;;  %v6387_v16 = vld [vmem:[#allocation2 + $0x40] sm:$0xff]  ;;  %v901_v58 = vor.u32 %v6385_v14, %v897_v0  ;;  %v6418_v0 = vshrl.u32 %v6371_v62, 16 }
  0x8a   : > { %5473 = vmatmul.msk.bf16.gmra.mxu2 %vm963_vm3, %v898_v34  ;;  %v833_v34 = vrot.slane %v6380_v38, 1  ;;  %8661 = vst [vmem:[#allocation50_spill] sm:$0xff] %v6391_v6  ;;  %v1905_v50 = vunpack.c.l.b16 %v511_v11  ;;  %v1495_v14 = vrot.slane %v6121_v54, 1 }
  0x8b   : > { %v962_v56 = vsel %vm694_vm2, %v957_v46, %v961_v8  ;;  %v6395_v8 = vshrl.u32 %v6346_v35, 16  ;;  %v6398_v46 = vshll.u32 %v6387_v16, 16  ;;  %8664 = vst [vmem:[#allocation53_spill] sm:$0xff] %v6418_v0 }
  0x8c   : > { %v834_v3 = vsel %vm694_vm2, %v829_v5, %v833_v34 }
  0x8d   : > { %8662 = vst [vmem:[#allocation51_spill] sm:$0xff] %v6395_v8  ;;  %v757_v42 = vor.u32 %v6395_v8, %v753_v33  ;;  %v761_v11 = vrot.slane %v6398_v46, 1 }
  0x8e   : > { %5455 = vmatmul.msk.bf16.gmra.mxu0 %vm963_vm3, %v754_v18  ;;  %8663 = vst [vmem:[#allocation52_spill] sm:$0xff] %v6398_v46  ;;  %v905_v18 = vrot.slane %v6391_v6, 1 }
  0x8f   : > { %v762_v5 = vsel %vm694_vm2, %v757_v42, %v761_v11  ;;  %v5621_v42 = vld [vmem:[%s8511_s2 + $0xa] sm:$0x3] }
  0x90   : > { %v906_v7 = vsel %vm694_vm2, %v901_v58, %v905_v18 }
  0x94   : > { %5465 = vmatmul.msk.bf16.gmra.mxu1 %vm963_vm3, %v834_v3 }
  0x97   : > { %5481 = vmatmul.msk.bf16.gmra.mxu3 %vm963_vm3, %v962_v56  ;;  %v1909_v56 = vpack.c.b16 %v8573_v2, %v1905_v50  ;;  %v5655_v50 = vld [vmem:[%s8511_s2 + $0xc] sm:$0x3]  ;;  %v2841_v2 = vsel %vm1063_vm0, %v5621_v42, 0 }
  0x98   : > { %v3112_v3 = vsel %vm1063_vm0, %v5655_v50, 0  ;;  %v6434_v50 = vshrl.u32 %v5786_v57, 16  ;;  %2850 = vmatpush.bf16.msra.mxu1 %v2841_v2 }
  0x99   : > { %v1912_v38 = vrot.slane %v1909_v56, 1  ;;  %3121 = vmatpush.bf16.msra.mxu2 %v3112_v3  ;;  %v5727_v3 = vld [vmem:[%s8511_s2 + $0x10] sm:$0x3] }
  0x9a   : > { %5474 = vmatmul.msk.bf16.gmra.mxu2 %vm963_vm3, %v906_v7  ;;  %v5693_v7 = vld [vmem:[%s8511_s2 + $0xe] sm:$0x3]  ;;  %8665 = vst [vmem:[#allocation54_spill] sm:$0xff] %v6434_v50  ;;  %v909_v42 = vor.u32 %v6434_v50, %v905_v18  ;;  %v4025_v57 = vsel %vm1063_vm0, %v5727_v3, 0 }
  0x9b   : > { %v1913_v33 = vsel %vm1489_vm4, %v1912_v38, %v6410_v37  ;;  %v3610_v58 = vsel %vm1063_vm0, %v5693_v7, 0  ;;  %v837_v38 = vor.u32 %v6418_v0, %v833_v34  ;;  %4034 = vmatpush.bf16.msra.mxu0 %v4025_v57  ;;  %v8669_v34 = vrot.slane %v6089_v31, 1 }
  0x9c   : > { %3619 = vmatpush.bf16.msra.mxu3 %v3610_v58  ;;  %v2177_v57 = vshrl.u32 %v1909_v56, 16 }
  0x9d   : > { %v914_v58 = vsel %vm694_vm2, %v909_v42, %v8669_v34  ;;  %v2180_v34 = vshll.u32 %v1909_v56, 16 }
  0x9e   : > { %5456 = vmatmul.msk.bf16.gmra.mxu0 %vm963_vm3, %v762_v5  ;;  %v6437_v5 = vshrl.u32 %v6387_v16, 16  ;;  %v2179_v50 = vrot.slane %v2177_v57, 1  ;;  %v1497_v57 = vrot.slane %v6179_v51, 1 }
  0xa0   : > { %8666 = vst [vmem:[#allocation55_spill] sm:$0xff] %v6437_v5  ;;  %v765_v2 = vor.u32 %v6437_v5, %v761_v11  ;;  %v5809_v11 = vld [vmem:[#allocation2] sm:$0xf0] }
  0xa1   : > { %v6442_v6 = vpop.f32.mrf.mxu1 }
  0xa2   : > { %8667 = vst [vmem:[#allocation56_spill] sm:$0xff] %v6442_v6 }
  0xa7   : > { %5554 = vmatmul.msk.bf16.vlgmr.msrb.gmra.mxu3 %vm963_vm3, %v1913_v33  ;;  %v8668_v33 = vrot.slane %v6002_v36, 1  ;;  %v8674_v36 = vshll.u32 %v6063_v9, 16 }
  0xa9   : > { %v842_v7 = vsel %vm694_vm2, %v837_v38, %v8668_v33  ;;  %v8670_v38 = vrot.slane %v5982_v24, 1  ;;  %v6461_v3 = vpop.f32.mrf.mxu1  ;;  %v1496_v33 = vsel %vm1489_vm4, %v6410_v37, %v1495_v14  ;;  %v2185_v0 = vrot.slane %v8674_v36, 2 }
  0xaa   : > { %5466 = vmatmul.msk.bf16.gmra.mxu1 %vm963_vm3, %v842_v7  ;;  %5475 = vmatmul.msk.bf16.gmra.mxu2 %vm963_vm3, %v914_v58  ;;  %8671 = vst [vmem:[#allocation57_spill] sm:$0xff] %v6461_v3  ;;  %v5810_v7 = vld [vmem:[#allocation2] sm:$0xe] }
  0xab   : > { %v6455_v6 = vpop.f32.mrf.mxu0  ;;  %v770_v18 = vsel %vm694_vm2, %v765_v2, %v8670_v38  ;;  %v6466_v42 = vpop.f32.mrf.mxu2  ;;  %v5811_v58 = vor.u32 %v5810_v7, %v5809_v11  ;;  %v2182_v2 = vrot.slane %v2180_v34, 2  ;;  %v8673_v38 = vshrl.u32 %v6063_v9, 16 }
  0xac   : > { %8672 = vst [vmem:[#allocation58_spill] sm:$0xff] %v6466_v42  ;;  %v1491_v42 = vrot.slane %v6026_v49, 1 }
  0xad   : > { %v2184_v3 = vrot.slane %v8673_v38, 1  ;;  %v2183_v56 = vor.u32 %v2182_v2, %v2179_v50  ;;  %v1498_v38 = vsel %vm1489_vm4, %v1495_v14, %v1497_v57  ;;  %v2189_v2 = vrot.slane %v6139_v4, 2 }
  0xae   : > { %5457 = vmatmul.msk.bf16.gmra.mxu0 %vm963_vm3, %v770_v18  ;;  %v1490_v18 = vrot.slane %v5811_v58, 1 }
  0xaf   : > { %v2186_v11 = vor.u32 %v2185_v0, %v2184_v3  ;;  %v2188_v3 = vrot.slane %v6194_v1, 1 }
  0xb0   : > { %v1492_v7 = vsel %vm1489_vm4, %v1490_v18, %v1491_v42 }
  0xb1   : > { %v6475_v30 = vpop.f32.mrf.mxu1  ;;  %v2187_v36 = vsel %vm2175_vm5, %v2183_v56, %v2186_v11  ;;  %v2190_v14 = vor.u32 %v2189_v2, %v2188_v3  ;;  %v2192_v2 = vrot.slane %v6251_v53, 1 }
  0xb3   : > { %v6469_v31 = vpop.f32.mrf.mxu0  ;;  %v6478_v32 = vpop.f32.mrf.mxu2  ;;  %v2191_v4 = vsel %vm2175_vm5, %v2186_v11, %v2190_v14 }
  0xb4   : > { %8675 = vst [vmem:[#allocation59_spill] sm:$0xff] %v6478_v32 }
  0xb7   : > { %5555 = vmatmul.msk.bf16.gmra.mxu3 %vm963_vm3, %v1496_v33 }
  0xb9   : > { %v6488_v58 = vpop.f32.mrf.mxu1 }
  0xba   : > { %5482 = vmatmul.msk.bf16.vlgmr.msrb.gmra.mxu1 %vm963_vm3, %v6014_v43  ;;  %5516 = vmatmul.msk.bf16.vlgmr.msrb.gmra.mxu2 %vm963_vm3, %v1492_v7  ;;  %v1494_v7 = vsel %vm1489_vm4, %v1491_v42, %v6410_v37 }
  0xbb   : > { %v6484_v34 = vpop.f32.mrf.mxu0  ;;  %v6492_v43 = vpop.f32.mrf.mxu2 }
  0xbc   : > { %8676 = vst [vmem:[#allocation60_spill] sm:$0xff] %v6492_v43 }
  0xbe   : > { %5588 = vmatmul.msk.bf16.vlgmr.msrb.gmra.mxu0 %vm963_vm3, %v2187_v36  ;;  %v1499_v36 = vrot.slane %v6234_v20, 1 }
  0xc1   : > { %v6501_v18 = vpop.f32.mrf.mxu1 }
  0xc3   : > { %v6497_v50 = vpop.f32.mrf.mxu0  ;;  %v6503_v56 = vpop.f32.mrf.mxu2 }
  0xc4   : > { %8678 = vst [vmem:[#allocation62_spill] sm:$0xff] %v6503_v56  ;;  %v1500_v56 = vsel %vm1489_vm4, %v1497_v57, %v1499_v36  ;;  %v1501_v57 = vrot.slane %v6291_v28, 1 }
  0xc7   : > { %5556 = vmatmul.msk.bf16.gmra.mxu3 %vm963_vm3, %v1498_v38 }
  0xc9   : > { %v6516_v1 = vpop.f32.mrf.mxu1 }
  0xca   : > { %v6495_v0 = vpop.f32.mrf.mxu3  ;;  %5483 = vmatmul.msk.bf16.gmra.mxu1 %vm963_vm3, %v6026_v49  ;;  %5517 = vmatmul.msk.bf16.gmra.mxu2 %vm963_vm3, %v1494_v7  ;;  %v2193_v7 = vrot.slane %v6197_v60, 2  ;;  %v1502_v60 = vsel %vm1489_vm4, %v1499_v36, %v1501_v57 }
  0xcb   : > { %8677 = vst [vmem:[#allocation61_spill] sm:$0xff] %v6495_v0  ;;  %v6512_v43 = vpop.f32.mrf.mxu0  ;;  %v6520_v3 = vpop.f32.mrf.mxu2 }
  0xcc   : > { %8680 = vst [vmem:[#allocation64_spill] sm:$0xff] %v6520_v3 }
  0xce   : > { %5589 = vmatmul.msk.bf16.gmra.mxu0 %vm963_vm3, %v2191_v4  ;;  %v2194_v4 = vor.u32 %v2193_v7, %v2192_v2  ;;  %v2196_v7 = vrot.slane %v6312_v13, 1 }
  0xd2   : > { %v6510_v0 = vpop.f32.mrf.mxu3 }
  0xd3   : > { %8679 = vst [vmem:[#allocation63_spill] sm:$0xff] %v6510_v0  ;;  %v6525_v42 = vpop.f32.mrf.mxu0  ;;  %v6529_v0 = vpop.f32.mrf.mxu1 }
  0xd4   : > { %v6531_v11 = vpop.f32.mrf.mxu2 }
  0xd5   : > { %8682 = vst [vmem:[#allocation66_spill] sm:$0xff] %v6531_v11 }
  0xd7   : > { %5557 = vmatmul.msk.bf16.gmra.mxu3 %vm963_vm3, %v1500_v56 }
  0xda   : > { %v6523_v37 = vpop.f32.mrf.mxu3  ;;  %5484 = vmatmul.msk.bf16.gmra.mxu1 %vm963_vm3, %v6063_v9  ;;  %5518 = vmatmul.msk.bf16.gmra.mxu2 %vm963_vm3, %v1496_v33  ;;  %v2197_v33 = vrot.slane %v6254_v48, 2 }
  0xdb   : > { %8681 = vst [vmem:[#allocation65_spill] sm:$0xff] %v6523_v37  ;;  %v6538_v3 = vpop.f32.mrf.mxu0  ;;  %v2195_v37 = vsel %vm2175_vm5, %v2190_v14, %v2194_v4  ;;  %v6542_v53 = vpop.f32.mrf.mxu1 }
  0xdc   : > { %8684 = vst [vmem:[#allocation68_spill] sm:$0xff] %v6542_v53  ;;  %v6546_v11 = vpop.f32.mrf.mxu2  ;;  %v2198_v36 = vor.u32 %v2197_v33, %v2196_v7  ;;  %v2200_v33 = vrot.slane %v6357_v41, 1 }
  0xdd   : > { %8685 = vst [vmem:[#allocation69_spill] sm:$0xff] %v6546_v11 }
  0xde   : > { %5590 = vmatmul.msk.bf16.gmra.mxu0 %vm963_vm3, %v2195_v37  ;;  %v1503_v37 = vrot.slane %v6346_v35, 1 }
  0xe0   : > { %v1504_v48 = vsel %vm1489_vm4, %v1501_v57, %v1503_v37 }
  0xe2   : > { %v6536_v49 = vpop.f32.mrf.mxu3 }
  0xe3   : > { %8683 = vst [vmem:[#allocation67_spill] sm:$0xff] %v6536_v49  ;;  %v6551_v2 = vpop.f32.mrf.mxu0  ;;  %v6555_v49 = vpop.f32.mrf.mxu1 }
  0xe4   : > { %8687 = vst [vmem:[#allocation71_spill] sm:$0xff] %v6555_v49  ;;  %v6557_v14 = vpop.f32.mrf.mxu2 }
  0xe5   : > { %8688 = vst [vmem:[#allocation72_spill] sm:$0xff] %v6557_v14 }
  0xe7   : > { %5558 = vmatmul.msk.bf16.gmra.mxu3 %vm963_vm3, %v1502_v60 }
  0xea   : > { %v6549_v9 = vpop.f32.mrf.mxu3  ;;  %5485 = vmatmul.msk.bf16.gmra.mxu1 %vm963_vm3, %v6121_v54  ;;  %5519 = vmatmul.msk.bf16.gmra.mxu2 %vm963_vm3, %v1498_v38  ;;  %v2201_v38 = vrot.slane %v6315_v63, 2 }
  0xeb   : > { %8686 = vst [vmem:[#allocation70_spill] sm:$0xff] %v6549_v9  ;;  %v6564_v32 = vpop.f32.mrf.mxu0  ;;  %v2199_v9 = vsel %vm2175_vm5, %v2194_v4, %v2198_v36  ;;  %v6568_v13 = vpop.f32.mrf.mxu1 }
  0xec   : > { %8690 = vst [vmem:[#allocation74_spill] sm:$0xff] %v6568_v13  ;;  %v2202_v57 = vor.u32 %v2201_v38, %v2200_v33  ;;  %v2204_v38 = vrot.slane %v6395_v8, 1 }
  0xed   : > { %v6572_v14 = vpop.f32.mrf.mxu2 }
  0xee   : > { %5591 = vmatmul.msk.bf16.gmra.mxu0 %vm963_vm3, %v2199_v9  ;;  %8691 = vst [vmem:[#allocation75_spill] sm:$0xff] %v6572_v14  ;;  %v1505_v9 = vrot.slane %v6387_v16, 1 }
  0xf0   : > { %v1506_v63 = vsel %vm1489_vm4, %v1503_v37, %v1505_v9 }
  0xf2   : > { %v6562_v11 = vpop.f32.mrf.mxu3 }
  0xf3   : > { %8689 = vst [vmem:[#allocation73_spill] sm:$0xff] %v6562_v11  ;;  %v6577_v7 = vpop.f32.mrf.mxu0  ;;  %v6581_v11 = vpop.f32.mrf.mxu1 }
  0xf4   : > { %8693 = vst [vmem:[#allocation77_spill] sm:$0xff] %v6581_v11 }
  0xf5   : > { %v6583_v4 = vpop.f32.mrf.mxu2 }
  0xf6   : > { %8694 = vst [vmem:[#allocation78_spill] sm:$0xff] %v6583_v4 }
  0xf7   : > { %5559 = vmatmul.msk.bf16.gmra.mxu3 %vm963_vm3, %v1504_v48 }
  0xfa   : > { %v6575_v54 = vpop.f32.mrf.mxu3  ;;  %5486 = vmatmul.msk.bf16.gmra.mxu1 %vm963_vm3, %v6179_v51  ;;  %5520 = vmatmul.msk.bf16.gmra.mxu2 %vm963_vm3, %v1500_v56  ;;  %v2205_v56 = vrot.slane %v6360_v12, 2 }
  0xfb   : > { %8692 = vst [vmem:[#allocation76_spill] sm:$0xff] %v6575_v54  ;;  %v6590_v13 = vpop.f32.mrf.mxu0  ;;  %v2203_v54 = vsel %vm2175_vm5, %v2198_v36, %v2202_v57  ;;  %v6594_v41 = vpop.f32.mrf.mxu1 }
  0xfc   : > { %8696 = vst [vmem:[#allocation80_spill] sm:$0xff] %v6594_v41  ;;  %v2206_v37 = vor.u32 %v2205_v56, %v2204_v38  ;;  %v2208_v38 = vrot.slane %v6437_v5, 1 }
  0xfd   : > { %v6598_v4 = vpop.f32.mrf.mxu2 }
  0xfe   : > { %5592 = vmatmul.msk.bf16.gmra.mxu0 %vm963_vm3, %v2203_v54  ;;  %8697 = vst [vmem:[#allocation81_spill] sm:$0xff] %v6598_v4  ;;  %v1507_v54 = vrot.slane %v5974_v19, 1 }
 0x100   : > { %v1508_v12 = vsel %vm1489_vm4, %v1505_v9, %v1507_v54 }
 0x102   : > { %v6588_v14 = vpop.f32.mrf.mxu3 }
 0x103   : > { %8695 = vst [vmem:[#allocation79_spill] sm:$0xff] %v6588_v14  ;;  %v6603_v33 = vpop.f32.mrf.mxu0  ;;  %v6607_v14 = vpop.f32.mrf.mxu1 }
 0x104   : > { %8699 = vst [vmem:[#allocation83_spill] sm:$0xff] %v6607_v14 }
 0x105   : > { %v6609_v36 = vpop.f32.mrf.mxu2 }
 0x106   : > { %8700 = vst [vmem:[#allocation84_spill] sm:$0xff] %v6609_v36 }
 0x107   : > { %5560 = vmatmul.msk.bf16.gmra.mxu3 %vm963_vm3, %v1506_v63 }
 0x10a   : > { %v6601_v51 = vpop.f32.mrf.mxu3  ;;  %5487 = vmatmul.msk.bf16.gmra.mxu1 %vm963_vm3, %v6234_v20  ;;  %5521 = vmatmul.msk.bf16.gmra.mxu2 %vm963_vm3, %v1502_v60  ;;  %v2209_v60 = vrot.slane %v6398_v46, 2 }
 0x10b   : > { %8698 = vst [vmem:[#allocation82_spill] sm:$0xff] %v6601_v51  ;;  %v6616_v41 = vpop.f32.mrf.mxu0  ;;  %v2207_v51 = vsel %vm2175_vm5, %v2202_v57, %v2206_v37  ;;  %v6620_v8 = vpop.f32.mrf.mxu1 }
 0x10c   : > { %8702 = vst [vmem:[#allocation86_spill] sm:$0xff] %v6620_v8  ;;  %v2210_v9 = vor.u32 %v2209_v60, %v2208_v38 }
 0x10d   : > { %v6624_v36 = vpop.f32.mrf.mxu2 }
 0x10e   : > { %5593 = vmatmul.msk.bf16.gmra.mxu0 %vm963_vm3, %v2207_v51  ;;  %8703 = vst [vmem:[#allocation87_spill] sm:$0xff] %v6624_v36  ;;  %v6639_v51 = vld [vmem:[#allocation2 + $0x50] sm:$0xff]  ;;  %v2211_v46 = vsel %vm2175_vm5, %v2206_v37, %v2210_v9 }
 0x112   : > { %v6614_v4 = vpop.f32.mrf.mxu3 }
 0x113   : > { %8701 = vst [vmem:[#allocation85_spill] sm:$0xff] %v6614_v4  ;;  %v6629_v19 = vpop.f32.mrf.mxu0  ;;  %v6633_v56 = vpop.f32.mrf.mxu1  ;;  %v1509_v4 = vrot.slane %v6639_v51, 1 }
 0x114   : > { %8705 = vst [vmem:[#allocation89_spill] sm:$0xff] %v6633_v56  ;;  %v2213_v56 = vrot.slane %v5982_v24, 2 }
 0x115   : > { %v6635_v57 = vpop.f32.mrf.mxu2 }
 0x116   : > { %8706 = vst [vmem:[#allocation90_spill] sm:$0xff] %v6635_v57  ;;  %v1510_v57 = vsel %vm1489_vm4, %v1507_v54, %v1509_v4 }
 0x117   : > { %5561 = vmatmul.msk.bf16.gmra.mxu3 %vm963_vm3, %v1508_v12 }
 0x11a   : > { %v6627_v20 = vpop.f32.mrf.mxu3  ;;  %5488 = vmatmul.msk.bf16.gmra.mxu1 %vm963_vm3, %v6291_v28  ;;  %5522 = vmatmul.msk.bf16.gmra.mxu2 %vm963_vm3, %v1504_v48 }
 0x11b   : > { %8704 = vst [vmem:[#allocation88_spill] sm:$0xff] %v6627_v20  ;;  %v6644_v20 = vpop.f32.mrf.mxu0  ;;  %v6648_v5 = vpop.f32.mrf.mxu1 }
 0x11c   : > { %8708 = vst [vmem:[#allocation92_spill] sm:$0xff] %v6648_v5 }
 0x11d   : > { %v6652_v28 = vpop.f32.mrf.mxu2 }
 0x11e   : > { %5594 = vmatmul.msk.bf16.gmra.mxu0 %vm963_vm3, %v2211_v46  ;;  %8709 = vst [vmem:[#allocation93_spill] sm:$0xff] %v6652_v28  ;;  %v1511_v46 = vrot.slane %v6034_v55, 1 }
 0x120   : > { %v6673_v24 = vsel %vm1489_vm4, %v1509_v4, %v1511_v46 }
 0x122   : > { %v6642_v36 = vpop.f32.mrf.mxu3 }
 0x123   : > { %8707 = vst [vmem:[#allocation91_spill] sm:$0xff] %v6642_v36  ;;  %v6655_v60 = vpop.f32.mrf.mxu0  ;;  %v2212_v36 = vrot.slane %v5985_v25, 1 }
 0x125   : > { %v6661_v37 = vpop.f32.mrf.mxu2  ;;  %v2214_v54 = vor.u32 %v2213_v56, %v2212_v36  ;;  %v2216_v36 = vrot.slane %v6039_v59, 1 }
 0x126   : > { %8711 = vst [vmem:[#allocation95_spill] sm:$0xff] %v6661_v37 }
 0x127   : > { %5562 = vmatmul.msk.bf16.gmra.mxu3 %vm963_vm3, %v1510_v57  ;;  %v6659_v48 = vpop.f32.mrf.mxu1  ;;  %v2215_v8 = vsel %vm2175_vm5, %v2210_v9, %v2214_v54 }
 0x128   : > { %8710 = vst [vmem:[#allocation94_spill] sm:$0xff] %v6659_v48 }
 0x12a   : > { %v1939_v38 = vpop.f32.mrf.mxu3  ;;  %5489 = vmatmul.msk.bf16.gmra.mxu1 %vm963_vm3, %v6346_v35  ;;  %5523 = vmatmul.msk.bf16.gmra.mxu2 %vm963_vm3, %v1506_v63  ;;  %v2217_v63 = vrot.slane %v5992_v29, 2 }
 0x12b   : > { %v6666_v5 = vpop.f32.mrf.mxu0 }
 0x12c   : > { %v2218_v4 = vor.u32 %v2217_v63, %v2216_v36 }
 0x12d   : > { %v6676_v37 = vpop.f32.mrf.mxu2 }
 0x12e   : > { %5595 = vmatmul.msk.bf16.gmra.mxu0 %vm963_vm3, %v2215_v8  ;;  %8713 = vst [vmem:[#allocation97_spill] sm:$0xff] %v6676_v37  ;;  %v1513_v8 = vrot.slane %v6087_v27, 1  ;;  %v2219_v48 = vsel %vm2175_vm5, %v2214_v54, %v2218_v4  ;;  %v2221_v54 = vrot.slane %v6044_v61, 2 }
 0x12f   : > { %v6670_v25 = vpop.f32.mrf.mxu1 }
 0x130   : > { %8712 = vst [vmem:[#allocation96_spill] sm:$0xff] %v6670_v25  ;;  %v6692_v59 = vsel %vm1489_vm4, %v1511_v46, %v1513_v8 }
 0x132   : > { %v1941_v28 = vpop.f32.mrf.mxu3 }
 0x133   : > { %v6680_v35 = vpop.f32.mrf.mxu0 }
 0x135   : > { %v6684_v9 = vpop.f32.mrf.mxu2 }
 0x136   : > { %8714 = vst [vmem:[#allocation98_spill] sm:$0xff] %v6684_v9 }
 0x137   : > { %5563 = vmatmul.msk.bf16.gmra.mxu3 %vm963_vm3, %v6673_v24  ;;  %v1319_v56 = vpop.f32.mrf.mxu1 }
 0x138   : > { %v1320_v29 = vadd.f32 %v1319_v56, %v6455_v6 }
 0x13a   : > { %v1944_v55 = vpop.f32.mrf.mxu3  ;;  %5490 = vmatmul.msk.bf16.gmra.mxu1 %vm963_vm3, %v6387_v16  ;;  %5524 = vmatmul.msk.bf16.gmra.mxu2 %vm963_vm3, %v1508_v12  ;;  %v2220_v12 = vrot.slane %v6102_v39, 1 }
 0x13b   : > { %v2437_v25 = vpop.f32.mrf.mxu0 }
 0x13d   : > { %v1668_v9 = vpop.f32.mrf.mxu2 }
 0x13e   : > { %5596 = vmatmul.msk.bf16.gmra.mxu0 %vm963_vm3, %v2219_v48  ;;  %v1833_v11 = vadd.f32 %v1668_v9, %v1320_v29  ;;  %v5828_v48 = vld [vmem:[#allocation2 + $0x48] sm:$0xff]  ;;  %v2222_v29 = vor.u32 %v2221_v54, %v2220_v12  ;;  %v1515_v9 = vrot.slane %v6153_v15, 1 }
 0x13f   : > { %v1321_v14 = vpop.f32.mrf.mxu1 }
 0x140   : > { %v2104_v27 = vadd.f32 %v1939_v38, %v1833_v11  ;;  %v1322_v49 = vadd.f32 %v1321_v14, %v6469_v31  ;;  %v2223_v61 = vsel %vm2175_vm5, %v2218_v4, %v2222_v29  ;;  %v6710_v31 = vsel %vm1489_vm4, %v1513_v8, %v1515_v9 }
 0x141   : > { %v2224_v4 = vrot.slane %v6168_v26, 1 }
 0x142   : > { %v1946_v37 = vpop.f32.mrf.mxu3  ;;  %v6700_v63 = vadd.f32 %v2437_v25, %v2104_v27 }
 0x143   : > { %v2439_v36 = vpop.f32.mrf.mxu0 }
 0x145   : > { %v1670_v6 = vpop.f32.mrf.mxu2 }
 0x146   : > { %v1834_v56 = vadd.f32 %v1670_v6, %v1322_v49 }
 0x147   : > { %5564 = vmatmul.msk.bf16.gmra.mxu3 %vm963_vm3, %v6692_v59  ;;  %v1324_v46 = vpop.f32.mrf.mxu1 }
 0x148   : > { %v2105_v11 = vadd.f32 %v1941_v28, %v1834_v56  ;;  %v1325_v49 = vadd.f32 %v1324_v46, %v6484_v34  ;;  %v1517_v56 = vrot.slane %v6206_v17, 1 }
 0x14a   : > { %v1949_v16 = vpop.f32.mrf.mxu3  ;;  %5491 = vmatmul.msk.bf16.gmra.mxu1 %vm963_vm3, %v5828_v48  ;;  %5525 = vmatmul.msk.bf16.gmra.mxu2 %vm963_vm3, %v1510_v57  ;;  %v6707_v25 = vadd.f32 %v2439_v36, %v2105_v11  ;;  %v2225_v36 = vrot.slane %v6105_v40, 2 }
 0x14b   : > { %v2442_v53 = vpop.f32.mrf.mxu0 }
 0x14d   : > { %v1673_v14 = vpop.f32.mrf.mxu2 }
 0x14e   : > { %5597 = vmatmul.msk.bf16.gmra.mxu0 %vm963_vm3, %v2223_v61  ;;  %v1835_v12 = vadd.f32 %v1673_v14, %v1325_v49  ;;  %v2226_v61 = vor.u32 %v2225_v36, %v2224_v4 }
 0x14f   : > { %v1326_v27 = vpop.f32.mrf.mxu1 }
 0x150   : > { %v2106_v15 = vadd.f32 %v1944_v55, %v1835_v12  ;;  %v1327_v6 = vadd.f32 %v1326_v27, %v6497_v50  ;;  %v6730_v50 = vsel %vm1489_vm4, %v1515_v9, %v1517_v56 }
 0x152   : > { %v1951_v38 = vpop.f32.mrf.mxu3  ;;  %v6718_v54 = vadd.f32 %v2442_v53, %v2106_v15  ;;  %v2227_v53 = vsel %vm2175_vm5, %v2222_v29, %v2226_v61  ;;  %v2228_v29 = vrot.slane %v6224_v47, 1  ;;  %v2229_v15 = vrot.slane %v6165_v23, 2 }
 0x153   : > { %v2444_v57 = vpop.f32.mrf.mxu0 }
 0x155   : > { %v1675_v34 = vpop.f32.mrf.mxu2 }
 0x156   : > { %v1836_v46 = vadd.f32 %v1675_v34, %v1327_v6  ;;  %v2230_v6 = vor.u32 %v2229_v15, %v2228_v29  ;;  %v1519_v34 = vrot.slane %v6263_v22, 1 }
 0x157   : > { %5565 = vmatmul.msk.bf16.gmra.mxu3 %vm963_vm3, %v6710_v31  ;;  %v1329_v8 = vpop.f32.mrf.mxu1 }
 0x158   : > { %v2107_v55 = vadd.f32 %v1946_v37, %v1836_v46  ;;  %v1330_v27 = vadd.f32 %v1329_v8, %v6512_v43  ;;  %v5829_v8 = vld [vmem:[#allocation2 + $0x58] sm:$0xff] }
 0x15a   : > { %v1954_v28 = vpop.f32.mrf.mxu3  ;;  %5492 = vmatmul.msk.bf16.gmra.mxu1 %vm963_vm3, %v6639_v51  ;;  %5526 = vmatmul.msk.bf16.gmra.mxu2 %vm963_vm3, %v6673_v24  ;;  %v6727_v49 = vadd.f32 %v2444_v57, %v2107_v55 }
 0x15b   : > { %v2447_v11 = vpop.f32.mrf.mxu0 }
 0x15d   : > { %v1678_v51 = vpop.f32.mrf.mxu2 }
 0x15e   : > { %5598 = vmatmul.msk.bf16.gmra.mxu0 %vm963_vm3, %v2227_v53  ;;  %v1837_v17 = vadd.f32 %v1678_v51, %v1330_v27 }
 0x15f   : > { %v1331_v14 = vpop.f32.mrf.mxu1 }
 0x160   : > { %v2108_v37 = vadd.f32 %v1949_v16, %v1837_v17  ;;  %v1332_v4 = vadd.f32 %v1331_v14, %v6525_v42  ;;  %v6749_v42 = vsel %vm1489_vm4, %v1517_v56, %v1519_v34 }
 0x162   : > { %v1956_v48 = vpop.f32.mrf.mxu3  ;;  %v6738_v57 = vadd.f32 %v2447_v11, %v2108_v37  ;;  %v2231_v11 = vsel %vm2175_vm5, %v2226_v61, %v2230_v6  ;;  %v2232_v61 = vrot.slane %v6281_v52, 1 }
 0x163   : > { %v2449_v24 = vpop.f32.mrf.mxu0 }
 0x165   : > { %v1680_v43 = vpop.f32.mrf.mxu2 }
 0x166   : > { %v1838_v36 = vadd.f32 %v1680_v43, %v1332_v4  ;;  %v5830_v4 = vld [vmem:[#allocation2 + $0x60] sm:$0xff] }
 0x167   : > { %5566 = vmatmul.msk.bf16.gmra.mxu3 %vm963_vm3, %v6730_v50  ;;  %v1334_v9 = vpop.f32.mrf.mxu1 }
 0x168   : > { %v2109_v16 = vadd.f32 %v1951_v38, %v1838_v36  ;;  %v1335_v14 = vadd.f32 %v1334_v9, %v6538_v3  ;;  %v1521_v36 = vrot.slane %v6330_v21, 1 }
 0x16a   : > { %v1959_v12 = vpop.f32.mrf.mxu3  ;;  %5493 = vmatmul.msk.bf16.gmra.mxu1 %vm963_vm3, %v5829_v8  ;;  %5527 = vmatmul.msk.bf16.gmra.mxu2 %vm963_vm3, %v6692_v59  ;;  %v6746_v53 = vadd.f32 %v2449_v24, %v2109_v16  ;;  %v2233_v24 = vrot.slane %v6219_v45, 2 }
 0x16b   : > { %v2452_v55 = vpop.f32.mrf.mxu0 }
 0x16c   : > { %v2234_v43 = vor.u32 %v2233_v24, %v2232_v61 }
 0x16d   : > { %v1683_v51 = vpop.f32.mrf.mxu2 }
 0x16e   : > { %5599 = vmatmul.msk.bf16.gmra.mxu0 %vm963_vm3, %v2231_v11  ;;  %v1839_v17 = vadd.f32 %v1683_v51, %v1335_v14 }
 0x16f   : > { %v1336_v27 = vpop.f32.mrf.mxu1 }
 0x170   : > { %v2110_v38 = vadd.f32 %v1954_v28, %v1839_v17  ;;  %v1337_v15 = vadd.f32 %v1336_v27, %v6551_v2  ;;  %v6768_v2 = vsel %vm1489_vm4, %v1519_v34, %v1521_v36 }
 0x172   : > { %v1961_v46 = vpop.f32.mrf.mxu3  ;;  %v6757_v29 = vadd.f32 %v2452_v55, %v2110_v38  ;;  %v2235_v55 = vsel %vm2175_vm5, %v2230_v6, %v2234_v43  ;;  %v2236_v6 = vrot.slane %v6337_v10, 1 }
 0x173   : > { %v2454_v59 = vpop.f32.mrf.mxu0 }
 0x175   : > { %v1685_v3 = vpop.f32.mrf.mxu2 }
 0x176   : > { %v1840_v9 = vadd.f32 %v1685_v3, %v1337_v15  ;;  %v5831_v15 = vld [vmem:[#allocation2 + $0x68] sm:$0xff] }
 0x177   : > { %5567 = vmatmul.msk.bf16.gmra.mxu3 %vm963_vm3, %v6749_v42  ;;  %v1339_v56 = vpop.f32.mrf.mxu1 }
 0x178   : > { %v2111_v28 = vadd.f32 %v1956_v48, %v1840_v9  ;;  %v1340_v27 = vadd.f32 %v1339_v56, %v6564_v32  ;;  %v1523_v9 = vrot.slane %v6371_v62, 1 }
 0x17a   : > { %v1964_v37 = vpop.f32.mrf.mxu3  ;;  %5494 = vmatmul.msk.bf16.gmra.mxu1 %vm963_vm3, %v5830_v4  ;;  %5528 = vmatmul.msk.bf16.gmra.mxu2 %vm963_vm3, %v6710_v31  ;;  %v6765_v11 = vadd.f32 %v2454_v59, %v2111_v28  ;;  %v2237_v59 = vrot.slane %v6276_v44, 2 }
 0x17b   : > { %v2457_v16 = vpop.f32.mrf.mxu0 }
 0x17c   : > { %v2238_v3 = vor.u32 %v2237_v59, %v2236_v6  ;;  %v8715_v6 = vld [vmem:[#allocation47_spill] sm:$0xff] }
 0x17d   : > { %v1688_v51 = vpop.f32.mrf.mxu2 }
 0x17e   : > { %5600 = vmatmul.msk.bf16.gmra.mxu0 %vm963_vm3, %v2235_v55  ;;  %v1841_v17 = vadd.f32 %v1688_v51, %v1340_v27 }
 0x17f   : > { %v1341_v14 = vpop.f32.mrf.mxu1 }
 0x180   : > { %v2112_v48 = vadd.f32 %v1959_v12, %v1841_v17  ;;  %v1342_v24 = vadd.f32 %v1341_v14, %v6577_v7  ;;  %v6787_v7 = vsel %vm1489_vm4, %v1521_v36, %v1523_v9 }
 0x182   : > { %v1966_v8 = vpop.f32.mrf.mxu3  ;;  %v6776_v61 = vadd.f32 %v2457_v16, %v2112_v48  ;;  %v2239_v16 = vsel %vm2175_vm5, %v2234_v43, %v2238_v3  ;;  %v2240_v43 = vrot.slane %v8715_v6, 1 }
 0x183   : > { %v2459_v31 = vpop.f32.mrf.mxu0 }
 0x185   : > { %v1690_v32 = vpop.f32.mrf.mxu2 }
 0x186   : > { %v1842_v56 = vadd.f32 %v1690_v32, %v1342_v24 }
 0x187   : > { %5568 = vmatmul.msk.bf16.gmra.mxu3 %vm963_vm3, %v6768_v2  ;;  %v1344_v34 = vpop.f32.mrf.mxu1 }
 0x188   : > { %v2113_v12 = vadd.f32 %v1961_v46, %v1842_v56  ;;  %v1345_v14 = vadd.f32 %v1344_v34, %v6590_v13  ;;  %v5832_v56 = vld [vmem:[#allocation2 + $0x70] sm:$0xff] }
 0x18a   : > { %v1969_v38 = vpop.f32.mrf.mxu3  ;;  %5495 = vmatmul.msk.bf16.gmra.mxu1 %vm963_vm3, %v5831_v15  ;;  %5529 = vmatmul.msk.bf16.gmra.mxu2 %vm963_vm3, %v6730_v50  ;;  %v6784_v55 = vadd.f32 %v2459_v31, %v2113_v12  ;;  %v8716_v31 = vld [vmem:[#allocation40_spill] sm:$0xff]  ;;  %v6799_v12 = vld [vmem:[#allocation2 + $0x90] sm:$0xff] }
 0x18b   : > { %v2462_v28 = vpop.f32.mrf.mxu0  ;;  %v2241_v59 = vrot.slane %v8716_v31, 2 }
 0x18d   : > { %v1693_v51 = vpop.f32.mrf.mxu2  ;;  %v2242_v15 = vor.u32 %v2241_v59, %v2240_v43 }
 0x18e   : > { %5601 = vmatmul.msk.bf16.gmra.mxu0 %vm963_vm3, %v2239_v16  ;;  %v1843_v17 = vadd.f32 %v1693_v51, %v1345_v14 }
 0x18f   : > { %v1346_v27 = vpop.f32.mrf.mxu1 }
 0x190   : > { %v2114_v46 = vadd.f32 %v1964_v37, %v1843_v17  ;;  %v1347_v32 = vadd.f32 %v1346_v27, %v6603_v33  ;;  %v1525_v37 = vrot.slane %v6799_v12, 1 }
 0x192   : > { %v1971_v4 = vpop.f32.mrf.mxu3  ;;  %v6795_v24 = vadd.f32 %v2462_v28, %v2114_v46  ;;  %v2243_v28 = vsel %vm2175_vm5, %v2238_v3, %v2242_v15  ;;  %v6808_v27 = vsel %vm1489_vm4, %v1523_v9, %v1525_v37 }
 0x193   : > { %v2464_v50 = vpop.f32.mrf.mxu0 }
 0x195   : > { %v1695_v13 = vpop.f32.mrf.mxu2 }
 0x196   : > { %v1844_v34 = vadd.f32 %v1695_v13, %v1347_v32  ;;  %v8718_v13 = vld [vmem:[#allocation53_spill] sm:$0xff] }
 0x197   : > { %5569 = vmatmul.msk.bf16.gmra.mxu3 %vm963_vm3, %v6787_v7  ;;  %v1349_v36 = vpop.f32.mrf.mxu1  ;;  %v2244_v3 = vrot.slane %v8718_v13, 1 }
 0x198   : > { %v2115_v16 = vadd.f32 %v1966_v8, %v1844_v34  ;;  %v1350_v46 = vadd.f32 %v1349_v36, %v6616_v41 }
 0x19a   : > { %v1974_v48 = vpop.f32.mrf.mxu3  ;;  %5496 = vmatmul.msk.bf16.gmra.mxu1 %vm963_vm3, %v5832_v56  ;;  %5530 = vmatmul.msk.bf16.gmra.mxu2 %vm963_vm3, %v6749_v42  ;;  %v6805_v17 = vadd.f32 %v2464_v50, %v2115_v16  ;;  %v8719_v50 = vld [vmem:[#allocation48_spill] sm:$0xff] }
 0x19b   : > { %v2467_v51 = vpop.f32.mrf.mxu0  ;;  %v2245_v34 = vrot.slane %v8719_v50, 2 }
 0x19c   : > { %8717 = vst [vmem:[#allocation47_spill] sm:$0xff] %v6805_v17 }
 0x19d   : > { %v1698_v43 = vpop.f32.mrf.mxu2 }
 0x19e   : > { %5602 = vmatmul.msk.bf16.gmra.mxu0 %vm963_vm3, %v2243_v28  ;;  %v1845_v59 = vadd.f32 %v1698_v43, %v1350_v46  ;;  %v2246_v28 = vor.u32 %v2245_v34, %v2244_v3  ;;  %v6821_v46 = vld [vmem:[#allocation2 + $0x98] sm:$0xff] }
 0x19f   : > { %v1351_v33 = vpop.f32.mrf.mxu1 }
 0x1a0   : > { %v2116_v8 = vadd.f32 %v1969_v38, %v1845_v59  ;;  %v1352_v16 = vadd.f32 %v1351_v33, %v6629_v19  ;;  %v1527_v38 = vrot.slane %v6821_v46, 1 }
 0x1a2   : > { %v1976_v14 = vpop.f32.mrf.mxu3  ;;  %v6816_v56 = vadd.f32 %v2467_v51, %v2116_v8  ;;  %v2247_v51 = vsel %vm2175_vm5, %v2242_v15, %v2246_v28  ;;  %v6830_v33 = vsel %vm1489_vm4, %v1525_v37, %v1527_v38 }
 0x1a3   : > { %v2469_v42 = vpop.f32.mrf.mxu0 }
 0x1a4   : > { %8720 = vst [vmem:[#allocation40_spill] sm:$0xff] %v6816_v56 }
 0x1a5   : > { %v1700_v41 = vpop.f32.mrf.mxu2 }
 0x1a6   : > { %v1846_v36 = vadd.f32 %v1700_v41, %v1352_v16  ;;  %v8722_v41 = vld [vmem:[#allocation7_spill] sm:$0xff] }
 0x1a7   : > { %5570 = vmatmul.msk.bf16.gmra.mxu3 %vm963_vm3, %v6808_v27  ;;  %v1354_v9 = vpop.f32.mrf.mxu1  ;;  %v2248_v15 = vrot.slane %v8722_v41, 1 }
 0x1a8   : > { %v2117_v43 = vadd.f32 %v1971_v4, %v1846_v36 }
 0x1aa   : > { %v1979_v32 = vpop.f32.mrf.mxu3  ;;  %5497 = vmatmul.msk.bf16.gmra.mxu1 %vm963_vm3, %v6263_v22  ;;  %5531 = vmatmul.msk.bf16.gmra.mxu2 %vm963_vm3, %v6768_v2  ;;  %v6827_v8 = vadd.f32 %v2469_v42, %v2117_v43  ;;  %v1355_v22 = vadd.f32 %v1354_v9, %v6644_v20  ;;  %v8723_v42 = vld [vmem:[#allocation6_spill] sm:$0xff] }
 0x1ab   : > { %v2472_v17 = vpop.f32.mrf.mxu0  ;;  %v2249_v36 = vrot.slane %v8723_v42, 2 }
 0x1ac   : > { %8721 = vst [vmem:[#allocation53_spill] sm:$0xff] %v6827_v8 }
 0x1ad   : > { %v1703_v3 = vpop.f32.mrf.mxu2 }
 0x1ae   : > { %5603 = vmatmul.msk.bf16.gmra.mxu0 %vm963_vm3, %v2247_v51  ;;  %v1847_v34 = vadd.f32 %v1703_v3, %v1355_v22  ;;  %v2250_v51 = vor.u32 %v2249_v36, %v2248_v15  ;;  %v6843_v22 = vld [vmem:[#allocation2 + $0xa0] sm:$0xff] }
 0x1af   : > { %v1356_v19 = vpop.f32.mrf.mxu1 }
 0x1b0   : > { %v2118_v4 = vadd.f32 %v1974_v48, %v1847_v34  ;;  %v1357_v8 = vadd.f32 %v1356_v19, %v6655_v60  ;;  %v1529_v48 = vrot.slane %v6843_v22, 1 }
 0x1b2   : > { %v1981_v59 = vpop.f32.mrf.mxu3  ;;  %v6838_v43 = vadd.f32 %v2472_v17, %v2118_v4  ;;  %v2251_v17 = vsel %vm2175_vm5, %v2246_v28, %v2250_v51 }
 0x1b3   : > { %v2474_v2 = vpop.f32.mrf.mxu0 }
 0x1b4   : > { %8724 = vst [vmem:[#allocation48_spill] sm:$0xff] %v6838_v43 }
 0x1b5   : > { %v1705_v20 = vpop.f32.mrf.mxu2 }
 0x1b6   : > { %v1848_v9 = vadd.f32 %v1705_v20, %v1357_v8  ;;  %v6852_v8 = vsel %vm1489_vm4, %v1527_v38, %v1529_v48  ;;  %v8726_v20 = vld [vmem:[#allocation12_spill] sm:$0xff] }
 0x1b7   : > { %5571 = vmatmul.msk.bf16.gmra.mxu3 %vm963_vm3, %v6830_v33  ;;  %v1359_v37 = vpop.f32.mrf.mxu1  ;;  %v2252_v28 = vrot.slane %v8726_v20, 1 }
 0x1b8   : > { %v2119_v3 = vadd.f32 %v1976_v14, %v1848_v9 }
 0x1ba   : > { %v1984_v16 = vpop.f32.mrf.mxu3  ;;  %5498 = vmatmul.msk.bf16.gmra.mxu1 %vm963_vm3, %v6330_v21  ;;  %5532 = vmatmul.msk.bf16.gmra.mxu2 %vm963_vm3, %v6787_v7  ;;  %v6849_v4 = vadd.f32 %v2474_v2, %v2119_v3  ;;  %v1360_v21 = vadd.f32 %v1359_v37, %v6666_v5  ;;  %v8727_v2 = vld [vmem:[#allocation8_spill] sm:$0xff] }
 0x1bb   : > { %v2477_v56 = vpop.f32.mrf.mxu0  ;;  %v2253_v9 = vrot.slane %v8727_v2, 2 }
 0x1bc   : > { %8725 = vst [vmem:[#allocation7_spill] sm:$0xff] %v6849_v4 }
 0x1bd   : > { %v1708_v19 = vpop.f32.mrf.mxu2 }
 0x1be   : > { %5604 = vmatmul.msk.bf16.gmra.mxu0 %vm963_vm3, %v2251_v17  ;;  %v1849_v15 = vadd.f32 %v1708_v19, %v1360_v21  ;;  %v2254_v17 = vor.u32 %v2253_v9, %v2252_v28  ;;  %v6865_v21 = vld [vmem:[#allocation2 + $0xa8] sm:$0xff] }
 0x1bf   : > { %v1361_v60 = vpop.f32.mrf.mxu1 }
 0x1c0   : > { %v2120_v14 = vadd.f32 %v1979_v32, %v1849_v15  ;;  %v1362_v4 = vadd.f32 %v1361_v60, %v6680_v35  ;;  %v1531_v32 = vrot.slane %v6865_v21, 1 }
 0x1c2   : > { %v1986_v34 = vpop.f32.mrf.mxu3  ;;  %v6860_v3 = vadd.f32 %v2477_v56, %v2120_v14  ;;  %v2255_v56 = vsel %vm2175_vm5, %v2250_v51, %v2254_v17 }
 0x1c3   : > { %v2479_v7 = vpop.f32.mrf.mxu0 }
 0x1c4   : > { %8728 = vst [vmem:[#allocation6_spill] sm:$0xff] %v6860_v3  ;;  %v8734_v3 = vld [vmem:[#allocation57_spill] sm:$0xff] }
 0x1c5   : > { %v1710_v5 = vpop.f32.mrf.mxu2 }
 0x1c6   : > { %v1850_v37 = vadd.f32 %v1710_v5, %v1362_v4  ;;  %v6874_v4 = vsel %vm1489_vm4, %v1529_v48, %v1531_v32 }
 0x1c7   : > { %5572 = vmatmul.msk.bf16.gmra.mxu3 %vm963_vm3, %v6852_v8  ;;  %v1364_v38 = vpop.f32.mrf.mxu1 }
 0x1c8   : > { %v2121_v19 = vadd.f32 %v1981_v59, %v1850_v37  ;;  %v8731_v37 = vld [vmem:[#allocation17_spill] sm:$0xff] }
 0x1c9   : > { %v2256_v51 = vrot.slane %v8731_v37, 1 }
 0x1ca   : > { %v1989_v36 = vpop.f32.mrf.mxu3  ;;  %5499 = vmatmul.msk.bf16.gmra.mxu1 %vm963_vm3, %v6371_v62  ;;  %5533 = vmatmul.msk.bf16.gmra.mxu2 %vm963_vm3, %v6808_v27  ;;  %v6871_v14 = vadd.f32 %v2479_v7, %v2121_v19  ;;  %v8730_v62 = vld [vmem:[#allocation56_spill] sm:$0xff]  ;;  %v8732_v7 = vld [vmem:[#allocation13_spill] sm:$0xff] }
 0x1cb   : > { %v2482_v43 = vpop.f32.mrf.mxu0  ;;  %v1365_v60 = vadd.f32 %v1364_v38, %v8730_v62  ;;  %v2257_v19 = vrot.slane %v8732_v7, 2 }
 0x1cc   : > { %8729 = vst [vmem:[#allocation12_spill] sm:$0xff] %v6871_v14 }
 0x1cd   : > { %v1713_v28 = vpop.f32.mrf.mxu2 }
 0x1ce   : > { %5605 = vmatmul.msk.bf16.gmra.mxu0 %vm963_vm3, %v2255_v56  ;;  %v1851_v9 = vadd.f32 %v1713_v28, %v1365_v60  ;;  %v2258_v56 = vor.u32 %v2257_v19, %v2256_v51  ;;  %v6887_v60 = vld [vmem:[#allocation2 + $0xb0] sm:$0xff] }
 0x1cf   : > { %v1366_v35 = vpop.f32.mrf.mxu1 }
 0x1d0   : > { %v2122_v59 = vadd.f32 %v1984_v16, %v1851_v9  ;;  %v1367_v2 = vadd.f32 %v1366_v35, %v8734_v3  ;;  %v1533_v16 = vrot.slane %v6887_v60, 1 }
 0x1d2   : > { %v1991_v15 = vpop.f32.mrf.mxu3  ;;  %v6882_v14 = vadd.f32 %v2482_v43, %v2122_v59  ;;  %v2259_v43 = vsel %vm2175_vm5, %v2254_v17, %v2258_v56 }
 0x1d3   : > { %v2484_v27 = vpop.f32.mrf.mxu0 }
 0x1d4   : > { %8733 = vst [vmem:[#allocation56_spill] sm:$0xff] %v6882_v14 }
 0x1d5   : > { %v1715_v38 = vpop.f32.mrf.mxu2 }
 0x1d6   : > { %v1852_v62 = vadd.f32 %v1715_v38, %v1367_v2  ;;  %v6896_v2 = vsel %vm1489_vm4, %v1531_v32, %v1533_v16  ;;  %v8736_v38 = vld [vmem:[#allocation22_spill] sm:$0xff] }
 0x1d7   : > { %5573 = vmatmul.msk.bf16.gmra.mxu3 %vm963_vm3, %v6874_v4  ;;  %v1369_v48 = vpop.f32.mrf.mxu1  ;;  %v2260_v17 = vrot.slane %v8736_v38, 1 }
 0x1d8   : > { %v2123_v28 = vadd.f32 %v1986_v34, %v1852_v62 }
 0x1da   : > { %v1994_v5 = vpop.f32.mrf.mxu3  ;;  %5500 = vmatmul.msk.bf16.gmra.mxu1 %vm963_vm3, %v6799_v12  ;;  %5534 = vmatmul.msk.bf16.gmra.mxu2 %vm963_vm3, %v6830_v33  ;;  %v6893_v59 = vadd.f32 %v2484_v27, %v2123_v28  ;;  %v1370_v12 = vadd.f32 %v1369_v48, %v6475_v30  ;;  %v8737_v27 = vld [vmem:[#allocation18_spill] sm:$0xff] }
 0x1db   : > { %v2487_v37 = vpop.f32.mrf.mxu0  ;;  %v2261_v62 = vrot.slane %v8737_v27, 2 }
 0x1dc   : > { %8735 = vst [vmem:[#allocation13_spill] sm:$0xff] %v6893_v59 }
 0x1dd   : > { %v1718_v35 = vpop.f32.mrf.mxu2 }
 0x1de   : > { %5606 = vmatmul.msk.bf16.gmra.mxu0 %vm963_vm3, %v2259_v43  ;;  %v1853_v51 = vadd.f32 %v1718_v35, %v1370_v12  ;;  %v2262_v43 = vor.u32 %v2261_v62, %v2260_v17  ;;  %v6909_v12 = vld [vmem:[#allocation2 + $0xb8] sm:$0xff] }
 0x1df   : > { %v1371_v3 = vpop.f32.mrf.mxu1 }
 0x1e0   : > { %v2124_v34 = vadd.f32 %v1989_v36, %v1853_v51  ;;  %v1372_v59 = vadd.f32 %v1371_v3, %v6488_v58  ;;  %v1535_v36 = vrot.slane %v6909_v12, 1 }
 0x1e2   : > { %v1996_v9 = vpop.f32.mrf.mxu3  ;;  %v6904_v28 = vadd.f32 %v2487_v37, %v2124_v34  ;;  %v2263_v37 = vsel %vm2175_vm5, %v2258_v56, %v2262_v43 }
 0x1e3   : > { %v2489_v33 = vpop.f32.mrf.mxu0 }
 0x1e4   : > { %8738 = vst [vmem:[#allocation57_spill] sm:$0xff] %v6904_v28 }
 0x1e5   : > { %v1720_v30 = vpop.f32.mrf.mxu2 }
 0x1e6   : > { %v1854_v48 = vadd.f32 %v1720_v30, %v1372_v59  ;;  %v6918_v59 = vsel %vm1489_vm4, %v1533_v16, %v1535_v36  ;;  %v8740_v30 = vld [vmem:[#allocation28_spill] sm:$0xff] }
 0x1e7   : > { %5574 = vmatmul.msk.bf16.gmra.mxu3 %vm963_vm3, %v6896_v2  ;;  %v1374_v32 = vpop.f32.mrf.mxu1  ;;  %v2264_v56 = vrot.slane %v8740_v30, 1 }
 0x1e8   : > { %v2125_v35 = vadd.f32 %v1991_v15, %v1854_v48 }
 0x1ea   : > { %v1999_v19 = vpop.f32.mrf.mxu3  ;;  %5501 = vmatmul.msk.bf16.gmra.mxu1 %vm963_vm3, %v6821_v46  ;;  %5535 = vmatmul.msk.bf16.gmra.mxu2 %vm963_vm3, %v6852_v8  ;;  %v6915_v34 = vadd.f32 %v2489_v33, %v2125_v35  ;;  %v1375_v46 = vadd.f32 %v1374_v32, %v6501_v18  ;;  %v8741_v33 = vld [vmem:[#allocation23_spill] sm:$0xff] }
 0x1eb   : > { %v2492_v14 = vpop.f32.mrf.mxu0  ;;  %v2265_v48 = vrot.slane %v8741_v33, 2 }
 0x1ec   : > { %8739 = vst [vmem:[#allocation22_spill] sm:$0xff] %v6915_v34 }
 0x1ed   : > { %v1723_v3 = vpop.f32.mrf.mxu2 }
 0x1ee   : > { %5607 = vmatmul.msk.bf16.gmra.mxu0 %vm963_vm3, %v2263_v37  ;;  %v1855_v17 = vadd.f32 %v1723_v3, %v1375_v46  ;;  %v2266_v37 = vor.u32 %v2265_v48, %v2264_v56  ;;  %v6931_v46 = vld [vmem:[#allocation2 + $0xc0] sm:$0xff] }
 0x1ef   : > { %v1376_v58 = vpop.f32.mrf.mxu1 }
 0x1f0   : > { %v2126_v15 = vadd.f32 %v1994_v5, %v1855_v17  ;;  %v1377_v34 = vadd.f32 %v1376_v58, %v6516_v1  ;;  %v1537_v5 = vrot.slane %v6931_v46, 1 }
 0x1f2   : > { %v2001_v51 = vpop.f32.mrf.mxu3  ;;  %v6926_v35 = vadd.f32 %v2492_v14, %v2126_v15  ;;  %v2267_v14 = vsel %vm2175_vm5, %v2262_v43, %v2266_v37 }
 0x1f3   : > { %v2494_v8 = vpop.f32.mrf.mxu0 }
 0x1f4   : > { %8742 = vst [vmem:[#allocation99_spill] sm:$0xff] %v6926_v35 }
 0x1f5   : > { %v1725_v18 = vpop.f32.mrf.mxu2 }
 0x1f6   : > { %v1856_v32 = vadd.f32 %v1725_v18, %v1377_v34  ;;  %v6940_v34 = vsel %vm1489_vm4, %v1535_v36, %v1537_v5  ;;  %v8744_v18 = vld [vmem:[#allocation34_spill] sm:$0xff] }
 0x1f7   : > { %5575 = vmatmul.msk.bf16.gmra.mxu3 %vm963_vm3, %v6918_v59  ;;  %v1379_v16 = vpop.f32.mrf.mxu1  ;;  %v2268_v43 = vrot.slane %v8744_v18, 1 }
 0x1f8   : > { %v2127_v3 = vadd.f32 %v1996_v9, %v1856_v32 }
 0x1fa   : > { %v2004_v62 = vpop.f32.mrf.mxu3  ;;  %5502 = vmatmul.msk.bf16.gmra.mxu1 %vm963_vm3, %v6843_v22  ;;  %5536 = vmatmul.msk.bf16.gmra.mxu2 %vm963_vm3, %v6874_v4  ;;  %v6937_v15 = vadd.f32 %v2494_v8, %v2127_v3  ;;  %v1380_v22 = vadd.f32 %v1379_v16, %v6529_v0  ;;  %v8745_v8 = vld [vmem:[#allocation29_spill] sm:$0xff] }
 0x1fb   : > { %v2497_v28 = vpop.f32.mrf.mxu0  ;;  %v2269_v32 = vrot.slane %v8745_v8, 2 }
 0x1fc   : > { %8743 = vst [vmem:[#allocation100_spill] sm:$0xff] %v6937_v15  ;;  %v8747_v15 = vld [vmem:[#allocation68_spill] sm:$0xff] }
 0x1fd   : > { %v1728_v58 = vpop.f32.mrf.mxu2 }
 0x1fe   : > { %5608 = vmatmul.msk.bf16.gmra.mxu0 %vm963_vm3, %v2267_v14  ;;  %v1857_v56 = vadd.f32 %v1728_v58, %v1380_v22  ;;  %v2270_v14 = vor.u32 %v2269_v32, %v2268_v43  ;;  %v6953_v22 = vld [vmem:[#allocation2 + $0xc8] sm:$0xff] }
 0x1ff   : > { %v1381_v1 = vpop.f32.mrf.mxu1 }
 0x200   : > { %v2128_v9 = vadd.f32 %v1999_v19, %v1857_v56  ;;  %v1382_v35 = vadd.f32 %v1381_v1, %v8747_v15  ;;  %v1539_v19 = vrot.slane %v6953_v22, 1 }
 0x202   : > { %v2006_v17 = vpop.f32.mrf.mxu3  ;;  %v6948_v3 = vadd.f32 %v2497_v28, %v2128_v9  ;;  %v2271_v28 = vsel %vm2175_vm5, %v2266_v37, %v2270_v14 }
 0x203   : > { %v2499_v4 = vpop.f32.mrf.mxu0 }
 0x204   : > { %8746 = vst [vmem:[#allocation101_spill] sm:$0xff] %v6948_v3  ;;  %v8753_v3 = vld [vmem:[#allocation74_spill] sm:$0xff] }
 0x205   : > { %v1730_v0 = vpop.f32.mrf.mxu2 }
 0x206   : > { %v1858_v16 = vadd.f32 %v1730_v0, %v1382_v35  ;;  %v6962_v35 = vsel %vm1489_vm4, %v1537_v5, %v1539_v19 }
 0x207   : > { %5576 = vmatmul.msk.bf16.gmra.mxu3 %vm963_vm3, %v6940_v34  ;;  %v1384_v36 = vpop.f32.mrf.mxu1 }
 0x208   : > { %v2129_v58 = vadd.f32 %v2001_v51, %v1858_v16  ;;  %v8750_v16 = vld [vmem:[#allocation41_spill] sm:$0xff] }
 0x209   : > { %v2272_v37 = vrot.slane %v8750_v16, 1 }
 0x20a   : > { %v2009_v48 = vpop.f32.mrf.mxu3  ;;  %5503 = vmatmul.msk.bf16.gmra.mxu1 %vm963_vm3, %v6865_v21  ;;  %5537 = vmatmul.msk.bf16.gmra.mxu2 %vm963_vm3, %v6896_v2  ;;  %v6959_v9 = vadd.f32 %v2499_v4, %v2129_v58  ;;  %v8749_v21 = vld [vmem:[#allocation71_spill] sm:$0xff] }
 0x20b   : > { %v2502_v18 = vpop.f32.mrf.mxu0  ;;  %v1385_v1 = vadd.f32 %v1384_v36, %v8749_v21  ;;  %v8751_v4 = vld [vmem:[#allocation35_spill] sm:$0xff] }
 0x20c   : > { %8748 = vst [vmem:[#allocation68_spill] sm:$0xff] %v6959_v9  ;;  %v2273_v58 = vrot.slane %v8751_v4, 2 }
 0x20d   : > { %v1733_v43 = vpop.f32.mrf.mxu2 }
 0x20e   : > { %5609 = vmatmul.msk.bf16.gmra.mxu0 %vm963_vm3, %v2271_v28  ;;  %v1859_v32 = vadd.f32 %v1733_v43, %v1385_v1  ;;  %v2274_v28 = vor.u32 %v2273_v58, %v2272_v37  ;;  %v6975_v1 = vld [vmem:[#allocation2 + $0xd0] sm:$0xff] }
 0x20f   : > { %v1386_v15 = vpop.f32.mrf.mxu1 }
 0x210   : > { %v2130_v51 = vadd.f32 %v2004_v62, %v1859_v32  ;;  %v1387_v8 = vadd.f32 %v1386_v15, %v8753_v3  ;;  %v1541_v62 = vrot.slane %v6975_v1, 1 }
 0x212   : > { %v2011_v56 = vpop.f32.mrf.mxu3  ;;  %v6970_v9 = vadd.f32 %v2502_v18, %v2130_v51  ;;  %v2275_v18 = vsel %vm2175_vm5, %v2270_v14, %v2274_v28 }
 0x213   : > { %v2504_v2 = vpop.f32.mrf.mxu0 }
 0x214   : > { %8752 = vst [vmem:[#allocation71_spill] sm:$0xff] %v6970_v9  ;;  %v8759_v9 = vld [vmem:[#allocation80_spill] sm:$0xff] }
 0x215   : > { %v1735_v36 = vpop.f32.mrf.mxu2 }
 0x216   : > { %v1860_v21 = vadd.f32 %v1735_v36, %v1387_v8  ;;  %v6984_v8 = vsel %vm1489_vm4, %v1539_v19, %v1541_v62 }
 0x217   : > { %5577 = vmatmul.msk.bf16.gmra.mxu3 %vm963_vm3, %v6962_v35  ;;  %v1389_v5 = vpop.f32.mrf.mxu1 }
 0x218   : > { %v2131_v43 = vadd.f32 %v2006_v17, %v1860_v21  ;;  %v8756_v21 = vld [vmem:[#allocation49_spill] sm:$0xff] }
 0x219   : > { %v2276_v14 = vrot.slane %v8756_v21, 1 }
 0x21a   : > { %v2014_v0 = vpop.f32.mrf.mxu3  ;;  %5504 = vmatmul.msk.bf16.gmra.mxu1 %vm963_vm3, %v6887_v60  ;;  %5538 = vmatmul.msk.bf16.gmra.mxu2 %vm963_vm3, %v6918_v59  ;;  %v6981_v51 = vadd.f32 %v2504_v2, %v2131_v43  ;;  %v8755_v60 = vld [vmem:[#allocation77_spill] sm:$0xff]  ;;  %v8757_v2 = vld [vmem:[#allocation42_spill] sm:$0xff] }
 0x21b   : > { %v2507_v16 = vpop.f32.mrf.mxu0  ;;  %v1390_v15 = vadd.f32 %v1389_v5, %v8755_v60  ;;  %v2277_v43 = vrot.slane %v8757_v2, 2 }
 0x21c   : > { %8754 = vst [vmem:[#allocation74_spill] sm:$0xff] %v6981_v51 }
 0x21d   : > { %v1738_v37 = vpop.f32.mrf.mxu2 }
 0x21e   : > { %5610 = vmatmul.msk.bf16.gmra.mxu0 %vm963_vm3, %v2275_v18  ;;  %v1861_v58 = vadd.f32 %v1738_v37, %v1390_v15  ;;  %v2278_v18 = vor.u32 %v2277_v43, %v2276_v14  ;;  %v6997_v15 = vld [vmem:[#allocation2 + $0xd8] sm:$0xff] }
 0x21f   : > { %v1391_v3 = vpop.f32.mrf.mxu1 }
 0x220   : > { %v2132_v17 = vadd.f32 %v2009_v48, %v1861_v58  ;;  %v1392_v4 = vadd.f32 %v1391_v3, %v8759_v9  ;;  %v1543_v48 = vrot.slane %v6997_v15, 1 }
 0x222   : > { %v2016_v32 = vpop.f32.mrf.mxu3  ;;  %v6992_v51 = vadd.f32 %v2507_v16, %v2132_v17  ;;  %v2279_v16 = vsel %vm2175_vm5, %v2274_v28, %v2278_v18 }
 0x223   : > { %v2509_v59 = vpop.f32.mrf.mxu0 }
 0x224   : > { %8758 = vst [vmem:[#allocation77_spill] sm:$0xff] %v6992_v51  ;;  %v8765_v51 = vld [vmem:[#allocation86_spill] sm:$0xff] }
 0x225   : > { %v1740_v5 = vpop.f32.mrf.mxu2 }
 0x226   : > { %v1862_v60 = vadd.f32 %v1740_v5, %v1392_v4  ;;  %v7006_v4 = vsel %vm1489_vm4, %v1541_v62, %v1543_v48 }
 0x227   : > { %5578 = vmatmul.msk.bf16.gmra.mxu3 %vm963_vm3, %v6984_v8  ;;  %v1394_v19 = vpop.f32.mrf.mxu1 }
 0x228   : > { %v2133_v37 = vadd.f32 %v2011_v56, %v1862_v60  ;;  %v8762_v60 = vld [vmem:[#allocation54_spill] sm:$0xff] }
 0x229   : > { %v2280_v28 = vrot.slane %v8762_v60, 1 }
 0x22a   : > { %v2019_v36 = vpop.f32.mrf.mxu3  ;;  %5505 = vmatmul.msk.bf16.gmra.mxu1 %vm963_vm3, %v6909_v12  ;;  %5539 = vmatmul.msk.bf16.gmra.mxu2 %vm963_vm3, %v6940_v34  ;;  %v7003_v17 = vadd.f32 %v2509_v59, %v2133_v37  ;;  %v8761_v12 = vld [vmem:[#allocation83_spill] sm:$0xff]  ;;  %v8763_v59 = vld [vmem:[#allocation50_spill] sm:$0xff] }
 0x22b   : > { %v2512_v21 = vpop.f32.mrf.mxu0  ;;  %v1395_v3 = vadd.f32 %v1394_v19, %v8761_v12  ;;  %v2281_v37 = vrot.slane %v8763_v59, 2 }
 0x22c   : > { %8760 = vst [vmem:[#allocation80_spill] sm:$0xff] %v7003_v17 }
 0x22d   : > { %v1743_v14 = vpop.f32.mrf.mxu2 }
 0x22e   : > { %5611 = vmatmul.msk.bf16.gmra.mxu0 %vm963_vm3, %v2279_v16  ;;  %v1863_v43 = vadd.f32 %v1743_v14, %v1395_v3  ;;  %v2282_v16 = vor.u32 %v2281_v37, %v2280_v28  ;;  %v7019_v3 = vld [vmem:[#allocation2 + $0xe0] sm:$0xff] }
 0x22f   : > { %v1396_v9 = vpop.f32.mrf.mxu1 }
 0x230   : > { %v2134_v56 = vadd.f32 %v2014_v0, %v1863_v43  ;;  %v1397_v2 = vadd.f32 %v1396_v9, %v8765_v51  ;;  %v1545_v0 = vrot.slane %v7019_v3, 1 }
 0x232   : > { %v2021_v58 = vpop.f32.mrf.mxu3  ;;  %v7014_v17 = vadd.f32 %v2512_v21, %v2134_v56  ;;  %v2283_v21 = vsel %vm2175_vm5, %v2278_v18, %v2282_v16 }
 0x233   : > { %v2514_v34 = vpop.f32.mrf.mxu0 }
 0x234   : > { %8764 = vst [vmem:[#allocation83_spill] sm:$0xff] %v7014_v17  ;;  %v8771_v17 = vld [vmem:[#allocation92_spill] sm:$0xff] }
 0x235   : > { %v1745_v19 = vpop.f32.mrf.mxu2 }
 0x236   : > { %v1864_v12 = vadd.f32 %v1745_v19, %v1397_v2  ;;  %v7028_v2 = vsel %vm1489_vm4, %v1543_v48, %v1545_v0 }
 0x237   : > { %5579 = vmatmul.msk.bf16.gmra.mxu3 %vm963_vm3, %v7006_v4  ;;  %v1399_v62 = vpop.f32.mrf.mxu1 }
 0x238   : > { %v2135_v14 = vadd.f32 %v2016_v32, %v1864_v12  ;;  %v8768_v12 = vld [vmem:[#allocation15_spill] sm:$0xff] }
 0x239   : > { %v2284_v18 = vrot.slane %v8768_v12, 1 }
 0x23a   : > { %v2024_v5 = vpop.f32.mrf.mxu3  ;;  %5506 = vmatmul.msk.bf16.gmra.mxu1 %vm963_vm3, %v6931_v46  ;;  %5540 = vmatmul.msk.bf16.gmra.mxu2 %vm963_vm3, %v6962_v35  ;;  %v7025_v56 = vadd.f32 %v2514_v34, %v2135_v14  ;;  %v8767_v46 = vld [vmem:[#allocation89_spill] sm:$0xff]  ;;  %v8769_v34 = vld [vmem:[#allocation14_spill] sm:$0xff] }
 0x23b   : > { %v2517_v60 = vpop.f32.mrf.mxu0  ;;  %v1400_v9 = vadd.f32 %v1399_v62, %v8767_v46  ;;  %v2285_v14 = vrot.slane %v8769_v34, 2 }
 0x23c   : > { %8766 = vst [vmem:[#allocation86_spill] sm:$0xff] %v7025_v56 }
 0x23d   : > { %v1748_v28 = vpop.f32.mrf.mxu2 }
 0x23e   : > { %5612 = vmatmul.msk.bf16.gmra.mxu0 %vm963_vm3, %v2283_v21  ;;  %v1865_v37 = vadd.f32 %v1748_v28, %v1400_v9  ;;  %v2286_v21 = vor.u32 %v2285_v14, %v2284_v18  ;;  %v7041_v9 = vld [vmem:[#allocation2 + $0xe8] sm:$0xff] }
 0x23f   : > { %v1401_v51 = vpop.f32.mrf.mxu1 }
 0x240   : > { %v2136_v32 = vadd.f32 %v2019_v36, %v1865_v37  ;;  %v1402_v59 = vadd.f32 %v1401_v51, %v8771_v17  ;;  %v1547_v36 = vrot.slane %v7041_v9, 1 }
 0x242   : > { %v2026_v43 = vpop.f32.mrf.mxu3  ;;  %v7036_v56 = vadd.f32 %v2517_v60, %v2136_v32  ;;  %v2287_v60 = vsel %vm2175_vm5, %v2282_v16, %v2286_v21 }
 0x243   : > { %v2519_v35 = vpop.f32.mrf.mxu0 }
 0x244   : > { %8770 = vst [vmem:[#allocation89_spill] sm:$0xff] %v7036_v56  ;;  %v8777_v56 = vld [vmem:[#allocation96_spill] sm:$0xff] }
 0x245   : > { %v1750_v62 = vpop.f32.mrf.mxu2 }
 0x246   : > { %v1866_v46 = vadd.f32 %v1750_v62, %v1402_v59  ;;  %v7050_v59 = vsel %vm1489_vm4, %v1545_v0, %v1547_v36 }
 0x247   : > { %5580 = vmatmul.msk.bf16.gmra.mxu3 %vm963_vm3, %v7028_v2  ;;  %v1404_v48 = vpop.f32.mrf.mxu1 }
 0x248   : > { %v2137_v28 = vadd.f32 %v2021_v58, %v1866_v46  ;;  %v8774_v46 = vld [vmem:[#allocation20_spill] sm:$0xff] }
 0x249   : > { %v2288_v16 = vrot.slane %v8774_v46, 1 }
 0x24a   : > { %v2029_v19 = vpop.f32.mrf.mxu3  ;;  %5507 = vmatmul.msk.bf16.gmra.mxu1 %vm963_vm3, %v6953_v22  ;;  %5541 = vmatmul.msk.bf16.gmra.mxu2 %vm963_vm3, %v6984_v8  ;;  %v7047_v32 = vadd.f32 %v2519_v35, %v2137_v28  ;;  %v8773_v22 = vld [vmem:[#allocation94_spill] sm:$0xff]  ;;  %v8775_v35 = vld [vmem:[#allocation16_spill] sm:$0xff] }
 0x24b   : > { %v2522_v12 = vpop.f32.mrf.mxu0  ;;  %v1405_v51 = vadd.f32 %v1404_v48, %v8773_v22  ;;  %v2289_v28 = vrot.slane %v8775_v35, 2 }
 0x24c   : > { %8772 = vst [vmem:[#allocation92_spill] sm:$0xff] %v7047_v32 }
 0x24d   : > { %v1753_v18 = vpop.f32.mrf.mxu2 }
 0x24e   : > { %5613 = vmatmul.msk.bf16.gmra.mxu0 %vm963_vm3, %v2287_v60  ;;  %v1867_v14 = vadd.f32 %v1753_v18, %v1405_v51  ;;  %v2290_v60 = vor.u32 %v2289_v28, %v2288_v16  ;;  %v7063_v51 = vld [vmem:[#allocation2 + $0xf0] sm:$0xff] }
 0x24f   : > { %v1406_v17 = vpop.f32.mrf.mxu1 }
 0x250   : > { %v2138_v58 = vadd.f32 %v2024_v5, %v1867_v14  ;;  %v1407_v34 = vadd.f32 %v1406_v17, %v8777_v56  ;;  %v1549_v5 = vrot.slane %v7063_v51, 1 }
 0x252   : > { %v2031_v37 = vpop.f32.mrf.mxu3  ;;  %v7058_v32 = vadd.f32 %v2522_v12, %v2138_v58  ;;  %v2291_v12 = vsel %vm2175_vm5, %v2286_v21, %v2290_v60 }
 0x253   : > { %v2524_v8 = vpop.f32.mrf.mxu0 }
 0x254   : > { %8776 = vst [vmem:[#allocation94_spill] sm:$0xff] %v7058_v32  ;;  %v8783_v32 = vld [vmem:[#allocation59_spill] sm:$0xff] }
 0x255   : > { %v1755_v48 = vpop.f32.mrf.mxu2 }
 0x256   : > { %v1868_v22 = vadd.f32 %v1755_v48, %v1407_v34  ;;  %v7072_v34 = vsel %vm1489_vm4, %v1547_v36, %v1549_v5 }
 0x257   : > { %5581 = vmatmul.msk.bf16.gmra.mxu3 %vm963_vm3, %v7050_v59  ;;  %v1409_v0 = vpop.f32.mrf.mxu1 }
 0x258   : > { %v2139_v18 = vadd.f32 %v2026_v43, %v1868_v22  ;;  %v8780_v22 = vld [vmem:[#allocation26_spill] sm:$0xff] }
 0x259   : > { %v2292_v21 = vrot.slane %v8780_v22, 1 }
 0x25a   : > { %v2034_v62 = vpop.f32.mrf.mxu3  ;;  %5508 = vmatmul.msk.bf16.gmra.mxu1 %vm963_vm3, %v6975_v1  ;;  %5542 = vmatmul.msk.bf16.gmra.mxu2 %vm963_vm3, %v7006_v4  ;;  %v7069_v58 = vadd.f32 %v2524_v8, %v2139_v18  ;;  %v8779_v1 = vld [vmem:[#allocation58_spill] sm:$0xff]  ;;  %v8781_v8 = vld [vmem:[#allocation21_spill] sm:$0xff] }
 0x25b   : > { %v2527_v46 = vpop.f32.mrf.mxu0  ;;  %v1410_v17 = vadd.f32 %v1409_v0, %v8779_v1  ;;  %v2293_v18 = vrot.slane %v8781_v8, 2 }
 0x25c   : > { %8778 = vst [vmem:[#allocation96_spill] sm:$0xff] %v7069_v58 }
 0x25d   : > { %v1758_v16 = vpop.f32.mrf.mxu2 }
 0x25e   : > { %5614 = vmatmul.msk.bf16.gmra.mxu0 %vm963_vm3, %v2291_v12  ;;  %v1869_v28 = vadd.f32 %v1758_v16, %v1410_v17  ;;  %v2294_v12 = vor.u32 %v2293_v18, %v2292_v21  ;;  %v7085_v17 = vld [vmem:[#allocation2 + $0xf8] sm:$0xff] }
 0x25f   : > { %v1411_v56 = vpop.f32.mrf.mxu1 }
 0x260   : > { %v2140_v43 = vadd.f32 %v2029_v19, %v1869_v28  ;;  %v1412_v35 = vadd.f32 %v1411_v56, %v8783_v32  ;;  %v1551_v19 = vrot.slane %v7085_v17, 1 }
 0x262   : > { %v2036_v14 = vpop.f32.mrf.mxu3  ;;  %v7080_v58 = vadd.f32 %v2527_v46, %v2140_v43  ;;  %v2295_v46 = vsel %vm2175_vm5, %v2290_v60, %v2294_v12  ;;  %v8786_v60 = vld [vmem:[#allocation32_spill] sm:$0xff] }
 0x263   : > { %v2529_v4 = vpop.f32.mrf.mxu0 }
 0x264   : > { %8782 = vst [vmem:[#allocation58_spill] sm:$0xff] %v7080_v58  ;;  %v8789_v58 = vld [vmem:[#allocation62_spill] sm:$0xff] }
 0x265   : > { %v1760_v0 = vpop.f32.mrf.mxu2 }
 0x266   : > { %v1870_v1 = vadd.f32 %v1760_v0, %v1412_v35  ;;  %v7094_v35 = vsel %vm1489_vm4, %v1549_v5, %v1551_v19 }
 0x267   : > { %5582 = vmatmul.msk.bf16.gmra.mxu3 %vm963_vm3, %v7072_v34  ;;  %v1414_v36 = vpop.f32.mrf.mxu1 }
 0x268   : > { %v2141_v16 = vadd.f32 %v2031_v37, %v1870_v1  ;;  %v8787_v1 = vld [vmem:[#allocation27_spill] sm:$0xff] }
 0x26a   : > { %v2039_v48 = vpop.f32.mrf.mxu3  ;;  %5509 = vmatmul.msk.bf16.gmra.mxu1 %vm963_vm3, %v6997_v15  ;;  %5543 = vmatmul.msk.bf16.gmra.mxu2 %vm963_vm3, %v7028_v2  ;;  %v7091_v43 = vadd.f32 %v2529_v4, %v2141_v16  ;;  %v8785_v15 = vld [vmem:[#allocation60_spill] sm:$0xff]  ;;  %v2296_v4 = vrot.slane %v8786_v60, 1  ;;  %v2297_v16 = vrot.slane %v8787_v1, 2  ;;  %v432_v60 = vld [vmem:[%s6307_s16 + $0x4] sm:$0xf] }
 0x26b   : > { %v2532_v22 = vpop.f32.mrf.mxu0  ;;  %v1415_v56 = vadd.f32 %v1414_v36, %v8785_v15  ;;  %438 = vst.msk [vmem:[#allocation2 + $0x10c] sm:$0xf] %vm364_vm1, %v432_v60 }
 0x26c   : > { %8784 = vst [vmem:[#allocation59_spill] sm:$0xff] %v7091_v43 }
 0x26d   : > { %v1763_v21 = vpop.f32.mrf.mxu2 }
 0x26e   : > { %5615 = vmatmul.msk.bf16.gmra.mxu0 %vm963_vm3, %v2295_v46  ;;  %v1871_v18 = vadd.f32 %v1763_v21, %v1415_v56  ;;  %v2298_v56 = vor.u32 %v2297_v16, %v2296_v4  ;;  %v7107_v21 = vld [vmem:[#allocation2 + $0x100] sm:$0xff]  ;;  %v8791_v4 = vld [vmem:[#allocation64_spill] sm:$0xff] }
 0x26f   : > { %v1416_v32 = vpop.f32.mrf.mxu1 }
 0x270   : > { %v2142_v37 = vadd.f32 %v2034_v62, %v1871_v18  ;;  %v1417_v36 = vadd.f32 %v1416_v32, %v8789_v58  ;;  %v7110_v62 = vrot.slane %v7107_v21, 1  ;;  %v2299_v58 = vsel %vm2175_vm5, %v2294_v12, %v2298_v56 }
 0x272   : > { %v2041_v28 = vpop.f32.mrf.mxu3  ;;  %v7102_v43 = vadd.f32 %v2532_v22, %v2142_v37  ;;  %v7121_v37 = vsel %vm1489_vm4, %v1551_v19, %v7110_v62 }
 0x273   : > { %v2534_v0 = vpop.f32.mrf.mxu0 }
 0x274   : > { %8788 = vst [vmem:[#allocation60_spill] sm:$0xff] %v7102_v43  ;;  %v7133_v43 = vld [vmem:[#allocation2 + $0x108] sm:$0xff] }
 0x275   : > { %v1765_v15 = vpop.f32.mrf.mxu2  ;;  %8795 = vst [vmem:[#allocation102_spill] sm:$0xff] %v7133_v43 }
 0x276   : > { %v1872_v46 = vadd.f32 %v1765_v15, %v1417_v36 }
 0x277   : > { %5583 = vmatmul.msk.bf16.gmra.mxu3 %vm963_vm3, %v7094_v35  ;;  %v1419_v5 = vpop.f32.mrf.mxu1 }
 0x278   : > { %v2143_v18 = vadd.f32 %v2036_v14, %v1872_v46  ;;  %v1420_v14 = vadd.f32 %v1419_v5, %v8791_v4  ;;  %v8793_v46 = vld [vmem:[#allocation33_spill] sm:$0xff]  ;;  %v8796_v5 = vld [vmem:[#allocation66_spill] sm:$0xff] }
 0x27a   : > { %v2044_v2 = vpop.f32.mrf.mxu3  ;;  %5510 = vmatmul.msk.bf16.gmra.mxu1 %vm963_vm3, %v7019_v3  ;;  %5544 = vmatmul.msk.bf16.gmra.mxu2 %vm963_vm3, %v7050_v59  ;;  %v7117_v32 = vadd.f32 %v2534_v0, %v2143_v18  ;;  %v8792_v0 = vld [vmem:[#allocation38_spill] sm:$0xff]  ;;  %v2301_v18 = vrot.slane %v8793_v46, 2 }
 0x27b   : > { %v2537_v22 = vpop.f32.mrf.mxu0  ;;  %v2300_v15 = vrot.slane %v8792_v0, 1 }
 0x27c   : > { %8790 = vst [vmem:[#allocation62_spill] sm:$0xff] %v7117_v32 }
 0x27d   : > { %v1768_v16 = vpop.f32.mrf.mxu2 }
 0x27e   : > { %5616 = vmatmul.msk.bf16.gmra.mxu0 %vm963_vm3, %v2299_v58  ;;  %v1873_v60 = vadd.f32 %v1768_v16, %v1420_v14  ;;  %v433_v14 = vld [vmem:[%s6307_s16 + $0x8] sm:$0xf] }
 0x27f   : > { %v1421_v3 = vpop.f32.mrf.mxu1  ;;  %439 = vst.msk [vmem:[#allocation2 + $0x110] sm:$0xf] %vm364_vm1, %v433_v14 }
 0x280   : > { %v2144_v59 = vadd.f32 %v2039_v48, %v1873_v60  ;;  %v1422_v58 = vadd.f32 %v1421_v3, %v8796_v5  ;;  %v2302_v48 = vor.u32 %v2301_v18, %v2300_v15  ;;  %v1914_v60 = vrot.slane %v7133_v43, 1  ;;  %v8798_v15 = vld [vmem:[#allocation69_spill] sm:$0xff] }
 0x282   : > { %v2046_v8 = vpop.f32.mrf.mxu3  ;;  %v7131_v19 = vadd.f32 %v2537_v22, %v2144_v59  ;;  %v2303_v3 = vsel %vm2175_vm5, %v2298_v56, %v2302_v48 }
 0x283   : > { %v2539_v12 = vpop.f32.mrf.mxu0 }
 0x284   : > { %8794 = vst [vmem:[#allocation64_spill] sm:$0xff] %v7131_v19 }
 0x285   : > { %v1770_v4 = vpop.f32.mrf.mxu2 }
 0x286   : > { %v1874_v16 = vadd.f32 %v1770_v4, %v1422_v58 }
 0x287   : > { %5584 = vmatmul.msk.bf16.gmra.mxu3 %vm963_vm3, %v7121_v37  ;;  %v1424_v32 = vpop.f32.mrf.mxu1 }
 0x288   : > { %v2145_v0 = vadd.f32 %v2041_v28, %v1874_v16  ;;  %v1425_v18 = vadd.f32 %v1424_v32, %v8798_v15  ;;  %v514_v28 = vld [vmem:[#allocation2 + $0x110] sm:$0x1]  ;;  %v8802_v15 = vld [vmem:[#allocation72_spill] sm:$0xff] }
 0x289   : > { %v1908_v14 = vunpack.c.l.b16 %v514_v28  ;;  %v517_v28 = vld [vmem:[#allocation2 + $0x10] sm:$0xc] }
 0x28a   : > { %v7127_v36 = vpop.f32.mrf.mxu3  ;;  %5511 = vmatmul.msk.bf16.gmra.mxu1 %vm963_vm3, %v7041_v9  ;;  %5545 = vmatmul.msk.bf16.gmra.mxu2 %vm963_vm3, %v7072_v34  ;;  %v7146_v59 = vadd.f32 %v2539_v12, %v2145_v0  ;;  %v1915_v9 = vsel %vm1489_vm4, %v7110_v62, %v1914_v60  ;;  %v8799_v12 = vld [vmem:[#allocation46_spill] sm:$0xff] }
 0x28b   : > { %v2542_v22 = vpop.f32.mrf.mxu0  ;;  %v2304_v0 = vrot.slane %v8799_v12, 1  ;;  %v1911_v32 = vpack.c.b16 %v1908_v14, %v1908_v14  ;;  %v7167_v14 = vld [vmem:[#allocation2 + $0x10] sm:$0xff]  }
 0x28c   : > { %8797 = vst [vmem:[#allocation66_spill] sm:$0xff] %v7146_v59  ;;  %v8800_v59 = vld [vmem:[#allocation39_spill] sm:$0xff] }
 0x28d   : > { %v1773_v58 = vpop.f32.mrf.mxu2  ;;  %v2305_v19 = vrot.slane %v8800_v59, 2 }
 0x28e   : > { %5617 = vmatmul.msk.bf16.gmra.mxu0 %vm963_vm3, %v2303_v3  ;;  %v1875_v4 = vadd.f32 %v1773_v58, %v1425_v18 }
 0x28f   : > { %v1426_v5 = vpop.f32.mrf.mxu1 }
 0x290   : > { %v2146_v16 = vadd.f32 %v2044_v2, %v1875_v4  ;;  %v1427_v3 = vadd.f32 %v1426_v5, %v8802_v15  ;;  %v1916_v2 = vrot.slane %v1911_v32, 1  ;;  %v8608_v5 = vunpack.c.h.b16 %v7167_v14 }
 0x291   : > { %v8609_v32 = vshrl.u32 %v7133_v43, 16  ;;  %v8612_v15 = vshll.u32 %v7133_v43, 16 }
 0x292   : > { %v7141_v46 = vpop.f32.mrf.mxu3  ;;  %v7157_v1 = vadd.f32 %v2542_v22, %v2146_v16 }
 0x293   : > { %v2544_v56 = vpop.f32.mrf.mxu0 }
 0x294   : > { %8801 = vst [vmem:[#allocation69_spill] sm:$0xff] %v7157_v1 }
 0x295   : > { %v1775_v30 = vpop.f32.mrf.mxu2 }
 0x296   : > { %v1876_v27 = vadd.f32 %v1775_v30, %v1427_v3  ;;  %v3089_v30 = vunpack.c.l.b16 %v517_v28  ;;  %v2314_v28 = vrot.slane %v8612_v15, 2 }
 0x297   : > { %5585 = vmatmul.msk.bf16.gmra.mxu3 %vm963_vm3, %v1915_v9  ;;  %v1429_v33 = vpop.f32.mrf.mxu1  ;;  %v2306_v9 = vor.u32 %v2305_v19, %v2304_v0 }
 0x298   : > { %v2147_v18 = vadd.f32 %v2046_v8, %v1876_v27  ;;  %v8804_v27 = vld [vmem:[#allocation75_spill] sm:$0xff]  ;;  %v7176_v0 = vpack.c.b16 %v8608_v5, %v3089_v30 }
 0x299   : > { %v2307_v22 = vsel %vm2175_vm5, %v2302_v48, %v2306_v9  ;;  %v1430_v8 = vadd.f32 %v1429_v33, %v8804_v27  ;;  %v515_v27 = vld [vmem:[#allocation2 + $0x110] sm:$0x3] }
 0x29a   : > { %v7153_v34 = vpop.f32.mrf.mxu3  ;;  %5512 = vmatmul.msk.bf16.gmra.mxu1 %vm963_vm3, %v7063_v51  ;;  %5546 = vmatmul.msk.bf16.gmra.mxu2 %vm963_vm3, %v7094_v35  ;;  %v1917_v51 = vsel %vm1489_vm4, %v1914_v60, %v1916_v2  ;;  %v7171_v19 = vadd.f32 %v2544_v56, %v2147_v18  ;;  %v3361_v60 = vshrl.u32 %v7176_v0, 16  ;;  %v3364_v56 = vshll.u32 %v7176_v0, 16 }
 0x29b   : > { %v2547_v4 = vpop.f32.mrf.mxu0  ;;  %v2311_v18 = vrot.slane %v8609_v32, 1  ;;  %v2173_v43 = vunpack.c.l.b16 %v515_v27 }
 0x29c   : > { %8803 = vst [vmem:[#allocation72_spill] sm:$0xff] %v7171_v19  ;;  %v8806_v19 = vld [vmem:[#allocation19_spill] sm:$0xff] }
 0x29d   : > { %v1778_v35 = vpop.f32.mrf.mxu2  ;;  %v3369_v1 = vrot.slane %v8806_v19, 3  ;;  %v2315_v32 = vor.u32 %v2314_v28, %v2311_v18  ;;  %v7204_v19 = vpack.c.b16 %v2173_v43, %v2173_v43 }
 0x29e   : > { %5618 = vmatmul.msk.bf16.gmra.mxu0 %vm963_vm3, %v2307_v22  ;;  %v1877_v48 = vadd.f32 %v1778_v35, %v1430_v8  ;;  %v3366_v8 = vrot.slane %v3364_v56, 3  ;;  %v8805_v35 = vld [vmem:[#allocation24_spill] sm:$0xff] }
 0x29f   : > { %v1431_v16 = vpop.f32.mrf.mxu1  ;;  %v3368_v5 = vrot.slane %v8805_v35, 2  ;;  %8808 = vst [vmem:[#allocation75_spill] sm:$0xff] %v7204_v19  ;;  %v2318_v28 = vshrl.u32 %v7204_v19, 16 }
 0x2a0   : > { %v2148_v33 = vadd.f32 %v7127_v36, %v1877_v48  ;;  %v8807_v36 = vld [vmem:[#allocation78_spill] sm:$0xff] }
 0x2a1   : > { %v1432_v48 = vadd.f32 %v1431_v16, %v8807_v36  ;;  %v2316_v16 = vsel %vm2175_vm5, %v2306_v9, %v2315_v32  ;;  %v2320_v27 = vrot.slane %v2318_v28, 1  ;;  %v8811_v36 = vld [vmem:[#allocation30_spill] sm:$0xff] }
 0x2a2   : > { %v7162_v58 = vpop.f32.mrf.mxu3  ;;  %v7191_v22 = vadd.f32 %v2547_v4, %v2148_v33  ;;  %v3370_v4 = vor.u32 %v3369_v1, %v3368_v5  ;;  %v8809_v1 = vld [vmem:[#allocation81_spill] sm:$0xff] }
 0x2a3   : > { %v2549_v2 = vpop.f32.mrf.mxu0 }
 0x2a5   : > { %v1780_v59 = vpop.f32.mrf.mxu2 }
 0x2a6   : > { %v1878_v12 = vadd.f32 %v1780_v59, %v1432_v48  ;;  %v3372_v48 = vrot.slane %v8811_v36, 2 }
 0x2a7   : > { %5586 = vmatmul.msk.bf16.gmra.mxu3 %vm963_vm3, %v1917_v51  ;;  %v1434_v30 = vpop.f32.mrf.mxu1  ;;  %v3363_v51 = vrot.slane %v3361_v60, 2 }
 0x2a8   : > { %v2149_v33 = vadd.f32 %v7141_v46, %v1878_v12  ;;  %v1435_v5 = vadd.f32 %v1434_v30, %v8809_v1  ;;  %v8813_v1 = vld [vmem:[#allocation84_spill] sm:$0xff] }
 0x2a9   : > { %v3367_v15 = vor.u32 %v3366_v8, %v3363_v51  ;;  %v8810_v8 = vld [vmem:[#allocation43_spill] sm:$0xff] }
 0x2aa   : > { %v7185_v3 = vpop.f32.mrf.mxu3  ;;  %5513 = vmatmul.msk.bf16.gmra.mxu1 %vm963_vm3, %v7085_v17  ;;  %5547 = vmatmul.msk.bf16.gmra.mxu2 %vm963_vm3, %v7121_v37  ;;  %v7206_v59 = vadd.f32 %v2549_v2, %v2149_v33  ;;  %v2321_v37 = vshll.u32 %v7204_v19, 16  ;;  %v1555_v35 = vrot.slane %v8810_v8, 1  ;;  %v8812_v33 = vld [vmem:[#allocation25_spill] sm:$0xff] }
 0x2ab   : > { %v2552_v56 = vpop.f32.mrf.mxu0  ;;  %v3371_v18 = vsel %vm3359_vm6, %v3367_v15, %v3370_v4 }
 0x2ac   : > { %v2323_v15 = vrot.slane %v2321_v37, 2 }
 0x2ad   : > { %v1783_v46 = vpop.f32.mrf.mxu2 }
 0x2ae   : > { %5619 = vmatmul.msk.bf16.gmra.mxu0 %vm963_vm3, %v2316_v16  ;;  %v1879_v12 = vadd.f32 %v1783_v46, %v1435_v5  ;;  %v3373_v16 = vrot.slane %v8812_v33, 3  ;;  %v516_v5 = vld [vmem:[#allocation2 + $0x8] sm:$0xc] }
 0x2af   : > { %v1436_v17 = vpop.f32.mrf.mxu1  ;;  %v2671_v28 = vunpack.c.l.b16 %v516_v5  ;;  %v2675_v5 = vrot.slane %v7167_v14, 2 }
 0x2b0   : > { %v2150_v43 = vadd.f32 %v7153_v34, %v1879_v12  ;;  %v2324_v12 = vor.u32 %v2323_v15, %v2320_v27  ;;  %v3374_v37 = vor.u32 %v3373_v16, %v3372_v48  ;;  %v8815_v15 = vld [vmem:[#allocation9_spill] sm:$0xff] }
 0x2b1   : > { %v8816_v33 = vunpack.c.h.b16 %v8815_v15 }
 0x2b2   : > { %v7199_v60 = vpop.f32.mrf.mxu3  ;;  %v7218_v30 = vadd.f32 %v2552_v56, %v2150_v43  ;;  %v1556_v56 = vsel %vm1489_vm4, %v7110_v62, %v1555_v35  ;;  %v2325_v36 = vsel %vm2175_vm5, %v2315_v32, %v2324_v12  ;;  %v3375_v62 = vsel %vm3359_vm6, %v3370_v4, %v3374_v37  ;;  %v8817_v35 = vld [vmem:[#allocation87_spill] sm:$0xff] }
 0x2b3   : > { %v2554_v2 = vpop.f32.mrf.mxu0 }
 0x2b5   : > { %v1785_v34 = vpop.f32.mrf.mxu2 }
 0x2b7   : > { %5694 = vmatmul.msk.bf16.vlgmr.msra.gmra.mxu3 %vm963_vm3, %v3371_v18  ;;  %v1439_v51 = vpop.f32.mrf.mxu1  ;;  %v1437_v18 = vadd.f32 %v1436_v17, %v8813_v1  ;;  %v2672_v1 = vpack.c.b16 %v8816_v33, %v2671_v28 }
 0x2b8   : > { %v1440_v48 = vadd.f32 %v1439_v51, %v8817_v35  ;;  %v4400_v51 = vld [vmem:[%s7247_s6] sm:$0xff] }
 0x2b9   : > { %v1880_v46 = vadd.f32 %v1785_v34, %v1437_v18  ;;  %v522_v18 = vld [vmem:[#allocation2 + $0x10] sm:$0x8]  ;;  %v2674_v16 = vrot.slane %v2672_v1, 2  ;;  %v3096_v1 = vrot.slane %v7176_v0, 2  ;;  %v8820_v35 = vld [vmem:[#allocation31_spill] sm:$0xff]  ;;  %v4401_v0 = vld [vmem:[%s7247_s6 + $0x8] sm:$0xff] }
 0x2ba   : > { %v7215_v9 = vpop.f32.mrf.mxu3  ;;  %5514 = vmatmul.msk.bf16.gmra.mxu1 %vm963_vm3, %v7107_v21  ;;  %5548 = vmatmul.msk.bf16.gmra.mxu2 %vm963_vm3, %v1556_v56  ;;  %v5849_v56 = vld [vmem:[#allocation2 + $0x18] sm:$0xff] }
 0x2bb   : > { %v2151_v43 = vadd.f32 %v7162_v58, %v1880_v46  ;;  %v2557_v17 = vpop.f32.mrf.mxu0  ;;  %v5888_v46 = vmov 0   ;;  %v2677_v28 = vrot.slane %v5849_v56, 2 }
 0x2bc   : > { %5824 = vset.pattern.permute.xlu0 %v5888_v46  ;;  %5825 = vset.pattern.permute.xlu1 %v5888_v46 }
 0x2bd   : > { %v7237_v21 = vadd.f32 %v2554_v2, %v2151_v43  ;;  %v1788_v58 = vpop.f32.mrf.mxu2  ;;  %v3855_v2 = vunpack.c.l.b16 %v522_v18  ;;  %v8818_v43 = vunpack.c.h.b16 %v7167_v14  ;;  %4468 = vperm.xlu0 %5824, %v4400_v51   ;;  %5826 = vset.pattern.permute.xlu2 %v5888_v46  ;;  %v8819_v18 = vld [vmem:[#allocation36_spill] sm:$0xff] }
 0x2be   : > { %5620 = vmatmul.msk.bf16.gmra.mxu0 %vm963_vm3, %v2325_v36  ;;  %v1881_v32 = vadd.f32 %v1788_v58, %v1440_v48  ;;  %v3377_v48 = vrot.slane %v8820_v35, 3  ;;  %v8821_v58 = vld [vmem:[#allocation90_spill] sm:$0xff] }
 0x2bf   : > { %8814 = vst [vmem:[#allocation24_spill] sm:$0xff] %v7237_v21  ;;  %v1441_v27 = vpop.f32.mrf.mxu1  ;;  %v3856_v36 = vpack.c.b16 %v8818_v43, %v3855_v2  ;;  %v3859_v2 = vrot.slane %v5849_v56, 3 }
 0x2c0   : > { %v2152_v4 = vadd.f32 %v7185_v3, %v1881_v32  ;;  %v2676_v3 = vsel %vm2673_vm7, %v2674_v16, %v2675_v5  ;;  %v1442_v32 = vadd.f32 %v1441_v27, %v8821_v58  ;;  %v5850_v58 = vld [vmem:[#allocation2 + $0x20] sm:$0xff] }
 0x2c1   : > { %v3858_v14 = vrot.slane %v3856_v36, 3  ;;  %v8822_v36 = vld [vmem:[#allocation93_spill] sm:$0xff] }
 0x2c2   : > { %v7232_v8 = vpop.f32.mrf.mxu3  ;;  %v7257_v15 = vadd.f32 %v2557_v17, %v2152_v4  ;;  %v3097_v17 = vsel %vm2673_vm7, %v3096_v1, %v2677_v28 }
 0x2c3   : > { %v2559_v12 = vpop.f32.mrf.mxu0  ;;  %v3860_v27 = vsel %vm3857_vm8, %v3858_v14, %v3859_v2 }
 0x2c5   : > { %v1790_v21 = vpop.f32.mrf.mxu2  ;;  %4473 = vperm.xlu0 %5824, %v4401_v0   ;;  %v8825_v0 = vld [vmem:[#allocation95_spill] sm:$0xff] }
 0x2c6   : > { %v1882_v19 = vadd.f32 %v1790_v21, %v1442_v32  ;;  %v8823_v32 = vld [vmem:[#allocation44_spill] sm:$0xff] }
 0x2c7   : > { %5695 = vmatmul.msk.bf16.gmra.mxu3 %vm963_vm3, %v3375_v62  ;;  %v1444_v33 = vpop.f32.mrf.mxu1  ;;  %v3376_v62 = vrot.slane %v8819_v18, 2  ;;  %v4402_v18 = vld [vmem:[%s7247_s6 + $0x10] sm:$0xff]  ;;  %v3380_v14 = vrot.slane %v8823_v32, 2 }
 0x2c8   : > { %v2153_v16 = vadd.f32 %v7199_v60, %v1882_v19  ;;  %4478 = vperm.xlu1 %5825, %v4402_v18  }
 0x2c9   : > { %v3378_v4 = vor.u32 %v3377_v48, %v3376_v62 }
 0x2ca   : > { %v7253_v34 = vpop.f32.mrf.mxu3  ;;  %5622 = vmatmul.msk.bf16.vlgmr.msra.gmra.mxu1 %vm963_vm3, %v2676_v3  ;;  %5660 = vmatmul.msk.bf16.vlgmr.msra.gmra.mxu2 %vm963_vm3, %v3097_v17  ;;  %v7272_v21 = vadd.f32 %v2559_v12, %v2153_v16  ;;  %v1445_v3 = vadd.f32 %v1444_v33, %v8822_v36  ;;  %v2679_v33 = vrot.slane %v5850_v58, 2  ;;  %v8824_v17 = vld [vmem:[#allocation37_spill] sm:$0xff]  ;;  %v3861_v36 = vrot.slane %v5850_v58, 3 }
 0x2cb   : > { %v2562_v46 = vpop.f32.mrf.mxu0  ;;  %v3379_v56 = vsel %vm3359_vm6, %v3374_v37, %v3378_v4  ;;  %v2678_v37 = vsel %vm2673_vm7, %v2675_v5, %v2677_v28  ;;  %v3381_v16 = vrot.slane %v8824_v17, 3 }
 0x2cc   : > { %v3862_v18 = vsel %vm3857_vm8, %v3859_v2, %v3861_v36 }
 0x2cd   : > { %v1793_v60 = vpop.f32.mrf.mxu2 }
 0x2ce   : > { %5728 = vmatmul.msk.bf16.vlgmr.msra.gmra.mxu0 %vm963_vm3, %v3860_v27  ;;  %v1883_v19 = vadd.f32 %v1793_v60, %v1445_v3  ;;  %v2680_v3 = vsel %vm2673_vm7, %v2677_v28, %v2679_v33 }
 0x2cf   : > { %v1446_v43 = vpop.f32.mrf.mxu1 }
 0x2d0   : > { %v2154_v1 = vadd.f32 %v7215_v9, %v1883_v19  ;;  %v1447_v27 = vadd.f32 %v1446_v43, %v8825_v0  ;;  %v4403_v19 = vld [vmem:[%s7247_s6 + $0x18] sm:$0xff] }
 0x2d1   : > { %4483 = vperm.xlu1 %5825, %v4403_v19   ;;  %v8830_v19 = vld [vmem:[#allocation98_spill] sm:$0xff] }
 0x2d2   : > { %v7268_v51 = vpop.f32.mrf.mxu3  ;;  %v7280_v12 = vadd.f32 %v2562_v46, %v2154_v1  ;;  %v3382_v46 = vor.u32 %v3381_v16, %v3380_v14 }
 0x2d3   : > { %v2564_v35 = vpop.f32.mrf.mxu0 }
 0x2d4   : > { %v3383_v17 = vsel %vm3359_vm6, %v3378_v4, %v3382_v46 }
 0x2d7   : > { %5696 = vmatmul.msk.bf16.gmra.mxu3 %vm963_vm3, %v3379_v56  ;;  %v1449_v48 = vpop.f32.mrf.mxu1  ;;  %v1795_v56 = vpop.f32.mrf.mxu2 }
 0x2d8   : > { %v1884_v9 = vadd.f32 %v1795_v56, %v1447_v27 }
 0x2da   : > { %v2074_v62 = vpop.f32.mrf.mxu3  ;;  %5623 = vmatmul.msk.bf16.gmra.mxu1 %vm963_vm3, %v2678_v37  ;;  %v2155_v60 = vadd.f32 %v7232_v8, %v1884_v9  ;;  %5661 = vmatmul.msk.bf16.gmra.mxu2 %vm963_vm3, %v2680_v3  ;;  %v8826_v37 = vld [vmem:[#allocation97_spill] sm:$0xff]  ;;  %v8828_v9 = vld [vmem:[#allocation51_spill] sm:$0xff] }
 0x2db   : > { %v2567_v1 = vpop.f32.mrf.mxu0  ;;  %v1450_v58 = vadd.f32 %v1449_v48, %v8826_v37  ;;  %v3384_v4 = vrot.slane %v8828_v9, 2 }
 0x2dc   : > { %v7292_v32 = vadd.f32 %v2564_v35, %v2155_v60  ;;  %v5851_v35 = vld [vmem:[#allocation2 + $0x28] sm:$0xff]  ;;  %v8829_v60 = vld [vmem:[#allocation45_spill] sm:$0xff] }
 0x2dd   : > { %v2681_v56 = vrot.slane %v5851_v35, 2  ;;  %v3385_v48 = vrot.slane %v8829_v60, 3 }
 0x2de   : > { %5729 = vmatmul.msk.bf16.gmra.mxu0 %vm963_vm3, %v3862_v18 }
 0x2df   : > { %v1451_v43 = vpop.f32.mrf.mxu1  ;;  %v1798_v28 = vpop.f32.mrf.mxu2 }
 0x2e0   : > { %v1885_v14 = vadd.f32 %v1798_v28, %v1450_v58  ;;  %v1452_v18 = vadd.f32 %v1451_v43, %v8830_v19  ;;  %v3386_v28 = vor.u32 %v3385_v48, %v3384_v4  ;;  %v4406_v48 = vld [vmem:[%s7247_s6 + $0x30] sm:$0xff] }
 0x2e1   : > { %4498 = vperm.xlu0 %5824, %v4406_v48  }
 0x2e2   : > { %v2076_v5 = vpop.f32.mrf.mxu3  ;;  %v2156_v8 = vadd.f32 %v7253_v34, %v1885_v14  ;;  %v2682_v34 = vsel %vm2673_vm7, %v2679_v33, %v2681_v56  ;;  %v3387_v19 = vsel %vm3359_vm6, %v3382_v46, %v3386_v28  ;;  %v5852_v46 = vld [vmem:[#allocation2 + $0x30] sm:$0xff] }
 0x2e3   : > { %v2569_v0 = vpop.f32.mrf.mxu0 }
 0x2e4   : > { %v7301_v27 = vadd.f32 %v2567_v1, %v2156_v8 }
 0x2e6   : > { %8827 = vst [vmem:[#allocation19_spill] sm:$0xff] %v7301_v27 }
 0x2e7   : > { %5697 = vmatmul.msk.bf16.gmra.mxu3 %vm963_vm3, %v3383_v17  ;;  %v1454_v2 = vpop.f32.mrf.mxu1  ;;  %v1800_v37 = vpop.f32.mrf.mxu2  ;;  %v3863_v17 = vrot.slane %v5851_v35, 3 }
 0x2e8   : > { %v1886_v58 = vadd.f32 %v1800_v37, %v1452_v18 }
 0x2e9   : > { %v3864_v9 = vsel %vm3857_vm8, %v3861_v36, %v3863_v17 }
 0x2ea   : > { %v7299_v16 = vpop.f32.mrf.mxu3  ;;  %5624 = vmatmul.msk.bf16.gmra.mxu1 %vm963_vm3, %v2680_v3  ;;  %v2157_v1 = vadd.f32 %v7268_v51, %v1886_v58  ;;  %5662 = vmatmul.msk.bf16.gmra.mxu2 %vm963_vm3, %v2682_v34  ;;  %v8832_v3 = vld [vmem:[#allocation61_spill] sm:$0xff]  ;;  %v2683_v58 = vrot.slane %v5852_v46, 2 }
 0x2eb   : > { %v2572_v8 = vpop.f32.mrf.mxu0  ;;  %v1455_v35 = vadd.f32 %v1454_v2, %v8832_v3  ;;  %v8834_v2 = vld [vmem:[#allocation55_spill] sm:$0xff] }
 0x2ec   : > { %v7313_v60 = vadd.f32 %v2569_v0, %v2157_v1  ;;  %v3388_v1 = vrot.slane %v8834_v2, 2  ;;  %v2684_v48 = vsel %vm2673_vm7, %v2681_v56, %v2683_v58  ;;  %v8837_v56 = vld [vmem:[#allocation65_spill] sm:$0xff] }
 0x2ee   : > { %8831 = vst [vmem:[#allocation78_spill] sm:$0xff] %v7313_v60  ;;  %5730 = vmatmul.msk.bf16.gmra.mxu0 %vm963_vm3, %v3864_v9  ;;  %v8835_v9 = vld [vmem:[#allocation52_spill] sm:$0xff] }
 0x2ef   : > { %v1456_v43 = vpop.f32.mrf.mxu1  ;;  %v1803_v33 = vpop.f32.mrf.mxu2  ;;  %v3389_v3 = vrot.slane %v8835_v9, 3 }
 0x2f0   : > { %v1887_v4 = vadd.f32 %v1803_v33, %v1455_v35  ;;  %v8836_v35 = vld [vmem:[#allocation63_spill] sm:$0xff] }
 0x2f1   : > { %v1457_v33 = vadd.f32 %v1456_v43, %v8836_v35  ;;  %v3390_v60 = vor.u32 %v3389_v3, %v3388_v1 }
 0x2f2   : > { %v7309_v14 = vpop.f32.mrf.mxu3  ;;  %v2158_v51 = vadd.f32 %v2074_v62, %v1887_v4  ;;  %v3865_v4 = vrot.slane %v5852_v46, 3 }
 0x2f3   : > { %v2574_v36 = vpop.f32.mrf.mxu0  ;;  %v3391_v46 = vsel %vm3359_vm6, %v3386_v28, %v3390_v60  ;;  %v5853_v28 = vld [vmem:[#allocation2 + $0x38] sm:$0xff] }
 0x2f4   : > { %v7322_v0 = vadd.f32 %v2572_v8, %v2158_v51  ;;  %v4404_v8 = vld [vmem:[%s7247_s6 + $0x20] sm:$0xff]  ;;  %v4407_v51 = vld [vmem:[%s7247_s6 + $0x38] sm:$0xff]  ;;  %v3866_v43 = vsel %vm3857_vm8, %v3863_v17, %v3865_v4 }
 0x2f5   : > { %4488 = vperm.xlu2 %5826, %v4404_v8   ;;  %4503 = vperm.xlu1 %5825, %v4407_v51   ;;  %v8840_v51 = vld [vmem:[#allocation3_spill] sm:$0xff] }
 0x2f6   : > { %8833 = vst [vmem:[#allocation81_spill] sm:$0xff] %v7322_v0 }
 0x2f7   : > { %5698 = vmatmul.msk.bf16.gmra.mxu3 %vm963_vm3, %v3387_v19  ;;  %v1459_v37 = vpop.f32.mrf.mxu1  ;;  %v1805_v19 = vpop.f32.mrf.mxu2 }
 0x2f8   : > { %v1888_v62 = vadd.f32 %v1805_v19, %v1457_v33  ;;  %v1460_v1 = vadd.f32 %v1459_v37, %v8837_v56  ;;  %v4405_v33 = vld [vmem:[%s7247_s6 + $0x28] sm:$0xff]  ;;  %v8841_v56 = vld [vmem:[#allocation67_spill] sm:$0xff] }
 0x2f9   : > { %v8839_v37 = vld [vmem:[#allocation4_spill] sm:$0xff] }
 0x2fa   : > { %v7320_v18 = vpop.f32.mrf.mxu3  ;;  %5625 = vmatmul.msk.bf16.gmra.mxu1 %vm963_vm3, %v2682_v34  ;;  %v2159_v27 = vadd.f32 %v2076_v5, %v1888_v62  ;;  %5663 = vmatmul.msk.bf16.gmra.mxu2 %vm963_vm3, %v2684_v48  ;;  %v2685_v62 = vrot.slane %v5853_v28, 2  ;;  %v3392_v8 = vrot.slane %v8839_v37, 2 }
 0x2fb   : > { %v2577_v2 = vpop.f32.mrf.mxu0 }
 0x2fc   : > { %v7335_v9 = vadd.f32 %v2574_v36, %v2159_v27 }
 0x2fd   : > { %4493 = vperm.xlu2 %5826, %v4405_v33  }
 0x2fe   : > { %5731 = vmatmul.msk.bf16.gmra.mxu0 %vm963_vm3, %v3866_v43  ;;  %v3393_v43 = vrot.slane %v8840_v51, 3 }
 0x2ff   : > { %v1461_v34 = vpop.f32.mrf.mxu1  ;;  %v1808_v5 = vpop.f32.mrf.mxu2 }
 0x300   : > { %v1889_v3 = vadd.f32 %v1808_v5, %v1460_v1  ;;  %v1462_v1 = vadd.f32 %v1461_v34, %v8841_v56  ;;  %v3394_v33 = vor.u32 %v3393_v43, %v3392_v8 }
 0x302   : > { %v7331_v0 = vpop.f32.mrf.mxu3  ;;  %v2160_v35 = vadd.f32 %v7299_v16, %v1889_v3  ;;  %v3867_v16 = vrot.slane %v5853_v28, 3  ;;  %v2686_v3 = vsel %vm2673_vm7, %v2683_v58, %v2685_v62  ;;  %v8843_v28 = vld [vmem:[#allocation70_spill] sm:$0xff] }
 0x303   : > { %v2579_v27 = vpop.f32.mrf.mxu0 }
 0x304   : > { %v7345_v17 = vadd.f32 %v2577_v2, %v2160_v35  ;;  %v4409_v35 = vld [vmem:[%s7247_s6 + $0x48] sm:$0xff]  ;;  %v3868_v34 = vsel %vm3857_vm8, %v3865_v4, %v3867_v16 }
 0x305   : > { %4513 = vperm.xlu0 %5824, %v4409_v35  }
 0x306   : > { %8838 = vst [vmem:[#allocation43_spill] sm:$0xff] %v7345_v17 }
 0x307   : > { %5699 = vmatmul.msk.bf16.gmra.mxu3 %vm963_vm3, %v3391_v46  ;;  %v1464_v36 = vpop.f32.mrf.mxu1  ;;  %v1810_v46 = vpop.f32.mrf.mxu2 }
 0x308   : > { %v1890_v5 = vadd.f32 %v1810_v46, %v1462_v1  ;;  %v1465_v58 = vadd.f32 %v1464_v36, %v8843_v28  ;;  %v4410_v1 = vld [vmem:[%s7247_s6 + $0x50] sm:$0xff]  ;;  %v8845_v36 = vld [vmem:[#allocation10_spill] sm:$0xff] }
 0x309   : > { %4518 = vperm.xlu1 %5825, %v4410_v1   ;;  %v3396_v35 = vrot.slane %v8845_v36, 2 }
 0x30a   : > { %v7343_v19 = vpop.f32.mrf.mxu3  ;;  %5626 = vmatmul.msk.bf16.gmra.mxu1 %vm963_vm3, %v2684_v48  ;;  %v2161_v2 = vadd.f32 %v7309_v14, %v1890_v5  ;;  %5664 = vmatmul.msk.bf16.gmra.mxu2 %vm963_vm3, %v2686_v3  ;;  %v3395_v48 = vsel %vm3359_vm6, %v3390_v60, %v3394_v33  ;;  %v5854_v60 = vld [vmem:[#allocation2 + $0x40] sm:$0xff] }
 0x30b   : > { %v2582_v37 = vpop.f32.mrf.mxu0 }
 0x30c   : > { %v7358_v51 = vadd.f32 %v2579_v27, %v2161_v2  ;;  %v2687_v2 = vrot.slane %v5854_v60, 2 }
 0x30e   : > { %8842 = vst [vmem:[#allocation30_spill] sm:$0xff] %v7358_v51  ;;  %5732 = vmatmul.msk.bf16.gmra.mxu0 %vm963_vm3, %v3868_v34  ;;  %v8846_v34 = vld [vmem:[#allocation5_spill] sm:$0xff] }
 0x30f   : > { %v1466_v56 = vpop.f32.mrf.mxu1  ;;  %v1813_v14 = vpop.f32.mrf.mxu2  ;;  %v3397_v28 = vrot.slane %v8846_v34, 3 }
 0x310   : > { %v1891_v8 = vadd.f32 %v1813_v14, %v1465_v58  ;;  %v8847_v58 = vld [vmem:[#allocation73_spill] sm:$0xff] }
 0x311   : > { %v1467_v14 = vadd.f32 %v1466_v56, %v8847_v58  ;;  %v3398_v1 = vor.u32 %v3397_v28, %v3396_v35  ;;  %v4412_v28 = vld [vmem:[%s7247_s6 + $0x60] sm:$0xff] }
 0x312   : > { %v7354_v17 = vpop.f32.mrf.mxu3  ;;  %v2162_v43 = vadd.f32 %v7320_v18, %v1891_v8  ;;  %v3869_v18 = vrot.slane %v5854_v60, 3  ;;  %v2688_v8 = vsel %vm2673_vm7, %v2685_v62, %v2687_v2  ;;  %v8848_v60 = vld [vmem:[#allocation76_spill] sm:$0xff]  ;;  %4528 = vperm.xlu0 %5824, %v4412_v28  }
 0x313   : > { %v2584_v4 = vpop.f32.mrf.mxu0 }
 0x314   : > { %v7368_v27 = vadd.f32 %v2582_v37, %v2162_v43  ;;  %v4408_v43 = vld [vmem:[%s7247_s6 + $0x40] sm:$0xff]  ;;  %v3870_v56 = vsel %vm3857_vm8, %v3867_v16, %v3869_v18 }
 0x315   : > { %4508 = vperm.xlu2 %5826, %v4408_v43   ;;  %v8850_v43 = vld [vmem:[#allocation11_spill] sm:$0xff] }
 0x316   : > { %8844 = vst [vmem:[#allocation25_spill] sm:$0xff] %v7368_v27 }
 0x317   : > { %5700 = vmatmul.msk.bf16.gmra.mxu3 %vm963_vm3, %v3395_v48  ;;  %v1469_v5 = vpop.f32.mrf.mxu1  ;;  %v1815_v48 = vpop.f32.mrf.mxu2 }
 0x318   : > { %v1892_v51 = vadd.f32 %v1815_v48, %v1467_v14  ;;  %v1470_v62 = vadd.f32 %v1469_v5, %v8848_v60  ;;  %v3400_v5 = vrot.slane %v6102_v39, 2  ;;  %v8851_v60 = vld [vmem:[#allocation79_spill] sm:$0xff] }
 0x31a   : > { %v7366_v46 = vpop.f32.mrf.mxu3  ;;  %5627 = vmatmul.msk.bf16.gmra.mxu1 %vm963_vm3, %v2686_v3  ;;  %v2163_v37 = vadd.f32 %v7331_v0, %v1892_v51  ;;  %5665 = vmatmul.msk.bf16.gmra.mxu2 %vm963_vm3, %v2688_v8  ;;  %v3399_v3 = vsel %vm3359_vm6, %v3394_v33, %v3398_v1  ;;  %v5855_v33 = vld [vmem:[#allocation2 + $0x48] sm:$0xff] }
 0x31b   : > { %v2587_v36 = vpop.f32.mrf.mxu0 }
 0x31c   : > { %v7381_v34 = vadd.f32 %v2584_v4, %v2163_v37  ;;  %v2689_v37 = vrot.slane %v5855_v33, 2 }
 0x31e   : > { %5733 = vmatmul.msk.bf16.gmra.mxu0 %vm963_vm3, %v3870_v56  ;;  %v3401_v56 = vrot.slane %v8850_v43, 3 }
 0x31f   : > { %v1471_v58 = vpop.f32.mrf.mxu1  ;;  %v1818_v0 = vpop.f32.mrf.mxu2 }
 0x320   : > { %v1893_v51 = vadd.f32 %v1818_v0, %v1470_v62  ;;  %v1472_v62 = vadd.f32 %v1471_v58, %v8851_v60  ;;  %v3402_v28 = vor.u32 %v3401_v56, %v3400_v5 }
 0x322   : > { %v7377_v27 = vpop.f32.mrf.mxu3  ;;  %v2164_v35 = vadd.f32 %v7343_v19, %v1893_v51  ;;  %v3871_v19 = vrot.slane %v5855_v33, 3  ;;  %v2690_v51 = vsel %vm2673_vm7, %v2687_v2, %v2689_v37  ;;  %v8852_v33 = vld [vmem:[#allocation82_spill] sm:$0xff] }
 0x323   : > { %v2589_v16 = vpop.f32.mrf.mxu0 }
 0x324   : > { %v7391_v4 = vadd.f32 %v2587_v36, %v2164_v35  ;;  %v4413_v35 = vld [vmem:[%s7247_s6 + $0x68] sm:$0xff]  ;;  %v3872_v58 = vsel %vm3857_vm8, %v3869_v18, %v3871_v19 }
 0x325   : > { %4533 = vperm.xlu1 %5825, %v4413_v35   ;;  %v3405_v35 = vrot.slane %v6105_v40, 3 }
 0x326   : > { %8849 = vst [vmem:[#allocation84_spill] sm:$0xff] %v7391_v4 }
 0x327   : > { %5701 = vmatmul.msk.bf16.gmra.mxu3 %vm963_vm3, %v3399_v3  ;;  %v1474_v48 = vpop.f32.mrf.mxu1  ;;  %v1820_v3 = vpop.f32.mrf.mxu2 }
 0x328   : > { %v1894_v0 = vadd.f32 %v1820_v3, %v1472_v62  ;;  %v1475_v2 = vadd.f32 %v1474_v48, %v8852_v33  ;;  %v4411_v3 = vld [vmem:[%s7247_s6 + $0x58] sm:$0xff]  ;;  %v3404_v48 = vrot.slane %v6168_v26, 2 }
 0x329   : > { %4523 = vperm.xlu2 %5826, %v4411_v3  }
 0x32a   : > { %v7389_v14 = vpop.f32.mrf.mxu3  ;;  %5628 = vmatmul.msk.bf16.gmra.mxu1 %vm963_vm3, %v2688_v8  ;;  %v2165_v36 = vadd.f32 %v7354_v17, %v1894_v0  ;;  %5666 = vmatmul.msk.bf16.gmra.mxu2 %vm963_vm3, %v2690_v51  ;;  %v3403_v8 = vsel %vm3359_vm6, %v3398_v1, %v3402_v28  ;;  %v5856_v1 = vld [vmem:[#allocation2 + $0x50] sm:$0xff] }
 0x32b   : > { %v2592_v39 = vpop.f32.mrf.mxu0 }
 0x32c   : > { %v7404_v43 = vadd.f32 %v2589_v16, %v2165_v36  ;;  %v2691_v36 = vrot.slane %v5856_v1, 2 }
 0x32e   : > { %5734 = vmatmul.msk.bf16.gmra.mxu0 %vm963_vm3, %v3872_v58  ;;  %v8853_v58 = vld [vmem:[#allocation85_spill] sm:$0xff] }
 0x32f   : > { %v1476_v60 = vpop.f32.mrf.mxu1  ;;  %v1823_v17 = vpop.f32.mrf.mxu2 }
 0x330   : > { %v1895_v5 = vadd.f32 %v1823_v17, %v1475_v2  ;;  %v1477_v33 = vadd.f32 %v1476_v60, %v8853_v58  ;;  %v2692_v17 = vsel %vm2673_vm7, %v2689_v37, %v2691_v36 }
 0x332   : > { %v7400_v4 = vpop.f32.mrf.mxu3  ;;  %v2166_v56 = vadd.f32 %v7366_v46, %v1895_v5  ;;  %v3873_v46 = vrot.slane %v5856_v1, 3  ;;  %v3406_v5 = vor.u32 %v3405_v35, %v3404_v48  ;;  %v8854_v1 = vld [vmem:[#allocation88_spill] sm:$0xff] }
 0x333   : > { %v2594_v0 = vpop.f32.mrf.mxu0 }
 0x334   : > { %v7414_v18 = vadd.f32 %v2592_v39, %v2166_v56  ;;  %v4415_v56 = vld [vmem:[%s7247_s6 + $0x78] sm:$0xff]  ;;  %v3874_v40 = vsel %vm3857_vm8, %v3871_v19, %v3873_v46 }
 0x335   : > { %4543 = vperm.xlu0 %5824, %v4415_v56   ;;  %v3409_v56 = vrot.slane %v6165_v23, 3 }
 0x337   : > { %5702 = vmatmul.msk.bf16.gmra.mxu3 %vm963_vm3, %v3403_v8  ;;  %v1479_v16 = vpop.f32.mrf.mxu1  ;;  %v1825_v8 = vpop.f32.mrf.mxu2 }
 0x338   : > { %v1896_v2 = vadd.f32 %v1825_v8, %v1477_v33  ;;  %v1480_v37 = vadd.f32 %v1479_v16, %v8854_v1  ;;  %v4416_v8 = vld [vmem:[%s7247_s6 + $0x80] sm:$0xff]  ;;  %v3408_v16 = vrot.slane %v6224_v47, 2 }
 0x339   : > { %4548 = vperm.xlu1 %5825, %v4416_v8   ;;  %v4414_v8 = vld [vmem:[%s7247_s6 + $0x70] sm:$0xff] }
 0x33a   : > { %v7411_v62 = vpop.f32.mrf.mxu3  ;;  %5629 = vmatmul.msk.bf16.gmra.mxu1 %vm963_vm3, %v2690_v51  ;;  %v2167_v39 = vadd.f32 %v7377_v27, %v1896_v2  ;;  %5667 = vmatmul.msk.bf16.gmra.mxu2 %vm963_vm3, %v2692_v17  ;;  %v3407_v51 = vsel %vm3359_vm6, %v3402_v28, %v3406_v5  ;;  %v5857_v28 = vld [vmem:[#allocation2 + $0x58] sm:$0xff] }
 0x33b   : > { %v2597_v26 = vpop.f32.mrf.mxu0  ;;  %4538 = vperm.xlu2 %5826, %v4414_v8  }
 0x33c   : > { %v7427_v60 = vadd.f32 %v2594_v0, %v2167_v39  ;;  %v2693_v39 = vrot.slane %v5857_v28, 2 }
 0x33e   : > { %5735 = vmatmul.msk.bf16.gmra.mxu0 %vm963_vm3, %v3874_v40  ;;  %v8856_v40 = vld [vmem:[#allocation91_spill] sm:$0xff] }
 0x33f   : > { %v1481_v58 = vpop.f32.mrf.mxu1  ;;  %v1828_v27 = vpop.f32.mrf.mxu2 }
 0x340   : > { %v1897_v48 = vadd.f32 %v1828_v27, %v1480_v37  ;;  %v1482_v1 = vadd.f32 %v1481_v58, %v8856_v40  ;;  %v2694_v27 = vsel %vm2673_vm7, %v2691_v36, %v2693_v39 }
 0x342   : > { %v7423_v3 = vpop.f32.mrf.mxu3  ;;  %v2168_v35 = vadd.f32 %v7389_v14, %v1897_v48  ;;  %v3875_v14 = vrot.slane %v5857_v28, 3  ;;  %v3410_v48 = vor.u32 %v3409_v56, %v3408_v16  ;;  %v4469_v16 = vpop.permute.xlu0 %4468 }
 0x343   : > { %v2599_v2 = vpop.f32.mrf.mxu0 }
 0x344   : > { %v7437_v19 = vadd.f32 %v2597_v26, %v2168_v35  ;;  %v3876_v23 = vsel %vm3857_vm8, %v3873_v46, %v3875_v14  ;;  %v3411_v58 = vsel %vm3359_vm6, %v3406_v5, %v3410_v48  ;;  %v4418_v46 = vld [vmem:[%s7247_s6 + $0x90] sm:$0xff]  ;;  %v7466_v5 = vld [vmem:[#allocation2 + $0x60] sm:$0xff] }
 0x345   : > { %4558 = vperm.xlu0 %5824, %v4418_v46  }
 0x346   : > { %8855 = vst [vmem:[#allocation9_spill] sm:$0xff] %v7437_v19 }
 0x347   : > { %5703 = vmatmul.msk.bf16.gmra.mxu3 %vm963_vm3, %v3407_v51  ;;  %v2852_v0 = vpop.f32.mrf.mxu1  ;;  %v1830_v51 = vpop.f32.mrf.mxu2 }
 0x348   : > { %v1898_v37 = vadd.f32 %v1830_v51, %v1482_v1  ;;  %v3017_v36 = vadd.f32 %v2852_v0, %v6700_v63  ;;  %v2695_v0 = vrot.slane %v7466_v5, 2  ;;  %v3413_v51 = vrot.slane %v6219_v45, 3 }
 0x34a   : > { %v7434_v33 = vpop.f32.mrf.mxu3  ;;  %5630 = vmatmul.msk.bf16.gmra.mxu1 %vm963_vm3, %v2692_v17  ;;  %v2169_v26 = vadd.f32 %v7400_v4, %v1898_v37  ;;  %5668 = vmatmul.msk.bf16.gmra.mxu2 %vm963_vm3, %v2694_v27 }
 0x34b   : > { %v4036_v19 = vpop.f32.mrf.mxu0 }
 0x34c   : > { %v7450_v47 = vadd.f32 %v2599_v2, %v2169_v26 }
 0x34e   : > { %5736 = vmatmul.msk.bf16.gmra.mxu0 %vm963_vm3, %v3876_v23  ;;  %v3877_v23 = vrot.slane %v7466_v5, 3 }
 0x34f   : > { %v2854_v17 = vpop.f32.mrf.mxu1  ;;  %v3123_v4 = vpop.f32.mrf.mxu2 }
 0x350   : > { %v3288_v28 = vadd.f32 %v3123_v4, %v3017_v36  ;;  %v3018_v37 = vadd.f32 %v2854_v17, %v6707_v25  ;;  %v4474_v4 = vpop.permute.xlu0 %4473  ;;  %v4419_v25 = vld [vmem:[%s7247_s6 + $0x98] sm:$0xff] }
 0x351   : > { %4563 = vperm.xlu1 %5825, %v4419_v25  }
 0x352   : > { %v7445_v35 = vpop.f32.mrf.mxu3  ;;  %v3786_v56 = vadd.f32 %v7411_v62, %v3288_v28  ;;  %v3412_v62 = vrot.slane %v6281_v52, 2 }
 0x353   : > { %v4038_v1 = vpop.f32.mrf.mxu0 }
 0x354   : > { %v4201_v2 = vadd.f32 %v4036_v19, %v3786_v56  ;;  %v7479_v36 = vor.u32 %v3413_v51, %v3412_v62  ;;  %v3878_v56 = vsel %vm3857_vm8, %v3875_v14, %v3877_v23 }
 0x356   : > { %v4267_v19 = vpack.c.bf16 %v4201_v2, %v4201_v2  ;;  %v4796_v52 = vmul.f32 %v4469_v16, %v4201_v2  ;;  %v3415_v16 = vsel %vm3359_vm6, %v3410_v48, %v7479_v36 }
 0x357   : > { %5704 = vmatmul.msk.bf16.gmra.mxu3 %vm963_vm3, %v3411_v58  ;;  %v2857_v63 = vpop.f32.mrf.mxu1  ;;  %v3125_v26 = vpop.f32.mrf.mxu2  ;;  %v2696_v58 = vsel %vm2673_vm7, %v2693_v39, %v2695_v0 }
 0x358   : > { %4334 = vst.msk [vmem:[%s7464_s10] sm:$0xf] %vm4333_vm9, %v4267_v19  ;;  %v3289_v8 = vadd.f32 %v3125_v26, %v3018_v37  ;;  %v3019_v46 = vadd.f32 %v2857_v63, %v6718_v54 }
 0x35a   : > { %v7458_v40 = vpop.f32.mrf.mxu3  ;;  %5631 = vmatmul.msk.bf16.gmra.mxu1 %vm963_vm3, %v2694_v27  ;;  %v3787_v45 = vadd.f32 %v7423_v3, %v3289_v8  ;;  %5669 = vmatmul.msk.bf16.gmra.mxu2 %vm963_vm3, %v2696_v58  ;;  %v5002_v3 = vmul.f32 %v4796_v52, %v4201_v2  ;;  %v4479_v2 = vpop.permute.xlu1 %4478 }
 0x35b   : > { %v4041_v17 = vpop.f32.mrf.mxu0 }
 0x35c   : > { %v4202_v27 = vadd.f32 %v4038_v1, %v3787_v45  ;;  %v4863_v1 = vsel %vm4862_vm10, %v4796_v52, 0.0  ;;  %v5068_v54 = vsel %vm4862_vm10, %v5002_v3, 0.0  ;;  %v4417_v52 = vld [vmem:[%s7247_s6 + $0x88] sm:$0xff]  ;;  %v3417_v3 = vrot.slane %v6276_v44, 3 }
 0x35d   : > { %4553 = vperm.xlu2 %5826, %v4417_v52  }
 0x35e   : > { %v4268_v62 = vpack.c.bf16 %v4202_v27, %v4202_v27  ;;  %v4797_v51 = vmul.f32 %v4474_v4, %v4202_v27  ;;  %5737 = vmatmul.msk.bf16.gmra.mxu0 %vm963_vm3, %v3878_v56 }
 0x35f   : > { %v2859_v39 = vpop.f32.mrf.mxu1  ;;  %v3128_v19 = vpop.f32.mrf.mxu2 }
 0x360   : > { %4335 = vst.msk [vmem:[%s7464_s10 + $0x4] sm:$0xf] %vm4333_vm9, %v4268_v62  ;;  %v4864_v14 = vsel %vm4862_vm10, %v4797_v51, 0.0  ;;  %v5003_v37 = vmul.f32 %v4797_v51, %v4202_v27  ;;  %v3290_v26 = vadd.f32 %v3128_v19, %v3019_v46  ;;  %v7504_v46 = vld [vmem:[#allocation2 + $0x68] sm:$0xff]  ;;  %v3416_v62 = vrot.slane %v6337_v10, 2 }
 0x361   : > { %v4865_v48 = vadd.f32 %v4864_v14, %v4863_v1 }
 0x362   : > { %v7482_v28 = vpop.f32.mrf.mxu3  ;;  %v5069_v63 = vsel %vm4862_vm10, %v5003_v37, 0.0  ;;  %v3788_v8 = vadd.f32 %v7434_v33, %v3290_v26  ;;  %v3020_v33 = vadd.f32 %v2859_v39, %v6727_v49  ;;  %v3879_v26 = vrot.slane %v7504_v46, 3 }
 0x363   : > { %v5070_v45 = vadd.f32 %v5069_v63, %v5068_v54  ;;  %v4043_v56 = vpop.f32.mrf.mxu0  ;;  %v7520_v10 = vor.u32 %v3417_v3, %v3416_v62  ;;  %v4484_v63 = vpop.permute.xlu1 %4483 }
 0x364   : > { %v4203_v25 = vadd.f32 %v4041_v17, %v3788_v8 }
 0x366   : > { %v4269_v51 = vpack.c.bf16 %v4203_v25, %v4203_v25  ;;  %v4798_v19 = vmul.f32 %v4479_v2, %v4203_v25 }
 0x367   : > { %5705 = vmatmul.msk.bf16.gmra.mxu3 %vm963_vm3, %v3415_v16  ;;  %v2862_v27 = vpop.f32.mrf.mxu1  ;;  %v2697_v16 = vrot.slane %v7504_v46, 2  ;;  %v3130_v1 = vpop.f32.mrf.mxu2 }
 0x368   : > { %4336 = vst.msk [vmem:[%s7464_s10 + $0x8] sm:$0xf] %vm4333_vm9, %v4269_v51  ;;  %v4866_v17 = vsel %vm4862_vm10, %v4798_v19, 0.0  ;;  %v5004_v14 = vmul.f32 %v4798_v19, %v4203_v25  ;;  %v3291_v37 = vadd.f32 %v3130_v1, %v3020_v33  ;;  %v4489_v19 = vpop.permute.xlu2 %4488 }
 0x369   : > { %v4867_v54 = vadd.f32 %v4866_v17, %v4865_v48  ;;  %v2698_v44 = vsel %vm2673_vm7, %v2695_v0, %v2697_v16  ;;  %v3880_v0 = vsel %vm3857_vm8, %v3877_v23, %v3879_v26  ;;  %v4422_v17 = vld [vmem:[%s7247_s6 + $0xb0] sm:$0xff] }
 0x36a   : > { %v7501_v4 = vpop.f32.mrf.mxu3  ;;  %5632 = vmatmul.msk.bf16.gmra.mxu1 %vm963_vm3, %v2696_v58  ;;  %v5071_v49 = vsel %vm4862_vm10, %v5004_v14, 0.0  ;;  %v3789_v39 = vadd.f32 %v7445_v35, %v3291_v37  ;;  %v4421_v58 = vld [vmem:[%s7247_s6 + $0xa8] sm:$0xff]  ;;  %5670 = vmatmul.msk.bf16.gmra.mxu2 %vm963_vm3, %v2698_v44  ;;  %v3419_v35 = vsel %vm3359_vm6, %v7479_v36, %v7520_v10 }
 0x36b   : > { %v5072_v2 = vadd.f32 %v5071_v49, %v5070_v45  ;;  %v4046_v52 = vpop.f32.mrf.mxu0  ;;  %4573 = vperm.xlu0 %5824, %v4421_v58   ;;  %v3021_v45 = vadd.f32 %v2862_v27, %v6738_v57  ;;  %4578 = vperm.xlu1 %5825, %v4422_v17   ;;  %v3421_v58 = vrot.slane %v8716_v31, 3 }
 0x36c   : > { %v4204_v48 = vadd.f32 %v4043_v56, %v3789_v39  ;;  %v7547_v39 = vld [vmem:[#allocation2 + $0x70] sm:$0xff] }
 0x36e   : > { %v4270_v62 = vpack.c.bf16 %v4204_v48, %v4204_v48  ;;  %v4799_v3 = vmul.f32 %v4484_v63, %v4204_v48  ;;  %5738 = vmatmul.msk.bf16.gmra.mxu0 %vm963_vm3, %v3880_v0  ;;  %v2699_v63 = vrot.slane %v7547_v39, 2 }
 0x36f   : > { %v2864_v25 = vpop.f32.mrf.mxu1  ;;  %v3133_v56 = vpop.f32.mrf.mxu2 }
 0x370   : > { %4337 = vst.msk [vmem:[%s7464_s10 + $0xc] sm:$0xf] %vm4333_vm9, %v4270_v62  ;;  %v4868_v5 = vsel %vm4862_vm10, %v4799_v3, 0.0  ;;  %v5005_v51 = vmul.f32 %v4799_v3, %v4204_v48  ;;  %v3292_v23 = vadd.f32 %v3133_v56, %v3021_v45  ;;  %v3881_v62 = vrot.slane %v7547_v39, 3 }
 0x371   : > { %v4869_v33 = vadd.f32 %v4868_v5, %v4867_v54  ;;  %v3420_v54 = vrot.slane %v8715_v6, 2  ;;  %v4494_v5 = vpop.permute.xlu2 %4493 }
 0x372   : > { %v7524_v8 = vpop.f32.mrf.mxu3  ;;  %v5073_v36 = vsel %vm4862_vm10, %v5005_v51, 0.0  ;;  %v3790_v57 = vadd.f32 %v7458_v40, %v3292_v23  ;;  %v3022_v40 = vadd.f32 %v2864_v25, %v6746_v53  ;;  %v2700_v53 = vsel %vm2673_vm7, %v2697_v16, %v2699_v63 }
 0x373   : > { %v5074_v27 = vadd.f32 %v5073_v36, %v5072_v2  ;;  %v4048_v37 = vpop.f32.mrf.mxu0  ;;  %v7563_v6 = vor.u32 %v3421_v58, %v3420_v54  ;;  %v3882_v16 = vsel %vm3857_vm8, %v3879_v26, %v3881_v62 }
 0x374   : > { %v4205_v14 = vadd.f32 %v4046_v52, %v3790_v57 }
 0x376   : > { %v4271_v48 = vpack.c.bf16 %v4205_v14, %v4205_v14  ;;  %v4800_v0 = vmul.f32 %v4489_v19, %v4205_v14 }
 0x377   : > { %5706 = vmatmul.msk.bf16.gmra.mxu3 %vm963_vm3, %v3419_v35  ;;  %v2867_v49 = vpop.f32.mrf.mxu1  ;;  %v3135_v2 = vpop.f32.mrf.mxu2 }
 0x378   : > { %4338 = vst.msk [vmem:[%s7464_s10 + $0x10] sm:$0xf] %vm4333_vm9, %v4271_v48  ;;  %v4870_v52 = vsel %vm4862_vm10, %v4800_v0, 0.0  ;;  %v5006_v35 = vmul.f32 %v4800_v0, %v4205_v14  ;;  %v3293_v45 = vadd.f32 %v3135_v2, %v3022_v40  ;;  %v3023_v36 = vadd.f32 %v2867_v49, %v6757_v29  ;;  %v4499_v49 = vpop.permute.xlu0 %4498  ;;  %v4424_v48 = vld [vmem:[%s7247_s6 + $0xc0] sm:$0xff] }
 0x379   : > { %v4871_v3 = vadd.f32 %v4870_v52, %v4869_v33  ;;  %4588 = vperm.xlu0 %5824, %v4424_v48   ;;  %v7590_v52 = vld [vmem:[#allocation2 + $0x78] sm:$0xff]  ;;  %v4509_v48 = vpop.permute.xlu2 %4508 }
 0x37a   : > { %v7544_v1 = vpop.f32.mrf.mxu3  ;;  %5633 = vmatmul.msk.bf16.gmra.mxu1 %vm963_vm3, %v2698_v44  ;;  %v5075_v31 = vsel %vm4862_vm10, %v5006_v35, 0.0  ;;  %v3791_v25 = vadd.f32 %v7482_v28, %v3293_v45  ;;  %v4420_v44 = vld [vmem:[%s7247_s6 + $0xa0] sm:$0xff]  ;;  %5671 = vmatmul.msk.bf16.gmra.mxu2 %vm963_vm3, %v2700_v53  ;;  %v3423_v28 = vsel %vm3359_vm6, %v7520_v10, %v7563_v6  ;;  %v2701_v35 = vrot.slane %v7590_v52, 2 }
 0x37b   : > { %v5076_v56 = vadd.f32 %v5075_v31, %v5074_v27  ;;  %v4051_v23 = vpop.f32.mrf.mxu0  ;;  %4568 = vperm.xlu2 %5826, %v4420_v44   ;;  %v3424_v45 = vrot.slane %v8718_v13, 2 }
 0x37c   : > { %v4206_v33 = vadd.f32 %v4048_v37, %v3791_v25 }
 0x37e   : > { %v4272_v57 = vpack.c.bf16 %v4206_v33, %v4206_v33  ;;  %v4801_v27 = vmul.f32 %v4494_v5, %v4206_v33  ;;  %5739 = vmatmul.msk.bf16.gmra.mxu0 %vm963_vm3, %v3882_v16 }
 0x37f   : > { %v2869_v19 = vpop.f32.mrf.mxu1  ;;  %v3138_v17 = vpop.f32.mrf.mxu2 }
 0x380   : > { %4339 = vst.msk [vmem:[%s7464_s10 + $0x14] sm:$0xf] %vm4333_vm9, %v4272_v57  ;;  %v4872_v46 = vsel %vm4862_vm10, %v4801_v27, 0.0  ;;  %v5007_v14 = vmul.f32 %v4801_v27, %v4206_v33  ;;  %v3294_v26 = vadd.f32 %v3138_v17, %v3023_v36  ;;  %v3883_v33 = vrot.slane %v7590_v52, 3  ;;  %v4504_v36 = vpop.permute.xlu1 %4503 }
 0x381   : > { %v4873_v37 = vadd.f32 %v4872_v46, %v4871_v3  ;;  %v3425_v3 = vrot.slane %v8719_v50, 3 }
 0x382   : > { %v7567_v51 = vpop.f32.mrf.mxu3  ;;  %v5077_v54 = vsel %vm4862_vm10, %v5007_v14, 0.0  ;;  %v3792_v10 = vadd.f32 %v7501_v4, %v3294_v26  ;;  %v3024_v4 = vadd.f32 %v2869_v19, %v6765_v11  ;;  %v2702_v11 = vsel %vm2673_vm7, %v2699_v63, %v2701_v35 }
 0x383   : > { %v5078_v29 = vadd.f32 %v5077_v54, %v5076_v56  ;;  %v4053_v0 = vpop.f32.mrf.mxu0  ;;  %v7606_v13 = vor.u32 %v3425_v3, %v3424_v45  ;;  %v3884_v63 = vsel %vm3857_vm8, %v3881_v62, %v3883_v33 }
 0x384   : > { %v4207_v40 = vadd.f32 %v4051_v23, %v3792_v10 }
 0x386   : > { %v4273_v31 = vpack.c.bf16 %v4207_v40, %v4207_v40  ;;  %v4802_v25 = vmul.f32 %v4499_v49, %v4207_v40 }
 0x387   : > { %5707 = vmatmul.msk.bf16.gmra.mxu3 %vm963_vm3, %v3423_v28  ;;  %v2872_v2 = vpop.f32.mrf.mxu1  ;;  %v3140_v56 = vpop.f32.mrf.mxu2 }
 0x388   : > { %4340 = vst.msk [vmem:[%s7464_s10 + $0x18] sm:$0xf] %vm4333_vm9, %v4273_v31  ;;  %v4874_v5 = vsel %vm4862_vm10, %v4802_v25, 0.0  ;;  %v5008_v44 = vmul.f32 %v4802_v25, %v4207_v40  ;;  %v3295_v23 = vadd.f32 %v3140_v56, %v3024_v4  ;;  %v3025_v14 = vadd.f32 %v2872_v2, %v6776_v61  ;;  %v7633_v31 = vld [vmem:[#allocation2 + $0x80] sm:$0xff] }
 0x389   : > { %v4875_v16 = vadd.f32 %v4874_v5, %v4873_v37  ;;  %v2703_v4 = vrot.slane %v7633_v31, 2  ;;  %v3428_v25 = vrot.slane %v8722_v41, 2  ;;  %v3429_v56 = vrot.slane %v8723_v42, 3 }
 0x38a   : > { %v7587_v58 = vpop.f32.mrf.mxu3  ;;  %5634 = vmatmul.msk.bf16.gmra.mxu1 %vm963_vm3, %v2700_v53  ;;  %v5079_v50 = vsel %vm4862_vm10, %v5008_v44, 0.0  ;;  %v3793_v19 = vadd.f32 %v7524_v8, %v3295_v23  ;;  %v4425_v53 = vld [vmem:[%s7247_s6 + $0xc8] sm:$0xff]  ;;  %5672 = vmatmul.msk.bf16.gmra.mxu2 %vm963_vm3, %v2702_v11  ;;  %v3427_v8 = vsel %vm3359_vm6, %v7563_v6, %v7606_v13 }
 0x38b   : > { %v5080_v28 = vadd.f32 %v5079_v50, %v5078_v29  ;;  %v4056_v27 = vpop.f32.mrf.mxu0  ;;  %4593 = vperm.xlu1 %5825, %v4425_v53   ;;  %v7649_v41 = vor.u32 %v3429_v56, %v3428_v25  ;;  %v3432_v25 = vrot.slane %v8726_v20, 2  ;;  %v8857_v56 = vld [vmem:[#allocation8_spill] sm:$0xff] }
 0x38c   : > { %v4208_v17 = vadd.f32 %v4053_v0, %v3793_v19  ;;  %v4423_v0 = vld [vmem:[%s7247_s6 + $0xb8] sm:$0xff] }
 0x38d   : > { %4583 = vperm.xlu2 %5826, %v4423_v0  }
 0x38e   : > { %v4274_v26 = vpack.c.bf16 %v4208_v17, %v4208_v17  ;;  %v4803_v37 = vmul.f32 %v4504_v36, %v4208_v17  ;;  %5740 = vmatmul.msk.bf16.gmra.mxu0 %vm963_vm3, %v3884_v63 }
 0x38f   : > { %v2874_v46 = vpop.f32.mrf.mxu1  ;;  %v3143_v54 = vpop.f32.mrf.mxu2 }
 0x390   : > { %4341 = vst.msk [vmem:[%s7464_s10 + $0x1c] sm:$0xf] %vm4333_vm9, %v4274_v26  ;;  %v4876_v39 = vsel %vm4862_vm10, %v4803_v37, 0.0  ;;  %v5009_v10 = vmul.f32 %v4803_v37, %v4208_v17  ;;  %v3296_v62 = vadd.f32 %v3143_v54, %v3025_v14  ;;  %v4514_v17 = vpop.permute.xlu0 %4513 }
 0x391   : > { %v4877_v29 = vadd.f32 %v4876_v39, %v4875_v16 }
 0x392   : > { %v7610_v57 = vpop.f32.mrf.mxu3  ;;  %v5081_v49 = vsel %vm4862_vm10, %v5009_v10, 0.0  ;;  %v3794_v6 = vadd.f32 %v7544_v1, %v3296_v62  ;;  %v3026_v1 = vadd.f32 %v2874_v46, %v6784_v55  ;;  %v2704_v55 = vsel %vm2673_vm7, %v2701_v35, %v2703_v4 }
 0x393   : > { %v5082_v61 = vadd.f32 %v5081_v49, %v5080_v28  ;;  %v4058_v45 = vpop.f32.mrf.mxu0  ;;  %v3885_v28 = vrot.slane %v7633_v31, 3  ;;  %v4519_v49 = vpop.permute.xlu1 %4518 }
 0x394   : > { %v4209_v2 = vadd.f32 %v4056_v27, %v3794_v6 }
 0x395   : > { %v3886_v35 = vsel %vm3857_vm8, %v3883_v33, %v3885_v28 }
 0x396   : > { %v4275_v5 = vpack.c.bf16 %v4209_v2, %v4209_v2  ;;  %v4804_v44 = vmul.f32 %v4509_v48, %v4209_v2 }
 0x397   : > { %5708 = vmatmul.msk.bf16.gmra.mxu3 %vm963_vm3, %v3427_v8  ;;  %v2877_v3 = vpop.f32.mrf.mxu1  ;;  %v3145_v23 = vpop.f32.mrf.mxu2 }
 0x398   : > { %4342 = vst.msk [vmem:[%s7464_s10 + $0x20] sm:$0xf] %vm4333_vm9, %v4275_v5  ;;  %v4878_v16 = vsel %vm4862_vm10, %v4804_v44, 0.0  ;;  %v5010_v50 = vmul.f32 %v4804_v44, %v4209_v2  ;;  %v3297_v19 = vadd.f32 %v3145_v23, %v3026_v1  ;;  %v3027_v26 = vadd.f32 %v2877_v3, %v6795_v24 }
 0x399   : > { %v4879_v36 = vadd.f32 %v4878_v16, %v4877_v29  ;;  %v3433_v5 = vrot.slane %v8857_v56, 3 }
 0x39a   : > { %v7630_v40 = vpop.f32.mrf.mxu3  ;;  %5635 = vmatmul.msk.bf16.gmra.mxu1 %vm963_vm3, %v2702_v11  ;;  %v5083_v42 = vsel %vm4862_vm10, %v5010_v50, 0.0  ;;  %v3795_v53 = vadd.f32 %v7567_v51, %v3297_v19  ;;  %v4427_v11 = vld [vmem:[%s7247_s6 + $0xd8] sm:$0xff]  ;;  %5673 = vmatmul.msk.bf16.gmra.mxu2 %vm963_vm3, %v2704_v55  ;;  %v3431_v51 = vsel %vm3359_vm6, %v7606_v13, %v7649_v41 }
 0x39b   : > { %v5084_v27 = vadd.f32 %v5083_v42, %v5082_v61  ;;  %v4061_v46 = vpop.f32.mrf.mxu0  ;;  %4603 = vperm.xlu0 %5824, %v4427_v11   ;;  %v4428_v61 = vld [vmem:[%s7247_s6 + $0xe0] sm:$0xff] }
 0x39c   : > { %v4210_v8 = vadd.f32 %v4058_v45, %v3795_v53  ;;  %4608 = vperm.xlu1 %5825, %v4428_v61   ;;  %v7676_v45 = vld [vmem:[#allocation2 + $0x88] sm:$0xff]  ;;  %v4430_v61 = vld [vmem:[%s7247_s6 + $0xf0] sm:$0xff] }
 0x39d   : > { %v2705_v3 = vrot.slane %v7676_v45, 2  ;;  %v3887_v42 = vrot.slane %v7676_v45, 3 }
 0x39e   : > { %v4276_v37 = vpack.c.bf16 %v4210_v8, %v4210_v8  ;;  %v4805_v54 = vmul.f32 %v4514_v17, %v4210_v8  ;;  %5741 = vmatmul.msk.bf16.gmra.mxu0 %vm963_vm3, %v3886_v35 }
 0x39f   : > { %v2879_v14 = vpop.f32.mrf.mxu1  ;;  %v3148_v39 = vpop.f32.mrf.mxu2  ;;  %v2706_v20 = vsel %vm2673_vm7, %v2703_v4, %v2705_v3  ;;  %v3888_v4 = vsel %vm3857_vm8, %v3885_v28, %v3887_v42 }
 0x3a0   : > { %4343 = vst.msk [vmem:[%s7464_s10 + $0x24] sm:$0xf] %vm4333_vm9, %v4276_v37  ;;  %v4880_v52 = vsel %vm4862_vm10, %v4805_v54, 0.0  ;;  %v5011_v10 = vmul.f32 %v4805_v54, %v4210_v8  ;;  %v3298_v33 = vadd.f32 %v3148_v39, %v3027_v26  ;;  %v4524_v8 = vpop.permute.xlu2 %4523  ;;  %v8859_v37 = vld [vmem:[#allocation40_spill] sm:$0xff] }
 0x3a1   : > { %v4881_v62 = vadd.f32 %v4880_v52, %v4879_v36 }
 0x3a2   : > { %v7653_v63 = vpop.f32.mrf.mxu3  ;;  %v5085_v29 = vsel %vm4862_vm10, %v5011_v10, 0.0  ;;  %v3796_v13 = vadd.f32 %v7587_v58, %v3298_v33  ;;  %v8858_v58 = vld [vmem:[#allocation47_spill] sm:$0xff] }
 0x3a3   : > { %v5086_v24 = vadd.f32 %v5085_v29, %v5084_v27  ;;  %v4063_v0 = vpop.f32.mrf.mxu0  ;;  %v3028_v44 = vadd.f32 %v2879_v14, %v8858_v58  ;;  %v7692_v27 = vor.u32 %v3433_v5, %v3432_v25  ;;  %4618 = vperm.xlu0 %5824, %v4430_v61   ;;  %v7719_v25 = vld [vmem:[#allocation2 + $0x90] sm:$0xff]  ;;  %v3437_v58 = vrot.slane %v8732_v7, 3 }
 0x3a4   : > { %v4211_v48 = vadd.f32 %v4061_v46, %v3796_v13  ;;  %v2707_v56 = vrot.slane %v7719_v25, 2  ;;  %v8860_v5 = vld [vmem:[#allocation17_spill] sm:$0xff] }
 0x3a6   : > { %v4277_v1 = vpack.c.bf16 %v4211_v48, %v4211_v48  ;;  %v4806_v23 = vmul.f32 %v4519_v49, %v4211_v48  ;;  %v2708_v7 = vsel %vm2673_vm7, %v2705_v3, %v2707_v56 }
 0x3a7   : > { %5709 = vmatmul.msk.bf16.gmra.mxu3 %vm963_vm3, %v3431_v51  ;;  %v2882_v2 = vpop.f32.mrf.mxu1  ;;  %v3150_v16 = vpop.f32.mrf.mxu2 }
 0x3a8   : > { %4344 = vst.msk [vmem:[%s7464_s10 + $0x28] sm:$0xf] %vm4333_vm9, %v4277_v1  ;;  %v4882_v50 = vsel %vm4862_vm10, %v4806_v23, 0.0  ;;  %v5012_v19 = vmul.f32 %v4806_v23, %v4211_v48  ;;  %v3299_v36 = vadd.f32 %v3150_v16, %v3028_v44  ;;  %v3029_v54 = vadd.f32 %v2882_v2, %v8859_v37 }
 0x3a9   : > { %v4883_v53 = vadd.f32 %v4882_v50, %v4881_v62  ;;  %v3436_v1 = vrot.slane %v8860_v5, 2 }
 0x3aa   : > { %v7673_v6 = vpop.f32.mrf.mxu3  ;;  %5636 = vmatmul.msk.bf16.gmra.mxu1 %vm963_vm3, %v2704_v55  ;;  %v5087_v17 = vsel %vm4862_vm10, %v5012_v19, 0.0  ;;  %v3797_v11 = vadd.f32 %v7610_v57, %v3299_v36  ;;  %v4426_v55 = vld [vmem:[%s7247_s6 + $0xd0] sm:$0xff]  ;;  %5674 = vmatmul.msk.bf16.gmra.mxu2 %vm963_vm3, %v2706_v20  ;;  %v3435_v57 = vsel %vm3359_vm6, %v7649_v41, %v7692_v27 }
 0x3ab   : > { %v5088_v46 = vadd.f32 %v5087_v17, %v5086_v24  ;;  %v4066_v14 = vpop.f32.mrf.mxu0  ;;  %4598 = vperm.xlu2 %5826, %v4426_v55   ;;  %v4529_v24 = vpop.permute.xlu0 %4528  ;;  %v3889_v17 = vrot.slane %v7719_v25, 3 }
 0x3ac   : > { %v4212_v51 = vadd.f32 %v4063_v0, %v3797_v11 }
 0x3ad   : > { %v3890_v3 = vsel %vm3857_vm8, %v3887_v42, %v3889_v17 }
 0x3ae   : > { %v4278_v39 = vpack.c.bf16 %v4212_v51, %v4212_v51  ;;  %v4807_v52 = vmul.f32 %v4524_v8, %v4212_v51  ;;  %5742 = vmatmul.msk.bf16.gmra.mxu0 %vm963_vm3, %v3888_v4 }
 0x3af   : > { %v2884_v26 = vpop.f32.mrf.mxu1  ;;  %v3153_v10 = vpop.f32.mrf.mxu2 }
 0x3b0   : > { %4345 = vst.msk [vmem:[%s7464_s10 + $0x2c] sm:$0xf] %vm4333_vm9, %v4278_v39  ;;  %v4884_v31 = vsel %vm4862_vm10, %v4807_v52, 0.0  ;;  %v5013_v33 = vmul.f32 %v4807_v52, %v4212_v51  ;;  %v3300_v28 = vadd.f32 %v3153_v10, %v3029_v54  ;;  %v4534_v51 = vpop.permute.xlu1 %4533  ;;  %v8862_v54 = vld [vmem:[#allocation48_spill] sm:$0xff] }
 0x3b1   : > { %v4885_v62 = vadd.f32 %v4884_v31, %v4883_v53 }
 0x3b2   : > { %v7696_v35 = vpop.f32.mrf.mxu3  ;;  %v5089_v29 = vsel %vm4862_vm10, %v5013_v33, 0.0  ;;  %v3798_v41 = vadd.f32 %v7630_v40, %v3300_v28  ;;  %v8861_v40 = vld [vmem:[#allocation53_spill] sm:$0xff] }
 0x3b3   : > { %v5090_v13 = vadd.f32 %v5089_v29, %v5088_v46  ;;  %v4068_v0 = vpop.f32.mrf.mxu0  ;;  %v3030_v23 = vadd.f32 %v2884_v26, %v8861_v40  ;;  %v7735_v46 = vor.u32 %v3437_v58, %v3436_v1  ;;  %v3440_v1 = vrot.slane %v8736_v38, 2  ;;  %v8863_v58 = vld [vmem:[#allocation18_spill] sm:$0xff] }
 0x3b4   : > { %v4213_v48 = vadd.f32 %v4066_v14, %v3798_v41  ;;  %v4539_v41 = vpop.permute.xlu2 %4538 }
 0x3b6   : > { %v4279_v44 = vpack.c.bf16 %v4213_v48, %v4213_v48  ;;  %v4808_v16 = vmul.f32 %v4529_v24, %v4213_v48  ;;  %v4429_v24 = vld [vmem:[%s7247_s6 + $0xe8] sm:$0xff] }
 0x3b7   : > { %5710 = vmatmul.msk.bf16.gmra.mxu3 %vm963_vm3, %v3435_v57  ;;  %v2887_v2 = vpop.f32.mrf.mxu1  ;;  %v3155_v50 = vpop.f32.mrf.mxu2  ;;  %4613 = vperm.xlu2 %5826, %v4429_v24  }
 0x3b8   : > { %4346 = vst.msk [vmem:[%s7464_s10 + $0x30] sm:$0xf] %vm4333_vm9, %v4279_v44  ;;  %v4886_v19 = vsel %vm4862_vm10, %v4808_v16, 0.0  ;;  %v5014_v36 = vmul.f32 %v4808_v16, %v4213_v48  ;;  %v3301_v53 = vadd.f32 %v3155_v50, %v3030_v23  ;;  %v3031_v39 = vadd.f32 %v2887_v2, %v8862_v54  ;;  %v7762_v2 = vld [vmem:[#allocation2 + $0x98] sm:$0xff] }
 0x3b9   : > { %v4887_v11 = vadd.f32 %v4886_v19, %v4885_v62  ;;  %v2709_v5 = vrot.slane %v7762_v2, 2  ;;  %v3441_v44 = vrot.slane %v8863_v58, 3  ;;  %v8865_v54 = vld [vmem:[#allocation6_spill] sm:$0xff] }
 0x3ba   : > { %v7716_v49 = vpop.f32.mrf.mxu3  ;;  %5637 = vmatmul.msk.bf16.gmra.mxu1 %vm963_vm3, %v2706_v20  ;;  %v5091_v8 = vsel %vm4862_vm10, %v5014_v36, 0.0  ;;  %v3799_v55 = vadd.f32 %v7653_v63, %v3301_v53  ;;  %v4431_v20 = vld [vmem:[%s7247_s6 + $0xf8] sm:$0xff]  ;;  %5675 = vmatmul.msk.bf16.gmra.mxu2 %vm963_vm3, %v2708_v7  ;;  %v3439_v63 = vsel %vm3359_vm6, %v7692_v27, %v7735_v46 }
 0x3bb   : > { %v5092_v14 = vadd.f32 %v5091_v8, %v5090_v13  ;;  %v4071_v26 = vpop.f32.mrf.mxu0  ;;  %4623 = vperm.xlu1 %5825, %v4431_v20   ;;  %v2710_v38 = vsel %vm2673_vm7, %v2707_v56, %v2709_v5 }
 0x3bc   : > { %v4214_v57 = vadd.f32 %v4068_v0, %v3799_v55  ;;  %v7778_v55 = vor.u32 %v3441_v44, %v3440_v1  ;;  %v8866_v1 = vld [vmem:[#allocation28_spill] sm:$0xff]  ;;  %v8867_v44 = vld [vmem:[#allocation23_spill] sm:$0xff] }
 0x3bd   : > { %v3444_v58 = vrot.slane %v8866_v1, 2 }
 0x3be   : > { %v4280_v52 = vpack.c.bf16 %v4214_v57, %v4214_v57  ;;  %v4809_v10 = vmul.f32 %v4534_v51, %v4214_v57  ;;  %5743 = vmatmul.msk.bf16.gmra.mxu0 %vm963_vm3, %v3890_v3 }
 0x3bf   : > { %v2889_v37 = vpop.f32.mrf.mxu1  ;;  %v3158_v31 = vpop.f32.mrf.mxu2 }
 0x3c0   : > { %4347 = vst.msk [vmem:[%s7464_s10 + $0x34] sm:$0xf] %vm4333_vm9, %v4280_v52  ;;  %v4888_v45 = vsel %vm4862_vm10, %v4809_v10, 0.0  ;;  %v5015_v33 = vmul.f32 %v4809_v10, %v4214_v57  ;;  %v3302_v42 = vadd.f32 %v3158_v31, %v3031_v39 }
 0x3c1   : > { %v4889_v28 = vadd.f32 %v4888_v45, %v4887_v11  ;;  %v3891_v11 = vrot.slane %v7762_v2, 3 }
 0x3c2   : > { %v7739_v4 = vpop.f32.mrf.mxu3  ;;  %v5093_v62 = vsel %vm4862_vm10, %v5015_v33, 0.0  ;;  %v3800_v27 = vadd.f32 %v7673_v6, %v3302_v42  ;;  %v8864_v6 = vld [vmem:[#allocation7_spill] sm:$0xff]  ;;  %v4434_v42 = vld [vmem:[%s7247_s6 + $0x110] sm:$0xff] }
 0x3c3   : > { %v5094_v29 = vadd.f32 %v5093_v62, %v5092_v14  ;;  %v4073_v48 = vpop.f32.mrf.mxu0  ;;  %v3032_v23 = vadd.f32 %v2889_v37, %v8864_v6  ;;  %v3892_v56 = vsel %vm3857_vm8, %v3889_v17, %v3891_v11  ;;  %4638 = vperm.xlu1 %5825, %v4434_v42   ;;  %v8868_v6 = vld [vmem:[#allocation12_spill] sm:$0xff] }
 0x3c4   : > { %v4215_v61 = vadd.f32 %v4071_v26, %v3800_v27  ;;  %v4544_v26 = vpop.permute.xlu0 %4543  ;;  %v4549_v27 = vpop.permute.xlu1 %4548 }
 0x3c6   : > { %v4281_v40 = vpack.c.bf16 %v4215_v61, %v4215_v61  ;;  %v4810_v16 = vmul.f32 %v4539_v41, %v4215_v61 }
 0x3c7   : > { %5711 = vmatmul.msk.bf16.gmra.mxu3 %vm963_vm3, %v3439_v63  ;;  %v2892_v0 = vpop.f32.mrf.mxu1  ;;  %v3160_v50 = vpop.f32.mrf.mxu2 }
 0x3c8   : > { %4348 = vst.msk [vmem:[%s7464_s10 + $0x38] sm:$0xf] %vm4333_vm9, %v4281_v40  ;;  %v4890_v19 = vsel %vm4862_vm10, %v4810_v16, 0.0  ;;  %v5016_v36 = vmul.f32 %v4810_v16, %v4215_v61  ;;  %v3303_v53 = vadd.f32 %v3160_v50, %v3032_v23  ;;  %v3033_v39 = vadd.f32 %v2892_v0, %v8865_v54 }
 0x3c9   : > { %v4891_v8 = vadd.f32 %v4890_v19, %v4889_v28  ;;  %v3445_v40 = vrot.slane %v8867_v44, 3  ;;  %v4436_v19 = vld [vmem:[%s7247_s6 + $0x120] sm:$0xff]  ;;  %v7851_v44 = vld [vmem:[#allocation2 + $0xa8] sm:$0xff] }
 0x3ca   : > { %v7759_v13 = vpop.f32.mrf.mxu3  ;;  %5638 = vmatmul.msk.bf16.gmra.mxu1 %vm963_vm3, %v2708_v7  ;;  %v5095_v14 = vsel %vm4862_vm10, %v5016_v36, 0.0  ;;  %v3801_v51 = vadd.f32 %v7696_v35, %v3303_v53  ;;  %v4433_v7 = vld [vmem:[%s7247_s6 + $0x108] sm:$0xff]  ;;  %5676 = vmatmul.msk.bf16.gmra.mxu2 %vm963_vm3, %v2710_v38  ;;  %v3443_v35 = vsel %vm3359_vm6, %v7735_v46, %v7778_v55 }
 0x3cb   : > { %v5096_v20 = vadd.f32 %v5095_v14, %v5094_v29  ;;  %v4076_v3 = vpop.f32.mrf.mxu0  ;;  %4633 = vperm.xlu0 %5824, %v4433_v7   ;;  %v4437_v7 = vld [vmem:[%s7247_s6 + $0x128] sm:$0xff] }
 0x3cc   : > { %v4216_v37 = vadd.f32 %v4073_v48, %v3801_v51  ;;  %v7805_v48 = vld [vmem:[#allocation2 + $0xa0] sm:$0xff]  ;;  %4653 = vperm.xlu1 %5825, %v4437_v7  }
 0x3cd   : > { %v2711_v0 = vrot.slane %v7805_v48, 2  ;;  %v3893_v14 = vrot.slane %v7805_v48, 3 }
 0x3ce   : > { %v4282_v52 = vpack.c.bf16 %v4216_v37, %v4216_v37  ;;  %v4811_v10 = vmul.f32 %v4544_v26, %v4216_v37  ;;  %5744 = vmatmul.msk.bf16.gmra.mxu0 %vm963_vm3, %v3892_v56  ;;  %v7822_v26 = vor.u32 %v3445_v40, %v3444_v58  ;;  %v2713_v40 = vrot.slane %v7851_v44, 2 }
 0x3cf   : > { %v2894_v63 = vpop.f32.mrf.mxu1  ;;  %v3163_v31 = vpop.f32.mrf.mxu2 }
 0x3d0   : > { %4349 = vst.msk [vmem:[%s7464_s10 + $0x3c] sm:$0xf] %vm4333_vm9, %v4282_v52  ;;  %v4892_v25 = vsel %vm4862_vm10, %v4811_v10, 0.0  ;;  %v5017_v45 = vmul.f32 %v4811_v10, %v4216_v37  ;;  %v3304_v33 = vadd.f32 %v3163_v31, %v3033_v39  ;;  %v3034_v23 = vadd.f32 %v2894_v63, %v8868_v6  ;;  %v8869_v10 = vld [vmem:[#allocation56_spill] sm:$0xff] }
 0x3d1   : > { %v4893_v17 = vadd.f32 %v4892_v25, %v4891_v8  ;;  %v3447_v52 = vsel %vm3359_vm6, %v7778_v55, %v7822_v26 }
 0x3d2   : > { %v7782_v57 = vpop.f32.mrf.mxu3  ;;  %v5097_v28 = vsel %vm4862_vm10, %v5017_v45, 0.0  ;;  %v3802_v46 = vadd.f32 %v7716_v49, %v3304_v33 }
 0x3d3   : > { %v5098_v62 = vadd.f32 %v5097_v28, %v5096_v20  ;;  %v4078_v24 = vpop.f32.mrf.mxu0  ;;  %4648 = vperm.xlu0 %5824, %v4436_v19   ;;  %v2712_v20 = vsel %vm2673_vm7, %v2709_v5, %v2711_v0  ;;  %v3894_v5 = vsel %vm3857_vm8, %v3891_v11, %v3893_v14 }
 0x3d4   : > { %v4217_v41 = vadd.f32 %v4076_v3, %v3802_v46  ;;  %v4440_v46 = vld [vmem:[%s7247_s6 + $0x140] sm:$0xff] }
 0x3d5   : > { %4668 = vperm.xlu1 %5825, %v4440_v46  }
 0x3d6   : > { %v4283_v49 = vpack.c.bf16 %v4217_v41, %v4217_v41  ;;  %v4812_v16 = vmul.f32 %v4549_v27, %v4217_v41 }
 0x3d7   : > { %5712 = vmatmul.msk.bf16.gmra.mxu3 %vm963_vm3, %v3443_v35  ;;  %v2897_v61 = vpop.f32.mrf.mxu1  ;;  %v3165_v50 = vpop.f32.mrf.mxu2  ;;  %v4432_v35 = vld [vmem:[%s7247_s6 + $0x100] sm:$0xff] }
 0x3d8   : > { %4350 = vst.msk [vmem:[%s7464_s10 + $0x40] sm:$0xf] %vm4333_vm9, %v4283_v49  ;;  %v4894_v36 = vsel %vm4862_vm10, %v4812_v16, 0.0  ;;  %v5018_v53 = vmul.f32 %v4812_v16, %v4217_v41  ;;  %v3305_v8 = vadd.f32 %v3165_v50, %v3034_v23  ;;  %4628 = vperm.xlu2 %5826, %v4432_v35   ;;  %v3035_v31 = vadd.f32 %v2897_v61, %v8869_v10  ;;  %v4559_v41 = vpop.permute.xlu0 %4558  ;;  %v8870_v49 = vld [vmem:[#allocation34_spill] sm:$0xff]  ;;  %v8871_v23 = vld [vmem:[#allocation29_spill] sm:$0xff] }
 0x3d9   : > { %v4895_v51 = vadd.f32 %v4894_v36, %v4893_v17  ;;  %v4439_v17 = vld [vmem:[%s7247_s6 + $0x138] sm:$0xff]  ;;  %v3448_v6 = vrot.slane %v8870_v49, 2  ;;  %v3449_v16 = vrot.slane %v8871_v23, 3  ;;  %v8872_v50 = vld [vmem:[#allocation13_spill] sm:$0xff] }
 0x3da   : > { %v7803_v29 = vpop.f32.mrf.mxu3  ;;  %5639 = vmatmul.msk.bf16.gmra.mxu1 %vm963_vm3, %v2710_v38  ;;  %v5099_v3 = vsel %vm4862_vm10, %v5018_v53, 0.0  ;;  %v3803_v37 = vadd.f32 %v7739_v4, %v3305_v8  ;;  %v4554_v38 = vpop.permute.xlu2 %4553  ;;  %5677 = vmatmul.msk.bf16.gmra.mxu2 %vm963_vm3, %v2712_v20  ;;  %v4442_v8 = vld [vmem:[%s7247_s6 + $0x150] sm:$0xff]  ;;  %v4435_v10 = vld [vmem:[%s7247_s6 + $0x118] sm:$0xff] }
 0x3db   : > { %v5100_v56 = vadd.f32 %v5099_v3, %v5098_v62  ;;  %v4081_v54 = vpop.f32.mrf.mxu0  ;;  %4663 = vperm.xlu0 %5824, %v4439_v17   ;;  %v7868_v35 = vor.u32 %v3449_v16, %v3448_v6  ;;  %v7898_v16 = vld [vmem:[#allocation2 + $0xb0] sm:$0xff] }
 0x3dc   : > { %v4218_v39 = vadd.f32 %v4078_v24, %v3803_v37  ;;  %v3895_v37 = vrot.slane %v7851_v44, 3 }
 0x3de   : > { %v4284_v25 = vpack.c.bf16 %v4218_v39, %v4218_v39  ;;  %v4813_v45 = vmul.f32 %v4554_v38, %v4218_v39  ;;  %5745 = vmatmul.msk.bf16.gmra.mxu0 %vm963_vm3, %v3894_v5  ;;  %v2714_v38 = vsel %vm2673_vm7, %v2711_v0, %v2713_v40  ;;  %v3896_v0 = vsel %vm3857_vm8, %v3893_v14, %v3895_v37 }
 0x3df   : > { %v2899_v4 = vpop.f32.mrf.mxu1  ;;  %v3168_v33 = vpop.f32.mrf.mxu2 }
 0x3e0   : > { %4351 = vst.msk [vmem:[%s7464_s10 + $0x44] sm:$0xf] %vm4333_vm9, %v4284_v25  ;;  %v4896_v2 = vsel %vm4862_vm10, %v4813_v45, 0.0  ;;  %v5019_v11 = vmul.f32 %v4813_v45, %v4218_v39  ;;  %v3306_v42 = vadd.f32 %v3168_v33, %v3035_v31  ;;  %v3036_v19 = vadd.f32 %v2899_v4, %v8872_v50  ;;  %4643 = vperm.xlu2 %5826, %v4435_v10   ;;  %v8873_v33 = vld [vmem:[#allocation57_spill] sm:$0xff] }
 0x3e1   : > { %v4897_v28 = vadd.f32 %v4896_v2, %v4895_v51  ;;  %v3451_v45 = vsel %vm3359_vm6, %v7822_v26, %v7868_v35  ;;  %v4446_v26 = vld [vmem:[%s7247_s6 + $0x170] sm:$0xff] }
 0x3e2   : > { %v7827_v63 = vpop.f32.mrf.mxu3  ;;  %v5101_v55 = vsel %vm4862_vm10, %v5019_v11, 0.0  ;;  %v3804_v62 = vadd.f32 %v7759_v13, %v3306_v42  ;;  %v8874_v50 = vld [vmem:[#allocation41_spill] sm:$0xff] }
 0x3e3   : > { %v5102_v27 = vadd.f32 %v5101_v55, %v5100_v56  ;;  %v4083_v1 = vpop.f32.mrf.mxu0  ;;  %4678 = vperm.xlu0 %5824, %v4442_v8   ;;  %v8876_v8 = vld [vmem:[#allocation22_spill] sm:$0xff] }
 0x3e4   : > { %v4219_v61 = vadd.f32 %v4081_v54, %v3804_v62  ;;  %v4443_v54 = vld [vmem:[%s7247_s6 + $0x158] sm:$0xff] }
 0x3e5   : > { %4683 = vperm.xlu1 %5825, %v4443_v54  }
 0x3e6   : > { %v4285_v13 = vpack.c.bf16 %v4219_v61, %v4219_v61  ;;  %v4814_v36 = vmul.f32 %v4559_v41, %v4219_v61 }
 0x3e7   : > { %5713 = vmatmul.msk.bf16.gmra.mxu3 %vm963_vm3, %v3447_v52  ;;  %v2902_v58 = vpop.f32.mrf.mxu1  ;;  %v3170_v53 = vpop.f32.mrf.mxu2 }
 0x3e8   : > { %4352 = vst.msk [vmem:[%s7464_s10 + $0x48] sm:$0xf] %vm4333_vm9, %v4285_v13  ;;  %v4898_v51 = vsel %vm4862_vm10, %v4814_v36, 0.0  ;;  %v5020_v7 = vmul.f32 %v4814_v36, %v4219_v61  ;;  %v3307_v3 = vadd.f32 %v3170_v53, %v3036_v19  ;;  %v3037_v17 = vadd.f32 %v2902_v58, %v8873_v33  ;;  %v4569_v61 = vpop.permute.xlu2 %4568  ;;  %v4438_v58 = vld [vmem:[%s7247_s6 + $0x130] sm:$0xff]  ;;  %v8875_v36 = vld [vmem:[#allocation35_spill] sm:$0xff] }
 0x3e9   : > { %v4899_v56 = vadd.f32 %v4898_v51, %v4897_v28  ;;  %v4445_v28 = vld [vmem:[%s7247_s6 + $0x168] sm:$0xff]  ;;  %4658 = vperm.xlu2 %5826, %v4438_v58   ;;  %v2715_v13 = vrot.slane %v7898_v16, 2  ;;  %v3452_v19 = vrot.slane %v8874_v50, 2 }
 0x3ea   : > { %v7849_v24 = vpop.f32.mrf.mxu3  ;;  %5640 = vmatmul.msk.bf16.gmra.mxu1 %vm963_vm3, %v2712_v20  ;;  %v5103_v39 = vsel %vm4862_vm10, %v5020_v7, 0.0  ;;  %v3805_v5 = vadd.f32 %v7782_v57, %v3307_v3  ;;  %v4564_v20 = vpop.permute.xlu1 %4563  ;;  %5678 = vmatmul.msk.bf16.gmra.mxu2 %vm963_vm3, %v2714_v38 }
 0x3eb   : > { %v5104_v4 = vadd.f32 %v5103_v39, %v5102_v27  ;;  %v4086_v31 = vpop.f32.mrf.mxu0  ;;  %4693 = vperm.xlu0 %5824, %v4445_v28   ;;  %v2716_v10 = vsel %vm2673_vm7, %v2713_v40, %v2715_v13  ;;  %v8877_v28 = vld [vmem:[#allocation99_spill] sm:$0xff] }
 0x3ec   : > { %v4220_v25 = vadd.f32 %v4083_v1, %v3805_v5 }
 0x3ed   : > { %4698 = vperm.xlu1 %5825, %v4446_v26   ;;  %v4451_v26 = vld [vmem:[%s7247_s6 + $0x198] sm:$0xff] }
 0x3ee   : > { %v4286_v2 = vpack.c.bf16 %v4220_v25, %v4220_v25  ;;  %v4815_v11 = vmul.f32 %v4564_v20, %v4220_v25  ;;  %5746 = vmatmul.msk.bf16.gmra.mxu0 %vm963_vm3, %v3896_v0 }
 0x3ef   : > { %v2904_v57 = vpop.f32.mrf.mxu1  ;;  %v3173_v42 = vpop.f32.mrf.mxu2 }
 0x3f0   : > { %4353 = vst.msk [vmem:[%s7464_s10 + $0x4c] sm:$0xf] %vm4333_vm9, %v4286_v2  ;;  %v4900_v48 = vsel %vm4862_vm10, %v4815_v11, 0.0  ;;  %v5021_v14 = vmul.f32 %v4815_v11, %v4220_v25  ;;  %v3308_v46 = vadd.f32 %v3173_v42, %v3037_v17  ;;  %v3038_v51 = vadd.f32 %v2904_v57, %v8876_v8  ;;  %v4449_v25 = vld [vmem:[%s7247_s6 + $0x188] sm:$0xff]  ;;  %v8878_v8 = vld [vmem:[#allocation49_spill] sm:$0xff] }
 0x3f1   : > { %v4901_v55 = vadd.f32 %v4900_v48, %v4899_v56  ;;  %v4448_v56 = vld [vmem:[%s7247_s6 + $0x180] sm:$0xff]  ;;  %v4441_v17 = vld [vmem:[%s7247_s6 + $0x148] sm:$0xff] }
 0x3f2   : > { %v7873_v52 = vpop.f32.mrf.mxu3  ;;  %v5105_v62 = vsel %vm4862_vm10, %v5021_v14, 0.0  ;;  %v3806_v27 = vadd.f32 %v7803_v29, %v3308_v46  ;;  %v3453_v29 = vrot.slane %v8875_v36, 3  ;;  %4673 = vperm.xlu2 %5826, %v4441_v17  }
 0x3f3   : > { %v5106_v41 = vadd.f32 %v5105_v62, %v5104_v4  ;;  %v4088_v6 = vpop.f32.mrf.mxu0  ;;  %v3897_v4 = vrot.slane %v7898_v16, 3  ;;  %4708 = vperm.xlu0 %5824, %v4448_v56   ;;  %v8880_v56 = vld [vmem:[#allocation100_spill] sm:$0xff] }
 0x3f4   : > { %v4221_v49 = vadd.f32 %v4086_v31, %v3806_v27  ;;  %v7915_v31 = vor.u32 %v3453_v29, %v3452_v19  ;;  %v7945_v29 = vld [vmem:[#allocation2 + $0xb8] sm:$0xff] }
 0x3f5   : > { %4713 = vperm.xlu1 %5825, %v4449_v25   ;;  %v3898_v40 = vsel %vm3857_vm8, %v3895_v37, %v3897_v4 }
 0x3f6   : > { %v4287_v53 = vpack.c.bf16 %v4221_v49, %v4221_v49  ;;  %v4816_v7 = vmul.f32 %v4569_v61, %v4221_v49  ;;  %v3455_v42 = vsel %vm3359_vm6, %v7868_v35, %v7915_v31  ;;  %v4452_v35 = vld [vmem:[%s7247_s6 + $0x1a0] sm:$0xff] }
 0x3f7   : > { %5714 = vmatmul.msk.bf16.gmra.mxu3 %vm963_vm3, %v3451_v45  ;;  %v2907_v23 = vpop.f32.mrf.mxu1  ;;  %v3175_v3 = vpop.f32.mrf.mxu2 }
 0x3f8   : > { %4354 = vst.msk [vmem:[%s7464_s10 + $0x50] sm:$0xf] %vm4333_vm9, %v4287_v53  ;;  %v4902_v54 = vsel %vm4862_vm10, %v4816_v7, 0.0  ;;  %v5022_v39 = vmul.f32 %v4816_v7, %v4221_v49  ;;  %v3309_v5 = vadd.f32 %v3175_v3, %v3038_v51  ;;  %v3039_v48 = vadd.f32 %v2907_v23, %v8877_v28  ;;  %v4579_v49 = vpop.permute.xlu1 %4578  ;;  %v4444_v23 = vld [vmem:[%s7247_s6 + $0x160] sm:$0xff]  ;;  %v8879_v7 = vld [vmem:[#allocation42_spill] sm:$0xff] }
 0x3f9   : > { %v4903_v20 = vadd.f32 %v4902_v54, %v4901_v55  ;;  %v2717_v53 = vrot.slane %v7945_v29, 2  ;;  %v3456_v51 = vrot.slane %v8878_v8, 2 }
 0x3fa   : > { %v7895_v1 = vpop.f32.mrf.mxu3  ;;  %5641 = vmatmul.msk.bf16.gmra.mxu1 %vm963_vm3, %v2714_v38  ;;  %v5107_v0 = vsel %vm4862_vm10, %v5022_v39, 0.0  ;;  %v3807_v57 = vadd.f32 %v7827_v63, %v3309_v5  ;;  %v4574_v38 = vpop.permute.xlu0 %4573  ;;  %5679 = vmatmul.msk.bf16.gmra.mxu2 %vm963_vm3, %v2716_v10 }
 0x3fb   : > { %v5108_v45 = vadd.f32 %v5107_v0, %v5106_v41  ;;  %v4091_v2 = vpop.f32.mrf.mxu0  ;;  %4723 = vperm.xlu0 %5824, %v4451_v26   ;;  %4688 = vperm.xlu2 %5826, %v4444_v23   ;;  %v2718_v17 = vsel %vm2673_vm7, %v2715_v13, %v2717_v53  ;;  %v8881_v26 = vld [vmem:[#allocation101_spill] sm:$0xff] }
 0x3fc   : > { %v4222_v11 = vadd.f32 %v4088_v6, %v3807_v57 }
 0x3fd   : > { %4728 = vperm.xlu1 %5825, %v4452_v35   ;;  %v4457_v35 = vld [vmem:[%s7247_s6 + $0x1c8] sm:$0xff] }
 0x3fe   : > { %v4288_v14 = vpack.c.bf16 %v4222_v11, %v4222_v11  ;;  %v4817_v46 = vmul.f32 %v4574_v38, %v4222_v11  ;;  %5747 = vmatmul.msk.bf16.gmra.mxu0 %vm963_vm3, %v3898_v40 }
 0x3ff   : > { %v2909_v63 = vpop.f32.mrf.mxu1  ;;  %v3178_v55 = vpop.f32.mrf.mxu2 }
 0x400   : > { %4355 = vst.msk [vmem:[%s7464_s10 + $0x54] sm:$0xf] %vm4333_vm9, %v4288_v14  ;;  %v4904_v44 = vsel %vm4862_vm10, %v4817_v46, 0.0  ;;  %v5023_v37 = vmul.f32 %v4817_v46, %v4222_v11  ;;  %v3310_v62 = vadd.f32 %v3178_v55, %v3039_v48  ;;  %v3040_v54 = vadd.f32 %v2909_v63, %v8880_v56  ;;  %v4455_v11 = vld [vmem:[%s7247_s6 + $0x1b8] sm:$0xff] }
 0x401   : > { %v4905_v27 = vadd.f32 %v4904_v44, %v4903_v20  ;;  %v4454_v20 = vld [vmem:[%s7247_s6 + $0x1b0] sm:$0xff]  ;;  %v4447_v48 = vld [vmem:[%s7247_s6 + $0x178] sm:$0xff] }
 0x402   : > { %v7920_v33 = vpop.f32.mrf.mxu3  ;;  %v5109_v41 = vsel %vm4862_vm10, %v5023_v37, 0.0  ;;  %v3808_v61 = vadd.f32 %v7849_v24, %v3310_v62  ;;  %v3457_v24 = vrot.slane %v8879_v7, 3  ;;  %v8882_v56 = vld [vmem:[#allocation54_spill] sm:$0xff] }
 0x403   : > { %v5110_v58 = vadd.f32 %v5109_v41, %v5108_v45  ;;  %v4093_v19 = vpop.f32.mrf.mxu0  ;;  %v3899_v45 = vrot.slane %v7945_v29, 3  ;;  %4738 = vperm.xlu0 %5824, %v4454_v20   ;;  %4703 = vperm.xlu2 %5826, %v4447_v48   ;;  %v8884_v20 = vld [vmem:[#allocation68_spill] sm:$0xff] }
 0x404   : > { %v4223_v50 = vadd.f32 %v4091_v2, %v3808_v61  ;;  %v7962_v2 = vor.u32 %v3457_v24, %v3456_v51  ;;  %v7992_v24 = vld [vmem:[#allocation2 + $0xc0] sm:$0xff] }
 0x405   : > { %4743 = vperm.xlu1 %5825, %v4455_v11   ;;  %v3900_v13 = vsel %vm3857_vm8, %v3897_v4, %v3899_v45 }
 0x406   : > { %v4289_v3 = vpack.c.bf16 %v4223_v50, %v4223_v50  ;;  %v4818_v39 = vmul.f32 %v4579_v49, %v4223_v50  ;;  %v3459_v55 = vsel %vm3359_vm6, %v7915_v31, %v7962_v2  ;;  %v4458_v31 = vld [vmem:[%s7247_s6 + $0x1d0] sm:$0xff] }
 0x407   : > { %5715 = vmatmul.msk.bf16.gmra.mxu3 %vm963_vm3, %v3455_v42  ;;  %v2912_v36 = vpop.f32.mrf.mxu1  ;;  %v3180_v5 = vpop.f32.mrf.mxu2 }
 0x408   : > { %4356 = vst.msk [vmem:[%s7464_s10 + $0x58] sm:$0xf] %vm4333_vm9, %v4289_v3  ;;  %v4906_v25 = vsel %vm4862_vm10, %v4818_v39, 0.0  ;;  %v5024_v0 = vmul.f32 %v4818_v39, %v4223_v50  ;;  %v3311_v57 = vadd.f32 %v3180_v5, %v3040_v54  ;;  %v3041_v44 = vadd.f32 %v2912_v36, %v8881_v26  ;;  %v4589_v50 = vpop.permute.xlu0 %4588  ;;  %v4450_v36 = vld [vmem:[%s7247_s6 + $0x190] sm:$0xff]  ;;  %v8883_v39 = vld [vmem:[#allocation50_spill] sm:$0xff] }
 0x409   : > { %v4907_v38 = vadd.f32 %v4906_v25, %v4905_v27  ;;  %v2719_v3 = vrot.slane %v7992_v24, 2  ;;  %v3460_v54 = vrot.slane %v8882_v56, 2 }
 0x40a   : > { %v7942_v6 = vpop.f32.mrf.mxu3  ;;  %5642 = vmatmul.msk.bf16.gmra.mxu1 %vm963_vm3, %v2716_v10  ;;  %v5111_v40 = vsel %vm4862_vm10, %v5024_v0, 0.0  ;;  %v3809_v63 = vadd.f32 %v7873_v52, %v3311_v57  ;;  %v4584_v10 = vpop.permute.xlu2 %4583  ;;  %5680 = vmatmul.msk.bf16.gmra.mxu2 %vm963_vm3, %v2718_v17 }
 0x40b   : > { %v5112_v42 = vadd.f32 %v5111_v40, %v5110_v58  ;;  %v4096_v14 = vpop.f32.mrf.mxu0  ;;  %4753 = vperm.xlu0 %5824, %v4457_v35   ;;  %4718 = vperm.xlu2 %5826, %v4450_v36   ;;  %v2720_v48 = vsel %vm2673_vm7, %v2717_v53, %v2719_v3  ;;  %v8885_v35 = vld [vmem:[#allocation71_spill] sm:$0xff] }
 0x40c   : > { %v4224_v46 = vadd.f32 %v4093_v19, %v3809_v63 }
 0x40d   : > { %4758 = vperm.xlu1 %5825, %v4458_v31   ;;  %v4463_v31 = vld [vmem:[%s7247_s6 + $0x1f8] sm:$0xff] }
 0x40e   : > { %v4290_v37 = vpack.c.bf16 %v4224_v46, %v4224_v46  ;;  %v4819_v62 = vmul.f32 %v4584_v10, %v4224_v46  ;;  %5748 = vmatmul.msk.bf16.gmra.mxu0 %vm963_vm3, %v3900_v13 }
 0x40f   : > { %v2914_v52 = vpop.f32.mrf.mxu1  ;;  %v3183_v27 = vpop.f32.mrf.mxu2 }
 0x410   : > { %4357 = vst.msk [vmem:[%s7464_s10 + $0x5c] sm:$0xf] %vm4333_vm9, %v4290_v37  ;;  %v4908_v16 = vsel %vm4862_vm10, %v4819_v62, 0.0  ;;  %v5025_v4 = vmul.f32 %v4819_v62, %v4224_v46  ;;  %v3312_v41 = vadd.f32 %v3183_v27, %v3041_v44  ;;  %v3042_v25 = vadd.f32 %v2914_v52, %v8884_v20  ;;  %v4461_v46 = vld [vmem:[%s7247_s6 + $0x1e8] sm:$0xff]  ;;  %v8886_v20 = vld [vmem:[#allocation15_spill] sm:$0xff] }
 0x411   : > { %v4909_v61 = vadd.f32 %v4908_v16, %v4907_v38  ;;  %v4460_v38 = vld [vmem:[%s7247_s6 + $0x1e0] sm:$0xff]  ;;  %v4453_v44 = vld [vmem:[%s7247_s6 + $0x1a8] sm:$0xff] }
 0x412   : > { %v7967_v28 = vpop.f32.mrf.mxu3  ;;  %v5113_v58 = vsel %vm4862_vm10, %v5025_v4, 0.0  ;;  %v3810_v49 = vadd.f32 %v7895_v1, %v3312_v41  ;;  %v3461_v1 = vrot.slane %v8883_v39, 3 }
 0x413   : > { %v5114_v23 = vadd.f32 %v5113_v58, %v5112_v42  ;;  %v4098_v51 = vpop.f32.mrf.mxu0  ;;  %v3901_v42 = vrot.slane %v7992_v24, 3  ;;  %4768 = vperm.xlu0 %5824, %v4460_v38   ;;  %4733 = vperm.xlu2 %5826, %v4453_v44   ;;  %v8888_v38 = vld [vmem:[#allocation74_spill] sm:$0xff] }
 0x414   : > { %v4225_v8 = vadd.f32 %v4096_v14, %v3810_v49  ;;  %v8009_v14 = vor.u32 %v3461_v1, %v3460_v54  ;;  %v8039_v1 = vld [vmem:[#allocation2 + $0xc8] sm:$0xff] }
 0x415   : > { %4773 = vperm.xlu1 %5825, %v4461_v46   ;;  %v3902_v53 = vsel %vm3857_vm8, %v3899_v45, %v3901_v42 }
 0x416   : > { %v4291_v5 = vpack.c.bf16 %v4225_v8, %v4225_v8  ;;  %v4820_v0 = vmul.f32 %v4589_v50, %v4225_v8  ;;  %v3463_v27 = vsel %vm3359_vm6, %v7962_v2, %v8009_v14  ;;  %v4464_v2 = vld [vmem:[%s7247_s6 + $0x200] sm:$0xff] }
 0x417   : > { %5716 = vmatmul.msk.bf16.gmra.mxu3 %vm963_vm3, %v3459_v55  ;;  %v2917_v7 = vpop.f32.mrf.mxu1  ;;  %v3185_v57 = vpop.f32.mrf.mxu2 }
 0x418   : > { %4358 = vst.msk [vmem:[%s7464_s10 + $0x60] sm:$0xf] %vm4333_vm9, %v4291_v5  ;;  %v4910_v11 = vsel %vm4862_vm10, %v4820_v0, 0.0  ;;  %v5026_v40 = vmul.f32 %v4820_v0, %v4225_v8  ;;  %v3313_v63 = vadd.f32 %v3185_v57, %v3042_v25  ;;  %v3043_v16 = vadd.f32 %v2917_v7, %v8885_v35  ;;  %v4599_v8 = vpop.permute.xlu2 %4598  ;;  %v4456_v7 = vld [vmem:[%s7247_s6 + $0x1c0] sm:$0xff]  ;;  %v8887_v0 = vld [vmem:[#allocation14_spill] sm:$0xff] }
 0x419   : > { %v4911_v10 = vadd.f32 %v4910_v11, %v4909_v61  ;;  %v2721_v5 = vrot.slane %v8039_v1, 2  ;;  %v3464_v25 = vrot.slane %v8886_v20, 2  ;;  %v3465_v57 = vrot.slane %v8887_v0, 3 }
 0x41a   : > { %v7989_v19 = vpop.f32.mrf.mxu3  ;;  %5643 = vmatmul.msk.bf16.gmra.mxu1 %vm963_vm3, %v2718_v17  ;;  %v5115_v13 = vsel %vm4862_vm10, %v5026_v40, 0.0  ;;  %v3811_v52 = vadd.f32 %v7920_v33, %v3313_v63  ;;  %v4594_v17 = vpop.permute.xlu1 %4593  ;;  %5681 = vmatmul.msk.bf16.gmra.mxu2 %vm963_vm3, %v2720_v48 }
 0x41b   : > { %v5116_v55 = vadd.f32 %v5115_v13, %v5114_v23  ;;  %v4101_v37 = vpop.f32.mrf.mxu0  ;;  %4783 = vperm.xlu0 %5824, %v4463_v31   ;;  %4748 = vperm.xlu2 %5826, %v4456_v7   ;;  %v8055_v44 = vor.u32 %v3465_v57, %v3464_v25  ;;  %v8890_v25 = vld [vmem:[#allocation20_spill] sm:$0xff] }
 0x41c   : > { %v4226_v62 = vadd.f32 %v4098_v51, %v3811_v52  ;;  %v3903_v52 = vrot.slane %v8039_v1, 3  ;;  %v3468_v0 = vrot.slane %v8890_v25, 2  ;;  %v8891_v57 = vld [vmem:[#allocation16_spill] sm:$0xff]  ;;  %v8894_v25 = vld [vmem:[#allocation26_spill] sm:$0xff] }
 0x41d   : > { %4788 = vperm.xlu1 %5825, %v4464_v2  }
 0x41e   : > { %v4292_v4 = vpack.c.bf16 %v4226_v62, %v4226_v62  ;;  %v4821_v41 = vmul.f32 %v4594_v17, %v4226_v62  ;;  %5749 = vmatmul.msk.bf16.gmra.mxu0 %vm963_vm3, %v3902_v53  ;;  %v2722_v17 = vsel %vm2673_vm7, %v2719_v3, %v2721_v5  ;;  %v3904_v3 = vsel %vm3857_vm8, %v3901_v42, %v3903_v52 }
 0x41f   : > { %v2919_v33 = vpop.f32.mrf.mxu1  ;;  %v3188_v61 = vpop.f32.mrf.mxu2 }
 0x420   : > { %4359 = vst.msk [vmem:[%s7464_s10 + $0x64] sm:$0xf] %vm4333_vm9, %v4292_v4  ;;  %v4912_v29 = vsel %vm4862_vm10, %v4821_v41, 0.0  ;;  %v5027_v45 = vmul.f32 %v4821_v41, %v4226_v62  ;;  %v3314_v58 = vadd.f32 %v3188_v61, %v3043_v16  ;;  %v3044_v11 = vadd.f32 %v2919_v33, %v8888_v38  ;;  %v4604_v33 = vpop.permute.xlu0 %4603  ;;  %v8889_v41 = vld [vmem:[#allocation77_spill] sm:$0xff] }
 0x421   : > { %v4913_v49 = vadd.f32 %v4912_v29, %v4911_v10 }
 0x422   : > { %v8014_v26 = vpop.f32.mrf.mxu3  ;;  %v5117_v23 = vsel %vm4862_vm10, %v5027_v45, 0.0  ;;  %v3812_v50 = vadd.f32 %v7942_v6, %v3314_v58 }
 0x423   : > { %v5118_v36 = vadd.f32 %v5117_v23, %v5116_v55  ;;  %v4103_v54 = vpop.f32.mrf.mxu0 }
 0x424   : > { %v4227_v56 = vadd.f32 %v4101_v37, %v3812_v50  ;;  %v4609_v50 = vpop.permute.xlu1 %4608 }
 0x426   : > { %v4293_v6 = vpack.c.bf16 %v4227_v56, %v4227_v56  ;;  %v4822_v40 = vmul.f32 %v4599_v8, %v4227_v56  ;;  %v4462_v8 = vld [vmem:[%s7247_s6 + $0x1f0] sm:$0xff] }
 0x427   : > { %5717 = vmatmul.msk.bf16.gmra.mxu3 %vm963_vm3, %v3463_v27  ;;  %v2922_v39 = vpop.f32.mrf.mxu1  ;;  %v3190_v63 = vpop.f32.mrf.mxu2 }
 0x428   : > { %4360 = vst.msk [vmem:[%s7464_s10 + $0x68] sm:$0xf] %vm4333_vm9, %v4293_v6  ;;  %v4914_v10 = vsel %vm4862_vm10, %v4822_v40, 0.0  ;;  %v5028_v46 = vmul.f32 %v4822_v40, %v4227_v56  ;;  %v3315_v13 = vadd.f32 %v3190_v63, %v3044_v11  ;;  %v3045_v61 = vadd.f32 %v2922_v39, %v8889_v41  ;;  %v8082_v39 = vld [vmem:[#allocation2 + $0xd0] sm:$0xff] }
 0x429   : > { %v4915_v55 = vadd.f32 %v4914_v10, %v4913_v49  ;;  %v2723_v20 = vrot.slane %v8082_v39, 2  ;;  %v3469_v6 = vrot.slane %v8891_v57, 3  ;;  %v8895_v57 = vld [vmem:[#allocation21_spill] sm:$0xff] }
 0x42a   : > { %v8036_v51 = vpop.f32.mrf.mxu3  ;;  %5644 = vmatmul.msk.bf16.gmra.mxu1 %vm963_vm3, %v2720_v48  ;;  %v5119_v37 = vsel %vm4862_vm10, %v5028_v46, 0.0  ;;  %v3813_v62 = vadd.f32 %v7967_v28, %v3315_v13  ;;  %v4459_v48 = vld [vmem:[%s7247_s6 + $0x1d8] sm:$0xff]  ;;  %5682 = vmatmul.msk.bf16.gmra.mxu2 %vm963_vm3, %v2722_v17  ;;  %v3467_v28 = vsel %vm3359_vm6, %v8009_v14, %v8055_v44 }
 0x42b   : > { %v5120_v53 = vadd.f32 %v5119_v37, %v5118_v36  ;;  %v4106_v35 = vpop.f32.mrf.mxu0  ;;  %4763 = vperm.xlu2 %5826, %v4459_v48  }
 0x42c   : > { %v4228_v16 = vadd.f32 %v4103_v54, %v3813_v62  ;;  %v2724_v62 = vsel %vm2673_vm7, %v2721_v5, %v2723_v20 }
 0x42e   : > { %v4294_v31 = vpack.c.bf16 %v4228_v16, %v4228_v16  ;;  %v4823_v29 = vmul.f32 %v4604_v33, %v4228_v16  ;;  %5750 = vmatmul.msk.bf16.gmra.mxu0 %vm963_vm3, %v3904_v3 }
 0x42f   : > { %v2924_v4 = vpop.f32.mrf.mxu1  ;;  %v3193_v45 = vpop.f32.mrf.mxu2 }
 0x430   : > { %4361 = vst.msk [vmem:[%s7464_s10 + $0x6c] sm:$0xf] %vm4333_vm9, %v4294_v31  ;;  %v4916_v24 = vsel %vm4862_vm10, %v4823_v29, 0.0  ;;  %v5029_v58 = vmul.f32 %v4823_v29, %v4228_v16  ;;  %v3316_v42 = vadd.f32 %v3193_v45, %v3045_v61  ;;  %v4614_v16 = vpop.permute.xlu2 %4613 }
 0x431   : > { %v4917_v49 = vadd.f32 %v4916_v24, %v4915_v55  ;;  %v3905_v55 = vrot.slane %v8082_v39, 3 }
 0x432   : > { %v8059_v27 = vpop.f32.mrf.mxu3  ;;  %v5121_v2 = vsel %vm4862_vm10, %v5029_v58, 0.0  ;;  %v3814_v14 = vadd.f32 %v7989_v19, %v3316_v42  ;;  %v8892_v19 = vld [vmem:[#allocation80_spill] sm:$0xff] }
 0x433   : > { %v5122_v23 = vadd.f32 %v5121_v2, %v5120_v53  ;;  %v4108_v56 = vpop.f32.mrf.mxu0  ;;  %4778 = vperm.xlu2 %5826, %v4462_v8   ;;  %v3046_v11 = vadd.f32 %v2924_v4, %v8892_v19  ;;  %v3470_v53 = vor.u32 %v3469_v6, %v3468_v0  ;;  %v3906_v41 = vsel %vm3857_vm8, %v3903_v52, %v3905_v55  ;;  %v8896_v19 = vld [vmem:[#allocation86_spill] sm:$0xff] }
 0x434   : > { %v4229_v7 = vadd.f32 %v4106_v35, %v3814_v14  ;;  %v4619_v14 = vpop.permute.xlu0 %4618  ;;  %v3472_v0 = vrot.slane %v8894_v25, 2  ;;  %v3473_v6 = vrot.slane %v8895_v57, 3  ;;  %v8899_v25 = vld [vmem:[#allocation27_spill] sm:$0xff] }
 0x435   : > { %v3471_v61 = vsel %vm3359_vm6, %v8055_v44, %v3470_v53 }
 0x436   : > { %v4295_v38 = vpack.c.bf16 %v4229_v7, %v4229_v7  ;;  %v4824_v40 = vmul.f32 %v4609_v50, %v4229_v7 }
 0x437   : > { %5718 = vmatmul.msk.bf16.gmra.mxu3 %vm963_vm3, %v3467_v28  ;;  %v2927_v54 = vpop.f32.mrf.mxu1  ;;  %v3195_v63 = vpop.f32.mrf.mxu2 }
 0x438   : > { %4362 = vst.msk [vmem:[%s7464_s10 + $0x70] sm:$0xf] %vm4333_vm9, %v4295_v38  ;;  %v4918_v10 = vsel %vm4862_vm10, %v4824_v40, 0.0  ;;  %v5030_v46 = vmul.f32 %v4824_v40, %v4229_v7  ;;  %v3317_v13 = vadd.f32 %v3195_v63, %v3046_v11 }
 0x439   : > { %v4919_v37 = vadd.f32 %v4918_v10, %v4917_v49 }
 0x43a   : > { %v8079_v36 = vpop.f32.mrf.mxu3  ;;  %5645 = vmatmul.msk.bf16.gmra.mxu1 %vm963_vm3, %v2722_v17  ;;  %v5123_v33 = vsel %vm4862_vm10, %v5030_v46, 0.0  ;;  %v3815_v48 = vadd.f32 %v8014_v26, %v3317_v13  ;;  %v4465_v17 = vld [vmem:[%s7247_s6 + $0x208] sm:$0xff]  ;;  %5683 = vmatmul.msk.bf16.gmra.mxu2 %vm963_vm3, %v2724_v62  ;;  %v8893_v26 = vld [vmem:[#allocation83_spill] sm:$0xff] }
 0x43b   : > { %v5124_v35 = vadd.f32 %v5123_v33, %v5122_v23  ;;  %v4111_v4 = vpop.f32.mrf.mxu0  ;;  %4793 = vperm.xlu2 %5826, %v4465_v17   ;;  %v3047_v31 = vadd.f32 %v2927_v54, %v8893_v26 }
 0x43c   : > { %v4230_v28 = vadd.f32 %v4108_v56, %v3815_v48  ;;  %v8119_v56 = vld [vmem:[#allocation2 + $0xd8] sm:$0xff]  ;;  %v3474_v48 = vor.u32 %v3473_v6, %v3472_v0  ;;  %v3477_v0 = vrot.slane %v8899_v25, 3  ;;  %v8900_v6 = vld [vmem:[#allocation92_spill] sm:$0xff] }
 0x43d   : > { %v2725_v54 = vrot.slane %v8119_v56, 2  ;;  %v3907_v13 = vrot.slane %v8119_v56, 3 }
 0x43e   : > { %v4296_v29 = vpack.c.bf16 %v4230_v28, %v4230_v28  ;;  %v4825_v45 = vmul.f32 %v4614_v16, %v4230_v28  ;;  %5751 = vmatmul.msk.bf16.gmra.mxu0 %vm963_vm3, %v3906_v41  ;;  %v3475_v39 = vsel %vm3359_vm6, %v3470_v53, %v3474_v48 }
 0x43f   : > { %v2929_v5 = vpop.f32.mrf.mxu1  ;;  %v3198_v24 = vpop.f32.mrf.mxu2  ;;  %v2726_v33 = vsel %vm2673_vm7, %v2723_v20, %v2725_v54  ;;  %v8897_v20 = vld [vmem:[#allocation89_spill] sm:$0xff] }
 0x440   : > { %4363 = vst.msk [vmem:[%s7464_s10 + $0x74] sm:$0xf] %vm4333_vm9, %v4296_v29  ;;  %v4920_v58 = vsel %vm4862_vm10, %v4825_v45, 0.0  ;;  %v5031_v42 = vmul.f32 %v4825_v45, %v4230_v28  ;;  %v3318_v1 = vadd.f32 %v3198_v24, %v3047_v31  ;;  %v3048_v11 = vadd.f32 %v2929_v5, %v8896_v19 }
 0x441   : > { %v4921_v52 = vadd.f32 %v4920_v58, %v4919_v37  ;;  %v3908_v5 = vsel %vm3857_vm8, %v3905_v55, %v3907_v13 }
 0x442   : > { %v8100_v3 = vpop.f32.mrf.mxu3  ;;  %v5125_v49 = vsel %vm4862_vm10, %v5031_v42, 0.0  ;;  %v3816_v44 = vadd.f32 %v8036_v51, %v3318_v1 }
 0x443   : > { %v5126_v2 = vadd.f32 %v5125_v49, %v5124_v35  ;;  %v4113_v8 = vpop.f32.mrf.mxu0 }
 0x444   : > { %v4231_v50 = vadd.f32 %v4111_v4, %v3816_v44  ;;  %v4624_v4 = vpop.permute.xlu1 %4623 }
 0x446   : > { %v4297_v38 = vpack.c.bf16 %v4231_v50, %v4231_v50  ;;  %v4826_v40 = vmul.f32 %v4619_v14, %v4231_v50 }
 0x447   : > { %5719 = vmatmul.msk.bf16.gmra.mxu3 %vm963_vm3, %v3471_v61  ;;  %v2932_v7 = vpop.f32.mrf.mxu1  ;;  %v3200_v51 = vpop.f32.mrf.mxu2 }
 0x448   : > { %4364 = vst.msk [vmem:[%s7464_s10 + $0x78] sm:$0xf] %vm4333_vm9, %v4297_v38  ;;  %v4922_v63 = vsel %vm4862_vm10, %v4826_v40, 0.0  ;;  %v5032_v10 = vmul.f32 %v4826_v40, %v4231_v50  ;;  %v3319_v46 = vadd.f32 %v3200_v51, %v3048_v11  ;;  %v3049_v26 = vadd.f32 %v2932_v7, %v8897_v20  ;;  %v8150_v50 = vld [vmem:[#allocation2 + $0xe0] sm:$0xff]  ;;  %v8898_v7 = vld [vmem:[#allocation32_spill] sm:$0xff] }
 0x449   : > { %v4923_v37 = vadd.f32 %v4922_v63, %v4921_v52  ;;  %v4629_v52 = vpop.permute.xlu2 %4628  ;;  %v3476_v56 = vrot.slane %v8898_v7, 2  ;;  %v3909_v63 = vrot.slane %v8150_v50, 3  ;;  %v8903_v7 = vld [vmem:[#allocation33_spill] sm:$0xff] }
 0x44a   : > { %v8117_v23 = vpop.f32.mrf.mxu3  ;;  %5646 = vmatmul.msk.bf16.gmra.mxu1 %vm963_vm3, %v2724_v62  ;;  %v5127_v35 = vsel %vm4862_vm10, %v5032_v10, 0.0  ;;  %v3817_v16 = vadd.f32 %v8059_v27, %v3319_v46  ;;  %5684 = vmatmul.msk.bf16.gmra.mxu2 %vm963_vm3, %v2726_v33 }
 0x44b   : > { %v5128_v17 = vadd.f32 %v5127_v35, %v5126_v2  ;;  %v4116_v41 = vpop.f32.mrf.mxu0 }
 0x44c   : > { %v4232_v62 = vadd.f32 %v4113_v8, %v3817_v16  ;;  %v2727_v8 = vrot.slane %v8150_v50, 2 }
 0x44e   : > { %v4298_v31 = vpack.c.bf16 %v4232_v62, %v4232_v62  ;;  %v4827_v29 = vmul.f32 %v4624_v4, %v4232_v62  ;;  %5752 = vmatmul.msk.bf16.gmra.mxu0 %vm963_vm3, %v3908_v5  ;;  %v2728_v46 = vsel %vm2673_vm7, %v2725_v54, %v2727_v8  ;;  %v4634_v4 = vpop.permute.xlu0 %4633  ;;  %v8901_v54 = vld [vmem:[#allocation94_spill] sm:$0xff] }
 0x44f   : > { %v2934_v61 = vpop.f32.mrf.mxu1  ;;  %v3203_v27 = vpop.f32.mrf.mxu2 }
 0x450   : > { %4365 = vst.msk [vmem:[%s7464_s10 + $0x7c] sm:$0xf] %vm4333_vm9, %v4298_v31  ;;  %v4924_v45 = vsel %vm4862_vm10, %v4827_v29, 0.0  ;;  %v5033_v24 = vmul.f32 %v4827_v29, %v4232_v62  ;;  %v3320_v58 = vadd.f32 %v3203_v27, %v3049_v26  ;;  %v3050_v38 = vadd.f32 %v2934_v61, %v8900_v6 }
 0x451   : > { %v4925_v42 = vadd.f32 %v4924_v45, %v4923_v37  ;;  %v3478_v37 = vor.u32 %v3477_v0, %v3476_v56  ;;  %v3481_v56 = vrot.slane %v8903_v7, 3  ;;  %v8904_v0 = vld [vmem:[#allocation96_spill] sm:$0xff] }
 0x452   : > { %v8135_v28 = vpop.f32.mrf.mxu3  ;;  %v5129_v55 = vsel %vm4862_vm10, %v5033_v24, 0.0  ;;  %v3818_v53 = vadd.f32 %v8079_v36, %v3320_v58 }
 0x453   : > { %v5130_v1 = vadd.f32 %v5129_v55, %v5128_v17  ;;  %v4118_v2 = vpop.f32.mrf.mxu0 }
 0x454   : > { %v4233_v44 = vadd.f32 %v4116_v41, %v3818_v53 }
 0x456   : > { %v4299_v57 = vpack.c.bf16 %v4233_v44, %v4233_v44  ;;  %v4828_v19 = vmul.f32 %v4629_v52, %v4233_v44 }
 0x457   : > { %5720 = vmatmul.msk.bf16.gmra.mxu3 %vm963_vm3, %v3475_v39  ;;  %v2937_v14 = vpop.f32.mrf.mxu1  ;;  %v3205_v36 = vpop.f32.mrf.mxu2  ;;  %v3479_v39 = vsel %vm3359_vm6, %v3474_v48, %v3478_v37 }
 0x458   : > { %4366 = vst.msk [vmem:[%s7464_s10 + $0x80] sm:$0xf] %vm4333_vm9, %v4299_v57  ;;  %v4926_v11 = vsel %vm4862_vm10, %v4828_v19, 0.0  ;;  %v5034_v40 = vmul.f32 %v4828_v19, %v4233_v44  ;;  %v3321_v51 = vadd.f32 %v3205_v36, %v3050_v38  ;;  %v3051_v20 = vadd.f32 %v2937_v14, %v8901_v54  ;;  %v8179_v44 = vld [vmem:[#allocation2 + $0xe8] sm:$0xff]  ;;  %v8902_v14 = vld [vmem:[#allocation38_spill] sm:$0xff] }
 0x459   : > { %v4927_v10 = vadd.f32 %v4926_v11, %v4925_v42  ;;  %v3480_v50 = vrot.slane %v8902_v14, 2  ;;  %v3911_v11 = vrot.slane %v8179_v44, 3  ;;  %v8907_v14 = vld [vmem:[#allocation39_spill] sm:$0xff] }
 0x45a   : > { %v8148_v49 = vpop.f32.mrf.mxu3  ;;  %5647 = vmatmul.msk.bf16.gmra.mxu1 %vm963_vm3, %v2726_v33  ;;  %v5131_v35 = vsel %vm4862_vm10, %v5034_v40, 0.0  ;;  %v3819_v16 = vadd.f32 %v8100_v3, %v3321_v51  ;;  %5685 = vmatmul.msk.bf16.gmra.mxu2 %vm963_vm3, %v2728_v46  ;;  %v3910_v33 = vsel %vm3857_vm8, %v3907_v13, %v3909_v63 }
 0x45b   : > { %v5132_v17 = vadd.f32 %v5131_v35, %v5130_v1  ;;  %v4121_v62 = vpop.f32.mrf.mxu0  ;;  %v4639_v1 = vpop.permute.xlu1 %4638 }
 0x45c   : > { %v4234_v5 = vadd.f32 %v4118_v2, %v3819_v16  ;;  %v2729_v2 = vrot.slane %v8179_v44, 2 }
 0x45e   : > { %v4300_v26 = vpack.c.bf16 %v4234_v5, %v4234_v5  ;;  %v4829_v31 = vmul.f32 %v4634_v4, %v4234_v5  ;;  %5753 = vmatmul.msk.bf16.gmra.mxu0 %vm963_vm3, %v3910_v33  ;;  %v2730_v51 = vsel %vm2673_vm7, %v2727_v8, %v2729_v2  ;;  %v4644_v33 = vpop.permute.xlu2 %4643 }
 0x45f   : > { %v2939_v61 = vpop.f32.mrf.mxu1  ;;  %v3208_v3 = vpop.f32.mrf.mxu2 }
 0x460   : > { %4367 = vst.msk [vmem:[%s7464_s10 + $0x84] sm:$0xf] %vm4333_vm9, %v4300_v26  ;;  %v4928_v29 = vsel %vm4862_vm10, %v4829_v31, 0.0  ;;  %v5035_v27 = vmul.f32 %v4829_v31, %v4234_v5  ;;  %v3322_v45 = vadd.f32 %v3208_v3, %v3051_v20  ;;  %v3052_v57 = vadd.f32 %v2939_v61, %v8904_v0  ;;  %v8905_v20 = vld [vmem:[#allocation58_spill] sm:$0xff] }
 0x461   : > { %v4929_v24 = vadd.f32 %v4928_v29, %v4927_v10  ;;  %v3482_v10 = vor.u32 %v3481_v56, %v3480_v50  ;;  %v3485_v50 = vrot.slane %v8907_v14, 3 }
 0x462   : > { %v8164_v41 = vpop.f32.mrf.mxu3  ;;  %v5133_v13 = vsel %vm4862_vm10, %v5035_v27, 0.0  ;;  %v3820_v48 = vadd.f32 %v8117_v23, %v3322_v45 }
 0x463   : > { %v5134_v58 = vadd.f32 %v5133_v13, %v5132_v17  ;;  %v4123_v53 = vpop.f32.mrf.mxu0 }
 0x464   : > { %v4235_v55 = vadd.f32 %v4121_v62, %v3820_v48 }
 0x466   : > { %v4301_v25 = vpack.c.bf16 %v4235_v55, %v4235_v55  ;;  %v4830_v6 = vmul.f32 %v4639_v1, %v4235_v55 }
 0x467   : > { %5721 = vmatmul.msk.bf16.gmra.mxu3 %vm963_vm3, %v3479_v39  ;;  %v2942_v52 = vpop.f32.mrf.mxu1  ;;  %v3210_v23 = vpop.f32.mrf.mxu2  ;;  %v3483_v39 = vsel %vm3359_vm6, %v3478_v37, %v3482_v10 }
 0x468   : > { %4368 = vst.msk [vmem:[%s7464_s10 + $0x88] sm:$0xf] %vm4333_vm9, %v4301_v25  ;;  %v4930_v38 = vsel %vm4862_vm10, %v4830_v6, 0.0  ;;  %v5036_v19 = vmul.f32 %v4830_v6, %v4235_v55  ;;  %v3323_v36 = vadd.f32 %v3210_v23, %v3052_v57  ;;  %v3053_v26 = vadd.f32 %v2942_v52, %v8905_v20  ;;  %v8906_v52 = vld [vmem:[#allocation46_spill] sm:$0xff]  ;;  %v8908_v25 = vld [vmem:[#allocation59_spill] sm:$0xff] }
 0x469   : > { %v4931_v40 = vadd.f32 %v4930_v38, %v4929_v24  ;;  %v3484_v44 = vrot.slane %v8906_v52, 2 }
 0x46a   : > { %v8177_v42 = vpop.f32.mrf.mxu3  ;;  %5648 = vmatmul.msk.bf16.gmra.mxu1 %vm963_vm3, %v2728_v46  ;;  %v5135_v35 = vsel %vm4862_vm10, %v5036_v19, 0.0  ;;  %v3821_v16 = vadd.f32 %v8135_v28, %v3323_v36  ;;  %5686 = vmatmul.msk.bf16.gmra.mxu2 %vm963_vm3, %v2730_v51  ;;  %v3912_v46 = vsel %vm3857_vm8, %v3909_v63, %v3911_v11 }
 0x46b   : > { %v5136_v17 = vadd.f32 %v5135_v35, %v5134_v58  ;;  %v4126_v5 = vpop.f32.mrf.mxu0  ;;  %v4649_v58 = vpop.permute.xlu0 %4648 }
 0x46c   : > { %v4236_v62 = vadd.f32 %v4123_v53, %v3821_v16  ;;  %v8208_v53 = vld [vmem:[#allocation2 + $0xf0] sm:$0xff] }
 0x46d   : > { %v2731_v1 = vrot.slane %v8208_v53, 2  ;;  %v3913_v38 = vrot.slane %v8208_v53, 3 }
 0x46e   : > { %v4302_v8 = vpack.c.bf16 %v4236_v62, %v4236_v62  ;;  %v4831_v54 = vmul.f32 %v4644_v33, %v4236_v62  ;;  %5754 = vmatmul.msk.bf16.gmra.mxu0 %vm963_vm3, %v3912_v46  ;;  %v4654_v33 = vpop.permute.xlu1 %4653 }
 0x46f   : > { %v2944_v61 = vpop.f32.mrf.mxu1  ;;  %v3213_v28 = vpop.f32.mrf.mxu2  ;;  %v2732_v36 = vsel %vm2673_vm7, %v2729_v2, %v2731_v1 }
 0x470   : > { %4369 = vst.msk [vmem:[%s7464_s10 + $0x8c] sm:$0xf] %vm4333_vm9, %v4302_v8  ;;  %v4932_v31 = vsel %vm4862_vm10, %v4831_v54, 0.0  ;;  %v5037_v3 = vmul.f32 %v4831_v54, %v4236_v62  ;;  %v3324_v29 = vadd.f32 %v3213_v28, %v3053_v26  ;;  %v3054_v0 = vadd.f32 %v2944_v61, %v8908_v25  ;;  %v8909_v54 = vld [vmem:[#allocation60_spill] sm:$0xff] }
 0x471   : > { %v4933_v63 = vadd.f32 %v4932_v31, %v4931_v40  ;;  %v3486_v40 = vor.u32 %v3485_v50, %v3484_v44 }
 0x472   : > { %v8193_v4 = vpop.f32.mrf.mxu3  ;;  %v5137_v27 = vsel %vm4862_vm10, %v5037_v3, 0.0  ;;  %v3822_v37 = vadd.f32 %v8148_v49, %v3324_v29 }
 0x473   : > { %v5138_v45 = vadd.f32 %v5137_v27, %v5136_v17  ;;  %v4128_v48 = vpop.f32.mrf.mxu0 }
 0x474   : > { %v4237_v13 = vadd.f32 %v4126_v5, %v3822_v37 }
 0x476   : > { %v4303_v7 = vpack.c.bf16 %v4237_v13, %v4237_v13  ;;  %v4832_v56 = vmul.f32 %v4649_v58, %v4237_v13 }
 0x477   : > { %5722 = vmatmul.msk.bf16.gmra.mxu3 %vm963_vm3, %v3483_v39  ;;  %v2947_v55 = vpop.f32.mrf.mxu1  ;;  %v3215_v49 = vpop.f32.mrf.mxu2  ;;  %v3487_v39 = vsel %vm3359_vm6, %v3482_v10, %v3486_v40 }
 0x478   : > { %4370 = vst.msk [vmem:[%s7464_s10 + $0x90] sm:$0xf] %vm4333_vm9, %v4303_v7  ;;  %v4934_v57 = vsel %vm4862_vm10, %v4832_v56, 0.0  ;;  %v5038_v6 = vmul.f32 %v4832_v56, %v4237_v13  ;;  %v3325_v23 = vadd.f32 %v3215_v49, %v3054_v0  ;;  %v3055_v20 = vadd.f32 %v2947_v55, %v8909_v54  ;;  %v8910_v55 = vld [vmem:[#allocation102_spill] sm:$0xff]  ;;  %v434_v0 = vld [vmem:[%s6307_s16 + $0xc] sm:$0xf] }
 0x479   : > { %v4935_v19 = vadd.f32 %v4934_v57, %v4933_v63  ;;  %v8911_v52 = vshrl.u32 %v8910_v55, 16  ;;  %v8912_v14 = vshll.u32 %v8910_v55, 16  ;;  %v8913_v56 = vld [vmem:[#allocation62_spill] sm:$0xff]  ;;  %440 = vst.msk [vmem:[#allocation2 + $0x114] sm:$0xf] %vm364_vm1, %v434_v0 }
 0x47a   : > { %v8206_v24 = vpop.f32.mrf.mxu3  ;;  %5649 = vmatmul.msk.bf16.gmra.mxu1 %vm963_vm3, %v2730_v51  ;;  %v5139_v35 = vsel %vm4862_vm10, %v5038_v6, 0.0  ;;  %v3823_v16 = vadd.f32 %v8164_v41, %v3325_v23  ;;  %5687 = vmatmul.msk.bf16.gmra.mxu2 %vm963_vm3, %v2732_v36  ;;  %v3914_v51 = vsel %vm3857_vm8, %v3911_v11, %v3913_v38 }
 0x47b   : > { %v5140_v17 = vadd.f32 %v5139_v35, %v5138_v45  ;;  %v4131_v46 = vpop.f32.mrf.mxu0  ;;  %v4659_v45 = vpop.permute.xlu2 %4658  ;;  %v3488_v44 = vrot.slane %v8911_v52, 2  ;;  %v3489_v50 = vrot.slane %v8912_v14, 3  ;;  %v8287_v14 = vld [vmem:[#allocation2 + $0x100] sm:$0xff] }
 0x47c   : > { %v4238_v5 = vadd.f32 %v4128_v48, %v3823_v16  ;;  %v8239_v48 = vld [vmem:[#allocation2 + $0xf8] sm:$0xff]  ;;  %v4669_v52 = vpop.permute.xlu1 %4668 }
 0x47d   : > { %v2733_v58 = vrot.slane %v8239_v48, 2 }
 0x47e   : > { %v4304_v2 = vpack.c.bf16 %v4238_v5, %v4238_v5  ;;  %v4833_v8 = vmul.f32 %v4654_v33, %v4238_v5  ;;  %5755 = vmatmul.msk.bf16.gmra.mxu0 %vm963_vm3, %v3914_v51 }
 0x47f   : > { %v2949_v61 = vpop.f32.mrf.mxu1  ;;  %v3218_v41 = vpop.f32.mrf.mxu2  ;;  %v2734_v16 = vsel %vm2673_vm7, %v2731_v1, %v2733_v58 }
 0x480   : > { %4371 = vst.msk [vmem:[%s7464_s10 + $0x94] sm:$0xf] %vm4333_vm9, %v4304_v2  ;;  %v4936_v26 = vsel %vm4862_vm10, %v4833_v8, 0.0  ;;  %v5039_v28 = vmul.f32 %v4833_v8, %v4238_v5  ;;  %v3326_v31 = vadd.f32 %v3218_v41, %v3055_v20  ;;  %v3056_v25 = vadd.f32 %v2949_v61, %v8913_v56  ;;  %v8272_v41 = vld [vmem:[#allocation2 + $0x110] sm:$0xff] }
 0x481   : > { %v4937_v11 = vadd.f32 %v4936_v26, %v4935_v19  ;;  %v3915_v19 = vrot.slane %v8239_v48, 3 }
 0x482   : > { %v8224_v62 = vpop.f32.mrf.mxu3  ;;  %v5141_v3 = vsel %vm4862_vm10, %v5039_v28, 0.0  ;;  %v3824_v10 = vadd.f32 %v8177_v42, %v3326_v31 }
 0x483   : > { %v5142_v29 = vadd.f32 %v5141_v3, %v5140_v17  ;;  %v4133_v37 = vpop.f32.mrf.mxu0  ;;  %v8259_v17 = vor.u32 %v3489_v50, %v3488_v44  ;;  %v3916_v53 = vsel %vm3857_vm8, %v3913_v38, %v3915_v19  ;;  %v3496_v3 = vshll.u32 %v8272_v41, 16 }
 0x484   : > { %v4239_v27 = vadd.f32 %v4131_v46, %v3824_v10  ;;  %v2735_v50 = vrot.slane %v8287_v14, 2 }
 0x485   : > { %v3491_v2 = vsel %vm3359_vm6, %v3486_v40, %v8259_v17  ;;  %v3493_v40 = vshrl.u32 %v8272_v41, 16 }
 0x486   : > { %v4305_v7 = vpack.c.bf16 %v4239_v27, %v4239_v27  ;;  %v4834_v42 = vmul.f32 %v4659_v45, %v4239_v27  ;;  %v435_v45 = vld [vmem:[%s6307_s16 + $0x10] sm:$0xf] }
 0x487   : > { %5723 = vmatmul.msk.bf16.gmra.mxu3 %vm963_vm3, %v3487_v39  ;;  %v2952_v13 = vpop.f32.mrf.mxu1  ;;  %v3220_v49 = vpop.f32.mrf.mxu2  ;;  %441 = vst.msk [vmem:[#allocation2 + $0x118] sm:$0xf] %vm364_vm1, %v435_v45 }
 0x488   : > { %4372 = vst.msk [vmem:[%s7464_s10 + $0x98] sm:$0xf] %vm4333_vm9, %v4305_v7  ;;  %v4938_v57 = vsel %vm4862_vm10, %v4834_v42, 0.0  ;;  %v5040_v6 = vmul.f32 %v4834_v42, %v4239_v27  ;;  %v3327_v23 = vadd.f32 %v3220_v49, %v3056_v25  ;;  %v4664_v39 = vpop.permute.xlu0 %4663  ;;  %v3495_v7 = vrot.slane %v3493_v40, 2 }
 0x489   : > { %v4939_v35 = vadd.f32 %v4938_v57, %v4937_v11  ;;  %v3498_v42 = vrot.slane %v3496_v3, 3 }
 0x48a   : > { %v8237_v63 = vpop.f32.mrf.mxu3  ;;  %5650 = vmatmul.msk.bf16.gmra.mxu1 %vm963_vm3, %v2732_v36  ;;  %v5143_v5 = vsel %vm4862_vm10, %v5040_v6, 0.0  ;;  %v3825_v46 = vadd.f32 %v8193_v4, %v3327_v23  ;;  %5688 = vmatmul.msk.bf16.gmra.mxu2 %vm963_vm3, %v2734_v16  ;;  %v8914_v4 = vld [vmem:[#allocation64_spill] sm:$0xff] }
 0x48b   : > { %v5144_v51 = vadd.f32 %v5143_v5, %v5142_v29  ;;  %v4136_v61 = vpop.f32.mrf.mxu0  ;;  %v3057_v20 = vadd.f32 %v2952_v13, %v8914_v4 }
 0x48c   : > { %v4240_v36 = vadd.f32 %v4133_v37, %v3825_v46  ;;  %v2736_v46 = vsel %vm2673_vm7, %v2733_v58, %v2735_v50 }
 0x48e   : > { %v4306_v8 = vpack.c.bf16 %v4240_v36, %v4240_v36  ;;  %v4835_v54 = vmul.f32 %v4664_v39, %v4240_v36  ;;  %5756 = vmatmul.msk.bf16.gmra.mxu0 %vm963_vm3, %v3916_v53 }
 0x48f   : > { %v2954_v1 = vpop.f32.mrf.mxu1  ;;  %v3223_v26 = vpop.f32.mrf.mxu2 }
 0x490   : > { %4373 = vst.msk [vmem:[%s7464_s10 + $0x9c] sm:$0xf] %vm4333_vm9, %v4306_v8  ;;  %v4940_v28 = vsel %vm4862_vm10, %v4835_v54, 0.0  ;;  %v5041_v38 = vmul.f32 %v4835_v54, %v4240_v36  ;;  %v3328_v31 = vadd.f32 %v3223_v26, %v3057_v20  ;;  %v4674_v54 = vpop.permute.xlu2 %4673 }
 0x491   : > { %v4941_v11 = vadd.f32 %v4940_v28, %v4939_v35  ;;  %v3917_v35 = vrot.slane %v8287_v14, 3  ;;  %v8916_v28 = vld [vmem:[#allocation69_spill] sm:$0xff] }
 0x492   : > { %v8263_v33 = vpop.f32.mrf.mxu3  ;;  %v5145_v10 = vsel %vm4862_vm10, %v5041_v38, 0.0  ;;  %v3826_v29 = vadd.f32 %v8206_v24, %v3328_v31  ;;  %v8915_v24 = vld [vmem:[#allocation66_spill] sm:$0xff] }
 0x493   : > { %v5146_v27 = vadd.f32 %v5145_v10, %v5144_v51  ;;  %v4138_v55 = vpop.f32.mrf.mxu0  ;;  %v3058_v0 = vadd.f32 %v2954_v1, %v8915_v24  ;;  %v8301_v51 = vor.u32 %v3498_v42, %v3495_v7  ;;  %v3918_v58 = vsel %vm3857_vm8, %v3915_v19, %v3917_v35  ;;  %v8330_v42 = vld [vmem:[#allocation2 + $0x108] sm:$0xff] }
 0x494   : > { %v4241_v13 = vadd.f32 %v4136_v61, %v3826_v29 }
 0x496   : > { %v4307_v56 = vpack.c.bf16 %v4241_v13, %v4241_v13  ;;  %v4836_v25 = vmul.f32 %v4669_v52, %v4241_v13 }
 0x497   : > { %5724 = vmatmul.msk.bf16.gmra.mxu3 %vm963_vm3, %v3491_v2  ;;  %v2957_v44 = vpop.f32.mrf.mxu1  ;;  %v3225_v49 = vpop.f32.mrf.mxu2 }
 0x498   : > { %4374 = vst.msk [vmem:[%s7464_s10 + $0xa0] sm:$0xf] %vm4333_vm9, %v4307_v56  ;;  %v4942_v57 = vsel %vm4862_vm10, %v4836_v25, 0.0  ;;  %v5042_v6 = vmul.f32 %v4836_v25, %v4241_v13  ;;  %v3329_v23 = vadd.f32 %v3225_v49, %v3058_v0  ;;  %v3059_v38 = vadd.f32 %v2957_v44, %v8916_v28  ;;  %v4679_v44 = vpop.permute.xlu0 %4678 }
 0x499   : > { %v4943_v5 = vadd.f32 %v4942_v57, %v4941_v11  ;;  %v8333_v56 = vrot.slane %v8330_v42, 2  ;;  %v8917_v57 = vld [vmem:[#allocation72_spill] sm:$0xff] }
 0x49a   : > { %v8283_v37 = vpop.f32.mrf.mxu3  ;;  %5651 = vmatmul.msk.bf16.gmra.mxu1 %vm963_vm3, %v2734_v16  ;;  %v5147_v36 = vsel %vm4862_vm10, %v5042_v6, 0.0  ;;  %v3827_v61 = vadd.f32 %v8224_v62, %v3329_v23  ;;  %v521_v16 = vld [vmem:[#allocation2 + $0x118] sm:$0x7]  ;;  %5689 = vmatmul.msk.bf16.gmra.mxu2 %vm963_vm3, %v2736_v46  ;;  %v3500_v62 = vsel %vm3359_vm6, %v8259_v17, %v8301_v51 }
 0x49b   : > { %v5148_v53 = vadd.f32 %v5147_v36, %v5146_v27  ;;  %v4141_v2 = vpop.f32.mrf.mxu0  ;;  %v3357_v8 = vunpack.c.l.b16 %v521_v16  ;;  %v2738_v16 = vsel %vm2673_vm7, %v2735_v50, %v8333_v56 }
 0x49c   : > { %v4242_v1 = vadd.f32 %v4138_v55, %v3827_v61  ;;  %v3919_v61 = vrot.slane %v8330_v42, 3 }
 0x49d   : > { %v8318_v11 = vpack.c.b16 %v3357_v8, %v3357_v8 }
 0x49e   : > { %v4308_v20 = vpack.c.bf16 %v4242_v1, %v4242_v1  ;;  %v4837_v26 = vmul.f32 %v4674_v54, %v4242_v1  ;;  %5757 = vmatmul.msk.bf16.gmra.mxu0 %vm963_vm3, %v3918_v58 }
 0x49f   : > { %v2959_v4 = vpop.f32.mrf.mxu1  ;;  %v3228_v31 = vpop.f32.mrf.mxu2  ;;  %v3502_v17 = vshrl.u32 %v8318_v11, 16  ;;  %v3505_v10 = vshll.u32 %v8318_v11, 16 }
 0x4a0   : > { %4375 = vst.msk [vmem:[%s7464_s10 + $0xa4] sm:$0xf] %vm4333_vm9, %v4308_v20  ;;  %v4944_v48 = vsel %vm4862_vm10, %v4837_v26, 0.0  ;;  %v5043_v19 = vmul.f32 %v4837_v26, %v4242_v1  ;;  %v3330_v40 = vadd.f32 %v3228_v31, %v3059_v38  ;;  %v3060_v6 = vadd.f32 %v2959_v4, %v8917_v57  ;;  %v4684_v20 = vpop.permute.xlu1 %4683 }
 0x4a1   : > { %v4945_v3 = vadd.f32 %v4944_v48, %v4943_v5  ;;  %v3504_v25 = vrot.slane %v3502_v17, 2  ;;  %v3507_v24 = vrot.slane %v3505_v10, 3 }
 0x4a2   : > { %v8305_v39 = vpop.f32.mrf.mxu3  ;;  %v5149_v29 = vsel %vm4862_vm10, %v5043_v19, 0.0  ;;  %v3828_v27 = vadd.f32 %v8237_v63, %v3330_v40 }
 0x4a3   : > { %v5150_v45 = vadd.f32 %v5149_v29, %v5148_v53  ;;  %v4143_v52 = vpop.f32.mrf.mxu0  ;;  %v3508_v1 = vor.u32 %v3507_v24, %v3504_v25  ;;  %v4689_v29 = vpop.permute.xlu2 %4688  ;;  %v3921_v24 = vrot.slane %v8272_v41, 3 }
 0x4a4   : > { %v4243_v55 = vadd.f32 %v4141_v2, %v3828_v27 }
 0x4a5   : > { %v3509_v50 = vsel %vm3359_vm6, %v8301_v51, %v3508_v1 }
 0x4a6   : > { %v4309_v0 = vpack.c.bf16 %v4243_v55, %v4243_v55  ;;  %v4838_v49 = vmul.f32 %v4679_v44, %v4243_v55 }
 0x4a7   : > { %5725 = vmatmul.msk.bf16.gmra.mxu3 %vm963_vm3, %v3500_v62  ;;  %v2962_v7 = vpop.f32.mrf.mxu1  ;;  %v3230_v23 = vpop.f32.mrf.mxu2 }
 0x4a8   : > { %4376 = vst.msk [vmem:[%s7464_s10 + $0xa8] sm:$0xf] %vm4333_vm9, %v4309_v0  ;;  %v4946_v63 = vsel %vm4862_vm10, %v4838_v49, 0.0  ;;  %v5044_v5 = vmul.f32 %v4838_v49, %v4243_v55  ;;  %v3331_v36 = vadd.f32 %v3230_v23, %v3060_v6 }
 0x4a9   : > { %v4947_v53 = vadd.f32 %v4946_v63, %v4945_v3 }
 0x4aa   : > { %v8328_v13 = vpop.f32.mrf.mxu3  ;;  %5652 = vmatmul.msk.bf16.gmra.mxu1 %vm963_vm3, %v2736_v46  ;;  %v5151_v2 = vsel %vm4862_vm10, %v5044_v5, 0.0  ;;  %v3829_v58 = vadd.f32 %v8263_v33, %v3331_v36  ;;  %5690 = vmatmul.msk.bf16.gmra.mxu2 %vm963_vm3, %v2738_v16  ;;  %v3920_v46 = vsel %vm3857_vm8, %v3917_v35, %v3919_v61  ;;  %v3061_v33 = vadd.f32 %v2962_v7, %v7191_v22 }
 0x4ab   : > { %v5152_v8 = vadd.f32 %v5151_v2, %v5150_v45  ;;  %v4146_v62 = vpop.f32.mrf.mxu0  ;;  %v3098_v45 = vrot.slane %v8272_v41, 2  ;;  %v4694_v41 = vpop.permute.xlu0 %4693 }
 0x4ac   : > { %v4244_v4 = vadd.f32 %v4143_v52, %v3829_v58 }
 0x4ad   : > { %v3099_v49 = vsel %vm2673_vm7, %v8333_v56, %v3098_v45 }
 0x4ae   : > { %v4310_v28 = vpack.c.bf16 %v4244_v4, %v4244_v4  ;;  %v4839_v38 = vmul.f32 %v4684_v20, %v4244_v4  ;;  %5758 = vmatmul.msk.bf16.gmra.mxu0 %vm963_vm3, %v3920_v46 }
 0x4af   : > { %v2964_v26 = vpop.f32.mrf.mxu1  ;;  %v3233_v31 = vpop.f32.mrf.mxu2 }
 0x4b0   : > { %4377 = vst.msk [vmem:[%s7464_s10 + $0xac] sm:$0xf] %vm4333_vm9, %v4310_v28  ;;  %v4948_v48 = vsel %vm4862_vm10, %v4839_v38, 0.0  ;;  %v5045_v19 = vmul.f32 %v4839_v38, %v4244_v4  ;;  %v3332_v14 = vadd.f32 %v3233_v31, %v3061_v33  ;;  %v3062_v44 = vadd.f32 %v2964_v26, %v7206_v59  ;;  %v520_v59 = vld [vmem:[#allocation2 + $0x118] sm:$0x3]  ;;  %v8918_v26 = vld [vmem:[#allocation75_spill] sm:$0xff] }
 0x4b1   : > { %v4949_v35 = vadd.f32 %v4948_v48, %v4947_v53  ;;  %v3922_v53 = vsel %vm3857_vm8, %v3919_v61, %v3921_v24  ;;  %v3092_v1 = vunpack.c.l.b16 %v520_v59 }
 0x4b2   : > { %v8347_v54 = vpop.f32.mrf.mxu3  ;;  %v5153_v40 = vsel %vm4862_vm10, %v5045_v19, 0.0  ;;  %v3830_v51 = vadd.f32 %v8283_v37, %v3332_v14  ;;  %v4699_v19 = vpop.permute.xlu1 %4698 }
 0x4b3   : > { %v5154_v3 = vadd.f32 %v5153_v40, %v5152_v8  ;;  %v4148_v10 = vpop.f32.mrf.mxu0  ;;  %v3095_v61 = vpack.c.b16 %v3092_v1, %v3092_v1 }
 0x4b4   : > { %v4245_v22 = vadd.f32 %v4146_v62, %v3830_v51 }
 0x4b5   : > { %v3100_v40 = vrot.slane %v3095_v61, 2 }
 0x4b6   : > { %v4311_v55 = vpack.c.bf16 %v4245_v22, %v4245_v22  ;;  %v4840_v52 = vmul.f32 %v4689_v29, %v4245_v22 }
 0x4b7   : > { %5726 = vmatmul.msk.bf16.gmra.mxu3 %vm963_vm3, %v3509_v50  ;;  %v2967_v27 = vpop.f32.mrf.mxu1  ;;  %v3235_v7 = vpop.f32.mrf.mxu2  ;;  %v2739_v50 = vrot.slane %v8918_v26, 2 }
 0x4b8   : > { %4378 = vst.msk [vmem:[%s7464_s10 + $0xb0] sm:$0xf] %vm4333_vm9, %v4311_v55  ;;  %v4950_v42 = vsel %vm4862_vm10, %v4840_v52, 0.0  ;;  %v5046_v25 = vmul.f32 %v4840_v52, %v4245_v22  ;;  %v3333_v37 = vadd.f32 %v3235_v7, %v3062_v44  ;;  %v3063_v8 = vadd.f32 %v2967_v27, %v7218_v30  ;;  %v8919_v22 = vld [vmem:[#allocation24_spill] sm:$0xff] }
 0x4b9   : > { %v4951_v0 = vadd.f32 %v4950_v42, %v4949_v35  ;;  %v2740_v35 = vsel %vm2673_vm7, %v8333_v56, %v2739_v50  ;;  %v3923_v52 = vrot.slane %v8318_v11, 3  ;;  %v3101_v7 = vsel %vm2673_vm7, %v3098_v45, %v3100_v40 }
 0x4ba   : > { %v8363_v17 = vpop.f32.mrf.mxu3  ;;  %5653 = vmatmul.msk.bf16.gmra.mxu1 %vm963_vm3, %v2738_v16  ;;  %v5155_v57 = vsel %vm4862_vm10, %v5046_v25, 0.0  ;;  %v3831_v6 = vadd.f32 %v8305_v39, %v3333_v37  ;;  %5691 = vmatmul.msk.bf16.gmra.mxu2 %vm963_vm3, %v3099_v49  ;;  %v4704_v37 = vpop.permute.xlu2 %4703 }
 0x4bb   : > { %v5156_v23 = vadd.f32 %v5155_v57, %v5154_v3  ;;  %v4151_v36 = vpop.f32.mrf.mxu0  ;;  %v3924_v57 = vsel %vm3857_vm8, %v3921_v24, %v3923_v52 }
 0x4bc   : > { %v4246_v5 = vadd.f32 %v4148_v10, %v3831_v6 }
 0x4be   : > { %v4312_v2 = vpack.c.bf16 %v4246_v5, %v4246_v5  ;;  %v4841_v58 = vmul.f32 %v4694_v41, %v4246_v5  ;;  %5759 = vmatmul.msk.bf16.gmra.mxu0 %vm963_vm3, %v3922_v53 }
 0x4bf   : > { %v2969_v16 = vpop.f32.mrf.mxu1  ;;  %v3238_v39 = vpop.f32.mrf.mxu2 }
 0x4c0   : > { %4379 = vst.msk [vmem:[%s7464_s10 + $0xb4] sm:$0xf] %vm4333_vm9, %v4312_v2  ;;  %v4952_v4 = vsel %vm4862_vm10, %v4841_v58, 0.0  ;;  %v5047_v62 = vmul.f32 %v4841_v58, %v4246_v5  ;;  %v3334_v46 = vadd.f32 %v3238_v39, %v3063_v8  ;;  %v3064_v10 = vadd.f32 %v2969_v16, %v8919_v22  ;;  %v4709_v8 = vpop.permute.xlu0 %4708 }
 0x4c1   : > { %v4953_v20 = vadd.f32 %v4952_v4, %v4951_v0 }
 0x4c2   : > { %v8376_v63 = vpop.f32.mrf.mxu3  ;;  %v5157_v28 = vsel %vm4862_vm10, %v5047_v62, 0.0  ;;  %v3832_v38 = vadd.f32 %v8328_v13, %v3334_v46 }
 0x4c3   : > { %v5158_v33 = vadd.f32 %v5157_v28, %v5156_v23  ;;  %v4153_v48 = vpop.f32.mrf.mxu0 }
 0x4c4   : > { %v4247_v31 = vadd.f32 %v4151_v36, %v3832_v38 }
 0x4c6   : > { %v4313_v51 = vpack.c.bf16 %v4247_v31, %v4247_v31  ;;  %v4842_v3 = vmul.f32 %v4699_v19, %v4247_v31  ;;  %v4714_v19 = vpop.permute.xlu1 %4713 }
 0x4c7   : > { %v2972_v14 = vpop.f32.mrf.mxu1  ;;  %v3240_v29 = vpop.f32.mrf.mxu2 }
 0x4c8   : > { %4380 = vst.msk [vmem:[%s7464_s10 + $0xb8] sm:$0xf] %vm4333_vm9, %v4313_v51  ;;  %v4954_v13 = vsel %vm4862_vm10, %v4842_v3, 0.0  ;;  %v5048_v27 = vmul.f32 %v4842_v3, %v4247_v31  ;;  %v3335_v55 = vadd.f32 %v3240_v29, %v3064_v10  ;;  %v3065_v5 = vadd.f32 %v2972_v14, %v7257_v15 }
 0x4c9   : > { %v4955_v44 = vadd.f32 %v4954_v13, %v4953_v20 }
 0x4ca   : > { %v8388_v30 = vpop.f32.mrf.mxu3  ;;  %5654 = vmatmul.msk.bf16.gmra.mxu1 %vm963_vm3, %v2740_v35  ;;  %v5159_v56 = vsel %vm4862_vm10, %v5048_v27, 0.0  ;;  %v3833_v42 = vadd.f32 %v8347_v54, %v3335_v55  ;;  %5692 = vmatmul.msk.bf16.gmra.mxu2 %vm963_vm3, %v3101_v7  ;;  %v4719_v7 = vpop.permute.xlu2 %4718 }
 0x4cb   : > { %v5160_v25 = vadd.f32 %v5159_v56, %v5158_v33  ;;  %v4156_v49 = vpop.f32.mrf.mxu0 }
 0x4cc   : > { %v4248_v0 = vadd.f32 %v4153_v48, %v3833_v42 }
 0x4ce   : > { %v4314_v23 = vpack.c.bf16 %v4248_v0, %v4248_v0  ;;  %v4843_v11 = vmul.f32 %v4704_v37, %v4248_v0  ;;  %5760 = vmatmul.msk.bf16.gmra.mxu0 %vm963_vm3, %v3924_v57 }
 0x4cf   : > { %v2974_v6 = vpop.f32.mrf.mxu1  ;;  %v3243_v45 = vpop.f32.mrf.mxu2 }
 0x4d0   : > { %4381 = vst.msk [vmem:[%s7464_s10 + $0xbc] sm:$0xf] %vm4333_vm9, %v4314_v23  ;;  %v4956_v54 = vsel %vm4862_vm10, %v4843_v11, 0.0  ;;  %v5049_v36 = vmul.f32 %v4843_v11, %v4248_v0  ;;  %v3336_v53 = vadd.f32 %v3243_v45, %v3065_v5  ;;  %v3066_v62 = vadd.f32 %v2974_v6, %v7272_v21 }
 0x4d1   : > { %v4957_v41 = vadd.f32 %v4956_v54, %v4955_v44 }
 0x4d2   : > { %v3748_v59 = vpop.f32.mrf.mxu3  ;;  %v5161_v16 = vsel %vm4862_vm10, %v5049_v36, 0.0  ;;  %v3834_v24 = vadd.f32 %v8363_v17, %v3336_v53  ;;  %v4724_v36 = vpop.permute.xlu0 %4723 }
 0x4d3   : > { %v5162_v1 = vadd.f32 %v5161_v16, %v5160_v25  ;;  %v4158_v58 = vpop.f32.mrf.mxu0  ;;  %v8920_v16 = vld [vmem:[#allocation19_spill] sm:$0xff] }
 0x4d4   : > { %v4249_v2 = vadd.f32 %v4156_v49, %v3834_v24 }
 0x4d6   : > { %v4315_v39 = vpack.c.bf16 %v4249_v2, %v4249_v2  ;;  %v4844_v4 = vmul.f32 %v4709_v8, %v4249_v2 }
 0x4d7   : > { %v2977_v15 = vpop.f32.mrf.mxu1  ;;  %v3245_v46 = vpop.f32.mrf.mxu2 }
 0x4d8   : > { %4382 = vst.msk [vmem:[%s7464_s10 + $0xc0] sm:$0xf] %vm4333_vm9, %v4315_v39  ;;  %v4958_v26 = vsel %vm4862_vm10, %v4844_v4, 0.0  ;;  %v5050_v50 = vmul.f32 %v4844_v4, %v4249_v2  ;;  %v3337_v61 = vadd.f32 %v3245_v46, %v3066_v62  ;;  %v3067_v40 = vadd.f32 %v2977_v15, %v7280_v12  ;;  %v4729_v62 = vpop.permute.xlu1 %4728 }
 0x4d9   : > { %v4959_v28 = vadd.f32 %v4958_v26, %v4957_v41 }
 0x4da   : > { %v3751_v20 = vpop.f32.mrf.mxu3  ;;  %v5163_v17 = vsel %vm4862_vm10, %v5050_v50, 0.0  ;;  %v3835_v38 = vadd.f32 %v8376_v63, %v3337_v61 }
 0x4db   : > { %v5164_v33 = vadd.f32 %v5163_v17, %v5162_v1  ;;  %v4161_v48 = vpop.f32.mrf.mxu0 }
 0x4dc   : > { %v4250_v31 = vadd.f32 %v4158_v58, %v3835_v38  ;;  %v8921_v38 = vld [vmem:[#allocation78_spill] sm:$0xff] }
 0x4de   : > { %v4316_v21 = vpack.c.bf16 %v4250_v31, %v4250_v31  ;;  %v4845_v35 = vmul.f32 %v4714_v19, %v4250_v31 }
 0x4df   : > { %v2979_v14 = vpop.f32.mrf.mxu1  ;;  %v3248_v51 = vpop.f32.mrf.mxu2 }
 0x4e0   : > { %4383 = vst.msk [vmem:[%s7464_s10 + $0xc4] sm:$0xf] %vm4333_vm9, %v4316_v21  ;;  %v4960_v3 = vsel %vm4862_vm10, %v4845_v35, 0.0  ;;  %v5051_v22 = vmul.f32 %v4845_v35, %v4250_v31  ;;  %v3338_v10 = vadd.f32 %v3248_v51, %v3067_v40  ;;  %v3068_v25 = vadd.f32 %v2979_v14, %v7292_v32 }
 0x4e1   : > { %v4961_v29 = vadd.f32 %v4960_v3, %v4959_v28 }
 0x4e2   : > { %v3753_v13 = vpop.f32.mrf.mxu3  ;;  %v5165_v63 = vsel %vm4862_vm10, %v5051_v22, 0.0  ;;  %v3836_v27 = vadd.f32 %v8388_v30, %v3338_v10  ;;  %v4734_v22 = vpop.permute.xlu2 %4733 }
 0x4e3   : > { %v5166_v55 = vadd.f32 %v5165_v63, %v5164_v33  ;;  %v4163_v44 = vpop.f32.mrf.mxu0 }
 0x4e4   : > { %v4251_v52 = vadd.f32 %v4161_v48, %v3836_v27  ;;  %v8922_v27 = vld [vmem:[#allocation81_spill] sm:$0xff] }
 0x4e6   : > { %v4317_v12 = vpack.c.bf16 %v4251_v52, %v4251_v52  ;;  %v4846_v42 = vmul.f32 %v4719_v7, %v4251_v52 }
 0x4e7   : > { %v2982_v56 = vpop.f32.mrf.mxu1  ;;  %v3250_v37 = vpop.f32.mrf.mxu2 }
 0x4e8   : > { %4384 = vst.msk [vmem:[%s7464_s10 + $0xc8] sm:$0xf] %vm4333_vm9, %v4317_v12  ;;  %v4962_v0 = vsel %vm4862_vm10, %v4846_v42, 0.0  ;;  %v5052_v49 = vmul.f32 %v4846_v42, %v4251_v52  ;;  %v3339_v57 = vadd.f32 %v3250_v37, %v3068_v25  ;;  %v3069_v24 = vadd.f32 %v2982_v56, %v8920_v16 }
 0x4e9   : > { %v4963_v6 = vadd.f32 %v4962_v0, %v4961_v29 }
 0x4ea   : > { %v5167_v30 = vsel %vm4862_vm10, %v5052_v49, 0.0  ;;  %v3837_v23 = vadd.f32 %v3748_v59, %v3339_v57  ;;  %v3756_v5 = vpop.f32.mrf.mxu3  ;;  %v4739_v57 = vpop.permute.xlu0 %4738 }
 0x4eb   : > { %v5168_v11 = vadd.f32 %v5167_v30, %v5166_v55  ;;  %v4166_v54 = vpop.f32.mrf.mxu0 }
 0x4ec   : > { %v4252_v45 = vadd.f32 %v4163_v44, %v3837_v23 }
 0x4ee   : > { %v4318_v41 = vpack.c.bf16 %v4252_v45, %v4252_v45  ;;  %v4847_v32 = vmul.f32 %v4724_v36, %v4252_v45 }
 0x4ef   : > { %v2984_v53 = vpop.f32.mrf.mxu1  ;;  %v3253_v1 = vpop.f32.mrf.mxu2 }
 0x4f0   : > { %4385 = vst.msk [vmem:[%s7464_s10 + $0xcc] sm:$0xf] %vm4333_vm9, %v4318_v41  ;;  %v4964_v2 = vsel %vm4862_vm10, %v4847_v32, 0.0  ;;  %v5053_v58 = vmul.f32 %v4847_v32, %v4252_v45  ;;  %v3340_v8 = vadd.f32 %v3253_v1, %v3069_v24  ;;  %v3070_v33 = vadd.f32 %v2984_v53, %v8921_v38 }
 0x4f1   : > { %v4965_v15 = vadd.f32 %v4964_v2, %v4963_v6 }
 0x4f2   : > { %v5169_v59 = vsel %vm4862_vm10, %v5053_v58, 0.0  ;;  %v3838_v39 = vadd.f32 %v3751_v20, %v3340_v8  ;;  %v3758_v61 = vpop.f32.mrf.mxu3  ;;  %v4744_v58 = vpop.permute.xlu1 %4743 }
 0x4f3   : > { %v5170_v4 = vadd.f32 %v5169_v59, %v5168_v11  ;;  %v4168_v26 = vpop.f32.mrf.mxu0  ;;  %v8923_v59 = vld [vmem:[#allocation43_spill] sm:$0xff] }
 0x4f4   : > { %v4253_v46 = vadd.f32 %v4166_v54, %v3838_v39 }
 0x4f6   : > { %v4319_v28 = vpack.c.bf16 %v4253_v46, %v4253_v46  ;;  %v4848_v17 = vmul.f32 %v4729_v62, %v4253_v46 }
 0x4f7   : > { %v2987_v50 = vpop.f32.mrf.mxu1  ;;  %v3255_v31 = vpop.f32.mrf.mxu2 }
 0x4f8   : > { %4386 = vst.msk [vmem:[%s7464_s10 + $0xd0] sm:$0xf] %vm4333_vm9, %v4319_v28  ;;  %v4966_v48 = vsel %vm4862_vm10, %v4848_v17, 0.0  ;;  %v5054_v19 = vmul.f32 %v4848_v17, %v4253_v46  ;;  %v3341_v14 = vadd.f32 %v3255_v31, %v3070_v33  ;;  %v3071_v55 = vadd.f32 %v2987_v50, %v8922_v27 }
 0x4f9   : > { %v4967_v21 = vadd.f32 %v4966_v48, %v4965_v15  ;;  %v4749_v48 = vpop.permute.xlu2 %4748 }
 0x4fa   : > { %v5171_v20 = vsel %vm4862_vm10, %v5054_v19, 0.0  ;;  %v3839_v35 = vadd.f32 %v3753_v13, %v3341_v14  ;;  %v3761_v44 = vpop.f32.mrf.mxu3 }
 0x4fb   : > { %v5172_v40 = vadd.f32 %v5171_v20, %v5170_v4  ;;  %v4171_v3 = vpop.f32.mrf.mxu0  ;;  %v8924_v20 = vld [vmem:[#allocation30_spill] sm:$0xff] }
 0x4fc   : > { %v4254_v51 = vadd.f32 %v4168_v26, %v3839_v35 }
 0x4fe   : > { %v4320_v29 = vpack.c.bf16 %v4254_v51, %v4254_v51  ;;  %v4849_v63 = vmul.f32 %v4734_v22, %v4254_v51 }
 0x4ff   : > { %v2989_v10 = vpop.f32.mrf.mxu1  ;;  %v3258_v52 = vpop.f32.mrf.mxu2 }
 0x500   : > { %4387 = vst.msk [vmem:[%s7464_s10 + $0xd4] sm:$0xf] %vm4333_vm9, %v4320_v29  ;;  %v4968_v7 = vsel %vm4862_vm10, %v4849_v63, 0.0  ;;  %v5055_v56 = vmul.f32 %v4849_v63, %v4254_v51  ;;  %v3342_v12 = vadd.f32 %v3258_v52, %v3071_v55  ;;  %v3072_v11 = vadd.f32 %v2989_v10, %v7335_v9  ;;  %v4754_v55 = vpop.permute.xlu0 %4753 }
 0x501   : > { %v4969_v42 = vadd.f32 %v4968_v7, %v4967_v21 }
 0x502   : > { %v5173_v13 = vsel %vm4862_vm10, %v5055_v56, 0.0  ;;  %v3840_v25 = vadd.f32 %v3756_v5, %v3342_v12  ;;  %v3763_v32 = vpop.f32.mrf.mxu3 }
 0x503   : > { %v5174_v37 = vadd.f32 %v5173_v13, %v5172_v40  ;;  %v4173_v49 = vpop.f32.mrf.mxu0  ;;  %v8925_v13 = vld [vmem:[#allocation25_spill] sm:$0xff] }
 0x504   : > { %v4255_v0 = vadd.f32 %v4171_v3, %v3840_v25 }
 0x506   : > { %v4321_v30 = vpack.c.bf16 %v4255_v0, %v4255_v0  ;;  %v4850_v23 = vmul.f32 %v4739_v57, %v4255_v0 }
 0x507   : > { %v2992_v6 = vpop.f32.mrf.mxu1  ;;  %v3260_v45 = vpop.f32.mrf.mxu2 }
 0x508   : > { %4388 = vst.msk [vmem:[%s7464_s10 + $0xd8] sm:$0xf] %vm4333_vm9, %v4321_v30  ;;  %v4970_v54 = vsel %vm4862_vm10, %v4850_v23, 0.0  ;;  %v5056_v36 = vmul.f32 %v4850_v23, %v4255_v0  ;;  %v3343_v53 = vadd.f32 %v3260_v45, %v3072_v11  ;;  %v3073_v39 = vadd.f32 %v2992_v6, %v8923_v59 }
 0x509   : > { %v4971_v41 = vadd.f32 %v4970_v54, %v4969_v42 }
 0x50a   : > { %v5175_v5 = vsel %vm4862_vm10, %v5056_v36, 0.0  ;;  %v3841_v16 = vadd.f32 %v3758_v61, %v3343_v53  ;;  %v3766_v38 = vpop.f32.mrf.mxu3  ;;  %v4759_v36 = vpop.permute.xlu1 %4758 }
 0x50b   : > { %v5176_v24 = vadd.f32 %v5175_v5, %v5174_v37  ;;  %v4176_v2 = vpop.f32.mrf.mxu0 }
 0x50c   : > { %v4256_v1 = vadd.f32 %v4173_v49, %v3841_v16 }
 0x50e   : > { %v4322_v15 = vpack.c.bf16 %v4256_v1, %v4256_v1  ;;  %v4851_v9 = vmul.f32 %v4744_v58, %v4256_v1 }
 0x50f   : > { %v2994_v8 = vpop.f32.mrf.mxu1  ;;  %v3263_v4 = vpop.f32.mrf.mxu2 }
 0x510   : > { %4389 = vst.msk [vmem:[%s7464_s10 + $0xdc] sm:$0xf] %vm4333_vm9, %v4322_v15  ;;  %v4972_v62 = vsel %vm4862_vm10, %v4851_v9, 0.0  ;;  %v5057_v46 = vmul.f32 %v4851_v9, %v4256_v1  ;;  %v3344_v26 = vadd.f32 %v3263_v4, %v3073_v39  ;;  %v3074_v35 = vadd.f32 %v2994_v8, %v8924_v20 }
 0x511   : > { %v4973_v50 = vadd.f32 %v4972_v62, %v4971_v41  ;;  %v4764_v62 = vpop.permute.xlu2 %4763 }
 0x512   : > { %v5177_v61 = vsel %vm4862_vm10, %v5057_v46, 0.0  ;;  %v3842_v28 = vadd.f32 %v3761_v44, %v3344_v26  ;;  %v3768_v56 = vpop.f32.mrf.mxu3 }
 0x513   : > { %v5178_v17 = vadd.f32 %v5177_v61, %v5176_v24  ;;  %v4178_v31 = vpop.f32.mrf.mxu0 }
 0x514   : > { %v4257_v33 = vadd.f32 %v4176_v2, %v3842_v28 }
 0x516   : > { %v4323_v14 = vpack.c.bf16 %v4257_v33, %v4257_v33  ;;  %v4852_v21 = vmul.f32 %v4749_v48, %v4257_v33 }
 0x517   : > { %v2997_v19 = vpop.f32.mrf.mxu1  ;;  %v3265_v40 = vpop.f32.mrf.mxu2 }
 0x518   : > { %4390 = vst.msk [vmem:[%s7464_s10 + $0xe0] sm:$0xf] %vm4333_vm9, %v4323_v14  ;;  %v4974_v51 = vsel %vm4862_vm10, %v4852_v21, 0.0  ;;  %v5058_v3 = vmul.f32 %v4852_v21, %v4257_v33  ;;  %v3345_v22 = vadd.f32 %v3265_v40, %v3074_v35  ;;  %v3075_v25 = vadd.f32 %v2997_v19, %v8925_v13  ;;  %v4769_v40 = vpop.permute.xlu0 %4768  ;;  %v4774_v13 = vpop.permute.xlu1 %4773 }
 0x519   : > { %v4975_v10 = vadd.f32 %v4974_v51, %v4973_v50  ;;  %v8926_v50 = vld [vmem:[#allocation84_spill] sm:$0xff] }
 0x51a   : > { %v5179_v29 = vsel %vm4862_vm10, %v5058_v3, 0.0  ;;  %v3843_v63 = vadd.f32 %v3763_v32, %v3345_v22  ;;  %v3771_v24 = vpop.f32.mrf.mxu3 }
 0x51b   : > { %v5180_v27 = vadd.f32 %v5179_v29, %v5178_v17  ;;  %v4181_v44 = vpop.f32.mrf.mxu0 }
 0x51c   : > { %v4258_v52 = vadd.f32 %v4178_v31, %v3843_v63 }
 0x51e   : > { %v4324_v12 = vpack.c.bf16 %v4258_v52, %v4258_v52  ;;  %v4853_v42 = vmul.f32 %v4754_v55, %v4258_v52 }
 0x51f   : > { %v2999_v7 = vpop.f32.mrf.mxu1  ;;  %v3268_v37 = vpop.f32.mrf.mxu2 }
 0x520   : > { %4391 = vst.msk [vmem:[%s7464_s10 + $0xe4] sm:$0xf] %vm4333_vm9, %v4324_v12  ;;  %v4976_v0 = vsel %vm4862_vm10, %v4853_v42, 0.0  ;;  %v5059_v49 = vmul.f32 %v4853_v42, %v4258_v52  ;;  %v3346_v57 = vadd.f32 %v3268_v37, %v3075_v25  ;;  %v3076_v5 = vadd.f32 %v2999_v7, %v7381_v34 }
 0x521   : > { %v4977_v6 = vadd.f32 %v4976_v0, %v4975_v10 }
 0x522   : > { %v5181_v30 = vsel %vm4862_vm10, %v5059_v49, 0.0  ;;  %v3844_v23 = vadd.f32 %v3766_v38, %v3346_v57  ;;  %v3773_v48 = vpop.f32.mrf.mxu3 }
 0x523   : > { %v5182_v11 = vadd.f32 %v5181_v30, %v5180_v27  ;;  %v4183_v54 = vpop.f32.mrf.mxu0 }
 0x524   : > { %v4259_v45 = vadd.f32 %v4181_v44, %v3844_v23 }
 0x526   : > { %v4325_v41 = vpack.c.bf16 %v4259_v45, %v4259_v45  ;;  %v4854_v32 = vmul.f32 %v4759_v36, %v4259_v45 }
 0x527   : > { %v3002_v53 = vpop.f32.mrf.mxu1  ;;  %v3270_v16 = vpop.f32.mrf.mxu2 }
 0x528   : > { %4392 = vst.msk [vmem:[%s7464_s10 + $0xe8] sm:$0xf] %vm4333_vm9, %v4325_v41  ;;  %v4978_v1 = vsel %vm4862_vm10, %v4854_v32, 0.0  ;;  %v5060_v2 = vmul.f32 %v4854_v32, %v4259_v45  ;;  %v3347_v58 = vadd.f32 %v3270_v16, %v3076_v5  ;;  %v3077_v61 = vadd.f32 %v3002_v53, %v8926_v50  ;;  %v4779_v41 = vpop.permute.xlu2 %4778 }
 0x529   : > { %v4979_v8 = vadd.f32 %v4978_v1, %v4977_v6 }
 0x52a   : > { %v5183_v15 = vsel %vm4862_vm10, %v5060_v2, 0.0  ;;  %v3845_v9 = vadd.f32 %v3768_v56, %v3347_v58  ;;  %v3776_v12 = vpop.f32.mrf.mxu3 }
 0x52b   : > { %v5184_v59 = vadd.f32 %v5183_v15, %v5182_v11  ;;  %v4186_v4 = vpop.f32.mrf.mxu0 }
 0x52c   : > { %v4260_v39 = vadd.f32 %v4183_v54, %v3845_v9 }
 0x52e   : > { %v4326_v26 = vpack.c.bf16 %v4260_v39, %v4260_v39  ;;  %v4855_v34 = vmul.f32 %v4764_v62, %v4260_v39 }
 0x52f   : > { %v3004_v46 = vpop.f32.mrf.mxu1  ;;  %v3273_v28 = vpop.f32.mrf.mxu2 }
 0x530   : > { %4393 = vst.msk [vmem:[%s7464_s10 + $0xec] sm:$0xf] %vm4333_vm9, %v4326_v26  ;;  %v4980_v17 = vsel %vm4862_vm10, %v4855_v34, 0.0  ;;  %v5061_v38 = vmul.f32 %v4855_v34, %v4260_v39  ;;  %v3348_v33 = vadd.f32 %v3273_v28, %v3077_v61  ;;  %v3078_v10 = vadd.f32 %v3004_v46, %v7404_v43  ;;  %v4784_v46 = vpop.permute.xlu0 %4783 }
 0x531   : > { %v4981_v31 = vadd.f32 %v4980_v17, %v4979_v8 }
 0x532   : > { %v5185_v19 = vsel %vm4862_vm10, %v5061_v38, 0.0  ;;  %v3846_v14 = vadd.f32 %v3771_v24, %v3348_v33  ;;  %v3778_v32 = vpop.f32.mrf.mxu3 }
 0x533   : > { %v5186_v21 = vadd.f32 %v5185_v19, %v5184_v59  ;;  %v4188_v35 = vpop.f32.mrf.mxu0 }
 0x534   : > { %v4261_v20 = vadd.f32 %v4186_v4, %v3846_v14 }
 0x536   : > { %v4327_v3 = vpack.c.bf16 %v4261_v20, %v4261_v20  ;;  %v4856_v22 = vmul.f32 %v4769_v40, %v4261_v20  ;;  %v4789_v40 = vpop.permute.xlu1 %4788 }
 0x537   : > { %v3007_v51 = vpop.f32.mrf.mxu1  ;;  %v3275_v29 = vpop.f32.mrf.mxu2 }
 0x538   : > { %4394 = vst.msk [vmem:[%s7464_s10 + $0xf0] sm:$0xf] %vm4333_vm9, %v4327_v3  ;;  %v4982_v63 = vsel %vm4862_vm10, %v4856_v22, 0.0  ;;  %v5062_v27 = vmul.f32 %v4856_v22, %v4261_v20  ;;  %v3349_v55 = vadd.f32 %v3275_v29, %v3078_v10  ;;  %v3079_v43 = vadd.f32 %v3007_v51, %v7414_v18 }
 0x539   : > { %v4983_v52 = vadd.f32 %v4982_v63, %v4981_v31 }
 0x53a   : > { %v5187_v44 = vsel %vm4862_vm10, %v5062_v27, 0.0  ;;  %v3847_v7 = vadd.f32 %v3773_v48, %v3349_v55  ;;  %v3781_v61 = vpop.f32.mrf.mxu3 }
 0x53b   : > { %v5188_v56 = vadd.f32 %v5187_v44, %v5186_v21  ;;  %v4191_v25 = vpop.f32.mrf.mxu0 }
 0x53c   : > { %v4262_v42 = vadd.f32 %v4188_v35, %v3847_v7 }
 0x53e   : > { %v4328_v37 = vpack.c.bf16 %v4262_v42, %v4262_v42  ;;  %v4857_v0 = vmul.f32 %v4774_v13, %v4262_v42  ;;  %v4794_v13 = vpop.permute.xlu2 %4793 }
 0x53f   : > { %v3278_v49 = vpop.f32.mrf.mxu2  ;;  %v3009_v57 = vpop.f32.mrf.mxu1 }
 0x540   : > { %4395 = vst.msk [vmem:[%s7464_s10 + $0xf4] sm:$0xf] %vm4333_vm9, %v4328_v37  ;;  %v4984_v6 = vsel %vm4862_vm10, %v4857_v0, 0.0  ;;  %v5063_v30 = vmul.f32 %v4857_v0, %v4262_v42  ;;  %v3350_v23 = vadd.f32 %v3278_v49, %v3079_v43  ;;  %v3080_v18 = vadd.f32 %v3009_v57, %v7427_v60  ;;  %v8927_v60 = vld [vmem:[#allocation9_spill] sm:$0xff] }
 0x541   : > { %v4985_v11 = vadd.f32 %v4984_v6, %v4983_v52 }
 0x542   : > { %v5189_v45 = vsel %vm4862_vm10, %v5063_v30, 0.0  ;;  %v3848_v54 = vadd.f32 %v3776_v12, %v3350_v23  ;;  %v3783_v52 = vpop.f32.mrf.mxu3 }
 0x543   : > { %v5190_v36 = vadd.f32 %v5189_v45, %v5188_v56  ;;  %v4193_v24 = vpop.f32.mrf.mxu0 }
 0x544   : > { %v4263_v53 = vadd.f32 %v4191_v25, %v3848_v54 }
 0x546   : > { %v4329_v5 = vpack.c.bf16 %v4263_v53, %v4263_v53  ;;  %v4858_v16 = vmul.f32 %v4779_v41, %v4263_v53 }
 0x547   : > { %v3280_v1 = vpop.f32.mrf.mxu2  ;;  %v3012_v9 = vpop.f32.mrf.mxu1 }
 0x548   : > { %4396 = vst.msk [vmem:[%s7464_s10 + $0xf8] sm:$0xf] %vm4333_vm9, %v4329_v5  ;;  %v4986_v2 = vsel %vm4862_vm10, %v4858_v16, 0.0  ;;  %v5064_v58 = vmul.f32 %v4858_v16, %v4263_v53  ;;  %v3351_v8 = vadd.f32 %v3280_v1, %v3080_v18  ;;  %v3081_v50 = vadd.f32 %v3012_v9, %v8927_v60 }
 0x549   : > { %v4987_v15 = vadd.f32 %v4986_v2, %v4985_v11 }
 0x54a   : > { %v5191_v59 = vsel %vm4862_vm10, %v5064_v58, 0.0  ;;  %v3849_v39 = vadd.f32 %v3778_v32, %v3351_v8 }
 0x54b   : > { %v5192_v4 = vadd.f32 %v5191_v59, %v5190_v36  ;;  %v4196_v48 = vpop.f32.mrf.mxu0 }
 0x54c   : > { %v4264_v62 = vadd.f32 %v4193_v24, %v3849_v39 }
 0x54e   : > { %v4330_v26 = vpack.c.bf16 %v4264_v62, %v4264_v62  ;;  %v4859_v34 = vmul.f32 %v4784_v46, %v4264_v62 }
 0x54f   : > { %v3283_v28 = vpop.f32.mrf.mxu2  ;;  %v3014_v20 = vpop.f32.mrf.mxu1 }
 0x550   : > { %4397 = vst.msk [vmem:[%s7464_s10 + $0xfc] sm:$0xf] %vm4333_vm9, %v4330_v26  ;;  %v4988_v17 = vsel %vm4862_vm10, %v4859_v34, 0.0  ;;  %v5065_v38 = vmul.f32 %v4859_v34, %v4264_v62  ;;  %v3352_v33 = vadd.f32 %v3283_v28, %v3081_v50  ;;  %v3082_v22 = vadd.f32 %v3014_v20, %v7450_v47 }
 0x551   : > { %v4989_v31 = vadd.f32 %v4988_v17, %v4987_v15 }
 0x552   : > { %v5193_v19 = vsel %vm4862_vm10, %v5065_v38, 0.0  ;;  %v3850_v14 = vadd.f32 %v3781_v61, %v3352_v33 }
 0x553   : > { %v5194_v21 = vadd.f32 %v5193_v19, %v5192_v4  ;;  %v4198_v12 = vpop.f32.mrf.mxu0 }
 0x554   : > { %v4265_v35 = vadd.f32 %v4196_v48, %v3850_v14 }
 0x556   : > { %v4331_v51 = vpack.c.bf16 %v4265_v35, %v4265_v35  ;;  %v4860_v3 = vmul.f32 %v4789_v40, %v4265_v35 }
 0x557   : > { %v3285_v10 = vpop.f32.mrf.mxu2 }
 0x558   : > { %4398 = vst.msk [vmem:[%s7464_s10 + $0x100] sm:$0xf] %vm4333_vm9, %v4331_v51  ;;  %v4990_v29 = vsel %vm4862_vm10, %v4860_v3, 0.0  ;;  %v5066_v63 = vmul.f32 %v4860_v3, %v4265_v35  ;;  %v3353_v27 = vadd.f32 %v3285_v10, %v3082_v22 }
 0x559   : > { %v4991_v55 = vadd.f32 %v4990_v29, %v4989_v31 }
 0x55a   : > { %v5195_v44 = vsel %vm4862_vm10, %v5066_v63, 0.0  ;;  %v3851_v7 = vadd.f32 %v3783_v52, %v3353_v27 }
 0x55b   : > { %v5196_v56 = vadd.f32 %v5195_v44, %v5194_v21 }
 0x55c   : > { %v4266_v42 = vadd.f32 %v4198_v12, %v3851_v7 }
 0x55e   : > { %v4332_v47 = vpack.c.bf16 %v4266_v42, %v4266_v42  ;;  %v4861_v25 = vmul.f32 %v4794_v13, %v4266_v42 }
 0x560   : > { %4399 = vst.msk [vmem:[%s7464_s10 + $0x104] sm:$0xf] %vm4333_vm9, %v4332_v47  ;;  %v4992_v37 = vsel %vm4862_vm10, %v4861_v25, 0.0  ;;  %v5067_v0 = vmul.f32 %v4861_v25, %v4266_v42 }
 0x561   : > { %v4993_v43 = vadd.f32 %v4992_v37, %v4991_v55 }
 0x562   : > { %v5197_v49 = vsel %vm4862_vm10, %v5067_v0, 0.0 }
 0x563   : > { %v4994_v57 = vrot.slane %v4993_v43, 4  ;;  %v5198_v6 = vadd.f32 %v5197_v49, %v5196_v56 }
 0x565   : > { %v4995_v30 = vadd.f32 %v4994_v57, %v4993_v43  ;;  %v5199_v23 = vrot.slane %v5198_v6, 4 }
 0x567   : > { %v4996_v11 = vrot.slane %v4995_v30, 2  ;;  %v5200_v45 = vadd.f32 %v5199_v23, %v5198_v6 }
 0x569   : > { %v4997_v54 = vadd.f32 %v4996_v11, %v4995_v30  ;;  %v5201_v36 = vrot.slane %v5200_v45, 2 }
 0x56b   : > { %v4998_v53 = vrot.slane %v4997_v54, 1  ;;  %v5202_v41 = vadd.f32 %v5201_v36, %v5200_v45 }
 0x56d   : > { %v4999_v32 = vadd.f32 %v4998_v53, %v4997_v54  ;;  %v5203_v5 = vrot.slane %v5202_v41, 1 }
 0x56f   : > { %5001 = vst.msk [vmem:[%s296_s13] sm:$0x1] %vm5000_vm11, %v4999_v32  ;;  %v5204_v16 = vadd.f32 %v5203_v5, %v5202_v41 }
 0x571   : > { %5205 = vst.msk [vmem:[%s296_s13 + $0x1] sm:$0x1] %vm5000_vm11, %v5204_v16 }
 0x572 PF: > { %s16_s18 = sadd.s32 1, %s5886_s18  }
 0x573   : > { %p13_p7 = scmp.ge.s32.totalorder %s16_s18, 4  }
 0x575   :  { %15 = sbr.rel (!%p13_p7) target bundleno = 1 (0x1), region = 92 }

</bundles_post_ra>
